<compile_context>
chip_gen: v6e
topology: v6e:2x2x1
jax: 0.10.0
libtpu: 0.0.40
codegen_flags: <defaults>
</compile_context>

<pallas_src>
import jax
import jax.numpy as jnp
from jax.experimental import pallas as pl
from jax.experimental.pallas import tpu as pltpu

EPS = 1e-09
NUM_DIGITS = 10
NUM_STYLE = 10
NUM_HIDDEN1 = 400
NUM_HIDDEN2 = 200
NUM_PIXELS = 784
DIGIT_TEMP = 0.66

IN_DIM = NUM_STYLE + NUM_DIGITS   # 20
LANES = 128
H2_PAD = 256                      # 200 -> 256 (MXU friendly)
H1_PAD = 512                      # 400 -> 512
PIX_PAD = 896                     # 784 -> 896 = 7*128 (lane-dense output)


def _round_up(x, m):
    return ((x + m - 1) // m) * m


def decoder_kernel(x_ref, img_ref,
                   w1_ref, b1_ref, w2_ref, b2_ref, w3_ref, b3_ref,
                   mean_ref, bce_ref):
    """One row tile: 3 matmuls + ReLUs + sigmoid + logits-space BCE partial sums."""
    x = x_ref[...]                                                       # [tm, 20]
    h2 = jnp.maximum(
        jnp.dot(x, w1_ref[...], preferred_element_type=jnp.float32) + b1_ref[...], 0.0)
    h1 = jnp.maximum(
        jnp.dot(h2, w2_ref[...], preferred_element_type=jnp.float32) + b2_ref[...], 0.0)
    z = jnp.dot(h1, w3_ref[...], preferred_element_type=jnp.float32) + b3_ref[...]

    # sigmoid(z) = where(z>=0, 1, e) / (1 + e), e = exp(-|z|): overflow-free and
    # e / (1+e) are shared with the softplus term of the BCE below.
    e = jnp.exp(-jnp.abs(z))
    denom = 1.0 + e
    x_mean = jnp.where(z >= 0.0, 1.0, e) / denom
    mean_ref[...] = x_mean                                               # [tm, 896]

    # BCE from logits: softplus(z) - img*z == -(log(sig)*img + log(1-sig)*(1-img))
    img = img_ref[...]                                                   # [tm, 896]
    bce_elem = jnp.maximum(z, 0.0) - img * z + jnp.log(denom)
    col = jax.lax.broadcasted_iota(jnp.int32, bce_elem.shape, 1)
    bce_elem = jnp.where(col < NUM_PIXELS, bce_elem, 0.0)                # zero the pad lanes

    # Fold the 7 lane-groups of 128 into lane-dense (tm, 128) partial sums.
    # Pure VPU adds; the final 128-way sum is done in the wrapper.
    acc = bce_elem[:, 0:LANES]
    for g in range(1, PIX_PAD // LANES):
        acc = acc + bce_elem[:, g * LANES:(g + 1) * LANES]
    bce_ref[...] = acc                                                   # [tm, 128]


def decoder_forward(digits, styles, images, params, tile_rows=512):
    """digits/styles: [S,B,10], images: [S,B,784] -> (images_mean [S,B,784], bce [S,B])."""
    S, B, _ = digits.shape
    N = S * B

    tm = min(tile_rows, _round_up(N, 8))
    n_pad = _round_up(N, tm)
    n_tiles = n_pad // tm

    # --- wrapper glue (plain JAX): concat latents, flatten, zero-pad rows / lanes ---
    x = jnp.concatenate([digits, styles], axis=-1).reshape(N, IN_DIM).astype(jnp.float32)
    img = images.reshape(N, NUM_PIXELS).astype(jnp.float32)
    x = jnp.pad(x, ((0, n_pad - N), (0, 0)))
    img = jnp.pad(img, ((0, n_pad - N), (0, PIX_PAD - NUM_PIXELS)))

    w1, b1, w2, b2, w3, b3 = params   # weights [in, out], biases [out]
    w1p = jnp.pad(w1.astype(jnp.float32), ((0, 0), (0, H2_PAD - NUM_HIDDEN2)))
    b1p = jnp.pad(b1.astype(jnp.float32), (0, H2_PAD - NUM_HIDDEN2)).reshape(1, H2_PAD)
    w2p = jnp.pad(w2.astype(jnp.float32),
                  ((0, H2_PAD - NUM_HIDDEN2), (0, H1_PAD - NUM_HIDDEN1)))
    b2p = jnp.pad(b2.astype(jnp.float32), (0, H1_PAD - NUM_HIDDEN1)).reshape(1, H1_PAD)
    w3p = jnp.pad(w3.astype(jnp.float32),
                  ((0, H1_PAD - NUM_HIDDEN1), (0, PIX_PAD - NUM_PIXELS)))
    b3p = jnp.pad(b3.astype(jnp.float32), (0, PIX_PAD - NUM_PIXELS)).reshape(1, PIX_PAD)

    row_spec = lambda cols: pl.BlockSpec((tm, cols), lambda i: (i, 0))
    full_spec = lambda arr: pl.BlockSpec(arr.shape, lambda i: (0, 0))

    flops = 2 * n_pad * (IN_DIM * H2_PAD + H2_PAD * H1_PAD + H1_PAD * PIX_PAD)
    transcendentals = 2 * n_pad * PIX_PAD
    bytes_accessed = 4 * (n_pad * (IN_DIM + 2 * PIX_PAD + LANES)
                          + IN_DIM * H2_PAD + H2_PAD
                          + H2_PAD * H1_PAD + H1_PAD
                          + H1_PAD * PIX_PAD + PIX_PAD)

    images_mean, bce_part = pl.pallas_call(
        decoder_kernel,
        out_shape=(jax.ShapeDtypeStruct((n_pad, PIX_PAD), jnp.float32),
                   jax.ShapeDtypeStruct((n_pad, LANES), jnp.float32)),
        grid=(n_tiles,),
        in_specs=[row_spec(IN_DIM), row_spec(PIX_PAD),
                  full_spec(w1p), full_spec(b1p),
                  full_spec(w2p), full_spec(b2p),
                  full_spec(w3p), full_spec(b3p)],
        out_specs=(row_spec(PIX_PAD), row_spec(LANES)),
        compiler_params=pltpu.CompilerParams(dimension_semantics=("parallel",)),
        cost_estimate=pl.CostEstimate(flops=flops,
                                      transcendentals=transcendentals,
                                      bytes_accessed=bytes_accessed),
    )(x, img, w1p, b1p, w2p, b2p, w3p, b3p)

    images_mean = images_mean[:N, :NUM_PIXELS].reshape(S, B, NUM_PIXELS)
    bce = bce_part[:N].sum(axis=-1).reshape(S, B)
    return images_mean, bce


def init_linear(kw, kb, fan_in, fan_out):
    """Deterministic PyTorch-Linear-style init; weight returned as [in, out], bias [out]."""
    bound = 1.0 / jnp.sqrt(jnp.float32(fan_in))
    w = jax.random.uniform(kw, (fan_in, fan_out), minval=-bound, maxval=bound, dtype=jnp.float32)
    b = jax.random.uniform(kb, (fan_out,), minval=-bound, maxval=bound, dtype=jnp.float32)
    return w, b


if __name__ == "__main__":
    key = jax.random.PRNGKey(0)
    kd, ks, ki, k1, k2, k3, k4, k5, k6 = jax.random.split(key, 9)

    # Small shapes consistent with the module's forward (num_samples, batch, features).
    # tile_rows=128 here so the run exercises multiple grid steps and row padding.
    S, B = 2, 100
    digits = jax.nn.softmax(
        jax.random.normal(kd, (S, B, NUM_DIGITS), dtype=jnp.float32) / DIGIT_TEMP, axis=-1)
    styles = jax.random.normal(ks, (S, B, NUM_STYLE), dtype=jnp.float32)
    images = jax.random.uniform(ki, (S, B, NUM_PIXELS), dtype=jnp.float32)

    w1, b1 = init_linear(k1, k2, IN_DIM, NUM_HIDDEN2)
    w2, b2 = init_linear(k3, k4, NUM_HIDDEN2, NUM_HIDDEN1)
    w3, b3 = init_linear(k5, k6, NUM_HIDDEN1, NUM_PIXELS)
    params = (w1, b1, w2, b2, w3, b3)

    images_mean, bce = decoder_forward(digits, styles, images, params, tile_rows=128)
    jax.block_until_ready((images_mean, bce))

    # pure-JAX reference (matches the PyTorch module's EPS-based BCE formulation)
    xr = jnp.concatenate([digits, styles], axis=-1)
    hr = jax.nn.relu(xr @ w1 + b1)
    hr = jax.nn.relu(hr @ w2 + b2)
    xm = jax.nn.sigmoid(hr @ w3 + b3)
    ref_bce = -(jnp.log(xm + EPS) * images + jnp.log(1.0 - xm + EPS) * (1.0 - images)).sum(-1)

    assert jnp.allclose(images_mean, xm, atol=1e-5, rtol=1e-5)
    assert jnp.allclose(bce, ref_bce, atol=1e-3, rtol=1e-4)

    print("KERNEL_OK")
</pallas_src>

<mosaic_0001>
module attributes {stable_mosaic.version = 11 : i64} {
  func.func @decoder_kernel(%arg0: i32, %arg1: memref<128x20xf32, #tpu.memory_space<vmem>>, %arg2: memref<128x896xf32, #tpu.memory_space<vmem>>, %arg3: memref<20x256xf32, #tpu.memory_space<vmem>>, %arg4: memref<1x256xf32, #tpu.memory_space<vmem>>, %arg5: memref<256x512xf32, #tpu.memory_space<vmem>>, %arg6: memref<1x512xf32, #tpu.memory_space<vmem>>, %arg7: memref<512x896xf32, #tpu.memory_space<vmem>>, %arg8: memref<1x896xf32, #tpu.memory_space<vmem>>, %arg9: memref<128x896xf32, #tpu.memory_space<vmem>>, %arg10: memref<128x128xf32, #tpu.memory_space<vmem>>) attributes {dimension_semantics = [#tpu.dimension_semantics<parallel>], iteration_bounds = array<i64: 2>, scalar_prefetch = 0 : i64, scratch_operands = 0 : i64, tpu.core_type = #tpu.core_type<tc>, window_params = [{transform_indices = @transform_0, window_bounds = array<i64: 128, 20>}, {transform_indices = @transform_1, window_bounds = array<i64: 128, 896>}, {pipeline_mode = #tpu.pipeline_mode<synchronous>, transform_indices = @transform_2, window_bounds = array<i64: 20, 256>}, {pipeline_mode = #tpu.pipeline_mode<synchronous>, transform_indices = @transform_3, window_bounds = array<i64: 1, 256>}, {pipeline_mode = #tpu.pipeline_mode<synchronous>, transform_indices = @transform_4, window_bounds = array<i64: 256, 512>}, {pipeline_mode = #tpu.pipeline_mode<synchronous>, transform_indices = @transform_5, window_bounds = array<i64: 1, 512>}, {pipeline_mode = #tpu.pipeline_mode<synchronous>, transform_indices = @transform_6, window_bounds = array<i64: 512, 896>}, {pipeline_mode = #tpu.pipeline_mode<synchronous>, transform_indices = @transform_7, window_bounds = array<i64: 1, 896>}, {transform_indices = @transform_8, window_bounds = array<i64: 128, 896>}, {transform_indices = @transform_9, window_bounds = array<i64: 128, 128>}]} {
    %c0 = arith.constant 0 : index
    %c0_0 = arith.constant 0 : index
    %0 = vector.load %arg1[%c0, %c0_0] : memref<128x20xf32, #tpu.memory_space<vmem>>, vector<128x20xf32>
    %c0_1 = arith.constant 0 : index
    %c0_2 = arith.constant 0 : index
    %1 = vector.load %arg3[%c0_1, %c0_2] : memref<20x256xf32, #tpu.memory_space<vmem>>, vector<20x256xf32>
    %cst = arith.constant dense<0.000000e+00> : vector<128x256xf32>
    %2 = tpu.matmul %0, %1, %cst {dimension_numbers = #tpu.dot_dimension_numbers<[1], [0], [0], [1], [0, 0, 1, 1], [], []>} : vector<128x20xf32>, vector<20x256xf32>, vector<128x256xf32> -> vector<128x256xf32>
    %c0_3 = arith.constant 0 : index
    %c0_4 = arith.constant 0 : index
    %3 = vector.load %arg4[%c0_3, %c0_4] : memref<1x256xf32, #tpu.memory_space<vmem>>, vector<1x256xf32>
    %4 = vector.broadcast %3 : vector<1x256xf32> to vector<128x256xf32>
    %5 = arith.addf %2, %4 : vector<128x256xf32>
    %cst_5 = arith.constant 0.000000e+00 : f32
    %6 = vector.broadcast %cst_5 : f32 to vector<128x256xf32>
    %7 = arith.maximumf %5, %6 : vector<128x256xf32>
    %c0_6 = arith.constant 0 : index
    %c0_7 = arith.constant 0 : index
    %8 = vector.load %arg5[%c0_6, %c0_7] : memref<256x512xf32, #tpu.memory_space<vmem>>, vector<256x512xf32>
    %cst_8 = arith.constant dense<0.000000e+00> : vector<128x512xf32>
    %9 = tpu.matmul %7, %8, %cst_8 {dimension_numbers = #tpu.dot_dimension_numbers<[1], [0], [0], [1], [0, 0, 1, 1], [], []>} : vector<128x256xf32>, vector<256x512xf32>, vector<128x512xf32> -> vector<128x512xf32>
    %c0_9 = arith.constant 0 : index
    %c0_10 = arith.constant 0 : index
    %10 = vector.load %arg6[%c0_9, %c0_10] : memref<1x512xf32, #tpu.memory_space<vmem>>, vector<1x512xf32>
    %11 = vector.broadcast %10 : vector<1x512xf32> to vector<128x512xf32>
    %12 = arith.addf %9, %11 : vector<128x512xf32>
    %cst_11 = arith.constant 0.000000e+00 : f32
    %13 = vector.broadcast %cst_11 : f32 to vector<128x512xf32>
    %14 = arith.maximumf %12, %13 : vector<128x512xf32>
    %c0_12 = arith.constant 0 : index
    %c0_13 = arith.constant 0 : index
    %15 = vector.load %arg7[%c0_12, %c0_13] : memref<512x896xf32, #tpu.memory_space<vmem>>, vector<512x896xf32>
    %cst_14 = arith.constant dense<0.000000e+00> : vector<128x896xf32>
    %16 = tpu.matmul %14, %15, %cst_14 {dimension_numbers = #tpu.dot_dimension_numbers<[1], [0], [0], [1], [0, 0, 1, 1], [], []>} : vector<128x512xf32>, vector<512x896xf32>, vector<128x896xf32> -> vector<128x896xf32>
    %c0_15 = arith.constant 0 : index
    %c0_16 = arith.constant 0 : index
    %17 = vector.load %arg8[%c0_15, %c0_16] : memref<1x896xf32, #tpu.memory_space<vmem>>, vector<1x896xf32>
    %18 = vector.broadcast %17 : vector<1x896xf32> to vector<128x896xf32>
    %19 = arith.addf %16, %18 : vector<128x896xf32>
    %20 = math.absf %19 : vector<128x896xf32>
    %cst_17 = arith.constant 0.000000e+00 : f32
    %21 = vector.broadcast %cst_17 : f32 to vector<128x896xf32>
    %22 = arith.subf %21, %20 : vector<128x896xf32>
    %23 = math.exp %22 : vector<128x896xf32>
    %cst_18 = arith.constant 1.000000e+00 : f32
    %24 = vector.broadcast %cst_18 : f32 to vector<128x896xf32>
    %25 = arith.addf %24, %23 : vector<128x896xf32>
    %cst_19 = arith.constant 0.000000e+00 : f32
    %26 = vector.broadcast %cst_19 : f32 to vector<128x896xf32>
    %27 = arith.cmpf oge, %19, %26 : vector<128x896xf32>
    %cst_20 = arith.constant 1.000000e+00 : f32
    %28 = vector.broadcast %cst_20 : f32 to vector<128x896xf32>
    %29 = arith.select %27, %28, %23 : vector<128x896xi1>, vector<128x896xf32>
    %30 = arith.divf %29, %25 : vector<128x896xf32>
    %c0_21 = arith.constant 0 : index
    %c0_22 = arith.constant 0 : index
    %31 = vector.load %arg9[%c0_21, %c0_22] : memref<128x896xf32, #tpu.memory_space<vmem>>, vector<128x896xf32>
    tpu.vector_store %arg9[%c0_21, %c0_22], %30 {strides = array<i32>} : memref<128x896xf32, #tpu.memory_space<vmem>>, vector<128x896xf32>,
    %c0_23 = arith.constant 0 : index
    %c0_24 = arith.constant 0 : index
    %32 = vector.load %arg2[%c0_23, %c0_24] : memref<128x896xf32, #tpu.memory_space<vmem>>, vector<128x896xf32>
    %cst_25 = arith.constant 0.000000e+00 : f32
    %33 = vector.broadcast %cst_25 : f32 to vector<128x896xf32>
    %34 = arith.maximumf %19, %33 : vector<128x896xf32>
    %35 = arith.mulf %32, %19 : vector<128x896xf32>
    %36 = arith.subf %34, %35 : vector<128x896xf32>
    %37 = math.log %25 : vector<128x896xf32>
    %38 = arith.addf %36, %37 : vector<128x896xf32>
    %39 = tpu.iota {dimensions = array<i32: 1>} : vector<128x896xi32>
    %c784_i32 = arith.constant 784 : i32
    %40 = vector.broadcast %c784_i32 : i32 to vector<128x896xi32>
    %41 = arith.cmpi slt, %39, %40 : vector<128x896xi32>
    %cst_26 = arith.constant 0.000000e+00 : f32
    %42 = vector.broadcast %cst_26 : f32 to vector<128x896xf32>
    %43 = arith.select %41, %38, %42 : vector<128x896xi1>, vector<128x896xf32>
    %44 = vector.extract_strided_slice %43 {offsets = [0, 0], sizes = [128, 128], strides = [1, 1]} : vector<128x896xf32> to vector<128x128xf32>
    %45 = vector.extract_strided_slice %43 {offsets = [0, 128], sizes = [128, 128], strides = [1, 1]} : vector<128x896xf32> to vector<128x128xf32>
    %46 = arith.addf %44, %45 : vector<128x128xf32>
    %47 = vector.extract_strided_slice %43 {offsets = [0, 256], sizes = [128, 128], strides = [1, 1]} : vector<128x896xf32> to vector<128x128xf32>
    %48 = arith.addf %46, %47 : vector<128x128xf32>
    %49 = vector.extract_strided_slice %43 {offsets = [0, 384], sizes = [128, 128], strides = [1, 1]} : vector<128x896xf32> to vector<128x128xf32>
    %50 = arith.addf %48, %49 : vector<128x128xf32>
    %51 = vector.extract_strided_slice %43 {offsets = [0, 512], sizes = [128, 128], strides = [1, 1]} : vector<128x896xf32> to vector<128x128xf32>
    %52 = arith.addf %50, %51 : vector<128x128xf32>
    %53 = vector.extract_strided_slice %43 {offsets = [0, 640], sizes = [128, 128], strides = [1, 1]} : vector<128x896xf32> to vector<128x128xf32>
    %54 = arith.addf %52, %53 : vector<128x128xf32>
    %55 = vector.extract_strided_slice %43 {offsets = [0, 768], sizes = [128, 128], strides = [1, 1]} : vector<128x896xf32> to vector<128x128xf32>
    %56 = arith.addf %54, %55 : vector<128x128xf32>
    %c0_27 = arith.constant 0 : index
    %c0_28 = arith.constant 0 : index
    %57 = vector.load %arg10[%c0_27, %c0_28] : memref<128x128xf32, #tpu.memory_space<vmem>>, vector<128x128xf32>
    tpu.vector_store %arg10[%c0_27, %c0_28], %56 {strides = array<i32>} : memref<128x128xf32, #tpu.memory_space<vmem>>, vector<128x128xf32>,
    return
  }
  func.func @transform_0(%arg0: i32) -> (i32, i32) {
    %c0_i32 = arith.constant 0 : i32
    %c0_i32_0 = arith.constant 0 : i32
    return %arg0, %c0_i32 : i32, i32
  }
  func.func @transform_1(%arg0: i32) -> (i32, i32) {
    %c0_i32 = arith.constant 0 : i32
    %c0_i32_0 = arith.constant 0 : i32
    return %arg0, %c0_i32 : i32, i32
  }
  func.func @transform_2(%arg0: i32) -> (i32, i32) {
    %c0_i32 = arith.constant 0 : i32
    %c0_i32_0 = arith.constant 0 : i32
    %c0_i32_1 = arith.constant 0 : i32
    return %c0_i32, %c0_i32_0 : i32, i32
  }
  func.func @transform_3(%arg0: i32) -> (i32, i32) {
    %c0_i32 = arith.constant 0 : i32
    %c0_i32_0 = arith.constant 0 : i32
    %c0_i32_1 = arith.constant 0 : i32
    return %c0_i32, %c0_i32_0 : i32, i32
  }
  func.func @transform_4(%arg0: i32) -> (i32, i32) {
    %c0_i32 = arith.constant 0 : i32
    %c0_i32_0 = arith.constant 0 : i32
    %c0_i32_1 = arith.constant 0 : i32
    return %c0_i32, %c0_i32_0 : i32, i32
  }
  func.func @transform_5(%arg0: i32) -> (i32, i32) {
    %c0_i32 = arith.constant 0 : i32
    %c0_i32_0 = arith.constant 0 : i32
    %c0_i32_1 = arith.constant 0 : i32
    return %c0_i32, %c0_i32_0 : i32, i32
  }
  func.func @transform_6(%arg0: i32) -> (i32, i32) {
    %c0_i32 = arith.constant 0 : i32
    %c0_i32_0 = arith.constant 0 : i32
    %c0_i32_1 = arith.constant 0 : i32
    return %c0_i32, %c0_i32_0 : i32, i32
  }
  func.func @transform_7(%arg0: i32) -> (i32, i32) {
    %c0_i32 = arith.constant 0 : i32
    %c0_i32_0 = arith.constant 0 : i32
    %c0_i32_1 = arith.constant 0 : i32
    return %c0_i32, %c0_i32_0 : i32, i32
  }
  func.func @transform_8(%arg0: i32) -> (i32, i32) {
    %c0_i32 = arith.constant 0 : i32
    %c0_i32_0 = arith.constant 0 : i32
    return %arg0, %c0_i32 : i32, i32
  }
  func.func @transform_9(%arg0: i32) -> (i32, i32) {
    %c0_i32 = arith.constant 0 : i32
    %c0_i32_0 = arith.constant 0 : i32
    return %arg0, %c0_i32 : i32, i32
  }
}

</mosaic_0001>

<bundles_post_ra>
// kernel: tpu_custom_call.1
= control target key start
LH: loop header
LB: loop body
LE: loop exit
PB: predicated region body
PF: predicated region fallthrough
CT: control target
= control target key end

     0   :  { %s10226_s0 = inlined_call_operand.vmem [shape: f32[256,20], index: 0, kind: input, shape index: {}]   ;;  %s10227_s1 = inlined_call_operand.hbm [shape: f32[256,896], index: 1, kind: input, shape index: {}]   ;;  %s10228_s2 = inlined_call_operand.hbm [shape: f32[20,256], index: 2, kind: input, shape index: {}]   ;;  %s10229_s3 = inlined_call_operand.hbm [shape: f32[1,256], index: 3, kind: input, shape index: {}]   ;;  %s10230_s4 = inlined_call_operand.hbm [shape: f32[256,512], index: 4, kind: input, shape index: {}]   ;;  %s10231_s5 = inlined_call_operand.hbm [shape: f32[1,512], index: 5, kind: input, shape index: {}]   ;;  %s10232_s6 = inlined_call_operand.hbm [shape: f32[512,896], index: 6, kind: input, shape index: {}]   ;;  %s10233_s7 = inlined_call_operand.hbm [shape: f32[1,896], index: 7, kind: input, shape index: {}]   ;;  %s10234_s8 = inlined_call_operand.hbm [shape: f32[256,896], index: 8, kind: output, shape index: {0}]   ;;  %s10235_s9 = inlined_call_operand.hbm [shape: f32[256,128], index: 9, kind: output, shape index: {1}]  }
   0x1   :  { %10329 = sst [smem:[#allocation78_spill]] %s10228_s2 }
   0x2   :  { %10330 = sst [smem:[#allocation79_spill]] %s10229_s3 }
   0x3   :  { %10331 = sst [smem:[#allocation80_spill]] %s10230_s4 }
   0x4   :  { %15 = vsyncpa [#allocation3], 0 }
   0x5   :  { %17 = vsyncpa [#allocation3 + $0x1], 0 }
   0x6   :  { %18 = vsyncpa [#allocation6], 0 }
   0x7   :  { %19 = vsyncpa [#allocation9], 0 }
   0x8   :  { %20 = vsyncpa [#allocation12], 0 }
   0x9   :  { %21 = vsyncpa [#allocation4], 0 }
   0xa   :  { %23 = vsyncpa [#allocation4 + $0x1], 0 }
   0xb   :  { %24 = vsyncpa [#allocation16], 0 }
   0xc   :  { %26 = vsyncpa [#allocation16 + $0x1], 0  ;;  %s6755_s30 = smov 0   ;;  %s6757_s10 = smov 0  }
   0xd   :  { %s6759_s11 = smov 0   ;;  %s6761_s12 = smov 0  }
   0xe LB: > { %s6685_s13 = smov [#allocation5]   ;;  %s6776_s15 = sadd.s32 4294967295, %s6683_s12   ;;  %s6683_s12 = sphi %s6761_s12, %s10548_s12   ;;  %s6679_s11 = sphi %s6759_s11, %s10547_s11   ;;  %s6675_s10 = sphi %s6757_s10, %s10546_s10   ;;  %s6671_s30 = sphi %s6755_s30, %s10545_s30  }
   0xf   : > { %s279_s14 = sshll.u32 %s6685_s13, 4  ;;  %p5383_p0 = scmp.ge.s32.totalorder %s6683_s12, 1  ;;  %s280_s14 = int_to_ptr.vmem [resolvable:$true] %s279_s14 }
  0x10   : > { %p10236_p1 = scmp.eq.s32.totalorder %s6776_s15, 0  ;;  %p267_p2 = scmp.lt.s32.totalorder %s6683_s12, 3 }
  0x11   : > { %s6686_s17 = smov [#allocation8]   ;;  %s6687_s20 = smov [#allocation11]  }
  0x12   : > { %p6781_p3 = pnand %p5383_p0, %p267_p2  ;;  %s303_s18 = sshll.u32 %s6686_s17, 4  ;;  %s6794_s18 = int_to_ptr.vmem [resolvable:$true] %s303_s18 }
  0x13   : > { %s6796_s21 = sshll.u32 %s6687_s20, 4  ;;  %s6404_s23 = scalar_lea.vmem %s280_s14, 768  ;;  %s328_s21 = int_to_ptr.vmem [resolvable:$true] %s6796_s21 }
  0x14   : > { %s10332_s16 = scalar_select %p6781_p3, 1, 0 }
  0x15   : > { %p5625_p5 = pneg %p6781_p3  ;;  %p6405_p8 = scmp.ne.s32.totalorder %s280_s14, %s6404_s23 }
  0x16   : > { %p6412_p11 = scmp.lt.s32.totalorder %s280_s14, %s280_s14  ;;  %p6413_p12 = scmp.lt.s32.totalorder %s6404_s23, %s6404_s23 }
  0x17   : > { %p6790_p6 = pnand %p5625_p5, %p10236_p1 }
  0x18   : > { %p6414_p13 = por %p6413_p12, %p6412_p11 }
  0x19   : > { %p6800_p7 = pneg %p6790_p6 }
  0x1b   : > { %p6407_p9 = pnand %p6405_p8, %p6800_p7 }
  0x1d   : > { %p6408_p10 = pneg %p6407_p9 }
  0x1f   : > { %p6415_p0 = pnand %p6414_p13, %p6408_p10 }
  0x21   : > { %6418 = shalt.err (!%p6415_p0)
}
  0x22   : > { %s6688_s24 = smov 256   ;;  %s6689_s25 = smov 16  }
  0x23   : > { %s10335_s2 = sld [smem:[#allocation78_spill]]  ;;  %s6430_s28 = scalar_lea.vmem %s6794_s18, 16384 }
  0x24   : > { %p6431_p2 = scmp.ne.s32.totalorder %s6794_s18, %s6430_s28  ;;  %p6438_p9 = scmp.lt.s32.totalorder %s6794_s18, %s6794_s18 }
  0x25   : > { %p6439_p10 = scmp.lt.s32.totalorder %s6430_s28, %s6430_s28 }
  0x26   : > { %p6433_p5 = pnand %p6431_p2, %p6800_p7 }
  0x27   : > { %p6440_p11 = por %p6439_p10, %p6438_p9 }
  0x28   : > { %p6434_p8 = pneg %p6433_p5 }
  0x29   : > { %5628 = dma.hbm_to_vmem [thread:$0]  (!%p6790_p6), %s10335_s2, 768, %s280_s14, [#allocation6], %s6688_s24, %s6688_s24, %s6689_s25  }
  0x2a   : > { %p6441_p12 = pnand %p6440_p11, %p6434_p8 }
  0x2c   : > { %6444 = shalt.err (!%p6441_p12)
}
  0x2d   : > { %s6690_s29 = smov 512   ;;  %s6691_s13 = smov 32  }
  0x2e   : > { %s10336_s4 = sld [smem:[#allocation80_spill]]  ;;  %s6456_s20 = scalar_lea.vmem %s328_s21, 57344 }
  0x2f   : > { %p6457_p13 = scmp.ne.s32.totalorder %s328_s21, %s6456_s20  ;;  %p6464_p5 = scmp.lt.s32.totalorder %s328_s21, %s328_s21 }
  0x30   : > { %p6465_p8 = scmp.lt.s32.totalorder %s6456_s20, %s6456_s20 }
  0x31   : > { %p6459_p0 = pnand %p6457_p13, %p6800_p7 }
  0x32   : > { %p6466_p9 = por %p6465_p8, %p6464_p5 }
  0x33   : > { %p6460_p2 = pneg %p6459_p0 }
  0x34   : > { %5634 = dma.hbm_to_vmem [thread:$0]  (!%p6790_p6), %s10336_s4, 16384, %s6794_s18, [#allocation9], %s6690_s29, %s6690_s29, %s6691_s13  }
  0x35   : > { %p6467_p10 = pnand %p6466_p9, %p6460_p2 }
  0x37   : > { %6470 = shalt.err (!%p6467_p10)
}
  0x38   : > { %s10238_s23 = smov 896   ;;  %s10239_s24 = smov 56  }
  0x39   : > { %5640 = dma.hbm_to_vmem [thread:$0]  (!%p6790_p6), %s10232_s6, 57344, %s328_s21, [#allocation12], %s10238_s23, %s10238_s23, %s10239_s24  }
  0x3a   : > { %s6694_s26 = smov [#allocation7]   ;;  %s6695_s28 = smov [#allocation10]  }
  0x3b   : > { %s293_s27 = sshll.u32 %s6694_s26, 4  ;;  %s317_s29 = sshll.u32 %s6695_s28, 4  ;;  %s294_s27 = int_to_ptr.vmem [resolvable:$true] %s293_s27  ;;  %s318_s29 = int_to_ptr.vmem [resolvable:$true] %s317_s29 }
  0x3c   : > { %s6482_s13 = scalar_lea.vmem %s294_s27, 32  ;;  %p6490_p0 = scmp.lt.s32.totalorder %s294_s27, %s294_s27 }
  0x3d   : > { %p6483_p11 = scmp.ne.s32.totalorder %s294_s27, %s6482_s13  ;;  %p6491_p2 = scmp.lt.s32.totalorder %s6482_s13, %s6482_s13 }
  0x3f   : > { %p6485_p12 = pnand %p6483_p11, %p6800_p7  ;;  %p6492_p5 = por %p6491_p2, %p6490_p0 }
  0x41   : > { %p6486_p13 = pneg %p6485_p12 }
  0x43   : > { %p6493_p8 = pnand %p6492_p5, %p6486_p13 }
  0x45   : > { %6496 = shalt.err (!%p6493_p8)
}
  0x46   : > { %s10337_s3 = sld [smem:[#allocation79_spill]]  ;;  %s6508_s21 = scalar_lea.vmem %s318_s29, 64 }
  0x47   : > { %p6509_p9 = scmp.ne.s32.totalorder %s318_s29, %s6508_s21  ;;  %p6516_p11 = scmp.lt.s32.totalorder %s318_s29, %s318_s29 }
  0x48   : > { %p6517_p12 = scmp.lt.s32.totalorder %s6508_s21, %s6508_s21 }
  0x49   : > { %p6511_p10 = pnand %p6509_p9, %p6800_p7 }
  0x4a   : > { %p6518_p1 = por %p6517_p12, %p6516_p11 }
  0x4b   : > { %p6512_p4 = pneg %p6511_p10 }
  0x4c   : > { %5631 = dma.hbm_to_vmem [thread:$0]  (!%p6790_p6), %s10337_s3, 32, %s294_s27, [#allocation6]  }
  0x4d   : > { %p6519_p3 = pnand %p6518_p1, %p6512_p4 }
  0x4f   : > { %6522 = shalt.err (!%p6519_p3)
}
  0x50   : > { %5637 = dma.hbm_to_vmem [thread:$0]  (!%p6790_p6), %s10231_s5, 64, %s318_s29, [#allocation9]  }
  0x51   : > { %s6696_s25 = smov [#allocation13]  }
  0x52   : > { %s341_s26 = sshll.u32 %s6696_s25, 4  ;;  %s342_s26 = int_to_ptr.vmem [resolvable:$true] %s341_s26 }
  0x53   : > { %s6534_s27 = scalar_lea.vmem %s342_s26, 112  ;;  %s6541_s28 = scalar_lea.vmem %s342_s26, 128 }
  0x54   : > { %p6535_p13 = scmp.ne.s32.totalorder %s342_s26, %s6534_s27  ;;  %p6542_p5 = scmp.lt.s32.totalorder %s342_s26, %s342_s26 }
  0x55   : > { %p6543_p8 = scmp.lt.s32.totalorder %s6541_s28, %s6534_s27 }
  0x56   : > { %p6537_p0 = pnand %p6535_p13, %p6800_p7 }
  0x57   : > { %p6544_p1 = por %p6543_p8, %p6542_p5 }
  0x58   : > { %p6538_p2 = pneg %p6537_p0 }
  0x5a   : > { %p6545_p3 = pnand %p6544_p1, %p6538_p2 }
  0x5c   : > { %6548 = shalt.err (!%p6545_p3)
}
  0x5d   : > { %5643 = dma.hbm_to_vmem [thread:$0]  (!%p6790_p6), %s10233_s7, 112, %s342_s26, [#allocation12]  }
  0x5e   : > { %s5382_s22 = sadd.s32 4294967294, %s6683_s12   ;;  %s6857_s19 = sadd.s32 1, %s6683_s12  }
  0x5f   : > { %s62_s29 = ssub.s32 %s6683_s12, %s6857_s19  ;;  %s65_s14 = sadd.s32 1, %s6679_s11 }
  0x60   : > { %p63_p4 = scmp.eq.s32.totalorder %s62_s29, 0  ;;  %p72_p7 = scmp.ne.s32.totalorder %s6679_s11, %s6675_s10 }
  0x61   : > { %p73_p9 = scmp.eq.s32.totalorder %s6683_s12, 0  ;;  %p78_p10 = scmp.ne.s32.totalorder %s6675_s10, %s6671_s30 }
  0x62   : > { %s6868_s21 = scalar_select %p63_p4, %s6679_s11, %s65_s14  }
  0x63   : > { %p74_p11 = por %p73_p9, %p72_p7  ;;  %p10338_p12 = scmp.eq.s32.totalorder %s6776_s15, 0 }
  0x64   : > { %p228_p6 = scmp.eq.s32.totalorder %s6776_s15, 1  ;;  %p234_p0 = scmp.eq.s32.totalorder %s5382_s22, 1 }
  0x65   : > { %p6872_p13 = por %p10338_p12, %p78_p10  ;;  %p5661_p2 = scmp.lt.s32.totalorder %s6683_s12, 2 }
  0x66   : > { %s361_s18 = sand.u32 1, %s6679_s11   ;;  %p6879_p5 = por %p228_p6, %p72_p7 }
  0x67   : > { %s10339_s20 = scalar_select %p6872_p13, 1, 0 }
  0x68   : > { %s10340_s25 = scalar_select %p6879_p5, 1, 0 }
  0x69   : > { %p6883_p8 = por %p234_p0, %p78_p10  ;;  %s5591_s27 = smul.u32 896, %s361_s18 }
  0x6a   : > { %s5592_s28 = smul.u32 14336, %s6683_s12  ;;  %p6888_p1 = pnand %p5661_p2, %p74_p11 }
  0x6b   : > { %s10341_s26 = scalar_select %p6883_p8, 1, 0 }
  0x6c   : > { %s6895_s22 = scalar_lea.hbm %s10227_s1, %s5592_s28  ;;  %s365_s14 = scalar_lea.vmem [#allocation2], %s5591_s27 }
  0x6d   : > { %s373_s23 = sshll.u32 %s365_s14, 4  ;;  %s6899_s24 = scalar_lea.sflag [#allocation3], %s361_s18  ;;  %s6897_s23 = int_to_ptr.vmem [resolvable:$true] %s373_s23 }
  0x6e   : > { %s6549_s2 = scalar_lea.hbm %s6895_s22, 14336  ;;  %p6551_p4 = pneg %p6888_p1 }
  0x6f   : > { %p6550_p3 = scmp.ne.s32.totalorder %s6895_s22, %s6549_s2  ;;  %s6554_s28 = scalar_lea.hbm %s10227_s1, 28672 }
  0x70   : > { %p6555_p10 = scmp.lt.s32.totalorder %s6895_s22, %s10227_s1  ;;  %p6556_p11 = scmp.lt.s32.totalorder %s6554_s28, %s6549_s2 }
  0x71   : > { %p6552_p7 = pnand %p6551_p4, %p6550_p3 }
  0x72   : > { %p6557_p12 = por %p6556_p11, %p6555_p10 }
  0x73   : > { %p6553_p9 = pneg %p6552_p7 }
  0x75   : > { %p6558_p6 = pnand %p6557_p12, %p6553_p9 }
  0x77   : > { %6561 = shalt.err (!%p6558_p6)
}
  0x78   : > { %s6562_s18 = scalar_lea.vmem %s6897_s23, 14336  ;;  %s6697_s27 = smov [#allocation2]  }
  0x79   : > { %p6563_p0 = scmp.ne.s32.totalorder %s6897_s23, %s6562_s18  ;;  %s6567_s14 = sshll.u32 %s6697_s27, 4  ;;  %s6568_s14 = int_to_ptr.vmem [resolvable:$false] %s6567_s14 }
  0x7a   : > { %s6569_s3 = scalar_lea.vmem %s6568_s14, 28672  ;;  %p6570_p7 = scmp.lt.s32.totalorder %s6897_s23, %s6568_s14 }
  0x7b   : > { %p6565_p2 = pnand %p6563_p0, %p6551_p4  ;;  %p6571_p8 = scmp.lt.s32.totalorder %s6569_s3, %s6562_s18 }
  0x7d   : > { %p6566_p3 = pneg %p6565_p2  ;;  %p6572_p5 = por %p6571_p8, %p6570_p7 }
  0x7f   : > { %p6573_p13 = pnand %p6572_p5, %p6566_p3 }
  0x81   : > { %6576 = shalt.err (!%p6573_p13)
}
  0x82   : > { %s10343_s2 = smov 56   ;;  %s10344_s4 = smov 896  }
  0x83   : > { %5647 = dma.hbm_to_vmem [thread:$0]  (!%p6888_p1), %s6895_s22, 14336, %s6897_s23, %s6899_s24, %s10344_s4, %s10344_s4, %s10343_s2  }
  0x84   : > { %p10345_p4 = scmp.ne.s32.totalorder %s10332_s16, 0 }
  0x86   : > { %385 = sbr.rel (%p10345_p4) target bundleno = 1339 (0x53b), region = 52 }
  0x8b   : > { %s6926_s17 = sand.u32 1, %s6675_s10   ;;  %p10346_p13 = scmp.ne.s32.totalorder %s10339_s20, 0 }
  0x8c   : > { %s5593_s28 = smul.u32 896, %s6926_s17  ;;  %s388_s29 = scalar_lea.sflag [#allocation3], %s6926_s17 }
  0x8e   : > { %s6932_s13 = scalar_lea.vmem [#allocation2], %s5593_s28 }
  0x8f   : > { %6646 = dma.done.wait (%p10346_p13), %s388_s29, 14336  }
  0x90   : > { %6648 = vsyncadd (%p10346_p13), %s388_s29, 4294952960  ;;  %p10347_p5 = scmp.eq.s32.totalorder %s6776_s15, 0 }
  0x92   : > { %6650 = dma.done.wait (%p10347_p5), [#allocation6], 800   ;;  %p10348_p8 = pmov %p10347_p5 }
  0x93   : > { %p10349_p1 = pmov %p10347_p5 }
  0x94   : > { %6652 = vsyncadd (%p10348_p8), [#allocation6], 4294966496 }
  0x95   : > { %6654 = dma.done.wait (%p10349_p1), [#allocation9], 16448   ;;  %p10350_p9 = pmov %p10349_p1 }
  0x96   : > { %p10351_p10 = pmov %p10349_p1 }
  0x97   : > { %6656 = vsyncadd (%p10350_p9), [#allocation9], 4294950848 }
  0x98   : > { %6658 = dma.done.wait (%p10351_p10), [#allocation12], 57456   ;;  %p10352_p11 = pmov %p10349_p1 }
  0x99   : > { %s5402_s16 = sshll.u32 %s6776_s15, 4  ;;  %v6698_v0 = vmov 0.0   ;;  %vm552_vm0 = vcmask 1043456   ;;  %v490_v1 = vld [vmem:[#allocation5 + $0x28] sm:$0xf]  ;;  %v488_v3 = vld [vmem:[#allocation5 + $0x18] sm:$0xff] }
  0x9a   : > { %6660 = vsyncadd (%p10352_p11), [#allocation12], 4294909840  ;;  %623 = vmatprep.mubr.f32.mxu0 %v6698_v0  ;;  %p461_p12 = scmp.lt.s32.totalorder %s5402_s16, 31  ;;  %v489_v2 = vld [vmem:[#allocation5 + $0x20] sm:$0xf]  ;;  %5404 = vmatprep.subr.msk.mxu0 %vm552_vm0, %v490_v1  ;;  %v487_v4 = vld [vmem:[#allocation5 + $0x10] sm:$0xff] }
  0x9b   : > { %5405 = vmatpush1.msk.msra.mxu0 %vm552_vm0, %v489_v2  ;;  %v486_v5 = vld [vmem:[#allocation5 + $0x8] sm:$0xff]  ;;  %v485_v6 = vld [vmem:[#allocation5] sm:$0xff]  ;;  %vm503_vm1 = vcmask 162816   ;;  %v812_v11 = vld [vmem:[#allocation8 + $0x1e0] sm:$0xff]  ;;  %s7626_s18 = scalar_lea.vmem [#allocation14], %s5593_s28  ;;  %s5401_s27 = sshll.u32 %s6926_s17, 7 }
  0x9c   : > { %s10550_s16 = smov (!%p461_p12, %s5402_s16), 31  ;;  %587 = vmatprep.subr.mxu0 %v488_v3  ;;  %v813_v9 = vld [vmem:[#allocation8 + $0x1e8] sm:$0xff]  ;;  %v815_v10 = vld [vmem:[#allocation8 + $0x1f8] sm:$0xff]  ;;  %v814_v12 = vld [vmem:[#allocation8 + $0x1f0] sm:$0xff]  ;;  %s9936_s14 = scalar_lea.vmem [#allocation15], %s5401_s27 }
  0x9d   : > { %s5403_s23 = sshll.u32 %s10550_s16, 3  ;;  %588 = vmatpush1.msra.mxu0 %v487_v4  ;;  %902 = vmatprep.subr.mxu1 %v813_v9  ;;  %v809_v13 = vld [vmem:[#allocation8 + $0x1c8] sm:$0xff]  ;;  %v811_v14 = vld [vmem:[#allocation8 + $0x1d8] sm:$0xff]  ;;  %v808_v15 = vld [vmem:[#allocation8 + $0x1c0] sm:$0xff]  ;;  %s5594_s3 = smul.u32 14336, %s6776_s15 }
  0x9e   : > { %s6955_s22 = scalar_lea.vmem %s10226_s0, %s5403_s23  ;;  %589 = vmatprep.subr.mxu0 %v486_v5  ;;  %903 = vmatpush1.msra.mxu1 %v812_v11  ;;  %v810_v16 = vld [vmem:[#allocation8 + $0x1d0] sm:$0xff]  ;;  %v805_v17 = vld [vmem:[#allocation8 + $0x1a8] sm:$0xff]  ;;  %v807_v18 = vld [vmem:[#allocation8 + $0x1b8] sm:$0xff]  ;;  %s5192_s2 = sshll.u32 %s7626_s18, 4  ;;  %s10141_s2 = int_to_ptr.vmem [resolvable:$true] %s5192_s2 }
  0x9f   : > { %v469_v7 = vld [vmem:[%s6955_s22] sm:$0xff]  ;;  %590 = vmatpush1.msra.mxu0 %v485_v6  ;;  %v470_v8 = vld [vmem:[%s6955_s22 + $0x8] sm:$0xff]  ;;  %904 = vmatprep.subr.mxu1 %v809_v13  ;;  %v804_v19 = vld [vmem:[#allocation8 + $0x1a0] sm:$0xff]  ;;  %s10139_s29 = scalar_lea.hbm %s10234_s8, %s5594_s3  ;;  %s5173_s23 = scalar_lea.sflag [#allocation4], %s6926_s17 }
  0xa0   : > { %5406 = vmatmul.mubr.msk.f32.vlgmr.msra.gmra.mxu0 %vm503_vm1, %v469_v7  ;;  %1063 = vmatprep.subr.mxu0 %v815_v10  ;;  %v471_v20 = vld [vmem:[%s6955_s22 + $0x10] sm:$0xff]  ;;  %v801_v21 = vld [vmem:[#allocation8 + $0x188] sm:$0xff]  ;;  %v806_v22 = vld [vmem:[#allocation8 + $0x1b0] sm:$0xff]  ;;  %s6577_s24 = scalar_lea.vmem %s10141_s2, 14336  ;;  %p10541_p0 = scmp.ne.s32.totalorder %s10340_s25, 0 }
  0xa1   : > { %629 = vmatprep.mubr.f32.mxu0 %v6698_v0  ;;  %1064 = vmatpush1.msra.mxu0 %v814_v12  ;;  %v803_v23 = vld [vmem:[#allocation8 + $0x198] sm:$0xff]  ;;  %v800_v24 = vld [vmem:[#allocation8 + $0x180] sm:$0xff]  ;;  %v802_v25 = vld [vmem:[#allocation8 + $0x190] sm:$0xff]  ;;  %p6578_p6 = scmp.ne.s32.totalorder %s10141_s2, %s6577_s24  ;;  %s6699_s20 = smov [#allocation14]  }
  0xa2   : > { %1065 = vmatprep.subr.mxu0 %v811_v14  ;;  %905 = vmatpush1.msra.mxu1 %v808_v15  ;;  %v797_v26 = vld [vmem:[#allocation8 + $0x168] sm:$0xff]  ;;  %v799_v28 = vld [vmem:[#allocation8 + $0x178] sm:$0xff]  ;;  %v796_v29 = vld [vmem:[#allocation8 + $0x160] sm:$0xff] }
  0xa3   : > { %1066 = vmatpush1.msra.mxu0 %v810_v16  ;;  %906 = vmatprep.subr.mxu1 %v805_v17  ;;  %v472_v27 = vld [vmem:[%s6955_s22 + $0x18] sm:$0xff]  ;;  %v798_v30 = vld [vmem:[#allocation8 + $0x170] sm:$0xff]  ;;  %v795_v32 = vld [vmem:[#allocation8 + $0x158] sm:$0xff]  ;;  %p6579_p2 = pnand %p6578_p6, %p10541_p0 }
  0xa4   : > { %5407 = vmatmul.mubr.msk.f32.gmra.mxu0 %vm503_vm1, %v470_v8  ;;  %1067 = vmatprep.subr.mxu0 %v807_v18  ;;  %v793_v31 = vld [vmem:[#allocation8 + $0x148] sm:$0xff]  ;;  %v792_v33 = vld [vmem:[#allocation8 + $0x140] sm:$0xff]  ;;  %v794_v36 = vld [vmem:[#allocation8 + $0x150] sm:$0xff] }
  0xa5   : > { %635 = vmatprep.mubr.f32.mxu0 %v6698_v0  ;;  %907 = vmatpush1.msra.mxu1 %v804_v19  ;;  %v473_v34 = vld [vmem:[%s6955_s22 + $0x20] sm:$0xff]  ;;  %v791_v37 = vld [vmem:[#allocation8 + $0x138] sm:$0xff]  ;;  %v788_v38 = vld [vmem:[#allocation8 + $0x120] sm:$0xff]  ;;  %p6580_p3 = pneg %p6579_p2 }
  0xa6   : > { %908 = vmatprep.subr.mxu1 %v801_v21  ;;  %1068 = vmatpush1.msra.mxu0 %v806_v22  ;;  %v789_v35 = vld [vmem:[#allocation8 + $0x128] sm:$0xff]  ;;  %v790_v39 = vld [vmem:[#allocation8 + $0x130] sm:$0xff]  ;;  %v787_v42 = vld [vmem:[#allocation8 + $0x118] sm:$0xff] }
  0xa7   : > { %1069 = vmatprep.subr.mxu0 %v803_v23  ;;  %909 = vmatpush1.msra.mxu1 %v800_v24  ;;  %v785_v40 = vld [vmem:[#allocation8 + $0x108] sm:$0xff]  ;;  %v474_v41 = vld [vmem:[%s6955_s22 + $0x28] sm:$0xff]  ;;  %v784_v43 = vld [vmem:[#allocation8 + $0x100] sm:$0xff] }
  0xa8   : > { %5408 = vmatmul.mubr.msk.f32.gmra.mxu0 %vm503_vm1, %v471_v20  ;;  %910 = vmatprep.subr.mxu1 %v797_v26  ;;  %v786_v44 = vld [vmem:[#allocation8 + $0x110] sm:$0xff]  ;;  %v781_v45 = vld [vmem:[#allocation8 + $0xe8] sm:$0xff]  ;;  %v783_v46 = vld [vmem:[#allocation8 + $0xf8] sm:$0xff] }
  0xa9   : > { %641 = vmatprep.mubr.f32.mxu0 %v6698_v0  ;;  %1070 = vmatpush1.msra.mxu0 %v802_v25  ;;  %v780_v47 = vld [vmem:[#allocation8 + $0xe0] sm:$0xff]  ;;  %v777_v49 = vld [vmem:[#allocation8 + $0xc8] sm:$0xff]  ;;  %v782_v50 = vld [vmem:[#allocation8 + $0xf0] sm:$0xff] }
  0xaa   : > { %1071 = vmatprep.subr.mxu0 %v799_v28  ;;  %911 = vmatpush1.msra.mxu1 %v796_v29  ;;  %v475_v48 = vld [vmem:[%s6955_s22 + $0x30] sm:$0xff]  ;;  %v778_v53 = vld [vmem:[#allocation8 + $0xd0] sm:$0xff]  ;;  %v773_v54 = vld [vmem:[#allocation8 + $0xa8] sm:$0xff] }
  0xab   : > { %1072 = vmatpush1.msra.mxu0 %v798_v30  ;;  %912 = vmatprep.subr.mxu1 %v793_v31  ;;  %v779_v51 = vld [vmem:[#allocation8 + $0xd8] sm:$0xff]  ;;  %v776_v52 = vld [vmem:[#allocation8 + $0xc0] sm:$0xff]  ;;  %v774_v58 = vld [vmem:[#allocation8 + $0xb0] sm:$0xff] }
  0xac   : > { %5409 = vmatmul.mubr.msk.f32.gmra.mxu0 %vm503_vm1, %v472_v27  ;;  %1073 = vmatprep.subr.mxu0 %v795_v32  ;;  %v476_v55 = vld [vmem:[%s6955_s22 + $0x38] sm:$0xff]  ;;  %v775_v56 = vld [vmem:[#allocation8 + $0xb8] sm:$0xff]  ;;  %v477_v62 = vld [vmem:[%s6955_s22 + $0x40] sm:$0xff] }
  0xad   : > { %647 = vmatprep.mubr.f32.mxu0 %v6698_v0  ;;  %913 = vmatpush1.msra.mxu1 %v792_v33  ;;  %v772_v57 = vld [vmem:[#allocation8 + $0xa0] sm:$0xff]  ;;  %v769_v59 = vld [vmem:[#allocation8 + $0x88] sm:$0xff]  ;;  %v771_v60 = vld [vmem:[#allocation8 + $0x98] sm:$0xff] }
  0xae   : > { %914 = vmatprep.subr.mxu1 %v789_v35  ;;  %1074 = vmatpush1.msra.mxu0 %v794_v36  ;;  %v768_v61 = vld [vmem:[#allocation8 + $0x80] sm:$0xff]  ;;  %v765_v63 = vld [vmem:[#allocation8 + $0x68] sm:$0xff]  ;;  %v770_v1 = vld [vmem:[#allocation8 + $0x90] sm:$0xff] }
  0xaf   : > { %1075 = vmatprep.subr.mxu0 %v791_v37  ;;  %915 = vmatpush1.msra.mxu1 %v788_v38  ;;  %v767_v2 = vld [vmem:[#allocation8 + $0x78] sm:$0xff]  ;;  %v764_v3 = vld [vmem:[#allocation8 + $0x60] sm:$0xff]  ;;  %v766_v4 = vld [vmem:[#allocation8 + $0x70] sm:$0xff] }
  0xb0   : > { %5410 = vmatmul.mubr.msk.f32.gmra.mxu0 %vm503_vm1, %v473_v34  ;;  %916 = vmatprep.subr.mxu1 %v785_v40  ;;  %v761_v5 = vld [vmem:[#allocation8 + $0x48] sm:$0xff]  ;;  %v478_v6 = vld [vmem:[%s6955_s22 + $0x48] sm:$0xff]  ;;  %v760_v8 = vld [vmem:[#allocation8 + $0x40] sm:$0xff] }
  0xb1   : > { %653 = vmatprep.mubr.f32.mxu0 %v6698_v0  ;;  %1076 = vmatpush1.msra.mxu0 %v790_v39  ;;  %v763_v7 = vld [vmem:[#allocation8 + $0x58] sm:$0xff]  ;;  %v762_v9 = vld [vmem:[#allocation8 + $0x50] sm:$0xff]  ;;  %v757_v10 = vld [vmem:[#allocation8 + $0x28] sm:$0xff] }
  0xb2   : > { %1077 = vmatprep.subr.mxu0 %v787_v42  ;;  %917 = vmatpush1.msra.mxu1 %v784_v43  ;;  %v759_v11 = vld [vmem:[#allocation8 + $0x38] sm:$0xff]  ;;  %v756_v12 = vld [vmem:[#allocation8 + $0x20] sm:$0xff]  ;;  %v753_v14 = vld [vmem:[#allocation8 + $0x8] sm:$0xff] }
  0xb3   : > { %1078 = vmatpush1.msra.mxu0 %v786_v44  ;;  %918 = vmatprep.subr.mxu1 %v781_v45  ;;  %v479_v13 = vld [vmem:[%s6955_s22 + $0x50] sm:$0xff]  ;;  %v758_v15 = vld [vmem:[#allocation8 + $0x30] sm:$0xff]  ;;  %v877_v19 = vld [vmem:[#allocation8 + $0x3e8] sm:$0xff] }
  0xb4   : > { %5411 = vmatmul.mubr.msk.f32.gmra.mxu0 %vm503_vm1, %v474_v41  ;;  %1079 = vmatprep.subr.mxu0 %v783_v46  ;;  %v755_v16 = vld [vmem:[#allocation8 + $0x18] sm:$0xff]  ;;  %v752_v17 = vld [vmem:[#allocation8] sm:$0xff]  ;;  %v754_v18 = vld [vmem:[#allocation8 + $0x10] sm:$0xff] }
  0xb5   : > { %659 = vmatprep.mubr.f32.mxu0 %v6698_v0  ;;  %919 = vmatpush1.msra.mxu1 %v780_v47  ;;  %v480_v20 = vld [vmem:[%s6955_s22 + $0x58] sm:$0xff]  ;;  %v879_v21 = vld [vmem:[#allocation8 + $0x3f8] sm:$0xff]  ;;  %v878_v23 = vld [vmem:[#allocation8 + $0x3f0] sm:$0xff] }
  0xb6   : > { %920 = vmatprep.subr.mxu1 %v777_v49  ;;  %1080 = vmatpush1.msra.mxu0 %v782_v50  ;;  %v876_v22 = vld [vmem:[#allocation8 + $0x3e0] sm:$0xff]  ;;  %v873_v24 = vld [vmem:[#allocation8 + $0x3c8] sm:$0xff]  ;;  %v875_v25 = vld [vmem:[#allocation8 + $0x3d8] sm:$0xff] }
  0xb7   : > { %1081 = vmatprep.subr.mxu0 %v779_v51  ;;  %921 = vmatpush1.msra.mxu1 %v776_v52  ;;  %v872_v26 = vld [vmem:[#allocation8 + $0x3c0] sm:$0xff]  ;;  %v481_v27 = vld [vmem:[%s6955_s22 + $0x60] sm:$0xff]  ;;  %v871_v30 = vld [vmem:[#allocation8 + $0x3b8] sm:$0xff] }
  0xb8   : > { %5412 = vmatmul.mubr.msk.f32.gmra.mxu0 %vm503_vm1, %v475_v48  ;;  %922 = vmatprep.subr.mxu1 %v773_v54  ;;  %v869_v28 = vld [vmem:[#allocation8 + $0x3a8] sm:$0xff]  ;;  %v874_v29 = vld [vmem:[#allocation8 + $0x3d0] sm:$0xff]  ;;  %v868_v31 = vld [vmem:[#allocation8 + $0x3a0] sm:$0xff] }
  0xb9   : > { %665 = vmatprep.mubr.f32.mxu0 %v6698_v0  ;;  %1082 = vmatpush1.msra.mxu0 %v778_v53  ;;  %v870_v32 = vld [vmem:[#allocation8 + $0x3b0] sm:$0xff]  ;;  %v865_v33 = vld [vmem:[#allocation8 + $0x388] sm:$0xff]  ;;  %v867_v35 = vld [vmem:[#allocation8 + $0x398] sm:$0xff] }
  0xba   : > { %1083 = vmatprep.subr.mxu0 %v775_v56  ;;  %923 = vmatpush1.msra.mxu1 %v772_v57  ;;  %v482_v34 = vld [vmem:[%s6955_s22 + $0x68] sm:$0xff]  ;;  %v864_v36 = vld [vmem:[#allocation8 + $0x380] sm:$0xff]  ;;  %v861_v38 = vld [vmem:[#allocation8 + $0x368] sm:$0xff] }
  0xbb   : > { %1084 = vmatpush1.msra.mxu0 %v774_v58  ;;  %924 = vmatprep.subr.mxu1 %v769_v59  ;;  %v866_v37 = vld [vmem:[#allocation8 + $0x390] sm:$0xff]  ;;  %v863_v39 = vld [vmem:[#allocation8 + $0x378] sm:$0xff]  ;;  %v860_v40 = vld [vmem:[#allocation8 + $0x360] sm:$0xff] }
  0xbc   : > { %5413 = vmatmul.mubr.msk.f32.gmra.mxu0 %vm503_vm1, %v476_v55  ;;  %1085 = vmatprep.subr.mxu0 %v771_v60  ;;  %v483_v41 = vld [vmem:[%s6955_s22 + $0x70] sm:$0xff]  ;;  %v857_v42 = vld [vmem:[#allocation8 + $0x348] sm:$0xff]  ;;  %v862_v43 = vld [vmem:[#allocation8 + $0x370] sm:$0xff] }
  0xbd   : > { %671 = vmatprep.mubr.f32.mxu0 %v6698_v0  ;;  %925 = vmatpush1.msra.mxu1 %v768_v61  ;;  %v859_v44 = vld [vmem:[#allocation8 + $0x358] sm:$0xff]  ;;  %v856_v45 = vld [vmem:[#allocation8 + $0x340] sm:$0xff]  ;;  %v858_v46 = vld [vmem:[#allocation8 + $0x350] sm:$0xff] }
  0xbe   : > { %926 = vmatprep.subr.mxu1 %v765_v63  ;;  %1086 = vmatpush1.msra.mxu0 %v770_v1  ;;  %v853_v47 = vld [vmem:[#allocation8 + $0x328] sm:$0xff]  ;;  %v855_v49 = vld [vmem:[#allocation8 + $0x338] sm:$0xff]  ;;  %v852_v50 = vld [vmem:[#allocation8 + $0x320] sm:$0xff] }
  0xbf   : > { %1087 = vmatprep.subr.mxu0 %v767_v2  ;;  %927 = vmatpush1.msra.mxu1 %v764_v3  ;;  %v484_v48 = vld [vmem:[%s6955_s22 + $0x78] sm:$0xff]  ;;  %v854_v51 = vld [vmem:[#allocation8 + $0x330] sm:$0xff]  ;;  %v851_v53 = vld [vmem:[#allocation8 + $0x318] sm:$0xff]  ;;  %s6581_s22 = sshll.u32 %s6699_s20, 4  ;;  %s6582_s22 = int_to_ptr.vmem [resolvable:$false] %s6581_s22 }
  0xc0   : > { %5414 = vmatmul.mubr.msk.f32.gmra.mxu0 %vm503_vm1, %v477_v62  ;;  %928 = vmatprep.subr.mxu1 %v761_v5  ;;  %v849_v52 = vld [vmem:[#allocation8 + $0x308] sm:$0xff]  ;;  %v848_v54 = vld [vmem:[#allocation8 + $0x300] sm:$0xff]  ;;  %v850_v55 = vld [vmem:[#allocation8 + $0x310] sm:$0xff]  ;;  %s6583_s27 = scalar_lea.vmem %s6582_s22, 28672  ;;  %p6584_p7 = scmp.lt.s32.totalorder %s10141_s2, %s6582_s22 }
  0xc1   : > { %677 = vmatprep.mubr.f32.mxu0 %v6698_v0  ;;  %1088 = vmatpush1.msra.mxu0 %v766_v4  ;;  %v845_v56 = vld [vmem:[#allocation8 + $0x2e8] sm:$0xff]  ;;  %v844_v57 = vld [vmem:[#allocation8 + $0x2e0] sm:$0xff]  ;;  %v846_v58 = vld [vmem:[#allocation8 + $0x2f0] sm:$0xff]  ;;  %p6585_p4 = scmp.lt.s32.totalorder %s6583_s27, %s6577_s24 }
  0xc2   : > { %1089 = vmatprep.subr.mxu0 %v763_v7  ;;  %929 = vmatpush1.msra.mxu1 %v760_v8  ;;  %v841_v59 = vld [vmem:[#allocation8 + $0x2c8] sm:$0xff]  ;;  %v843_v60 = vld [vmem:[#allocation8 + $0x2d8] sm:$0xff]  ;;  %v840_v61 = vld [vmem:[#allocation8 + $0x2c0] sm:$0xff] }
  0xc3   : > { %1090 = vmatpush1.msra.mxu0 %v762_v9  ;;  %930 = vmatprep.subr.mxu1 %v757_v10  ;;  %v842_v62 = vld [vmem:[#allocation8 + $0x2d0] sm:$0xff]  ;;  %v837_v63 = vld [vmem:[#allocation8 + $0x2a8] sm:$0xff]  ;;  %v839_v1 = vld [vmem:[#allocation8 + $0x2b8] sm:$0xff]  ;;  %p6586_p13 = por %p6585_p4, %p6584_p7 }
  0xc4   : > { %5415 = vmatmul.mubr.msk.f32.gmra.mxu0 %vm503_vm1, %v478_v6  ;;  %1091 = vmatprep.subr.mxu0 %v759_v11  ;;  %v836_v2 = vld [vmem:[#allocation8 + $0x2a0] sm:$0xff]  ;;  %v838_v3 = vld [vmem:[#allocation8 + $0x2b0] sm:$0xff]  ;;  %v833_v4 = vld [vmem:[#allocation8 + $0x288] sm:$0xff] }
  0xc5   : > { %683 = vmatprep.mubr.f32.mxu0 %v6698_v0  ;;  %931 = vmatpush1.msra.mxu1 %v756_v12  ;;  %v835_v5 = vld [vmem:[#allocation8 + $0x298] sm:$0xff]  ;;  %v832_v6 = vld [vmem:[#allocation8 + $0x280] sm:$0xff]  ;;  %v834_v7 = vld [vmem:[#allocation8 + $0x290] sm:$0xff]  ;;  %p6587_p5 = pnand %p6586_p13, %p6580_p3 }
  0xc6   : > { %932 = vmatprep.subr.mxu1 %v753_v14  ;;  %1092 = vmatpush1.msra.mxu0 %v758_v15  ;;  %v829_v8 = vld [vmem:[#allocation8 + $0x268] sm:$0xff]  ;;  %v831_v9 = vld [vmem:[#allocation8 + $0x278] sm:$0xff]  ;;  %v828_v10 = vld [vmem:[#allocation8 + $0x260] sm:$0xff] }
  0xc7   : > { %1093 = vmatprep.subr.mxu0 %v755_v16  ;;  %933 = vmatpush1.msra.mxu1 %v752_v17  ;;  %v830_v11 = vld [vmem:[#allocation8 + $0x270] sm:$0xff]  ;;  %v825_v12 = vld [vmem:[#allocation8 + $0x248] sm:$0xff]  ;;  %v824_v14 = vld [vmem:[#allocation8 + $0x240] sm:$0xff] }
  0xc8   : > { %5416 = vmatmul.mubr.msk.f32.gmra.mxu0 %vm503_vm1, %v479_v13  ;;  %934 = vmatprep.subr.mxu1 %v877_v19  ;;  %v827_v13 = vld [vmem:[#allocation8 + $0x258] sm:$0xff]  ;;  %v826_v15 = vld [vmem:[#allocation8 + $0x250] sm:$0xff]  ;;  %v821_v16 = vld [vmem:[#allocation8 + $0x228] sm:$0xff] }
  0xc9   : > { %689 = vmatprep.mubr.f32.mxu0 %v6698_v0  ;;  %1094 = vmatpush1.msra.mxu0 %v754_v18  ;;  %v823_v17 = vld [vmem:[#allocation8 + $0x238] sm:$0xff]  ;;  %v820_v18 = vld [vmem:[#allocation8 + $0x220] sm:$0xff]  ;;  %v822_v19 = vld [vmem:[#allocation8 + $0x230] sm:$0xff] }
  0xca   : > { %1095 = vmatprep.subr.mxu0 %v879_v21  ;;  %935 = vmatpush2.msra.mxu1 %v876_v22  ;;  %v819_v21 = vld [vmem:[#allocation8 + $0x218] sm:$0xff]  ;;  %v816_v22 = vld [vmem:[#allocation8 + $0x200] sm:$0xff] }
  0xcb   : > { %1096 = vmatpush2.msra.mxu0 %v878_v23  ;;  %936 = vmatprep.subr.mxu1 %v873_v24  ;;  %v818_v23 = vld [vmem:[#allocation8 + $0x210] sm:$0xff] }
  0xcc   : > { %5417 = vmatmul.mubr.msk.f32.gmra.mxu0 %vm503_vm1, %v480_v20  ;;  %1097 = vmatprep.subr.mxu0 %v875_v25  ;;  %v817_v20 = vld [vmem:[#allocation8 + $0x208] sm:$0xff]  ;;  %v1394_v24 = vld [vmem:[#allocation11 + $0x350] sm:$0xff] }
  0xcd   : > { %695 = vmatprep.mubr.f32.mxu0 %v6698_v0  ;;  %937 = vmatpush2.msra.mxu1 %v872_v26  ;;  %v1618_v25 = vld [vmem:[#allocation11 + $0xa50] sm:$0xff]  ;;  %v10242_v26 = vlaneseq }
  0xce   : > { %938 = vmatprep.subr.mxu1 %v869_v28  ;;  %1098 = vmatpush2.msra.mxu0 %v874_v29  ;;  %v491_v29 = vld [vmem:[#allocation7] sm:$0x3] }
  0xcf   : > { %1099 = vmatprep.subr.mxu0 %v871_v30  ;;  %939 = vmatpush2.msra.mxu1 %v868_v31 }
  0xd0   : > { %5418 = vmatmul.mubr.msk.f32.gmra.mxu0 %vm503_vm1, %v481_v27  ;;  %940 = vmatprep.subr.mxu1 %v865_v33  ;;  %v7005_v27 = vshrl.u32 %v10242_v26, 7 }
  0xd1   : > { %701 = vmatprep.mubr.f32.mxu0 %v6698_v0  ;;  %1100 = vmatpush2.msra.mxu0 %v870_v32 }
  0xd2   : > { %1101 = vmatprep.subr.mxu0 %v867_v35  ;;  %941 = vmatpush2.msra.mxu1 %v864_v36  ;;  %10353 = vst [vmem:[#allocation23_spill] sm:$0xff] %v7005_v27  ;;  %v7008_v28 = vsub.s32 0, %v7005_v27  ;;  %v7011_v30 = vsub.s32 1, %v7005_v27 }
  0xd3   : > { %1102 = vmatpush2.msra.mxu0 %v866_v37  ;;  %942 = vmatprep.subr.mxu1 %v861_v38 }
  0xd4   : > { %5419 = vmatmul.mubr.msk.f32.gmra.mxu0 %vm503_vm1, %v482_v34  ;;  %1103 = vmatprep.subr.mxu0 %v863_v39  ;;  %10354 = vst [vmem:[#allocation24_spill] sm:$0xff] %v7008_v28  ;;  %10355 = vst [vmem:[#allocation25_spill] sm:$0xff] %v7011_v30  ;;  %v7014_v31 = vrot.slane %v491_v29, %v7008_v28  ;;  %v7017_v32 = vrot.slane %v491_v29, %v7011_v30 }
  0xd5   : > { %707 = vmatprep.mubr.f32.mxu0 %v6698_v0  ;;  %943 = vmatpush2.msra.mxu1 %v860_v40 }
  0xd6   : > { %944 = vmatprep.subr.mxu1 %v857_v42  ;;  %1104 = vmatpush2.msra.mxu0 %v862_v43  ;;  %v1393_v42 = vld [vmem:[#allocation11 + $0x348] sm:$0xff] }
  0xd7   : > { %1105 = vmatprep.subr.mxu0 %v859_v44  ;;  %945 = vmatpush2.msra.mxu1 %v856_v45  ;;  %v1617_v43 = vld [vmem:[#allocation11 + $0xa48] sm:$0xff]  ;;  %v1387_v45 = vld [vmem:[#allocation11 + $0x318] sm:$0xff] }
  0xd8   : > { %5420 = vmatmul.mubr.msk.f32.gmra.mxu0 %vm503_vm1, %v483_v41  ;;  %946 = vmatprep.subr.mxu1 %v853_v47 }
  0xd9   : > { %713 = vmatprep.mubr.f32.mxu0 %v6698_v0  ;;  %1106 = vmatpush2.msra.mxu0 %v858_v46  ;;  %v847_v0 = vld [vmem:[#allocation8 + $0x2f8] sm:$0xff] }
  0xda   : > { %1107 = vmatprep.subr.mxu0 %v855_v49  ;;  %947 = vmatpush2.msra.mxu1 %v852_v50  ;;  %v1611_v46 = vld [vmem:[#allocation11 + $0xa18] sm:$0xff] }
  0xdb   : > { %1108 = vmatpush2.msra.mxu0 %v854_v51  ;;  %948 = vmatprep.subr.mxu1 %v849_v52  ;;  %v1386_v52 = vld [vmem:[#allocation11 + $0x310] sm:$0xff] }
  0xdc   : > { %5421 = vmatmul.mubr.msk.f32.gmra.mxu0 %vm503_vm1, %v484_v48  ;;  %1109 = vmatprep.subr.mxu0 %v851_v53  ;;  %v1610_v53 = vld [vmem:[#allocation11 + $0xa10] sm:$0xff] }
  0xdd   : > { %949 = vmatpush2.msra.mxu1 %v848_v54  ;;  %1110 = vmatpush2.msra.mxu0 %v850_v55  ;;  %v1380_v55 = vld [vmem:[#allocation11 + $0x2e0] sm:$0xff] }
  0xde   : > { %950 = vmatprep.subr.mxu1 %v845_v56  ;;  %1111 = vmatprep.subr.mxu0 %v847_v0  ;;  %v1604_v56 = vld [vmem:[#allocation11 + $0x9e0] sm:$0xff] }
  0xdf   : > { %951 = vmatpush2.msra.mxu1 %v844_v57  ;;  %1112 = vmatpush2.msra.mxu0 %v846_v58 }
  0xe0   : > { %952 = vmatprep.subr.mxu1 %v841_v59  ;;  %1113 = vmatprep.subr.mxu0 %v843_v60 }
  0xe1   : > { %953 = vmatpush2.msra.mxu1 %v840_v61  ;;  %1114 = vmatpush2.msra.mxu0 %v842_v62  ;;  %v1379_v61 = vld [vmem:[#allocation11 + $0x2d8] sm:$0xff] }
  0xe2   : > { %954 = vmatprep.subr.mxu1 %v837_v63  ;;  %1115 = vmatprep.subr.mxu0 %v839_v1  ;;  %v1603_v62 = vld [vmem:[#allocation11 + $0x9d8] sm:$0xff]  ;;  %v1373_v1 = vld [vmem:[#allocation11 + $0x2a8] sm:$0xff] }
  0xe3   : > { %955 = vmatpush2.msra.mxu1 %v836_v2  ;;  %1116 = vmatpush2.msra.mxu0 %v838_v3  ;;  %v1597_v2 = vld [vmem:[#allocation11 + $0x9a8] sm:$0xff] }
  0xe4   : > { %956 = vmatprep.subr.mxu1 %v833_v4  ;;  %1117 = vmatprep.subr.mxu0 %v835_v5 }
  0xe5   : > { %957 = vmatpush2.msra.mxu1 %v832_v6  ;;  %1118 = vmatpush2.msra.mxu0 %v834_v7 }
  0xe6   : > { %958 = vmatprep.subr.mxu1 %v829_v8  ;;  %1119 = vmatprep.subr.mxu0 %v831_v9  ;;  %v1372_v8 = vld [vmem:[#allocation11 + $0x2a0] sm:$0xff] }
  0xe7   : > { %959 = vmatpush2.msra.mxu1 %v828_v10  ;;  %1120 = vmatpush2.msra.mxu0 %v830_v11  ;;  %v1596_v9 = vld [vmem:[#allocation11 + $0x9a0] sm:$0xff]  ;;  %v1366_v11 = vld [vmem:[#allocation11 + $0x270] sm:$0xff] }
  0xe8   : > { %960 = vmatprep.subr.mxu1 %v825_v12  ;;  %1121 = vmatprep.subr.mxu0 %v827_v13  ;;  %v1590_v12 = vld [vmem:[#allocation11 + $0x970] sm:$0xff] }
  0xe9   : > { %961 = vmatpush2.msra.mxu1 %v824_v14  ;;  %1122 = vmatpush2.msra.mxu0 %v826_v15 }
  0xea   : > { %962 = vmatprep.subr.mxu1 %v821_v16  ;;  %1123 = vmatprep.subr.mxu0 %v823_v17 }
  0xeb   : > { %963 = vmatpush2.msra.mxu1 %v820_v18  ;;  %1124 = vmatpush2.msra.mxu0 %v822_v19  ;;  %v1365_v18 = vld [vmem:[#allocation11 + $0x268] sm:$0xff] }
  0xec   : > { %964 = vmatprep.subr.mxu1 %v817_v20  ;;  %1125 = vmatprep.subr.mxu0 %v819_v21  ;;  %v1589_v19 = vld [vmem:[#allocation11 + $0x968] sm:$0xff]  ;;  %v1359_v21 = vld [vmem:[#allocation11 + $0x238] sm:$0xff] }
  0xed   : > { %965 = vmatpush2.msra.mxu1 %v816_v22  ;;  %1126 = vmatpush2.msra.mxu0 %v818_v23  ;;  %v1583_v22 = vld [vmem:[#allocation11 + $0x938] sm:$0xff] }
  0xee   : > { %1773 = vmatprep.subr.mxu1 %v1394_v24  ;;  %1934 = vmatprep.subr.mxu0 %v1618_v25 }
 0x160   : > { %v625_v33 = vpop.f32.mrf.mxu0 }
 0x161   : > { %v626_v34 = vadd.f32 %v625_v33, %v7014_v31 }
 0x162   : > { %v627_v35 = vpop.f32.mrf.mxu0 }
 0x163   : > { %v628_v36 = vadd.f32 %v627_v35, %v7017_v32  ;;  %v720_v39 = vmax.f32 %v626_v34, 0.0  ;;  %v1358_v34 = vld [vmem:[#allocation11 + $0x230] sm:$0xff] }
 0x164   : > { %v631_v37 = vpop.f32.mrf.mxu0  ;;  %v1582_v35 = vld [vmem:[#allocation11 + $0x930] sm:$0xff] }
 0x165   : > { %v721_v38 = vmax.f32 %v628_v36, 0.0  ;;  %v632_v40 = vadd.f32 %v631_v37, %v7014_v31  ;;  %v1352_v37 = vld [vmem:[#allocation11 + $0x200] sm:$0xff] }
 0x166   : > { %v633_v41 = vpop.f32.mrf.mxu0 }
 0x167   : > { %v634_v44 = vadd.f32 %v633_v41, %v7017_v32  ;;  %966 = vmatprep.mubr.f32.mxu1 %v721_v38  ;;  %1127 = vmatprep.mubr.f32.mxu0 %v721_v38  ;;  %v722_v49 = vmax.f32 %v632_v40, 0.0  ;;  %v1576_v38 = vld [vmem:[#allocation11 + $0x900] sm:$0xff] }
 0x168   : > { %v637_v47 = vpop.f32.mrf.mxu0  ;;  %967 = vmatmul.mubr.f32.vlgmr.msra.gmra.mxu1 %v720_v39  ;;  %1128 = vmatmul.mubr.f32.vlgmr.msra.gmra.mxu0 %v720_v39 }
 0x169   : > { %v723_v48 = vmax.f32 %v634_v44, 0.0  ;;  %1774 = vmatpush1.msra.mxu1 %v1393_v42  ;;  %1935 = vmatpush1.msra.mxu0 %v1617_v43  ;;  %v638_v50 = vadd.f32 %v637_v47, %v7014_v31  ;;  %v1351_v44 = vld [vmem:[#allocation11 + $0x1f8] sm:$0xff]  ;;  %v1345_v47 = vld [vmem:[#allocation11 + $0x1c8] sm:$0xff] }
 0x16a   : > { %v639_v51 = vpop.f32.mrf.mxu0  ;;  %1775 = vmatprep.subr.mxu1 %v1387_v45  ;;  %1936 = vmatprep.subr.mxu0 %v1611_v46  ;;  %v1575_v45 = vld [vmem:[#allocation11 + $0x8f8] sm:$0xff] }
 0x16b   : > { %v640_v54 = vadd.f32 %v639_v51, %v7017_v32  ;;  %972 = vmatprep.mubr.f32.mxu1 %v723_v48  ;;  %1133 = vmatprep.mubr.f32.mxu0 %v723_v48  ;;  %v724_v58 = vmax.f32 %v638_v50, 0.0  ;;  %v1569_v48 = vld [vmem:[#allocation11 + $0x8c8] sm:$0xff] }
 0x16c   : > { %v643_v0 = vpop.f32.mrf.mxu0  ;;  %973 = vmatmul.mubr.f32.gmra.mxu1 %v722_v49  ;;  %1134 = vmatmul.mubr.f32.gmra.mxu0 %v722_v49 }
 0x16d   : > { %v725_v57 = vmax.f32 %v640_v54, 0.0  ;;  %1776 = vmatpush1.msra.mxu1 %v1386_v52  ;;  %1937 = vmatpush1.msra.mxu0 %v1610_v53  ;;  %v644_v59 = vadd.f32 %v643_v0, %v7014_v31  ;;  %v1344_v54 = vld [vmem:[#allocation11 + $0x1c0] sm:$0xff]  ;;  %v1338_v0 = vld [vmem:[#allocation11 + $0x190] sm:$0xff] }
 0x16e   : > { %v645_v60 = vpop.f32.mrf.mxu0  ;;  %1777 = vmatprep.subr.mxu1 %v1380_v55  ;;  %1938 = vmatprep.subr.mxu0 %v1604_v56  ;;  %v1568_v55 = vld [vmem:[#allocation11 + $0x8c0] sm:$0xff] }
 0x16f   : > { %v646_v63 = vadd.f32 %v645_v60, %v7017_v32  ;;  %978 = vmatprep.mubr.f32.mxu1 %v725_v57  ;;  %1139 = vmatprep.mubr.f32.mxu0 %v725_v57  ;;  %v726_v5 = vmax.f32 %v644_v59, 0.0  ;;  %v1562_v57 = vld [vmem:[#allocation11 + $0x890] sm:$0xff] }
 0x170   : > { %v649_v3 = vpop.f32.mrf.mxu0  ;;  %979 = vmatmul.mubr.f32.gmra.mxu1 %v724_v58  ;;  %1140 = vmatmul.mubr.f32.gmra.mxu0 %v724_v58 }
 0x171   : > { %v727_v4 = vmax.f32 %v646_v63, 0.0  ;;  %1778 = vmatpush1.msra.mxu1 %v1379_v61  ;;  %1939 = vmatpush1.msra.mxu0 %v1603_v62  ;;  %v650_v6 = vadd.f32 %v649_v3, %v7014_v31  ;;  %v1337_v63 = vld [vmem:[#allocation11 + $0x188] sm:$0xff]  ;;  %v1331_v3 = vld [vmem:[#allocation11 + $0x158] sm:$0xff] }
 0x172   : > { %v651_v7 = vpop.f32.mrf.mxu0  ;;  %1779 = vmatprep.subr.mxu1 %v1373_v1  ;;  %1940 = vmatprep.subr.mxu0 %v1597_v2  ;;  %v1561_v1 = vld [vmem:[#allocation11 + $0x888] sm:$0xff] }
 0x173   : > { %v652_v10 = vadd.f32 %v651_v7, %v7017_v32  ;;  %984 = vmatprep.mubr.f32.mxu1 %v727_v4  ;;  %1145 = vmatprep.mubr.f32.mxu0 %v727_v4  ;;  %v728_v15 = vmax.f32 %v650_v6, 0.0  ;;  %v1555_v4 = vld [vmem:[#allocation11 + $0x858] sm:$0xff] }
 0x174   : > { %v655_v13 = vpop.f32.mrf.mxu0  ;;  %985 = vmatmul.mubr.f32.gmra.mxu1 %v726_v5  ;;  %1146 = vmatmul.mubr.f32.gmra.mxu0 %v726_v5 }
 0x175   : > { %v729_v14 = vmax.f32 %v652_v10, 0.0  ;;  %1780 = vmatpush1.msra.mxu1 %v1372_v8  ;;  %1941 = vmatpush1.msra.mxu0 %v1596_v9  ;;  %v656_v16 = vadd.f32 %v655_v13, %v7014_v31  ;;  %v1330_v10 = vld [vmem:[#allocation11 + $0x150] sm:$0xff]  ;;  %v1324_v13 = vld [vmem:[#allocation11 + $0x120] sm:$0xff] }
 0x176   : > { %v657_v17 = vpop.f32.mrf.mxu0  ;;  %1781 = vmatprep.subr.mxu1 %v1366_v11  ;;  %1942 = vmatprep.subr.mxu0 %v1590_v12  ;;  %v1554_v11 = vld [vmem:[#allocation11 + $0x850] sm:$0xff] }
 0x177   : > { %v658_v20 = vadd.f32 %v657_v17, %v7017_v32  ;;  %990 = vmatprep.mubr.f32.mxu1 %v729_v14  ;;  %1151 = vmatprep.mubr.f32.mxu0 %v729_v14  ;;  %v730_v25 = vmax.f32 %v656_v16, 0.0  ;;  %v1548_v14 = vld [vmem:[#allocation11 + $0x820] sm:$0xff] }
 0x178   : > { %v661_v23 = vpop.f32.mrf.mxu0  ;;  %991 = vmatmul.mubr.f32.gmra.mxu1 %v728_v15  ;;  %1152 = vmatmul.mubr.f32.gmra.mxu0 %v728_v15 }
 0x179   : > { %v731_v24 = vmax.f32 %v658_v20, 0.0  ;;  %1782 = vmatpush1.msra.mxu1 %v1365_v18  ;;  %1943 = vmatpush1.msra.mxu0 %v1589_v19  ;;  %v662_v29 = vadd.f32 %v661_v23, %v7014_v31  ;;  %v1323_v20 = vld [vmem:[#allocation11 + $0x118] sm:$0xff]  ;;  %v1317_v23 = vld [vmem:[#allocation11 + $0xe8] sm:$0xff] }
 0x17a   : > { %v663_v33 = vpop.f32.mrf.mxu0  ;;  %1783 = vmatprep.subr.mxu1 %v1359_v21  ;;  %1944 = vmatprep.subr.mxu0 %v1583_v22  ;;  %v1547_v21 = vld [vmem:[#allocation11 + $0x818] sm:$0xff] }
 0x17b   : > { %v664_v36 = vadd.f32 %v663_v33, %v7017_v32  ;;  %996 = vmatprep.mubr.f32.mxu1 %v731_v24  ;;  %1157 = vmatprep.mubr.f32.mxu0 %v731_v24  ;;  %v732_v41 = vmax.f32 %v662_v29, 0.0  ;;  %v1541_v24 = vld [vmem:[#allocation11 + $0x7e8] sm:$0xff] }
 0x17c   : > { %v667_v39 = vpop.f32.mrf.mxu0  ;;  %997 = vmatmul.mubr.f32.gmra.mxu1 %v730_v25  ;;  %1158 = vmatmul.mubr.f32.gmra.mxu0 %v730_v25 }
 0x17d   : > { %v733_v40 = vmax.f32 %v664_v36, 0.0  ;;  %1784 = vmatpush1.msra.mxu1 %v1358_v34  ;;  %1945 = vmatpush1.msra.mxu0 %v1582_v35  ;;  %v668_v42 = vadd.f32 %v667_v39, %v7014_v31  ;;  %v1316_v36 = vld [vmem:[#allocation11 + $0xe0] sm:$0xff]  ;;  %v1310_v39 = vld [vmem:[#allocation11 + $0xb0] sm:$0xff] }
 0x17e   : > { %v669_v43 = vpop.f32.mrf.mxu0  ;;  %1785 = vmatprep.subr.mxu1 %v1352_v37  ;;  %1946 = vmatprep.subr.mxu0 %v1576_v38  ;;  %v1540_v37 = vld [vmem:[#allocation11 + $0x7e0] sm:$0xff] }
 0x17f   : > { %v670_v46 = vadd.f32 %v669_v43, %v7017_v32  ;;  %1002 = vmatprep.mubr.f32.mxu1 %v733_v40  ;;  %1163 = vmatprep.mubr.f32.mxu0 %v733_v40  ;;  %v734_v51 = vmax.f32 %v668_v42, 0.0  ;;  %v1534_v40 = vld [vmem:[#allocation11 + $0x7b0] sm:$0xff] }
 0x180   : > { %v673_v49 = vpop.f32.mrf.mxu0  ;;  %1003 = vmatmul.mubr.f32.gmra.mxu1 %v732_v41  ;;  %1164 = vmatmul.mubr.f32.gmra.mxu0 %v732_v41 }
 0x181   : > { %v735_v50 = vmax.f32 %v670_v46, 0.0  ;;  %1786 = vmatpush1.msra.mxu1 %v1351_v44  ;;  %1947 = vmatpush1.msra.mxu0 %v1575_v45  ;;  %v674_v52 = vadd.f32 %v673_v49, %v7014_v31  ;;  %v1309_v46 = vld [vmem:[#allocation11 + $0xa8] sm:$0xff]  ;;  %v1303_v49 = vld [vmem:[#allocation11 + $0x78] sm:$0xff] }
 0x182   : > { %v675_v53 = vpop.f32.mrf.mxu0  ;;  %1787 = vmatprep.subr.mxu1 %v1345_v47  ;;  %1948 = vmatprep.subr.mxu0 %v1569_v48  ;;  %v1533_v47 = vld [vmem:[#allocation11 + $0x7a8] sm:$0xff] }
 0x183   : > { %v676_v56 = vadd.f32 %v675_v53, %v7017_v32  ;;  %1008 = vmatprep.mubr.f32.mxu1 %v735_v50  ;;  %1169 = vmatprep.mubr.f32.mxu0 %v735_v50  ;;  %v736_v60 = vmax.f32 %v674_v52, 0.0  ;;  %v1527_v50 = vld [vmem:[#allocation11 + $0x778] sm:$0xff] }
 0x184   : > { %v679_v58 = vpop.f32.mrf.mxu0  ;;  %1009 = vmatmul.mubr.f32.gmra.mxu1 %v734_v51  ;;  %1170 = vmatmul.mubr.f32.gmra.mxu0 %v734_v51 }
 0x185   : > { %v737_v59 = vmax.f32 %v676_v56, 0.0  ;;  %1788 = vmatpush1.msra.mxu1 %v1344_v54  ;;  %1949 = vmatpush1.msra.mxu0 %v1568_v55  ;;  %v680_v61 = vadd.f32 %v679_v58, %v7014_v31  ;;  %v1302_v56 = vld [vmem:[#allocation11 + $0x70] sm:$0xff]  ;;  %v1296_v58 = vld [vmem:[#allocation11 + $0x40] sm:$0xff] }
 0x186   : > { %v681_v62 = vpop.f32.mrf.mxu0  ;;  %1789 = vmatprep.subr.mxu1 %v1338_v0  ;;  %1950 = vmatprep.subr.mxu0 %v1562_v57  ;;  %v1526_v0 = vld [vmem:[#allocation11 + $0x770] sm:$0xff] }
 0x187   : > { %v682_v2 = vadd.f32 %v681_v62, %v7017_v32  ;;  %1014 = vmatprep.mubr.f32.mxu1 %v737_v59  ;;  %1175 = vmatprep.mubr.f32.mxu0 %v737_v59  ;;  %v738_v7 = vmax.f32 %v680_v61, 0.0  ;;  %v1520_v59 = vld [vmem:[#allocation11 + $0x740] sm:$0xff] }
 0x188   : > { %v685_v5 = vpop.f32.mrf.mxu0  ;;  %1015 = vmatmul.mubr.f32.gmra.mxu1 %v736_v60  ;;  %1176 = vmatmul.mubr.f32.gmra.mxu0 %v736_v60 }
 0x189   : > { %v739_v6 = vmax.f32 %v682_v2, 0.0  ;;  %1790 = vmatpush1.msra.mxu1 %v1337_v63  ;;  %1951 = vmatpush1.msra.mxu0 %v1561_v1  ;;  %v686_v8 = vadd.f32 %v685_v5, %v7014_v31  ;;  %v1295_v2 = vld [vmem:[#allocation11 + $0x38] sm:$0xff]  ;;  %v1289_v5 = vld [vmem:[#allocation11 + $0x8] sm:$0xff] }
 0x18a   : > { %v687_v9 = vpop.f32.mrf.mxu0  ;;  %1791 = vmatprep.subr.mxu1 %v1331_v3  ;;  %1952 = vmatprep.subr.mxu0 %v1555_v4  ;;  %v1519_v3 = vld [vmem:[#allocation11 + $0x738] sm:$0xff] }
 0x18b   : > { %v688_v12 = vadd.f32 %v687_v9, %v7017_v32  ;;  %1020 = vmatprep.mubr.f32.mxu1 %v739_v6  ;;  %1181 = vmatprep.mubr.f32.mxu0 %v739_v6  ;;  %v740_v17 = vmax.f32 %v686_v8, 0.0  ;;  %v1513_v6 = vld [vmem:[#allocation11 + $0x708] sm:$0xff]  ;;  %v1288_v9 = vld [vmem:[#allocation11] sm:$0xff] }
 0x18c   : > { %v691_v15 = vpop.f32.mrf.mxu0  ;;  %1021 = vmatmul.mubr.f32.gmra.mxu1 %v738_v7  ;;  %1182 = vmatmul.mubr.f32.gmra.mxu0 %v738_v7 }
 0x18d   : > { %v741_v16 = vmax.f32 %v688_v12, 0.0  ;;  %1792 = vmatpush1.msra.mxu1 %v1330_v10  ;;  %1953 = vmatpush1.msra.mxu0 %v1554_v11  ;;  %v692_v18 = vadd.f32 %v691_v15, %v7014_v31  ;;  %v1506_v10 = vld [vmem:[#allocation11 + $0x6d0] sm:$0xff]  ;;  %v1729_v12 = vld [vmem:[#allocation11 + $0xdc8] sm:$0xff] }
 0x18e   : > { %v693_v19 = vpop.f32.mrf.mxu0  ;;  %1793 = vmatprep.subr.mxu1 %v1324_v13  ;;  %1954 = vmatprep.subr.mxu0 %v1548_v14  ;;  %v1730_v11 = vld [vmem:[#allocation11 + $0xdd0] sm:$0xff]  ;;  %v1499_v13 = vld [vmem:[#allocation11 + $0x698] sm:$0xff] }
 0x18f   : > { %v694_v22 = vadd.f32 %v693_v19, %v7017_v32  ;;  %1026 = vmatprep.mubr.f32.mxu1 %v741_v16  ;;  %1187 = vmatprep.mubr.f32.mxu0 %v741_v16  ;;  %v742_v33 = vmax.f32 %v692_v18, 0.0  ;;  %v1723_v14 = vld [vmem:[#allocation11 + $0xd98] sm:$0xff]  ;;  %v1498_v15 = vld [vmem:[#allocation11 + $0x690] sm:$0xff]  ;;  %v1716_v18 = vld [vmem:[#allocation11 + $0xd60] sm:$0xff] }
 0x190   : > { %v697_v25 = vpop.f32.mrf.mxu0  ;;  %1027 = vmatmul.mubr.f32.gmra.mxu1 %v740_v17  ;;  %1188 = vmatmul.mubr.f32.gmra.mxu0 %v740_v17  ;;  %v1722_v16 = vld [vmem:[#allocation11 + $0xd90] sm:$0xff]  ;;  %v1492_v17 = vld [vmem:[#allocation11 + $0x660] sm:$0xff]  ;;  %v1491_v19 = vld [vmem:[#allocation11 + $0x658] sm:$0xff] }
 0x191   : > { %v743_v29 = vmax.f32 %v694_v22, 0.0  ;;  %1794 = vmatpush1.msra.mxu1 %v1323_v20  ;;  %1955 = vmatpush1.msra.mxu0 %v1547_v21  ;;  %v698_v34 = vadd.f32 %v697_v25, %v7014_v31  ;;  %v1715_v20 = vld [vmem:[#allocation11 + $0xd58] sm:$0xff]  ;;  %v1485_v21 = vld [vmem:[#allocation11 + $0x628] sm:$0xff]  ;;  %v1478_v25 = vld [vmem:[#allocation11 + $0x5f0] sm:$0xff] }
 0x192   : > { %v699_v35 = vpop.f32.mrf.mxu0  ;;  %1795 = vmatprep.subr.mxu1 %v1317_v23  ;;  %1956 = vmatprep.subr.mxu0 %v1541_v24  ;;  %v1709_v22 = vld [vmem:[#allocation11 + $0xd28] sm:$0xff]  ;;  %v1484_v23 = vld [vmem:[#allocation11 + $0x620] sm:$0xff] }
 0x193   : > { %v700_v38 = vadd.f32 %v699_v35, %v7017_v32  ;;  %1032 = vmatprep.mubr.f32.mxu1 %v743_v29  ;;  %1193 = vmatprep.mubr.f32.mxu0 %v743_v29  ;;  %v744_v43 = vmax.f32 %v698_v34, 0.0  ;;  %v1708_v24 = vld [vmem:[#allocation11 + $0xd20] sm:$0xff]  ;;  %v1702_v29 = vld [vmem:[#allocation11 + $0xcf0] sm:$0xff]  ;;  %v1701_v34 = vld [vmem:[#allocation11 + $0xce8] sm:$0xff] }
 0x194   : > { %v703_v41 = vpop.f32.mrf.mxu0  ;;  %1033 = vmatmul.mubr.f32.gmra.mxu1 %v742_v33  ;;  %1194 = vmatmul.mubr.f32.gmra.mxu0 %v742_v33  ;;  %v1477_v33 = vld [vmem:[#allocation11 + $0x5e8] sm:$0xff]  ;;  %v1471_v35 = vld [vmem:[#allocation11 + $0x5b8] sm:$0xff] }
 0x195   : > { %v745_v42 = vmax.f32 %v700_v38, 0.0  ;;  %1796 = vmatpush1.msra.mxu1 %v1316_v36  ;;  %1957 = vmatpush1.msra.mxu0 %v1540_v37  ;;  %v704_v44 = vadd.f32 %v703_v41, %v7014_v31  ;;  %v1695_v36 = vld [vmem:[#allocation11 + $0xcb8] sm:$0xff]  ;;  %v1470_v37 = vld [vmem:[#allocation11 + $0x5b0] sm:$0xff] }
 0x196   : > { %v705_v45 = vpop.f32.mrf.mxu0  ;;  %1797 = vmatprep.subr.mxu1 %v1310_v39  ;;  %1958 = vmatprep.subr.mxu0 %v1534_v40  ;;  %v1694_v38 = vld [vmem:[#allocation11 + $0xcb0] sm:$0xff]  ;;  %v1464_v39 = vld [vmem:[#allocation11 + $0x580] sm:$0xff]  ;;  %v1463_v41 = vld [vmem:[#allocation11 + $0x578] sm:$0xff] }
 0x197   : > { %v706_v48 = vadd.f32 %v705_v45, %v7017_v32  ;;  %1038 = vmatprep.mubr.f32.mxu1 %v745_v42  ;;  %1199 = vmatprep.mubr.f32.mxu0 %v745_v42  ;;  %v746_v53 = vmax.f32 %v704_v44, 0.0  ;;  %v1688_v40 = vld [vmem:[#allocation11 + $0xc80] sm:$0xff]  ;;  %v1687_v42 = vld [vmem:[#allocation11 + $0xc78] sm:$0xff]  ;;  %v1681_v44 = vld [vmem:[#allocation11 + $0xc48] sm:$0xff] }
 0x198   : > { %v709_v51 = vpop.f32.mrf.mxu0  ;;  %1039 = vmatmul.mubr.f32.gmra.mxu1 %v744_v43  ;;  %1200 = vmatmul.mubr.f32.gmra.mxu0 %v744_v43  ;;  %v1457_v43 = vld [vmem:[#allocation11 + $0x548] sm:$0xff]  ;;  %v1456_v45 = vld [vmem:[#allocation11 + $0x540] sm:$0xff] }
 0x199   : > { %v747_v52 = vmax.f32 %v706_v48, 0.0  ;;  %1798 = vmatpush1.msra.mxu1 %v1309_v46  ;;  %1959 = vmatpush1.msra.mxu0 %v1533_v47  ;;  %v710_v54 = vadd.f32 %v709_v51, %v7014_v31  ;;  %v1680_v46 = vld [vmem:[#allocation11 + $0xc40] sm:$0xff]  ;;  %v1450_v47 = vld [vmem:[#allocation11 + $0x510] sm:$0xff]  ;;  %v1443_v51 = vld [vmem:[#allocation11 + $0x4d8] sm:$0xff] }
 0x19a   : > { %v711_v55 = vpop.f32.mrf.mxu0  ;;  %1799 = vmatprep.subr.mxu1 %v1303_v49  ;;  %1960 = vmatprep.subr.mxu0 %v1527_v50  ;;  %v1674_v48 = vld [vmem:[#allocation11 + $0xc10] sm:$0xff]  ;;  %v1449_v49 = vld [vmem:[#allocation11 + $0x508] sm:$0xff] }
 0x19b   : > { %v712_v57 = vadd.f32 %v711_v55, %v7017_v32  ;;  %1044 = vmatprep.mubr.f32.mxu1 %v747_v52  ;;  %1205 = vmatprep.mubr.f32.mxu0 %v747_v52  ;;  %v748_v62 = vmax.f32 %v710_v54, 0.0  ;;  %v1673_v50 = vld [vmem:[#allocation11 + $0xc08] sm:$0xff]  ;;  %v1667_v52 = vld [vmem:[#allocation11 + $0xbd8] sm:$0xff]  ;;  %v1666_v54 = vld [vmem:[#allocation11 + $0xbd0] sm:$0xff] }
 0x19c   : > { %v715_v60 = vpop.f32.mrf.mxu0  ;;  %1045 = vmatmul.mubr.f32.gmra.mxu1 %v746_v53  ;;  %1206 = vmatmul.mubr.f32.gmra.mxu0 %v746_v53  ;;  %v1442_v53 = vld [vmem:[#allocation11 + $0x4d0] sm:$0xff]  ;;  %v1436_v55 = vld [vmem:[#allocation11 + $0x4a0] sm:$0xff] }
 0x19d   : > { %v749_v61 = vmax.f32 %v712_v57, 0.0  ;;  %1800 = vmatpush1.msra.mxu1 %v1302_v56  ;;  %1961 = vmatpush1.msra.mxu0 %v1526_v0  ;;  %v716_v63 = vadd.f32 %v715_v60, %v7014_v31  ;;  %v1512_v31 = vld [vmem:[#allocation11 + $0x700] sm:$0xff]  ;;  %v1435_v0 = vld [vmem:[#allocation11 + $0x498] sm:$0xff] }
 0x19e   : > { %v717_v1 = vpop.f32.mrf.mxu0  ;;  %1801 = vmatprep.subr.mxu1 %v1296_v58  ;;  %1962 = vmatprep.subr.mxu0 %v1520_v59  ;;  %v1660_v56 = vld [vmem:[#allocation11 + $0xba0] sm:$0xff]  ;;  %v1659_v57 = vld [vmem:[#allocation11 + $0xb98] sm:$0xff]  ;;  %v1429_v58 = vld [vmem:[#allocation11 + $0x468] sm:$0xff] }
 0x19f   : > { %v718_v4 = vadd.f32 %v717_v1, %v7017_v32  ;;  %1050 = vmatprep.mubr.f32.mxu1 %v749_v61  ;;  %1211 = vmatprep.mubr.f32.mxu0 %v749_v61  ;;  %v750_v8 = vmax.f32 %v716_v63, 0.0  ;;  %v1505_v32 = vld [vmem:[#allocation11 + $0x6c8] sm:$0xff]  ;;  %v1428_v60 = vld [vmem:[#allocation11 + $0x460] sm:$0xff]  ;;  %v1646_v63 = vld [vmem:[#allocation11 + $0xb30] sm:$0xff] }
 0x1a0   : > { %1051 = vmatmul.mubr.f32.gmra.mxu1 %v748_v62  ;;  %1212 = vmatmul.mubr.f32.gmra.mxu0 %v748_v62  ;;  %v1653_v59 = vld [vmem:[#allocation11 + $0xb68] sm:$0xff]  ;;  %v1652_v61 = vld [vmem:[#allocation11 + $0xb60] sm:$0xff]  ;;  %v1422_v62 = vld [vmem:[#allocation11 + $0x430] sm:$0xff] }
 0x1a1   : > { %v751_v7 = vmax.f32 %v718_v4, 0.0  ;;  %1802 = vmatpush1.msra.mxu1 %v1295_v2  ;;  %1963 = vmatpush1.msra.mxu0 %v1519_v3  ;;  %v1421_v1 = vld [vmem:[#allocation11 + $0x428] sm:$0xff]  ;;  %v1415_v3 = vld [vmem:[#allocation11 + $0x3f8] sm:$0xff] }
 0x1a2   : > { %1803 = vmatprep.subr.mxu1 %v1289_v5  ;;  %1964 = vmatprep.subr.mxu0 %v1513_v6  ;;  %v1645_v2 = vld [vmem:[#allocation11 + $0xb28] sm:$0xff]  ;;  %v1639_v4 = vld [vmem:[#allocation11 + $0xaf8] sm:$0xff]  ;;  %v1414_v5 = vld [vmem:[#allocation11 + $0x3f0] sm:$0xff] }
 0x1a3   : > { %1056 = vmatprep.mubr.f32.mxu1 %v751_v7  ;;  %1217 = vmatprep.mubr.f32.mxu0 %v751_v7  ;;  %v1638_v6 = vld [vmem:[#allocation11 + $0xaf0] sm:$0xff]  ;;  %v1408_v7 = vld [vmem:[#allocation11 + $0x3c0] sm:$0xff] }
 0x1a4   : > { %1057 = vmatmul.mubr.f32.gmra.mxu1 %v750_v8  ;;  %1218 = vmatmul.mubr.f32.gmra.mxu0 %v750_v8  ;;  %v1632_v8 = vld [vmem:[#allocation11 + $0xac0] sm:$0xff] }
 0x1a5   : > { %1804 = vmatpush1.msra.mxu1 %v1288_v9  ;;  %1965 = vmatpush1.msra.mxu0 %v1512_v31  ;;  %v1407_v9 = vld [vmem:[#allocation11 + $0x3b8] sm:$0xff] }
 0x1a6   : > { %1805 = vmatprep.subr.mxu1 %v1506_v10  ;;  %1966 = vmatprep.subr.mxu0 %v1730_v11  ;;  %v1631_v31 = vld [vmem:[#allocation11 + $0xab8] sm:$0xff]  ;;  %v1401_v10 = vld [vmem:[#allocation11 + $0x388] sm:$0xff] }
 0x1a7   : > { %1806 = vmatpush2.msra.mxu1 %v1505_v32  ;;  %1967 = vmatpush2.msra.mxu0 %v1729_v12  ;;  %v1625_v11 = vld [vmem:[#allocation11 + $0xa88] sm:$0xff]  ;;  %v1400_v32 = vld [vmem:[#allocation11 + $0x380] sm:$0xff] }
 0x1a8   : > { %1807 = vmatprep.subr.mxu1 %v1499_v13  ;;  %1968 = vmatprep.subr.mxu0 %v1723_v14  ;;  %v1624_v12 = vld [vmem:[#allocation11 + $0xa80] sm:$0xff] }
 0x1a9   : > { %1808 = vmatpush2.msra.mxu1 %v1498_v15  ;;  %1969 = vmatpush2.msra.mxu0 %v1722_v16  ;;  %v1396_v13 = vld [vmem:[#allocation11 + $0x360] sm:$0xff]  ;;  %v10244_v15 = vsub.s32 2, %v7005_v27  ;;  %v880_v16 = vld [vmem:[#allocation10] sm:$0xf] }
 0x1aa   : > { %1809 = vmatprep.subr.mxu1 %v1492_v17  ;;  %1970 = vmatprep.subr.mxu0 %v1716_v18  ;;  %v1620_v14 = vld [vmem:[#allocation11 + $0xa60] sm:$0xff]  ;;  %v10243_v17 = vsub.s32 3, %v7005_v27  ;;  %v7054_v18 = vrot.slane %v880_v16, %v7008_v28  ;;  %v1514_v27 = vld [vmem:[#allocation11 + $0x710] sm:$0xff] }
 0x1ab   : > { %1810 = vmatpush2.msra.mxu1 %v1491_v19  ;;  %1971 = vmatpush2.msra.mxu0 %v1715_v20  ;;  %v7058_v19 = vrot.slane %v880_v16, %v10244_v15  ;;  %v7061_v20 = vrot.slane %v880_v16, %v7011_v30  ;;  %v1515_v15 = vld [vmem:[#allocation11 + $0x718] sm:$0xff] }
 0x1ac   : > { %1811 = vmatprep.subr.mxu1 %v1485_v21  ;;  %1972 = vmatprep.subr.mxu0 %v1709_v22  ;;  %v7065_v21 = vrot.slane %v880_v16, %v10243_v17 }
 0x1ad   : > { %1812 = vmatpush2.msra.mxu1 %v1484_v23  ;;  %1973 = vmatpush2.msra.mxu0 %v1708_v24 }
 0x1ae   : > { %1813 = vmatprep.subr.mxu1 %v1478_v25  ;;  %1974 = vmatprep.subr.mxu0 %v1702_v29 }
 0x1af   : > { %1814 = vmatpush2.msra.mxu1 %v1477_v33  ;;  %1975 = vmatpush2.msra.mxu0 %v1701_v34 }
 0x1b0   : > { %1815 = vmatprep.subr.mxu1 %v1471_v35  ;;  %1976 = vmatprep.subr.mxu0 %v1695_v36 }
 0x1b1   : > { %1816 = vmatpush2.msra.mxu1 %v1470_v37  ;;  %1977 = vmatpush2.msra.mxu0 %v1694_v38 }
 0x1b2   : > { %1817 = vmatprep.subr.mxu1 %v1464_v39  ;;  %1978 = vmatprep.subr.mxu0 %v1688_v40 }
 0x1b3   : > { %1818 = vmatpush2.msra.mxu1 %v1463_v41  ;;  %1979 = vmatpush2.msra.mxu0 %v1687_v42 }
 0x1b4   : > { %1819 = vmatprep.subr.mxu1 %v1457_v43  ;;  %1980 = vmatprep.subr.mxu0 %v1681_v44  ;;  %v1395_v44 = vld [vmem:[#allocation11 + $0x358] sm:$0xff] }
 0x1b5   : > { %1820 = vmatpush2.msra.mxu1 %v1456_v45  ;;  %1981 = vmatpush2.msra.mxu0 %v1680_v46  ;;  %v1619_v45 = vld [vmem:[#allocation11 + $0xa58] sm:$0xff] }
 0x1b6   : > { %1821 = vmatprep.subr.mxu1 %v1450_v47  ;;  %1982 = vmatprep.subr.mxu0 %v1674_v48 }
 0x1b7   : > { %1822 = vmatpush2.msra.mxu1 %v1449_v49  ;;  %1983 = vmatpush2.msra.mxu0 %v1673_v50  ;;  %v1389_v49 = vld [vmem:[#allocation11 + $0x328] sm:$0xff] }
 0x1b8   : > { %1823 = vmatprep.subr.mxu1 %v1443_v51  ;;  %1984 = vmatprep.subr.mxu0 %v1667_v52  ;;  %v1613_v50 = vld [vmem:[#allocation11 + $0xa28] sm:$0xff] }
 0x1b9   : > { %1824 = vmatpush2.msra.mxu1 %v1442_v53  ;;  %1985 = vmatpush2.msra.mxu0 %v1666_v54  ;;  %v1388_v54 = vld [vmem:[#allocation11 + $0x320] sm:$0xff] }
 0x1ba   : > { %1825 = vmatprep.subr.mxu1 %v1436_v55  ;;  %1986 = vmatprep.subr.mxu0 %v1660_v56 }
 0x1bb   : > { %1826 = vmatpush2.msra.mxu1 %v1435_v0  ;;  %1987 = vmatpush2.msra.mxu0 %v1659_v57  ;;  %v1382_v0 = vld [vmem:[#allocation11 + $0x2f0] sm:$0xff] }
 0x1bc   : > { %1827 = vmatprep.subr.mxu1 %v1429_v58  ;;  %1988 = vmatprep.subr.mxu0 %v1653_v59  ;;  %v1612_v59 = vld [vmem:[#allocation11 + $0xa20] sm:$0xff] }
 0x1bd   : > { %1828 = vmatpush2.msra.mxu1 %v1428_v60  ;;  %1989 = vmatpush2.msra.mxu0 %v1652_v61 }
 0x1be   : > { %1829 = vmatprep.subr.mxu1 %v1422_v62  ;;  %1990 = vmatprep.subr.mxu0 %v1646_v63  ;;  %v1381_v63 = vld [vmem:[#allocation11 + $0x2e8] sm:$0xff] }
 0x1bf   : > { %1830 = vmatpush2.msra.mxu1 %v1421_v1  ;;  %1991 = vmatpush2.msra.mxu0 %v1645_v2 }
 0x1c0   : > { %1831 = vmatprep.subr.mxu1 %v1415_v3  ;;  %1992 = vmatprep.subr.mxu0 %v1639_v4  ;;  %v1606_v4 = vld [vmem:[#allocation11 + $0x9f0] sm:$0xff] }
 0x1c1   : > { %1832 = vmatpush2.msra.mxu1 %v1414_v5  ;;  %1993 = vmatpush2.msra.mxu0 %v1638_v6  ;;  %v1375_v5 = vld [vmem:[#allocation11 + $0x2b8] sm:$0xff] }
 0x1c2   : > { %1833 = vmatprep.subr.mxu1 %v1408_v7  ;;  %1994 = vmatprep.subr.mxu0 %v1632_v8  ;;  %v1605_v8 = vld [vmem:[#allocation11 + $0x9e8] sm:$0xff] }
 0x1c3   : > { %1834 = vmatpush2.msra.mxu1 %v1407_v9  ;;  %1995 = vmatpush2.msra.mxu0 %v1631_v31  ;;  %v1374_v9 = vld [vmem:[#allocation11 + $0x2b0] sm:$0xff] }
 0x1c4   : > { %1835 = vmatprep.subr.mxu1 %v1401_v10  ;;  %1996 = vmatprep.subr.mxu0 %v1625_v11 }
 0x1c5   : > { %1836 = vmatpush2.msra.mxu1 %v1400_v32  ;;  %1997 = vmatpush2.msra.mxu0 %v1624_v12  ;;  %v1599_v12 = vld [vmem:[#allocation11 + $0x9b8] sm:$0xff] }
 0x1c6   : > { %2095 = vmatprep.subr.mxu1 %v1396_v13  ;;  %2256 = vmatprep.subr.mxu0 %v1620_v14  ;;  %v1368_v14 = vld [vmem:[#allocation11 + $0x280] sm:$0xff] }
 0x228   : > { %v968_v22 = vpop.f32.mrf.mxu1  ;;  %v1129_v23 = vpop.f32.mrf.mxu0 }
 0x229   : > { %v969_v24 = vadd.f32 %v968_v22, %v7054_v18  ;;  %v1130_v25 = vadd.f32 %v1129_v23, %v7058_v19  ;;  %v1598_v22 = vld [vmem:[#allocation11 + $0x9b0] sm:$0xff] }
 0x22a   : > { %v970_v29 = vpop.f32.mrf.mxu1  ;;  %v1131_v33 = vpop.f32.mrf.mxu0 }
 0x22b   : > { %v971_v34 = vadd.f32 %v970_v29, %v7061_v20  ;;  %v1132_v35 = vadd.f32 %v1131_v33, %v7065_v21  ;;  %v7075_v40 = vmax.f32 %v969_v24, 0.0  ;;  %v7077_v41 = vmax.f32 %v1130_v25, 0.0  ;;  %v1367_v29 = vld [vmem:[#allocation11 + $0x278] sm:$0xff] }
 0x22c   : > { %v974_v36 = vpop.f32.mrf.mxu1  ;;  %v1135_v37 = vpop.f32.mrf.mxu0 }
 0x22d   : > { %v7071_v38 = vmax.f32 %v971_v34, 0.0  ;;  %v7073_v39 = vmax.f32 %v1132_v35, 0.0  ;;  %10357 = vst [vmem:[#allocation27_spill] sm:$0xff] %v7077_v41  ;;  %v975_v46 = vadd.f32 %v974_v36, %v7054_v18  ;;  %v1136_v51 = vadd.f32 %v1135_v37, %v7058_v19  ;;  %v1592_v34 = vld [vmem:[#allocation11 + $0x980] sm:$0xff]  ;;  %v1361_v35 = vld [vmem:[#allocation11 + $0x248] sm:$0xff] }
 0x22e   : > { %v976_v42 = vpop.f32.mrf.mxu1  ;;  %v1137_v43 = vpop.f32.mrf.mxu0 }
 0x22f   : > { %10356 = vst [vmem:[#allocation26_spill] sm:$0xff] %v7073_v39  ;;  %v977_v47 = vadd.f32 %v976_v42, %v7061_v20  ;;  %v1138_v48 = vadd.f32 %v1137_v43, %v7065_v21  ;;  %1837 = vmatprep.mubr.f32.mxu1 %v7071_v38  ;;  %1998 = vmatprep.mubr.f32.mxu0 %v7073_v39  ;;  %v7091_v60 = vmax.f32 %v975_v46, 0.0  ;;  %v7096_v1 = vmax.f32 %v1136_v51, 0.0 }
 0x230   : > { %v980_v52 = vpop.f32.mrf.mxu1  ;;  %v1141_v53 = vpop.f32.mrf.mxu0  ;;  %1838 = vmatmul.mubr.f32.vlgmr.msra.gmra.mxu1 %v7075_v40  ;;  %1999 = vmatmul.mubr.f32.vlgmr.msra.gmra.mxu0 %v7077_v41 }
 0x231   : > { %v7087_v55 = vmax.f32 %v977_v47, 0.0  ;;  %v7089_v56 = vmax.f32 %v1138_v48, 0.0  ;;  %2096 = vmatpush1.msra.mxu1 %v1395_v44  ;;  %2257 = vmatpush1.msra.mxu0 %v1619_v45  ;;  %10359 = vst [vmem:[#allocation29_spill] sm:$0xff] %v7091_v60  ;;  %10360 = vst [vmem:[#allocation30_spill] sm:$0xff] %v7096_v1  ;;  %v981_v6 = vadd.f32 %v980_v52, %v7054_v18  ;;  %v1591_v44 = vld [vmem:[#allocation11 + $0x978] sm:$0xff]  ;;  %v1360_v45 = vld [vmem:[#allocation11 + $0x240] sm:$0xff] }
 0x232   : > { %2097 = vmatprep.subr.mxu1 %v1389_v49  ;;  %v982_v57 = vpop.f32.mrf.mxu1  ;;  %v1143_v58 = vpop.f32.mrf.mxu0  ;;  %2258 = vmatprep.subr.mxu0 %v1613_v50  ;;  %v1142_v31 = vadd.f32 %v1141_v53, %v7058_v19  ;;  %v1585_v48 = vld [vmem:[#allocation11 + $0x948] sm:$0xff]  ;;  %v1354_v52 = vld [vmem:[#allocation11 + $0x210] sm:$0xff] }
 0x233   : > { %10358 = vst [vmem:[#allocation28_spill] sm:$0xff] %v7089_v56  ;;  %v983_v61 = vadd.f32 %v982_v57, %v7061_v20  ;;  %v1144_v62 = vadd.f32 %v1143_v58, %v7065_v21  ;;  %2098 = vmatpush1.msra.mxu1 %v1388_v54  ;;  %1843 = vmatprep.mubr.f32.mxu1 %v7087_v55  ;;  %v7109_v25 = vmax.f32 %v981_v6, 0.0  ;;  %v1584_v54 = vld [vmem:[#allocation11 + $0x940] sm:$0xff]  ;;  %v1577_v6 = vld [vmem:[#allocation11 + $0x908] sm:$0xff] }
 0x234   : > { %2004 = vmatprep.mubr.f32.mxu0 %v7089_v56  ;;  %2099 = vmatprep.subr.mxu1 %v1382_v0  ;;  %v986_v2 = vpop.f32.mrf.mxu1  ;;  %v1147_v3 = vpop.f32.mrf.mxu0  ;;  %v7112_v33 = vmax.f32 %v1142_v31, 0.0 }
 0x235   : > { %v7100_v7 = vmax.f32 %v983_v61, 0.0  ;;  %2259 = vmatpush1.msra.mxu0 %v1612_v59  ;;  %1844 = vmatmul.mubr.f32.gmra.mxu1 %v7091_v60  ;;  %v7104_v10 = vmax.f32 %v1144_v62, 0.0  ;;  %10363 = vst [vmem:[#allocation33_spill] sm:$0xff] %v7109_v25  ;;  %v987_v42 = vadd.f32 %v986_v2, %v7054_v18  ;;  %v1148_v46 = vadd.f32 %v1147_v3, %v7058_v19  ;;  %v1353_v59 = vld [vmem:[#allocation11 + $0x208] sm:$0xff]  ;;  %v1578_v62 = vld [vmem:[#allocation11 + $0x910] sm:$0xff] }
 0x236   : > { %2005 = vmatmul.mubr.f32.gmra.mxu0 %v7096_v1  ;;  %2100 = vmatpush1.msra.mxu1 %v1381_v63  ;;  %v988_v11 = vpop.f32.mrf.mxu1  ;;  %v1149_v32 = vpop.f32.mrf.mxu0  ;;  %10364 = vst [vmem:[#allocation34_spill] sm:$0xff] %v7112_v33  ;;  %v1347_v63 = vld [vmem:[#allocation11 + $0x1d8] sm:$0xff] }
 0x237   : > { %10361 = vst [vmem:[#allocation31_spill] sm:$0xff] %v7100_v7  ;;  %10362 = vst [vmem:[#allocation32_spill] sm:$0xff] %v7104_v10  ;;  %2260 = vmatprep.subr.mxu0 %v1606_v4  ;;  %2101 = vmatprep.subr.mxu1 %v1375_v5  ;;  %v989_v13 = vadd.f32 %v988_v11, %v7061_v20  ;;  %v1150_v16 = vadd.f32 %v1149_v32, %v7065_v21  ;;  %v7125_v58 = vmax.f32 %v987_v42, 0.0  ;;  %v1571_v11 = vld [vmem:[#allocation11 + $0x8d8] sm:$0xff] }
 0x238   : > { %2261 = vmatpush1.msra.mxu0 %v1605_v8  ;;  %2102 = vmatpush1.msra.mxu1 %v1374_v9  ;;  %v992_v23 = vpop.f32.mrf.mxu1  ;;  %v1153_v24 = vpop.f32.mrf.mxu0  ;;  %v7128_v61 = vmax.f32 %v1148_v46, 0.0  ;;  %v1346_v8 = vld [vmem:[#allocation11 + $0x1d0] sm:$0xff] }
 0x239   : > { %2262 = vmatprep.subr.mxu0 %v1599_v12  ;;  %1849 = vmatprep.mubr.f32.mxu1 %v7100_v7  ;;  %v7116_v43 = vmax.f32 %v989_v13, 0.0  ;;  %v7120_v47 = vmax.f32 %v1150_v16, 0.0  ;;  %10367 = vst [vmem:[#allocation37_spill] sm:$0xff] %v7125_v58  ;;  %v993_v4 = vadd.f32 %v992_v23, %v7054_v18  ;;  %v1154_v9 = vadd.f32 %v1153_v24, %v7058_v19 }
 0x23a   : > { %2010 = vmatprep.mubr.f32.mxu0 %v7104_v10  ;;  %2103 = vmatprep.subr.mxu1 %v1368_v14  ;;  %v994_v36 = vpop.f32.mrf.mxu1  ;;  %v1155_v37 = vpop.f32.mrf.mxu0  ;;  %10368 = vst [vmem:[#allocation38_spill] sm:$0xff] %v7128_v61  ;;  %v1340_v14 = vld [vmem:[#allocation11 + $0x1a0] sm:$0xff] }
 0x23b   : > { %10365 = vst [vmem:[#allocation35_spill] sm:$0xff] %v7116_v43  ;;  %2263 = vmatpush1.msra.mxu0 %v1598_v22  ;;  %1850 = vmatmul.mubr.f32.gmra.mxu1 %v7109_v25  ;;  %10366 = vst [vmem:[#allocation36_spill] sm:$0xff] %v7120_v47  ;;  %v995_v51 = vadd.f32 %v994_v36, %v7061_v20  ;;  %v1156_v53 = vadd.f32 %v1155_v37, %v7065_v21  ;;  %v1570_v22 = vld [vmem:[#allocation11 + $0x8d0] sm:$0xff]  ;;  %v1564_v36 = vld [vmem:[#allocation11 + $0x8a0] sm:$0xff] }
 0x23c   : > { %2011 = vmatmul.mubr.f32.gmra.mxu0 %v7112_v33  ;;  %2104 = vmatpush1.msra.mxu1 %v1367_v29  ;;  %v998_v49 = vpop.f32.mrf.mxu1  ;;  %v1159_v50 = vpop.f32.mrf.mxu0  ;;  %v7149_v29 = vmax.f32 %v993_v4, 0.0  ;;  %v1333_v37 = vld [vmem:[#allocation11 + $0x168] sm:$0xff] }
 0x23d   : > { %2264 = vmatprep.subr.mxu0 %v1592_v34  ;;  %2105 = vmatprep.subr.mxu1 %v1361_v35  ;;  %v7136_v5 = vmax.f32 %v995_v51, 0.0  ;;  %v7140_v31 = vmax.f32 %v1156_v53, 0.0  ;;  %v1339_v34 = vld [vmem:[#allocation11 + $0x198] sm:$0xff]  ;;  %v7152_v35 = vmax.f32 %v1154_v9, 0.0  ;;  %v1332_v51 = vld [vmem:[#allocation11 + $0x160] sm:$0xff] }
 0x23e   : > { %2265 = vmatpush1.msra.mxu0 %v1591_v44  ;;  %2106 = vmatpush1.msra.mxu1 %v1360_v45  ;;  %v1000_v0 = vpop.f32.mrf.mxu1  ;;  %v1161_v57 = vpop.f32.mrf.mxu0  ;;  %10371 = vst [vmem:[#allocation41_spill] sm:$0xff] %v7149_v29  ;;  %v999_v45 = vadd.f32 %v998_v49, %v7054_v18 }
 0x23f   : > { %2266 = vmatprep.subr.mxu0 %v1585_v48  ;;  %1855 = vmatprep.mubr.f32.mxu1 %v7116_v43  ;;  %10369 = vst [vmem:[#allocation39_spill] sm:$0xff] %v7136_v5  ;;  %10370 = vst [vmem:[#allocation40_spill] sm:$0xff] %v7140_v31  ;;  %v1001_v13 = vadd.f32 %v1000_v0, %v7061_v20  ;;  %v1162_v16 = vadd.f32 %v1161_v57, %v7065_v21  ;;  %v1563_v48 = vld [vmem:[#allocation11 + $0x898] sm:$0xff] }
 0x240   : > { %2016 = vmatprep.mubr.f32.mxu0 %v7120_v47  ;;  %2107 = vmatprep.subr.mxu1 %v1354_v52  ;;  %v7131_v2 = vpop.f32.mrf.mxu1  ;;  %v7133_v3 = vpop.f32.mrf.mxu0  ;;  %10372 = vst [vmem:[#allocation42_spill] sm:$0xff] %v7152_v35  ;;  %v1160_v52 = vadd.f32 %v1159_v50, %v7058_v19  ;;  %v1556_v50 = vld [vmem:[#allocation11 + $0x860] sm:$0xff] }
 0x241   : > { %2267 = vmatpush1.msra.mxu0 %v1584_v54  ;;  %1856 = vmatmul.mubr.f32.gmra.mxu1 %v7125_v58  ;;  %v7156_v46 = vmax.f32 %v1001_v13, 0.0  ;;  %v7160_v53 = vmax.f32 %v1162_v16, 0.0  ;;  %v1557_v54 = vld [vmem:[#allocation11 + $0x868] sm:$0xff] }
 0x242   : > { %2017 = vmatmul.mubr.f32.gmra.mxu0 %v7128_v61  ;;  %2108 = vmatpush1.msra.mxu1 %v1353_v59  ;;  %v1006_v32 = vpop.f32.mrf.mxu1  ;;  %v1167_v12 = vpop.f32.mrf.mxu0  ;;  %v1326_v59 = vld [vmem:[#allocation11 + $0x130] sm:$0xff]  ;;  %v7172_v9 = vmax.f32 %v1160_v52, 0.0  ;;  %v1312_v52 = vld [vmem:[#allocation11 + $0xc0] sm:$0xff] }
 0x243   : > { %2268 = vmatprep.subr.mxu0 %v1578_v62  ;;  %2109 = vmatprep.subr.mxu1 %v1347_v63  ;;  %10373 = vst [vmem:[#allocation43_spill] sm:$0xff] %v7156_v46  ;;  %10374 = vst [vmem:[#allocation44_spill] sm:$0xff] %v7160_v53  ;;  %v1007_v49 = vadd.f32 %v1006_v32, %v7061_v20  ;;  %v1168_v62 = vadd.f32 %v1167_v12, %v7065_v21  ;;  %v1319_v32 = vld [vmem:[#allocation11 + $0xf8] sm:$0xff] }
 0x244   : > { %2269 = vmatpush1.msra.mxu0 %v1577_v6  ;;  %2110 = vmatpush1.msra.mxu1 %v1346_v8  ;;  %v7145_v23 = vpop.f32.mrf.mxu1  ;;  %v7147_v24 = vpop.f32.mrf.mxu0  ;;  %v7169_v6 = vmax.f32 %v999_v45, 0.0  ;;  %v1325_v8 = vld [vmem:[#allocation11 + $0x128] sm:$0xff]  ;;  %10376 = vst [vmem:[#allocation46_spill] sm:$0xff] %v7172_v9  ;;  %v1543_v45 = vld [vmem:[#allocation11 + $0x7f8] sm:$0xff] }
 0x245   : > { %2270 = vmatprep.subr.mxu0 %v1571_v11  ;;  %1861 = vmatprep.mubr.f32.mxu1 %v7136_v5  ;;  %v1550_v11 = vld [vmem:[#allocation11 + $0x830] sm:$0xff]  ;;  %v7181_v16 = vmax.f32 %v1007_v49, 0.0 }
 0x246   : > { %2022 = vmatprep.mubr.f32.mxu0 %v7140_v31  ;;  %2111 = vmatprep.subr.mxu1 %v1340_v14  ;;  %v1012_v42 = vpop.f32.mrf.mxu1  ;;  %v1173_v44 = vpop.f32.mrf.mxu0  ;;  %10375 = vst [vmem:[#allocation45_spill] sm:$0xff] %v7169_v6  ;;  %v1005_v14 = vadd.f32 %v7131_v2, %v7054_v18 }
 0x247   : > { %2271 = vmatpush1.msra.mxu0 %v1570_v22  ;;  %1862 = vmatmul.mubr.f32.gmra.mxu1 %v7149_v29  ;;  %10377 = vst [vmem:[#allocation47_spill] sm:$0xff] %v7181_v16  ;;  %v1549_v22 = vld [vmem:[#allocation11 + $0x828] sm:$0xff]  ;;  %v1013_v2 = vadd.f32 %v1012_v42, %v7061_v20  ;;  %v1536_v42 = vld [vmem:[#allocation11 + $0x7c0] sm:$0xff] }
 0x248   : > { %2023 = vmatmul.mubr.f32.gmra.mxu0 %v7152_v35  ;;  %2112 = vmatpush1.msra.mxu1 %v1339_v34  ;;  %v7163_v0 = vpop.f32.mrf.mxu1  ;;  %v7165_v57 = vpop.f32.mrf.mxu0  ;;  %v1318_v34 = vld [vmem:[#allocation11 + $0xf0] sm:$0xff] }
 0x249   : > { %2272 = vmatprep.subr.mxu0 %v1564_v36  ;;  %2113 = vmatprep.subr.mxu1 %v1333_v37  ;;  %v1166_v36 = vadd.f32 %v7133_v3, %v7058_v19  ;;  %v7186_v37 = vmax.f32 %v1168_v62, 0.0  ;;  %v1542_v3 = vld [vmem:[#allocation11 + $0x7f0] sm:$0xff]  ;;  %v1311_v62 = vld [vmem:[#allocation11 + $0xb8] sm:$0xff] }
 0x24a   : > { %2273 = vmatpush1.msra.mxu0 %v1563_v48  ;;  %2114 = vmatpush1.msra.mxu1 %v1332_v51  ;;  %v1018_v63 = vpop.f32.mrf.mxu1  ;;  %v1179_v4 = vpop.f32.mrf.mxu0 }
 0x24b   : > { %2274 = vmatprep.subr.mxu0 %v1557_v54  ;;  %1867 = vmatprep.mubr.f32.mxu1 %v7156_v46  ;;  %10378 = vst [vmem:[#allocation48_spill] sm:$0xff] %v7186_v37  ;;  %v1174_v54 = vadd.f32 %v1173_v44, %v7065_v21  ;;  %v1011_v44 = vadd.f32 %v7145_v23, %v7054_v18 }
 0x24c   : > { %2028 = vmatprep.mubr.f32.mxu0 %v7160_v53  ;;  %2115 = vmatprep.subr.mxu1 %v1326_v59  ;;  %v7175_v13 = vpop.f32.mrf.mxu1  ;;  %v7177_v12 = vpop.f32.mrf.mxu0  ;;  %v7197_v59 = vmax.f32 %v1005_v14, 0.0  ;;  %v1535_v14 = vld [vmem:[#allocation11 + $0x7b8] sm:$0xff]  ;;  %v1019_v23 = vadd.f32 %v1018_v63, %v7061_v20  ;;  %v1180_v26 = vadd.f32 %v1179_v4, %v7065_v21  ;;  %v1522_v63 = vld [vmem:[#allocation11 + $0x750] sm:$0xff]  ;;  %v1017_v4 = vadd.f32 %v7163_v0, %v7054_v18 }
 0x24d   : > { %2275 = vmatpush1.msra.mxu0 %v1556_v50  ;;  %1868 = vmatmul.mubr.f32.gmra.mxu1 %v7169_v6 }
 0x24e   : > { %2029 = vmatmul.mubr.f32.gmra.mxu0 %v7172_v9  ;;  %2116 = vmatpush1.msra.mxu1 %v1325_v8  ;;  %v7189_v48 = vpop.f32.mrf.mxu1  ;;  %v7191_v51 = vpop.f32.mrf.mxu0  ;;  %10379 = vst [vmem:[#allocation49_spill] sm:$0xff] %v7197_v59  ;;  %v7202_v8 = vmax.f32 %v1166_v36, 0.0  ;;  %v7212_v36 = vmax.f32 %v1174_v54, 0.0  ;;  %v7221_v54 = vmax.f32 %v1011_v44, 0.0  ;;  %v1521_v44 = vld [vmem:[#allocation11 + $0x748] sm:$0xff] }
 0x24f   : > { %2276 = vmatprep.subr.mxu0 %v1550_v11  ;;  %2117 = vmatprep.subr.mxu1 %v1319_v32  ;;  %v1305_v11 = vld [vmem:[#allocation11 + $0x88] sm:$0xff]  ;;  %v7207_v32 = vmax.f32 %v1013_v2, 0.0  ;;  %v1298_v2 = vld [vmem:[#allocation11 + $0x50] sm:$0xff]  ;;  %v1025_v0 = vadd.f32 %v7189_v48, %v7061_v20  ;;  %v1732_v48 = vld [vmem:[#allocation11 + $0xde0] sm:$0xff] }
 0x250   : > { %2277 = vmatpush1.msra.mxu0 %v1549_v22  ;;  %2118 = vmatpush1.msra.mxu1 %v1318_v34  ;;  %v7195_v49 = vpop.f32.mrf.mxu1  ;;  %v7200_v50 = vpop.f32.mrf.mxu0  ;;  %10380 = vst [vmem:[#allocation50_spill] sm:$0xff] %v7202_v8  ;;  %v1304_v22 = vld [vmem:[#allocation11 + $0x80] sm:$0xff]  ;;  %v1172_v34 = vadd.f32 %v7147_v24, %v7058_v19  ;;  %10382 = vst [vmem:[#allocation52_spill] sm:$0xff] %v7212_v36 }
 0x251   : > { %2278 = vmatprep.subr.mxu0 %v1543_v45  ;;  %1873 = vmatprep.mubr.f32.mxu1 %v7181_v16  ;;  %10381 = vst [vmem:[#allocation51_spill] sm:$0xff] %v7207_v32  ;;  %v1529_v45 = vld [vmem:[#allocation11 + $0x788] sm:$0xff]  ;;  %v1528_v24 = vld [vmem:[#allocation11 + $0x780] sm:$0xff]  ;;  %10383 = vst [vmem:[#allocation53_spill] sm:$0xff] %v7221_v54 }
 0x252   : > { %2034 = vmatprep.mubr.f32.mxu0 %v7186_v37  ;;  %2119 = vmatprep.subr.mxu1 %v1312_v52  ;;  %v7215_v52 = vpop.f32.mrf.mxu1  ;;  %v7224_v17 = vmax.f32 %v1172_v34, 0.0  ;;  %v1178_v34 = vadd.f32 %v7165_v57, %v7058_v19  ;;  %v7245_v57 = vmax.f32 %v1017_v4, 0.0  ;;  %v1500_v4 = vld [vmem:[#allocation11 + $0x6a0] sm:$0xff] }
 0x253   : > { %2279 = vmatpush1.msra.mxu0 %v1542_v3  ;;  %1874 = vmatmul.mubr.f32.gmra.mxu1 %v7197_v59  ;;  %v7218_v3 = vpop.f32.mrf.mxu0 }
 0x254   : > { %2035 = vmatmul.mubr.f32.gmra.mxu0 %v7202_v8  ;;  %2120 = vmatpush1.msra.mxu1 %v1311_v62  ;;  %v1297_v62 = vld [vmem:[#allocation11 + $0x48] sm:$0xff]  ;;  %10384 = vst [vmem:[#allocation54_spill] sm:$0xff] %v7224_v17  ;;  %10387 = vst [vmem:[#allocation57_spill] sm:$0xff] %v7245_v57 }
 0x255   : > { %2280 = vmatprep.subr.mxu0 %v1536_v42  ;;  %2121 = vmatprep.subr.mxu1 %v1305_v11  ;;  %v1291_v42 = vld [vmem:[#allocation11 + $0x18] sm:$0xff]  ;;  %v7227_v11 = vpop.f32.mrf.mxu1 }
 0x256   : > { %2281 = vmatpush1.msra.mxu0 %v1535_v14  ;;  %2122 = vmatpush1.msra.mxu1 %v1304_v22  ;;  %v7231_v14 = vmax.f32 %v1019_v23, 0.0  ;;  %v1290_v22 = vld [vmem:[#allocation11 + $0x10] sm:$0xff]  ;;  %v1508_v23 = vld [vmem:[#allocation11 + $0x6e0] sm:$0xff] }
 0x257   : > { %2282 = vmatprep.subr.mxu0 %v1529_v45  ;;  %1879 = vmatprep.mubr.f32.mxu1 %v7207_v32  ;;  %v7234_v45 = vpop.f32.mrf.mxu0  ;;  %v1036_v30 = vpop.f32.mrf.mxu1 }
 0x258   : > { %2040 = vmatprep.mubr.f32.mxu0 %v7212_v36  ;;  %2123 = vmatprep.subr.mxu1 %v1298_v2  ;;  %10385 = vst [vmem:[#allocation55_spill] sm:$0xff] %v7231_v14  ;;  %v7238_v2 = vmax.f32 %v1180_v26, 0.0  ;;  %v1507_v26 = vld [vmem:[#allocation11 + $0x6d8] sm:$0xff] }
 0x259   : > { %2283 = vmatpush1.msra.mxu0 %v1528_v24  ;;  %1880 = vmatmul.mubr.f32.gmra.mxu1 %v7221_v54  ;;  %v1186_v24 = vadd.f32 %v7191_v51, %v7065_v21  ;;  %v1023_v51 = vadd.f32 %v7175_v13, %v7054_v18  ;;  %v7261_v28 = vpop.f32.mrf.mxu1  ;;  %v1494_v13 = vld [vmem:[#allocation11 + $0x670] sm:$0xff] }
 0x25a   : > { %10386 = vst [vmem:[#allocation56_spill] sm:$0xff] %v7238_v2  ;;  %2041 = vmatmul.mubr.f32.gmra.mxu0 %v7224_v17  ;;  %2124 = vmatpush1.msra.mxu1 %v1297_v62  ;;  %v1197_v62 = vpop.f32.mrf.mxu0 }
 0x25b   : > { %2284 = vmatprep.subr.mxu0 %v1522_v63  ;;  %2125 = vmatprep.subr.mxu1 %v1291_v42  ;;  %v7248_v63 = vmax.f32 %v1178_v34, 0.0  ;;  %v1501_v42 = vld [vmem:[#allocation11 + $0x6a8] sm:$0xff]  ;;  %v7258_v34 = vmax.f32 %v1186_v24, 0.0  ;;  %v1724_v24 = vld [vmem:[#allocation11 + $0xda0] sm:$0xff] }
 0x25c   : > { %2285 = vmatpush1.msra.mxu0 %v1521_v44  ;;  %2126 = vmatpush1.msra.mxu1 %v1290_v22  ;;  %v7253_v44 = vmax.f32 %v1025_v0, 0.0  ;;  %v1184_v22 = vadd.f32 %v7177_v12, %v7058_v19  ;;  %v7265_v0 = vpop.f32.mrf.mxu0  ;;  %v1192_v12 = vadd.f32 %v7218_v3, %v7065_v21 }
 0x25d   : > { %2286 = vmatprep.subr.mxu0 %v1515_v15  ;;  %1885 = vmatprep.mubr.f32.mxu1 %v7231_v14  ;;  %10388 = vst [vmem:[#allocation58_spill] sm:$0xff] %v7248_v63  ;;  %v1731_v15 = vld [vmem:[#allocation11 + $0xdd8] sm:$0xff]  ;;  %10390 = vst [vmem:[#allocation60_spill] sm:$0xff] %v7258_v34 }
 0x25e   : > { %2046 = vmatprep.mubr.f32.mxu0 %v7238_v2  ;;  %2127 = vmatprep.subr.mxu1 %v1508_v23  ;;  %10389 = vst [vmem:[#allocation59_spill] sm:$0xff] %v7253_v44  ;;  %v1725_v23 = vld [vmem:[#allocation11 + $0xda8] sm:$0xff] }
 0x25f   : > { %2287 = vmatpush1.msra.mxu0 %v1514_v27  ;;  %1886 = vmatmul.mubr.f32.gmra.mxu1 %v7245_v57  ;;  %v1031_v27 = vadd.f32 %v7215_v52, %v7061_v20  ;;  %v7269_v57 = vmax.f32 %v1023_v51, 0.0  ;;  %v1718_v52 = vld [vmem:[#allocation11 + $0xd70] sm:$0xff]  ;;  %v1717_v51 = vld [vmem:[#allocation11 + $0xd68] sm:$0xff] }
 0x260   : > { %2047 = vmatmul.mubr.f32.gmra.mxu0 %v7248_v63  ;;  %2128 = vmatpush2.msra.mxu1 %v1507_v26  ;;  %v1493_v26 = vld [vmem:[#allocation11 + $0x668] sm:$0xff]  ;;  %v1042_v63 = vpop.f32.mrf.mxu1 }
 0x261   : > { %2288 = vmatprep.subr.mxu0 %v1732_v48  ;;  %2129 = vmatprep.subr.mxu1 %v1501_v42  ;;  %10391 = vst [vmem:[#allocation61_spill] sm:$0xff] %v7269_v57  ;;  %v7272_v48 = vmax.f32 %v1184_v22, 0.0  ;;  %v1487_v42 = vld [vmem:[#allocation11 + $0x638] sm:$0xff]  ;;  %v7277_v3 = vmax.f32 %v1031_v27, 0.0  ;;  %v1190_v22 = vadd.f32 %v7200_v50, %v7058_v19  ;;  %v1480_v27 = vld [vmem:[#allocation11 + $0x600] sm:$0xff] }
 0x262   : > { %2289 = vmatpush2.msra.mxu0 %v1731_v15  ;;  %2130 = vmatpush2.msra.mxu1 %v1500_v4  ;;  %v1029_v15 = vadd.f32 %v7195_v49, %v7054_v18  ;;  %v1486_v4 = vld [vmem:[#allocation11 + $0x630] sm:$0xff]  ;;  %v1037_v49 = vadd.f32 %v1036_v30, %v7061_v20  ;;  %v1479_v50 = vld [vmem:[#allocation11 + $0x5f8] sm:$0xff]  ;;  %v1704_v30 = vld [vmem:[#allocation11 + $0xd00] sm:$0xff] }
 0x263   : > { %2290 = vmatprep.subr.mxu0 %v1725_v23  ;;  %1891 = vmatprep.mubr.f32.mxu1 %v7253_v44  ;;  %10392 = vst [vmem:[#allocation62_spill] sm:$0xff] %v7272_v48  ;;  %10393 = vst [vmem:[#allocation63_spill] sm:$0xff] %v7277_v3  ;;  %v1203_v23 = vpop.f32.mrf.mxu0  ;;  %v7282_v44 = vmax.f32 %v1192_v12, 0.0 }
 0x264   : > { %2052 = vmatprep.mubr.f32.mxu0 %v7258_v34  ;;  %2131 = vmatprep.subr.mxu1 %v1494_v13  ;;  %v1711_v13 = vld [vmem:[#allocation11 + $0xd38] sm:$0xff]  ;;  %v7287_v34 = vpop.f32.mrf.mxu1  ;;  %v7289_v2 = vmax.f32 %v1029_v15, 0.0 }
 0x265   : > { %2291 = vmatpush2.msra.mxu0 %v1724_v24  ;;  %1892 = vmatmul.mubr.f32.gmra.mxu1 %v7269_v57  ;;  %10394 = vst [vmem:[#allocation64_spill] sm:$0xff] %v7282_v44  ;;  %v1198_v24 = vadd.f32 %v1197_v62, %v7065_v21  ;;  %v1710_v57 = vld [vmem:[#allocation11 + $0xd30] sm:$0xff]  ;;  %v7292_v12 = vpop.f32.mrf.mxu0  ;;  %v1035_v62 = vadd.f32 %v7227_v11, %v7054_v18  ;;  %v1703_v15 = vld [vmem:[#allocation11 + $0xcf8] sm:$0xff] }
 0x266   : > { %2053 = vmatmul.mubr.f32.gmra.mxu0 %v7272_v48  ;;  %2132 = vmatpush2.msra.mxu1 %v1493_v26  ;;  %10395 = vst [vmem:[#allocation65_spill] sm:$0xff] %v7289_v2  ;;  %v7294_v26 = vmax.f32 %v1190_v22, 0.0  ;;  %v1043_v11 = vadd.f32 %v1042_v63, %v7061_v20  ;;  %v1459_v63 = vld [vmem:[#allocation11 + $0x558] sm:$0xff] }
 0x267   : > { %2292 = vmatprep.subr.mxu0 %v1718_v52  ;;  %2133 = vmatprep.subr.mxu1 %v1487_v42  ;;  %v1473_v52 = vld [vmem:[#allocation11 + $0x5c8] sm:$0xff]  ;;  %v7299_v42 = vmax.f32 %v1037_v49, 0.0  ;;  %v7304_v22 = vmax.f32 %v1198_v24, 0.0  ;;  %v1466_v49 = vld [vmem:[#allocation11 + $0x590] sm:$0xff] }
 0x268   : > { %2293 = vmatpush2.msra.mxu0 %v1717_v51  ;;  %2134 = vmatpush2.msra.mxu1 %v1486_v4  ;;  %10396 = vst [vmem:[#allocation66_spill] sm:$0xff] %v7294_v26  ;;  %v1472_v51 = vld [vmem:[#allocation11 + $0x5c0] sm:$0xff]  ;;  %v1196_v4 = vadd.f32 %v7234_v45, %v7058_v19  ;;  %v1465_v45 = vld [vmem:[#allocation11 + $0x588] sm:$0xff] }
 0x269   : > { %2294 = vmatprep.subr.mxu0 %v1711_v13  ;;  %1897 = vmatprep.mubr.f32.mxu1 %v7277_v3  ;;  %10397 = vst [vmem:[#allocation67_spill] sm:$0xff] %v7299_v42  ;;  %10398 = vst [vmem:[#allocation68_spill] sm:$0xff] %v7304_v22  ;;  %v1697_v13 = vld [vmem:[#allocation11 + $0xcc8] sm:$0xff]  ;;  %v7309_v3 = vmax.f32 %v1035_v62, 0.0 }
 0x26a   : > { %2058 = vmatprep.mubr.f32.mxu0 %v7282_v44  ;;  %2135 = vmatprep.subr.mxu1 %v1480_v27  ;;  %v1048_v27 = vpop.f32.mrf.mxu1  ;;  %v1696_v44 = vld [vmem:[#allocation11 + $0xcc0] sm:$0xff]  ;;  %v7312_v24 = vmax.f32 %v1196_v4, 0.0  ;;  %v1689_v62 = vld [vmem:[#allocation11 + $0xc88] sm:$0xff]  ;;  %v1202_v4 = vadd.f32 %v7265_v0, %v7058_v19 }
 0x26b   : > { %2295 = vmatpush2.msra.mxu0 %v1710_v57  ;;  %1898 = vmatmul.mubr.f32.gmra.mxu1 %v7289_v2  ;;  %v1209_v57 = vpop.f32.mrf.mxu0  ;;  %v1204_v2 = vadd.f32 %v1203_v23, %v7065_v21  ;;  %10399 = vst [vmem:[#allocation69_spill] sm:$0xff] %v7309_v3  ;;  %v1041_v23 = vadd.f32 %v7261_v28, %v7054_v18 }
 0x26c   : > { %2059 = vmatmul.mubr.f32.gmra.mxu0 %v7294_v26  ;;  %2136 = vmatpush2.msra.mxu1 %v1479_v50  ;;  %10400 = vst [vmem:[#allocation70_spill] sm:$0xff] %v7312_v24  ;;  %v1690_v50 = vld [vmem:[#allocation11 + $0xc90] sm:$0xff]  ;;  %v1049_v28 = vadd.f32 %v1048_v27, %v7061_v20  ;;  %v1676_v27 = vld [vmem:[#allocation11 + $0xc20] sm:$0xff] }
 0x26d   : > { %2296 = vmatprep.subr.mxu0 %v1704_v30  ;;  %2137 = vmatprep.subr.mxu1 %v1473_v52  ;;  %v7315_v30 = vpop.f32.mrf.mxu1  ;;  %v7319_v52 = vmax.f32 %v1043_v11, 0.0  ;;  %v1210_v11 = vadd.f32 %v1209_v57, %v7065_v21  ;;  %v1047_v57 = vadd.f32 %v7287_v34, %v7054_v18 }
 0x26e   : > { %2297 = vmatpush2.msra.mxu0 %v1703_v15  ;;  %2138 = vmatpush2.msra.mxu1 %v1472_v51  ;;  %v1458_v15 = vld [vmem:[#allocation11 + $0x550] sm:$0xff]  ;;  %v7322_v51 = vpop.f32.mrf.mxu0 }
 0x26f   : > { %2298 = vmatprep.subr.mxu0 %v1697_v13  ;;  %1903 = vmatprep.mubr.f32.mxu1 %v7299_v42  ;;  %10401 = vst [vmem:[#allocation71_spill] sm:$0xff] %v7319_v52  ;;  %v7326_v13 = vmax.f32 %v1204_v2, 0.0  ;;  %v7331_v42 = vmax.f32 %v1041_v23, 0.0  ;;  %v1451_v2 = vld [vmem:[#allocation11 + $0x518] sm:$0xff] }
 0x270   : > { %2064 = vmatprep.mubr.f32.mxu0 %v7304_v22  ;;  %2139 = vmatprep.subr.mxu1 %v1466_v49  ;;  %v1683_v49 = vld [vmem:[#allocation11 + $0xc58] sm:$0xff]  ;;  %v1054_v22 = vpop.f32.mrf.mxu1  ;;  %v1215_v0 = vpop.f32.mrf.mxu0 }
 0x271   : > { %2299 = vmatpush2.msra.mxu0 %v1696_v44  ;;  %1904 = vmatmul.mubr.f32.gmra.mxu1 %v7309_v3  ;;  %10402 = vst [vmem:[#allocation72_spill] sm:$0xff] %v7326_v13  ;;  %v1452_v44 = vld [vmem:[#allocation11 + $0x520] sm:$0xff]  ;;  %v1682_v3 = vld [vmem:[#allocation11 + $0xc50] sm:$0xff]  ;;  %10403 = vst [vmem:[#allocation73_spill] sm:$0xff] %v7331_v42  ;;  %v1055_v34 = vadd.f32 %v1054_v22, %v7061_v20 }
 0x272   : > { %2065 = vmatmul.mubr.f32.gmra.mxu0 %v7312_v24  ;;  %2140 = vmatpush2.msra.mxu1 %v1465_v45  ;;  %v7334_v45 = vmax.f32 %v1202_v4, 0.0  ;;  %v1675_v23 = vld [vmem:[#allocation11 + $0xc18] sm:$0xff]  ;;  %v7344_v4 = vmax.f32 %v1210_v11, 0.0 }
 0x273   : > { %2300 = vmatprep.subr.mxu0 %v1690_v50  ;;  %2141 = vmatprep.subr.mxu1 %v1459_v63  ;;  %v1445_v50 = vld [vmem:[#allocation11 + $0x4e8] sm:$0xff]  ;;  %v7339_v63 = vmax.f32 %v1049_v28, 0.0  ;;  %v1438_v28 = vld [vmem:[#allocation11 + $0x4b0] sm:$0xff]  ;;  %v1431_v22 = vld [vmem:[#allocation11 + $0x478] sm:$0xff] }
 0x274   : > { %2301 = vmatpush2.msra.mxu0 %v1689_v62  ;;  %2142 = vmatpush2.msra.mxu1 %v1458_v15  ;;  %v1444_v62 = vld [vmem:[#allocation11 + $0x4e0] sm:$0xff]  ;;  %v1208_v15 = vadd.f32 %v7292_v12, %v7058_v19  ;;  %10405 = vst [vmem:[#allocation75_spill] sm:$0xff] %v7344_v4  ;;  %v1437_v12 = vld [vmem:[#allocation11 + $0x4a8] sm:$0xff] }
 0x275   : > { %2302 = vmatprep.subr.mxu0 %v1683_v49  ;;  %1909 = vmatprep.mubr.f32.mxu1 %v7319_v52  ;;  %10404 = vst [vmem:[#allocation74_spill] sm:$0xff] %v7339_v63  ;;  %v1669_v49 = vld [vmem:[#allocation11 + $0xbe8] sm:$0xff]  ;;  %v7349_v52 = vmax.f32 %v1047_v57, 0.0 }
 0x276   : > { %2070 = vmatprep.mubr.f32.mxu0 %v7326_v13  ;;  %2143 = vmatprep.subr.mxu1 %v1452_v44  ;;  %v1058_v44 = vpop.f32.mrf.mxu1  ;;  %v1668_v13 = vld [vmem:[#allocation11 + $0xbe0] sm:$0xff]  ;;  %v7352_v11 = vmax.f32 %v1208_v15, 0.0  ;;  %v1661_v57 = vld [vmem:[#allocation11 + $0xba8] sm:$0xff]  ;;  %v1214_v15 = vadd.f32 %v7322_v51, %v7058_v19 }
 0x277   : > { %2303 = vmatpush2.msra.mxu0 %v1682_v3  ;;  %1910 = vmatmul.mubr.f32.gmra.mxu1 %v7331_v42  ;;  %v1219_v3 = vpop.f32.mrf.mxu0  ;;  %v1216_v42 = vadd.f32 %v1215_v0, %v7065_v21  ;;  %10406 = vst [vmem:[#allocation76_spill] sm:$0xff] %v7349_v52  ;;  %v7357_v0 = vmax.f32 %v1055_v34, 0.0  ;;  %v1424_v34 = vld [vmem:[#allocation11 + $0x440] sm:$0xff] }
 0x278   : > { %2071 = vmatmul.mubr.f32.gmra.mxu0 %v7334_v45  ;;  %2144 = vmatpush2.msra.mxu1 %v1451_v2  ;;  %v1662_v2 = vld [vmem:[#allocation11 + $0xbb0] sm:$0xff]  ;;  %v7370_v51 = vmax.f32 %v1214_v15, 0.0 }
 0x279   : > { %2304 = vmatprep.subr.mxu0 %v1676_v27  ;;  %2145 = vmatprep.subr.mxu1 %v1445_v50  ;;  %v1060_v27 = vpop.f32.mrf.mxu1  ;;  %v1053_v50 = vadd.f32 %v7315_v30, %v7054_v18 }
 0x27a   : > { %2305 = vmatpush2.msra.mxu0 %v1675_v23  ;;  %2146 = vmatpush2.msra.mxu1 %v1444_v62  ;;  %v1221_v23 = vpop.f32.mrf.mxu0  ;;  %v1430_v62 = vld [vmem:[#allocation11 + $0x470] sm:$0xff]  ;;  %v1061_v30 = vadd.f32 %v1060_v27, %v7061_v20  ;;  %v1059_v20 = vadd.f32 %v1058_v44, %v7054_v18  ;;  %v1416_v27 = vld [vmem:[#allocation11 + $0x400] sm:$0xff] }
 0x27b   : > { %2306 = vmatprep.subr.mxu0 %v1669_v49  ;;  %1915 = vmatprep.mubr.f32.mxu1 %v7339_v63  ;;  %v7362_v49 = vmax.f32 %v1216_v42, 0.0  ;;  %v1423_v42 = vld [vmem:[#allocation11 + $0x438] sm:$0xff]  ;;  %v1640_v18 = vld [vmem:[#allocation11 + $0xb00] sm:$0xff] }
 0x27c   : > { %2076 = vmatprep.mubr.f32.mxu0 %v7344_v4  ;;  %2147 = vmatprep.subr.mxu1 %v1438_v28  ;;  %v1655_v28 = vld [vmem:[#allocation11 + $0xb78] sm:$0xff]  ;;  %v7367_v4 = vmax.f32 %v1053_v50, 0.0  ;;  %v1220_v50 = vadd.f32 %v1219_v3, %v7058_v19  ;;  %v7381_v44 = vmax.f32 %v1059_v20, 0.0  ;;  %v1634_v19 = vld [vmem:[#allocation11 + $0xad0] sm:$0xff] }
 0x27d   : > { %2307 = vmatpush2.msra.mxu0 %v1668_v13  ;;  %1916 = vmatmul.mubr.f32.gmra.mxu1 %v7349_v52  ;;  %v1222_v13 = vadd.f32 %v1221_v23, %v7065_v21  ;;  %v1654_v52 = vld [vmem:[#allocation11 + $0xb70] sm:$0xff]  ;;  %v1647_v21 = vld [vmem:[#allocation11 + $0xb38] sm:$0xff]  ;;  %v1641_v23 = vld [vmem:[#allocation11 + $0xb08] sm:$0xff] }
 0x27e   : > { %2077 = vmatmul.mubr.f32.gmra.mxu0 %v7352_v11  ;;  %2148 = vmatpush2.msra.mxu1 %v1437_v12  ;;  %v1648_v12 = vld [vmem:[#allocation11 + $0xb40] sm:$0xff]  ;;  %v7384_v15 = vmax.f32 %v1220_v50, 0.0  ;;  %v1403_v3 = vld [vmem:[#allocation11 + $0x398] sm:$0xff] }
 0x27f   : > { %2308 = vmatprep.subr.mxu0 %v1662_v2  ;;  %2149 = vmatprep.subr.mxu1 %v1431_v22  ;;  %v1417_v2 = vld [vmem:[#allocation11 + $0x408] sm:$0xff]  ;;  %v7374_v22 = vmax.f32 %v1061_v30, 0.0  ;;  %v1402_v30 = vld [vmem:[#allocation11 + $0x390] sm:$0xff]  ;;  %v1391_v20 = vld [vmem:[#allocation11 + $0x338] sm:$0xff] }
 0x280   : > { %2309 = vmatpush2.msra.mxu0 %v1661_v57  ;;  %2150 = vmatpush2.msra.mxu1 %v1430_v62  ;;  %v7378_v57 = vmax.f32 %v1222_v13, 0.0  ;;  %v1410_v62 = vld [vmem:[#allocation11 + $0x3d0] sm:$0xff]  ;;  %v1615_v50 = vld [vmem:[#allocation11 + $0xa38] sm:$0xff] }
 0x281   : > { %2310 = vmatprep.subr.mxu0 %v1655_v28  ;;  %1921 = vmatprep.mubr.f32.mxu1 %v7357_v0  ;;  %v1633_v28 = vld [vmem:[#allocation11 + $0xac8] sm:$0xff]  ;;  %v1398_v13 = vld [vmem:[#allocation11 + $0x370] sm:$0xff] }
 0x282   : > { %2082 = vmatprep.mubr.f32.mxu0 %v7362_v49  ;;  %2151 = vmatprep.subr.mxu1 %v1424_v34  ;;  %10407 = vst [vmem:[#allocation77_spill] sm:$0xff] %v7378_v57  ;;  %v1627_v34 = vld [vmem:[#allocation11 + $0xa98] sm:$0xff] }
 0x283   : > { %2311 = vmatpush2.msra.mxu0 %v1654_v52  ;;  %1922 = vmatmul.mubr.f32.gmra.mxu1 %v7367_v4  ;;  %v1409_v52 = vld [vmem:[#allocation11 + $0x3c8] sm:$0xff] }
 0x284   : > { %2083 = vmatmul.mubr.f32.gmra.mxu0 %v7370_v51  ;;  %2152 = vmatpush2.msra.mxu1 %v1423_v42  ;;  %v1626_v42 = vld [vmem:[#allocation11 + $0xa90] sm:$0xff] }
 0x285   : > { %2312 = vmatprep.subr.mxu0 %v1648_v12  ;;  %2153 = vmatprep.subr.mxu1 %v1417_v2  ;;  %v1397_v12 = vld [vmem:[#allocation11 + $0x368] sm:$0xff]  ;;  %v1622_v2 = vld [vmem:[#allocation11 + $0xa70] sm:$0xff] }
 0x286   : > { %2313 = vmatpush2.msra.mxu0 %v1647_v21  ;;  %2154 = vmatpush2.msra.mxu1 %v1416_v27  ;;  %v1621_v21 = vld [vmem:[#allocation11 + $0xa68] sm:$0xff]  ;;  %v1390_v27 = vld [vmem:[#allocation11 + $0x330] sm:$0xff] }
 0x287   : > { %2314 = vmatprep.subr.mxu0 %v1641_v23  ;;  %1927 = vmatprep.mubr.f32.mxu1 %v7374_v22  ;;  %v1384_v23 = vld [vmem:[#allocation11 + $0x300] sm:$0xff] }
 0x288   : > { %2088 = vmatprep.mubr.f32.mxu0 %v7378_v57  ;;  %2155 = vmatprep.subr.mxu1 %v1410_v62  ;;  %v1614_v62 = vld [vmem:[#allocation11 + $0xa30] sm:$0xff] }
 0x289   : > { %2315 = vmatpush2.msra.mxu0 %v1640_v18  ;;  %1928 = vmatmul.mubr.f32.gmra.mxu1 %v7381_v44  ;;  %v1383_v18 = vld [vmem:[#allocation11 + $0x2f8] sm:$0xff] }
 0x28a   : > { %2089 = vmatmul.mubr.f32.gmra.mxu0 %v7384_v15  ;;  %2156 = vmatpush2.msra.mxu1 %v1409_v52  ;;  %v1608_v52 = vld [vmem:[#allocation11 + $0xa00] sm:$0xff] }
 0x28b   : > { %2316 = vmatprep.subr.mxu0 %v1634_v19  ;;  %2157 = vmatprep.subr.mxu1 %v1403_v3  ;;  %v1377_v19 = vld [vmem:[#allocation11 + $0x2c8] sm:$0xff]  ;;  %v1607_v3 = vld [vmem:[#allocation11 + $0x9f8] sm:$0xff] }
 0x28c   : > { %2159 = vmatprep.mubr.f32.mxu1 %v7071_v38  ;;  %2317 = vmatpush2.msra.mxu0 %v1633_v28  ;;  %v1376_v28 = vld [vmem:[#allocation11 + $0x2c0] sm:$0xff] }
 0x28d   : > { %2320 = vmatprep.mubr.f32.mxu0 %v7073_v39  ;;  %2158 = vmatpush2.msra.mxu1 %v1402_v30  ;;  %v1601_v30 = vld [vmem:[#allocation11 + $0x9c8] sm:$0xff] }
 0x28e   : > { %2318 = vmatprep.subr.mxu0 %v1627_v34  ;;  %2417 = vmatprep.subr.mxu1 %v1398_v13  ;;  %v1370_v34 = vld [vmem:[#allocation11 + $0x290] sm:$0xff]  ;;  %v1600_v13 = vld [vmem:[#allocation11 + $0x9c0] sm:$0xff] }
 0x28f   : > { %2319 = vmatpush2.msra.mxu0 %v1626_v42  ;;  %2160 = vmatmul.mubr.f32.vlgmr.msra.gmra.mxu1 %v7075_v40  ;;  %v1369_v42 = vld [vmem:[#allocation11 + $0x288] sm:$0xff] }
 0x290   : > { %2321 = vmatmul.mubr.f32.vlgmr.msra.gmra.mxu0 %v7077_v41  ;;  %2418 = vmatpush1.msra.mxu1 %v1397_v12  ;;  %v1594_v12 = vld [vmem:[#allocation11 + $0x990] sm:$0xff] }
 0x291   : > { %2578 = vmatprep.subr.mxu0 %v1622_v2  ;;  %2165 = vmatprep.mubr.f32.mxu1 %v7087_v55  ;;  %v1363_v2 = vld [vmem:[#allocation11 + $0x258] sm:$0xff] }
 0x292   : > { %2326 = vmatprep.mubr.f32.mxu0 %v7089_v56  ;;  %2419 = vmatprep.subr.mxu1 %v1391_v20  ;;  %v1593_v20 = vld [vmem:[#allocation11 + $0x988] sm:$0xff] }
 0x293   : > { %2579 = vmatpush1.msra.mxu0 %v1621_v21  ;;  %2420 = vmatpush1.msra.mxu1 %v1390_v27  ;;  %v1362_v21 = vld [vmem:[#allocation11 + $0x250] sm:$0xff]  ;;  %v1587_v27 = vld [vmem:[#allocation11 + $0x958] sm:$0xff] }
 0x294   : > { %2580 = vmatprep.subr.mxu0 %v1615_v50  ;;  %2421 = vmatprep.subr.mxu1 %v1384_v23  ;;  %v1356_v50 = vld [vmem:[#allocation11 + $0x220] sm:$0xff]  ;;  %v1586_v23 = vld [vmem:[#allocation11 + $0x950] sm:$0xff] }
 0x295   : > { %2581 = vmatpush1.msra.mxu0 %v1614_v62  ;;  %2166 = vmatmul.mubr.f32.gmra.mxu1 %v7091_v60  ;;  %v1355_v62 = vld [vmem:[#allocation11 + $0x218] sm:$0xff] }
 0x296   : > { %2327 = vmatmul.mubr.f32.gmra.mxu0 %v7096_v1  ;;  %2422 = vmatpush1.msra.mxu1 %v1383_v18  ;;  %v1580_v18 = vld [vmem:[#allocation11 + $0x920] sm:$0xff] }
 0x297   : > { %2582 = vmatprep.subr.mxu0 %v1608_v52  ;;  %2171 = vmatprep.mubr.f32.mxu1 %v7100_v7  ;;  %v1349_v52 = vld [vmem:[#allocation11 + $0x1e8] sm:$0xff] }
 0x298   : > { %2332 = vmatprep.mubr.f32.mxu0 %v7104_v10  ;;  %2423 = vmatprep.subr.mxu1 %v1377_v19  ;;  %v1579_v19 = vld [vmem:[#allocation11 + $0x918] sm:$0xff] }
 0x299   : > { %2583 = vmatpush1.msra.mxu0 %v1607_v3  ;;  %2424 = vmatpush1.msra.mxu1 %v1376_v28  ;;  %v1348_v3 = vld [vmem:[#allocation11 + $0x1e0] sm:$0xff]  ;;  %v1573_v28 = vld [vmem:[#allocation11 + $0x8e8] sm:$0xff] }
 0x29a   : > { %2584 = vmatprep.subr.mxu0 %v1601_v30  ;;  %2425 = vmatprep.subr.mxu1 %v1370_v34  ;;  %v1342_v30 = vld [vmem:[#allocation11 + $0x1b0] sm:$0xff]  ;;  %v1572_v34 = vld [vmem:[#allocation11 + $0x8e0] sm:$0xff] }
 0x29b   : > { %2585 = vmatpush1.msra.mxu0 %v1600_v13  ;;  %2172 = vmatmul.mubr.f32.gmra.mxu1 %v7109_v25  ;;  %v1341_v13 = vld [vmem:[#allocation11 + $0x1a8] sm:$0xff] }
 0x29c   : > { %2333 = vmatmul.mubr.f32.gmra.mxu0 %v7112_v33  ;;  %2426 = vmatpush1.msra.mxu1 %v1369_v42  ;;  %v1566_v42 = vld [vmem:[#allocation11 + $0x8b0] sm:$0xff] }
 0x29d   : > { %2586 = vmatprep.subr.mxu0 %v1594_v12  ;;  %2177 = vmatprep.mubr.f32.mxu1 %v7116_v43  ;;  %v1335_v12 = vld [vmem:[#allocation11 + $0x178] sm:$0xff] }
 0x29e   : > { %2338 = vmatprep.mubr.f32.mxu0 %v7120_v47  ;;  %2427 = vmatprep.subr.mxu1 %v1363_v2  ;;  %v1565_v2 = vld [vmem:[#allocation11 + $0x8a8] sm:$0xff] }
 0x29f   : > { %2587 = vmatpush1.msra.mxu0 %v1593_v20  ;;  %2428 = vmatpush1.msra.mxu1 %v1362_v21  ;;  %v1334_v20 = vld [vmem:[#allocation11 + $0x170] sm:$0xff]  ;;  %v1559_v21 = vld [vmem:[#allocation11 + $0x878] sm:$0xff] }
 0x2a0   : > { %2588 = vmatprep.subr.mxu0 %v1587_v27  ;;  %2429 = vmatprep.subr.mxu1 %v1356_v50  ;;  %v1328_v27 = vld [vmem:[#allocation11 + $0x140] sm:$0xff]  ;;  %v1558_v50 = vld [vmem:[#allocation11 + $0x870] sm:$0xff] }
 0x2a1   : > { %2589 = vmatpush1.msra.mxu0 %v1586_v23  ;;  %2178 = vmatmul.mubr.f32.gmra.mxu1 %v7125_v58  ;;  %v1327_v23 = vld [vmem:[#allocation11 + $0x138] sm:$0xff] }
 0x2a2   : > { %2339 = vmatmul.mubr.f32.gmra.mxu0 %v7128_v61  ;;  %2430 = vmatpush1.msra.mxu1 %v1355_v62  ;;  %v1552_v62 = vld [vmem:[#allocation11 + $0x840] sm:$0xff] }
 0x2a3   : > { %2590 = vmatprep.subr.mxu0 %v1580_v18  ;;  %2183 = vmatprep.mubr.f32.mxu1 %v7136_v5  ;;  %v1321_v18 = vld [vmem:[#allocation11 + $0x108] sm:$0xff] }
 0x2a4   : > { %2344 = vmatprep.mubr.f32.mxu0 %v7140_v31  ;;  %2431 = vmatprep.subr.mxu1 %v1349_v52  ;;  %v1551_v52 = vld [vmem:[#allocation11 + $0x838] sm:$0xff] }
 0x2a5   : > { %2591 = vmatpush1.msra.mxu0 %v1579_v19  ;;  %2432 = vmatpush1.msra.mxu1 %v1348_v3  ;;  %v1320_v19 = vld [vmem:[#allocation11 + $0x100] sm:$0xff]  ;;  %v1545_v3 = vld [vmem:[#allocation11 + $0x808] sm:$0xff] }
 0x2a6   : > { %2592 = vmatprep.subr.mxu0 %v1573_v28  ;;  %2433 = vmatprep.subr.mxu1 %v1342_v30  ;;  %v1314_v28 = vld [vmem:[#allocation11 + $0xd0] sm:$0xff]  ;;  %v1544_v30 = vld [vmem:[#allocation11 + $0x800] sm:$0xff] }
 0x2a7   : > { %2593 = vmatpush1.msra.mxu0 %v1572_v34  ;;  %2184 = vmatmul.mubr.f32.gmra.mxu1 %v7149_v29  ;;  %v1313_v34 = vld [vmem:[#allocation11 + $0xc8] sm:$0xff] }
 0x2a8   : > { %2345 = vmatmul.mubr.f32.gmra.mxu0 %v7152_v35  ;;  %2434 = vmatpush1.msra.mxu1 %v1341_v13  ;;  %v1538_v13 = vld [vmem:[#allocation11 + $0x7d0] sm:$0xff] }
 0x2a9   : > { %2594 = vmatprep.subr.mxu0 %v1566_v42  ;;  %2189 = vmatprep.mubr.f32.mxu1 %v7156_v46  ;;  %v1307_v42 = vld [vmem:[#allocation11 + $0x98] sm:$0xff] }
 0x2aa   : > { %2350 = vmatprep.mubr.f32.mxu0 %v7160_v53  ;;  %2435 = vmatprep.subr.mxu1 %v1335_v12  ;;  %v1537_v12 = vld [vmem:[#allocation11 + $0x7c8] sm:$0xff] }
 0x2ab   : > { %2595 = vmatpush1.msra.mxu0 %v1565_v2  ;;  %2436 = vmatpush1.msra.mxu1 %v1334_v20  ;;  %v1306_v2 = vld [vmem:[#allocation11 + $0x90] sm:$0xff]  ;;  %v1531_v20 = vld [vmem:[#allocation11 + $0x798] sm:$0xff] }
 0x2ac   : > { %2596 = vmatprep.subr.mxu0 %v1559_v21  ;;  %2437 = vmatprep.subr.mxu1 %v1328_v27  ;;  %v1300_v21 = vld [vmem:[#allocation11 + $0x60] sm:$0xff]  ;;  %v1530_v27 = vld [vmem:[#allocation11 + $0x790] sm:$0xff] }
 0x2ad   : > { %2597 = vmatpush1.msra.mxu0 %v1558_v50  ;;  %2190 = vmatmul.mubr.f32.gmra.mxu1 %v7169_v6  ;;  %v1299_v50 = vld [vmem:[#allocation11 + $0x58] sm:$0xff] }
 0x2ae   : > { %2351 = vmatmul.mubr.f32.gmra.mxu0 %v7172_v9  ;;  %2438 = vmatpush1.msra.mxu1 %v1327_v23  ;;  %v1524_v23 = vld [vmem:[#allocation11 + $0x760] sm:$0xff] }
 0x2af   : > { %2598 = vmatprep.subr.mxu0 %v1552_v62  ;;  %2195 = vmatprep.mubr.f32.mxu1 %v7181_v16  ;;  %v1293_v62 = vld [vmem:[#allocation11 + $0x28] sm:$0xff] }
 0x2b0   : > { %2356 = vmatprep.mubr.f32.mxu0 %v7186_v37  ;;  %2439 = vmatprep.subr.mxu1 %v1321_v18  ;;  %v1523_v18 = vld [vmem:[#allocation11 + $0x758] sm:$0xff] }
 0x2b1   : > { %2599 = vmatpush1.msra.mxu0 %v1551_v52  ;;  %2440 = vmatpush1.msra.mxu1 %v1320_v19  ;;  %v1292_v52 = vld [vmem:[#allocation11 + $0x20] sm:$0xff]  ;;  %v1517_v19 = vld [vmem:[#allocation11 + $0x728] sm:$0xff] }
 0x2b2   : > { %2600 = vmatprep.subr.mxu0 %v1545_v3  ;;  %2441 = vmatprep.subr.mxu1 %v1314_v28  ;;  %v1510_v3 = vld [vmem:[#allocation11 + $0x6f0] sm:$0xff] }
 0x2b3   : > { %2601 = vmatpush1.msra.mxu0 %v1544_v30  ;;  %2196 = vmatmul.mubr.f32.gmra.mxu1 %v7197_v59  ;;  %v10408_v28 = vld [vmem:[#allocation56_spill] sm:$0xff]  ;;  %v1516_v30 = vld [vmem:[#allocation11 + $0x720] sm:$0xff] }
 0x2b4   : > { %2357 = vmatmul.mubr.f32.gmra.mxu0 %v7202_v8  ;;  %2442 = vmatpush1.msra.mxu1 %v1313_v34  ;;  %v1509_v34 = vld [vmem:[#allocation11 + $0x6e8] sm:$0xff] }
 0x2b5   : > { %2602 = vmatprep.subr.mxu0 %v1538_v13  ;;  %2201 = vmatprep.mubr.f32.mxu1 %v7207_v32  ;;  %v1734_v13 = vld [vmem:[#allocation11 + $0xdf0] sm:$0xff] }
 0x2b6   : > { %2362 = vmatprep.mubr.f32.mxu0 %v7212_v36  ;;  %2443 = vmatprep.subr.mxu1 %v1307_v42  ;;  %v10409_v42 = vld [vmem:[#allocation57_spill] sm:$0xff] }
 0x2b7   : > { %2603 = vmatpush1.msra.mxu0 %v1537_v12  ;;  %2444 = vmatpush1.msra.mxu1 %v1306_v2  ;;  %v1503_v12 = vld [vmem:[#allocation11 + $0x6b8] sm:$0xff]  ;;  %v10410_v2 = vld [vmem:[#allocation58_spill] sm:$0xff] }
 0x2b8   : > { %2604 = vmatprep.subr.mxu0 %v1531_v20  ;;  %2445 = vmatprep.subr.mxu1 %v1300_v21  ;;  %v1733_v20 = vld [vmem:[#allocation11 + $0xde8] sm:$0xff]  ;;  %v1502_v21 = vld [vmem:[#allocation11 + $0x6b0] sm:$0xff] }
 0x2b9   : > { %2605 = vmatpush1.msra.mxu0 %v1530_v27  ;;  %2202 = vmatmul.mubr.f32.gmra.mxu1 %v7221_v54  ;;  %v10411_v27 = vld [vmem:[#allocation59_spill] sm:$0xff] }
 0x2ba   : > { %2363 = vmatmul.mubr.f32.gmra.mxu0 %v7224_v17  ;;  %2446 = vmatpush1.msra.mxu1 %v1299_v50  ;;  %v1727_v50 = vld [vmem:[#allocation11 + $0xdb8] sm:$0xff] }
 0x2bb   : > { %2606 = vmatprep.subr.mxu0 %v1524_v23  ;;  %2207 = vmatprep.mubr.f32.mxu1 %v7231_v14  ;;  %v1496_v23 = vld [vmem:[#allocation11 + $0x680] sm:$0xff] }
 0x2bc   : > { %2368 = vmatprep.mubr.f32.mxu0 %v10408_v28  ;;  %2447 = vmatprep.subr.mxu1 %v1293_v62  ;;  %v10412_v62 = vld [vmem:[#allocation60_spill] sm:$0xff] }
 0x2bd   : > { %2607 = vmatpush1.msra.mxu0 %v1523_v18  ;;  %2448 = vmatpush1.msra.mxu1 %v1292_v52  ;;  %v1726_v18 = vld [vmem:[#allocation11 + $0xdb0] sm:$0xff]  ;;  %v1495_v52 = vld [vmem:[#allocation11 + $0x678] sm:$0xff] }
 0x2be   : > { %2608 = vmatprep.subr.mxu0 %v1517_v19  ;;  %2449 = vmatprep.subr.mxu1 %v1510_v3  ;;  %v1720_v19 = vld [vmem:[#allocation11 + $0xd80] sm:$0xff]  ;;  %v10413_v3 = vld [vmem:[#allocation61_spill] sm:$0xff] }
 0x2bf   : > { %2609 = vmatpush1.msra.mxu0 %v1516_v30  ;;  %2208 = vmatmul.mubr.f32.gmra.mxu1 %v10409_v42  ;;  %v1489_v30 = vld [vmem:[#allocation11 + $0x648] sm:$0xff] }
 0x2c0   : > { %2369 = vmatmul.mubr.f32.gmra.mxu0 %v10410_v2  ;;  %2450 = vmatpush2.msra.mxu1 %v1509_v34  ;;  %v1719_v34 = vld [vmem:[#allocation11 + $0xd78] sm:$0xff] }
 0x2c1   : > { %2610 = vmatprep.subr.mxu0 %v1734_v13  ;;  %2213 = vmatprep.mubr.f32.mxu1 %v10411_v27  ;;  %v1488_v13 = vld [vmem:[#allocation11 + $0x640] sm:$0xff]  ;;  %v10414_v27 = vld [vmem:[#allocation63_spill] sm:$0xff] }
 0x2c2   : > { %2374 = vmatprep.mubr.f32.mxu0 %v10412_v62  ;;  %2451 = vmatprep.subr.mxu1 %v1503_v12  ;;  %v1713_v12 = vld [vmem:[#allocation11 + $0xd48] sm:$0xff]  ;;  %v1482_v62 = vld [vmem:[#allocation11 + $0x610] sm:$0xff] }
 0x2c3   : > { %2611 = vmatpush2.msra.mxu0 %v1733_v20  ;;  %2452 = vmatpush2.msra.mxu1 %v1502_v21  ;;  %v10415_v20 = vld [vmem:[#allocation64_spill] sm:$0xff]  ;;  %v1712_v21 = vld [vmem:[#allocation11 + $0xd40] sm:$0xff] }
 0x2c4   : > { %2612 = vmatprep.subr.mxu0 %v1727_v50  ;;  %2453 = vmatprep.subr.mxu1 %v1496_v23  ;;  %v1481_v50 = vld [vmem:[#allocation11 + $0x608] sm:$0xff]  ;;  %v1706_v23 = vld [vmem:[#allocation11 + $0xd10] sm:$0xff] }
 0x2c5   : > { %2613 = vmatpush2.msra.mxu0 %v1726_v18  ;;  %2214 = vmatmul.mubr.f32.gmra.mxu1 %v10413_v3  ;;  %v10416_v18 = vld [vmem:[#allocation65_spill] sm:$0xff] }
 0x2c6   : > { %2375 = vmatmul.mubr.f32.gmra.mxu0 %v7272_v48  ;;  %2454 = vmatpush2.msra.mxu1 %v1495_v52  ;;  %v1475_v52 = vld [vmem:[#allocation11 + $0x5d8] sm:$0xff]  ;;  %v10417_v48 = vld [vmem:[#allocation67_spill] sm:$0xff] }
 0x2c7   : > { %2614 = vmatprep.subr.mxu0 %v1720_v19  ;;  %2219 = vmatprep.mubr.f32.mxu1 %v10414_v27  ;;  %v1705_v19 = vld [vmem:[#allocation11 + $0xd08] sm:$0xff]  ;;  %v1474_v27 = vld [vmem:[#allocation11 + $0x5d0] sm:$0xff] }
 0x2c8   : > { %2380 = vmatprep.mubr.f32.mxu0 %v10415_v20  ;;  %2455 = vmatprep.subr.mxu1 %v1489_v30  ;;  %v1699_v30 = vld [vmem:[#allocation11 + $0xcd8] sm:$0xff]  ;;  %v1468_v20 = vld [vmem:[#allocation11 + $0x5a0] sm:$0xff] }
 0x2c9   : > { %2615 = vmatpush2.msra.mxu0 %v1719_v34  ;;  %2456 = vmatpush2.msra.mxu1 %v1488_v13  ;;  %v10418_v34 = vld [vmem:[#allocation68_spill] sm:$0xff] }
 0x2ca   : > { %2616 = vmatprep.subr.mxu0 %v1713_v12  ;;  %2457 = vmatprep.subr.mxu1 %v1482_v62  ;;  %v1698_v13 = vld [vmem:[#allocation11 + $0xcd0] sm:$0xff]  ;;  %v1467_v62 = vld [vmem:[#allocation11 + $0x598] sm:$0xff]  ;;  %v1692_v12 = vld [vmem:[#allocation11 + $0xca0] sm:$0xff] }
 0x2cb   : > { %2617 = vmatpush2.msra.mxu0 %v1712_v21  ;;  %2220 = vmatmul.mubr.f32.gmra.mxu1 %v10416_v18  ;;  %v10419_v21 = vld [vmem:[#allocation69_spill] sm:$0xff] }
 0x2cc   : > { %2381 = vmatmul.mubr.f32.gmra.mxu0 %v7294_v26  ;;  %2458 = vmatpush2.msra.mxu1 %v1481_v50  ;;  %v1461_v50 = vld [vmem:[#allocation11 + $0x568] sm:$0xff] }
 0x2cd   : > { %2618 = vmatprep.subr.mxu0 %v1706_v23  ;;  %2225 = vmatprep.mubr.f32.mxu1 %v10417_v48  ;;  %v1691_v23 = vld [vmem:[#allocation11 + $0xc98] sm:$0xff]  ;;  %v1460_v48 = vld [vmem:[#allocation11 + $0x560] sm:$0xff]  ;;  %v10420_v26 = vld [vmem:[#allocation71_spill] sm:$0xff] }
 0x2ce   : > { %2386 = vmatprep.mubr.f32.mxu0 %v10418_v34  ;;  %2459 = vmatprep.subr.mxu1 %v1475_v52  ;;  %v1685_v52 = vld [vmem:[#allocation11 + $0xc68] sm:$0xff]  ;;  %v1454_v34 = vld [vmem:[#allocation11 + $0x530] sm:$0xff] }
 0x2cf   : > { %2619 = vmatpush2.msra.mxu0 %v1705_v19  ;;  %2460 = vmatpush2.msra.mxu1 %v1474_v27  ;;  %v10421_v19 = vld [vmem:[#allocation72_spill] sm:$0xff]  ;;  %v1684_v27 = vld [vmem:[#allocation11 + $0xc60] sm:$0xff] }
 0x2d0   : > { %2620 = vmatprep.subr.mxu0 %v1699_v30  ;;  %2461 = vmatprep.subr.mxu1 %v1468_v20  ;;  %v1453_v20 = vld [vmem:[#allocation11 + $0x528] sm:$0xff]  ;;  %v1678_v30 = vld [vmem:[#allocation11 + $0xc30] sm:$0xff] }
 0x2d1   : > { %2621 = vmatpush2.msra.mxu0 %v1698_v13  ;;  %2226 = vmatmul.mubr.f32.gmra.mxu1 %v10419_v21  ;;  %v10422_v13 = vld [vmem:[#allocation73_spill] sm:$0xff] }
 0x2d2   : > { %2387 = vmatmul.mubr.f32.gmra.mxu0 %v7312_v24  ;;  %2462 = vmatpush2.msra.mxu1 %v1467_v62  ;;  %v1447_v62 = vld [vmem:[#allocation11 + $0x4f8] sm:$0xff] }
 0x2d3   : > { %2622 = vmatprep.subr.mxu0 %v1692_v12  ;;  %2231 = vmatprep.mubr.f32.mxu1 %v10420_v26  ;;  %v1677_v12 = vld [vmem:[#allocation11 + $0xc28] sm:$0xff]  ;;  %v1446_v26 = vld [vmem:[#allocation11 + $0x4f0] sm:$0xff] }
 0x2d4   : > { %2392 = vmatprep.mubr.f32.mxu0 %v10421_v19  ;;  %2463 = vmatprep.subr.mxu1 %v1461_v50  ;;  %v1671_v50 = vld [vmem:[#allocation11 + $0xbf8] sm:$0xff]  ;;  %v1440_v19 = vld [vmem:[#allocation11 + $0x4c0] sm:$0xff] }
 0x2d5   : > { %2623 = vmatpush2.msra.mxu0 %v1691_v23  ;;  %2464 = vmatpush2.msra.mxu1 %v1460_v48  ;;  %v10423_v23 = vld [vmem:[#allocation75_spill] sm:$0xff]  ;;  %v1670_v48 = vld [vmem:[#allocation11 + $0xbf0] sm:$0xff] }
 0x2d6   : > { %2624 = vmatprep.subr.mxu0 %v1685_v52  ;;  %2465 = vmatprep.subr.mxu1 %v1454_v34  ;;  %v1439_v34 = vld [vmem:[#allocation11 + $0x4b8] sm:$0xff]  ;;  %v1664_v52 = vld [vmem:[#allocation11 + $0xbc0] sm:$0xff] }
 0x2d7   : > { %2625 = vmatpush2.msra.mxu0 %v1684_v27  ;;  %2232 = vmatmul.mubr.f32.gmra.mxu1 %v10422_v13  ;;  %v10424_v27 = vld [vmem:[#allocation76_spill] sm:$0xff] }
 0x2d8   : > { %2393 = vmatmul.mubr.f32.gmra.mxu0 %v7334_v45  ;;  %2466 = vmatpush2.msra.mxu1 %v1453_v20  ;;  %v1433_v20 = vld [vmem:[#allocation11 + $0x488] sm:$0xff] }
 0x2d9   : > { %2626 = vmatprep.subr.mxu0 %v1678_v30  ;;  %2237 = vmatprep.mubr.f32.mxu1 %v7339_v63  ;;  %v1663_v30 = vld [vmem:[#allocation11 + $0xbb8] sm:$0xff]  ;;  %v1432_v63 = vld [vmem:[#allocation11 + $0x480] sm:$0xff] }
 0x2da   : > { %2398 = vmatprep.mubr.f32.mxu0 %v10423_v23  ;;  %2467 = vmatprep.subr.mxu1 %v1447_v62  ;;  %v1657_v62 = vld [vmem:[#allocation11 + $0xb88] sm:$0xff]  ;;  %v1426_v23 = vld [vmem:[#allocation11 + $0x450] sm:$0xff] }
 0x2db   : > { %2627 = vmatpush2.msra.mxu0 %v1677_v12  ;;  %2468 = vmatpush2.msra.mxu1 %v1446_v26  ;;  %v1656_v26 = vld [vmem:[#allocation11 + $0xb80] sm:$0xff]  ;;  %v1650_v12 = vld [vmem:[#allocation11 + $0xb50] sm:$0xff] }
 0x2dc   : > { %2628 = vmatprep.subr.mxu0 %v1671_v50  ;;  %2469 = vmatprep.subr.mxu1 %v1440_v19  ;;  %v1425_v19 = vld [vmem:[#allocation11 + $0x448] sm:$0xff]  ;;  %v1419_v50 = vld [vmem:[#allocation11 + $0x418] sm:$0xff] }
 0x2dd   : > { %2629 = vmatpush2.msra.mxu0 %v1670_v48  ;;  %2238 = vmatmul.mubr.f32.gmra.mxu1 %v10424_v27  ;;  %v1649_v48 = vld [vmem:[#allocation11 + $0xb48] sm:$0xff] }
 0x2de   : > { %2399 = vmatmul.mubr.f32.gmra.mxu0 %v7352_v11  ;;  %2470 = vmatpush2.msra.mxu1 %v1439_v34  ;;  %v1418_v34 = vld [vmem:[#allocation11 + $0x410] sm:$0xff] }
 0x2df   : > { %2630 = vmatprep.subr.mxu0 %v1664_v52  ;;  %2243 = vmatprep.mubr.f32.mxu1 %v7357_v0  ;;  %v1643_v52 = vld [vmem:[#allocation11 + $0xb18] sm:$0xff] }
 0x2e0   : > { %2404 = vmatprep.mubr.f32.mxu0 %v7362_v49  ;;  %2471 = vmatprep.subr.mxu1 %v1433_v20  ;;  %v1412_v20 = vld [vmem:[#allocation11 + $0x3e0] sm:$0xff] }
 0x2e1   : > { %2631 = vmatpush2.msra.mxu0 %v1663_v30  ;;  %2472 = vmatpush2.msra.mxu1 %v1432_v63  ;;  %v1642_v63 = vld [vmem:[#allocation11 + $0xb10] sm:$0xff]  ;;  %v1636_v30 = vld [vmem:[#allocation11 + $0xae0] sm:$0xff] }
 0x2e2   : > { %2632 = vmatprep.subr.mxu0 %v1657_v62  ;;  %2473 = vmatprep.subr.mxu1 %v1426_v23  ;;  %v1411_v23 = vld [vmem:[#allocation11 + $0x3d8] sm:$0xff]  ;;  %v1405_v62 = vld [vmem:[#allocation11 + $0x3a8] sm:$0xff] }
 0x2e3   : > { %2633 = vmatpush2.msra.mxu0 %v1656_v26  ;;  %2244 = vmatmul.mubr.f32.gmra.mxu1 %v7367_v4  ;;  %v1635_v26 = vld [vmem:[#allocation11 + $0xad8] sm:$0xff] }
 0x2e4   : > { %2405 = vmatmul.mubr.f32.gmra.mxu0 %v7370_v51  ;;  %2474 = vmatpush2.msra.mxu1 %v1425_v19  ;;  %v1404_v19 = vld [vmem:[#allocation11 + $0x3a0] sm:$0xff] }
 0x2e5   : > { %2634 = vmatprep.subr.mxu0 %v1650_v12  ;;  %2249 = vmatprep.mubr.f32.mxu1 %v7374_v22  ;;  %v1736_v12 = vld [vmem:[#allocation13] sm:$0xff] }
 0x2e6   : > { %2410 = vmatprep.mubr.f32.mxu0 %v7378_v57  ;;  %2475 = vmatprep.subr.mxu1 %v1419_v50  ;;  %v1629_v50 = vld [vmem:[#allocation11 + $0xaa8] sm:$0xff]  ;;  %v1511_v57 = vld [vmem:[#allocation11 + $0x6f8] sm:$0xff] }
 0x2e7   : > { %2635 = vmatpush2.msra.mxu0 %v1649_v48  ;;  %2476 = vmatpush2.msra.mxu1 %v1418_v34  ;;  %v1628_v48 = vld [vmem:[#allocation11 + $0xaa0] sm:$0xff]  ;;  %v1399_v34 = vld [vmem:[#allocation11 + $0x378] sm:$0xff] }
 0x2e8   : > { %2636 = vmatprep.subr.mxu0 %v1643_v52  ;;  %2477 = vmatprep.subr.mxu1 %v1412_v20  ;;  %v10425_v52 = vld [vmem:[#allocation24_spill] sm:$0xff] }
 0x2e9   : > { %2637 = vmatpush2.msra.mxu0 %v1642_v63  ;;  %2250 = vmatmul.mubr.f32.gmra.mxu1 %v7381_v44  ;;  %v7456_v20 = vrot.slane %v1736_v12, %v10425_v52  ;;  %v1735_v63 = vld [vmem:[#allocation11 + $0xdf8] sm:$0xff] }
 0x2ea   : > { %2411 = vmatmul.mubr.f32.gmra.mxu0 %v7384_v15  ;;  %2478 = vmatpush2.msra.mxu1 %v1411_v23  ;;  %v1504_v23 = vld [vmem:[#allocation11 + $0x6c0] sm:$0xff] }
 0x2eb   : > { %2638 = vmatprep.subr.mxu0 %v1636_v30  ;;  %2479 = vmatprep.subr.mxu1 %v1405_v62  ;;  %v10426_v30 = vld [vmem:[#allocation25_spill] sm:$0xff] }
 0x2ec   : > { %2481 = vmatprep.mubr.f32.mxu1 %v7071_v38  ;;  %2639 = vmatpush2.msra.mxu0 %v1635_v26  ;;  %v7460_v62 = vrot.slane %v1736_v12, %v10426_v30  ;;  %v1623_v26 = vld [vmem:[#allocation11 + $0xa78] sm:$0xff]  ;;  %v1728_v12 = vld [vmem:[#allocation11 + $0xdc0] sm:$0xff]  ;;  %v1497_v30 = vld [vmem:[#allocation11 + $0x688] sm:$0xff] }
 0x2ed   : > { %2642 = vmatprep.mubr.f32.mxu0 %v7073_v39  ;;  %2480 = vmatpush2.msra.mxu1 %v1404_v19 }
 0x2ee   : > { %2640 = vmatprep.subr.mxu0 %v1629_v50  ;;  %5431 = vmatprep.subr.mxu1 %v1511_v57  ;;  %v1392_v50 = vld [vmem:[#allocation11 + $0x340] sm:$0xff] }
 0x2ef   : > { %2641 = vmatpush2.msra.mxu0 %v1628_v48  ;;  %2482 = vmatmul.mubr.f32.vlgmr.msra.gmra.mxu1 %v7075_v40 }
 0x2f0   : > { %2643 = vmatmul.mubr.f32.vlgmr.msra.gmra.mxu0 %v7077_v41  ;;  %5432 = vmatpush3.msra.mxu1 %v1399_v34  ;;  %v1839_v39 = vpop.f32.mrf.mxu1  ;;  %v2000_v19 = vpop.f32.mrf.mxu0 }
 0x2f1   : > { %2487 = vmatprep.mubr.f32.mxu1 %v7087_v55  ;;  %2648 = vmatprep.mubr.f32.mxu0 %v7089_v56  ;;  %v1840_v57 = vadd.f32 %v1839_v39, %v7456_v20  ;;  %v1616_v56 = vld [vmem:[#allocation11 + $0xa40] sm:$0xff]  ;;  %v1385_v39 = vld [vmem:[#allocation11 + $0x308] sm:$0xff] }
 0x2f2   : > { %5511 = vmatprep.subr.mxu0 %v1735_v63  ;;  %5433 = vmatprep.subr.mxu1 %v1504_v23  ;;  %v1841_v48 = vpop.f32.mrf.mxu1  ;;  %v2002_v52 = vpop.f32.mrf.mxu0 }
 0x2f3   : > { %5512 = vmatpush3.msra.mxu0 %v1623_v26  ;;  %2488 = vmatmul.mubr.f32.gmra.mxu1 %v7091_v60  ;;  %v7467_v34 = vadd.f32 %v2000_v19, %v1840_v57  ;;  %v1842_v41 = vadd.f32 %v1841_v48, %v7460_v62  ;;  %v1490_v48 = vld [vmem:[#allocation11 + $0x650] sm:$0xff] }
 0x2f4   : > { %2649 = vmatmul.mubr.f32.gmra.mxu0 %v7096_v1  ;;  %5434 = vmatpush3.msra.mxu1 %v1392_v50  ;;  %v1721_v50 = vld [vmem:[#allocation11 + $0xd88] sm:$0xff] }
 0x2f5   : > { %2493 = vmatprep.mubr.f32.mxu1 %v7100_v7  ;;  %2654 = vmatprep.mubr.f32.mxu0 %v7104_v10  ;;  %v3029_v63 = vand.u32 2147483647, %v7467_v34  ;;  %v1845_v23 = vpop.f32.mrf.mxu1  ;;  %v7474_v26 = vadd.f32 %v2002_v52, %v1842_v41  ;;  %v1609_v10 = vld [vmem:[#allocation11 + $0xa08] sm:$0xff]  ;;  %v1378_v41 = vld [vmem:[#allocation11 + $0x2d0] sm:$0xff]  ;;  %vm3589_vm2 = vcmp.ge.f32.partialorder %v7467_v34, 0.0 }
 0x2f6   : > { %5513 = vmatprep.subr.mxu0 %v1728_v12  ;;  %5435 = vmatprep.subr.mxu1 %v1497_v30  ;;  %v1846_v19 = vadd.f32 %v1845_v23, %v7456_v20  ;;  %v2006_v57 = vpop.f32.mrf.mxu0  ;;  %v1483_v23 = vld [vmem:[#allocation11 + $0x618] sm:$0xff] }
 0x2f7   : > { %5514 = vmatpush3.msra.mxu0 %v1616_v56  ;;  %2494 = vmatmul.mubr.f32.gmra.mxu1 %v7109_v25  ;;  %v3141_v1 = vsub.f32 0.0, %v3029_v63  ;;  %v1847_v7 = vpop.f32.mrf.mxu1  ;;  %v3030_v60 = vand.u32 2147483647, %v7474_v26  ;;  %vm3590_vm3 = vcmp.ge.f32.partialorder %v7474_v26, 0.0 }
 0x2f8   : > { %2655 = vmatmul.mubr.f32.gmra.mxu0 %v7112_v33  ;;  %5436 = vmatpush3.msra.mxu1 %v1385_v39  ;;  %v2008_v12 = vpop.f32.mrf.mxu0  ;;  %v7482_v56 = vadd.f32 %v2006_v57, %v1846_v19  ;;  %v1848_v30 = vadd.f32 %v1847_v7, %v7460_v62  ;;  %v1714_v39 = vld [vmem:[#allocation11 + $0xd50] sm:$0xff] }
 0x2f9   : > { %2499 = vmatprep.mubr.f32.mxu1 %v7116_v43  ;;  %2660 = vmatprep.mubr.f32.mxu0 %v7120_v47  ;;  %v3253_v52 = vmul.f32 1.442695, %v3141_v1  ;;  %v3142_v63 = vsub.f32 0.0, %v3030_v60  ;;  %v1602_v1 = vld [vmem:[#allocation11 + $0x9d0] sm:$0xff]  ;;  %v1371_v60 = vld [vmem:[#allocation11 + $0x298] sm:$0xff] }
 0x2fa   : > { %5515 = vmatprep.subr.mxu0 %v1721_v50  ;;  %5437 = vmatprep.subr.mxu1 %v1490_v48  ;;  %v3036_v33 = vand.u32 2147483647, %v7482_v56  ;;  %v7488_v57 = vadd.f32 %v2008_v12, %v1848_v30  ;;  %v1707_v12 = vld [vmem:[#allocation11 + $0xd18] sm:$0xff]  ;;  %v1476_v30 = vld [vmem:[#allocation11 + $0x5e0] sm:$0xff]  ;;  %vm3596_vm4 = vcmp.ge.f32.partialorder %v7482_v56, 0.0 }
 0x2fb   : > { %5516 = vmatpush3.msra.mxu0 %v1609_v10  ;;  %2500 = vmatmul.mubr.f32.gmra.mxu1 %v7125_v58  ;;  %5718 = vpow2.f32 %v3253_v52  ;;  %v1851_v43 = vpop.f32.mrf.mxu1  ;;  %v3255_v19 = vmul.f32 1.442695, %v3142_v63 }
 0x2fc   : > { %2661 = vmatmul.mubr.f32.gmra.mxu0 %v7128_v61  ;;  %5438 = vmatpush3.msra.mxu1 %v1378_v41  ;;  %v1852_v7 = vadd.f32 %v1851_v43, %v7456_v20  ;;  %v2012_v50 = vpop.f32.mrf.mxu0  ;;  %v3148_v10 = vsub.f32 0.0, %v3036_v33  ;;  %v3037_v52 = vand.u32 2147483647, %v7488_v57  ;;  %vm3597_vm5 = vcmp.ge.f32.partialorder %v7488_v57, 0.0 }
 0x2fd   : > { %2505 = vmatprep.mubr.f32.mxu1 %v7136_v5  ;;  %2666 = vmatprep.mubr.f32.mxu0 %v7140_v31  ;;  %v1853_v48 = vpop.f32.mrf.mxu1  ;;  %5720 = vpow2.f32 %v3255_v19  ;;  %v1595_v31 = vld [vmem:[#allocation11 + $0x998] sm:$0xff] }
 0x2fe   : > { %5517 = vmatprep.subr.mxu0 %v1714_v39  ;;  %5439 = vmatprep.subr.mxu1 %v1483_v23  ;;  %v2014_v41 = vpop.f32.mrf.mxu0  ;;  %v3267_v43 = vmul.f32 1.442695, %v3148_v10  ;;  %v7495_v63 = vadd.f32 %v2012_v50, %v1852_v7  ;;  %v3149_v33 = vsub.f32 0.0, %v3037_v52  ;;  %v1854_v39 = vadd.f32 %v1853_v48, %v7460_v62  ;;  %v1364_v23 = vld [vmem:[#allocation11 + $0x260] sm:$0xff]  ;;  %v1469_v48 = vld [vmem:[#allocation11 + $0x5a8] sm:$0xff] }
 0x2ff   : > { %5518 = vmatpush3.msra.mxu0 %v1602_v1  ;;  %2506 = vmatmul.mubr.f32.gmra.mxu1 %v7149_v29 }
 0x300   : > { %2667 = vmatmul.mubr.f32.gmra.mxu0 %v7152_v35  ;;  %5440 = vmatpush3.msra.mxu1 %v1371_v60  ;;  %5722 = vpow2.f32 %v3267_v43  ;;  %v3043_v1 = vand.u32 2147483647, %v7495_v63  ;;  %v3269_v7 = vmul.f32 1.442695, %v3149_v33  ;;  %v7502_v50 = vadd.f32 %v2014_v41, %v1854_v39  ;;  %v1700_v60 = vld [vmem:[#allocation11 + $0xce0] sm:$0xff] }
 0x301   : > { %2511 = vmatprep.mubr.f32.mxu1 %v7156_v46  ;;  %2672 = vmatprep.mubr.f32.mxu0 %v7160_v53  ;;  %v1857_v19 = vpop.f32.mrf.mxu1  ;;  %v1588_v43 = vld [vmem:[#allocation11 + $0x960] sm:$0xff]  ;;  %vm3603_vm6 = vcmp.ge.f32.partialorder %v7495_v63, 0.0 }
 0x302   : > { %5519 = vmatprep.subr.mxu0 %v1707_v12  ;;  %5441 = vmatprep.subr.mxu1 %v1476_v30  ;;  %v2018_v10 = vpop.f32.mrf.mxu0  ;;  %v3155_v52 = vsub.f32 0.0, %v3043_v1  ;;  %v1858_v46 = vadd.f32 %v1857_v19, %v7456_v20  ;;  %5724 = vpow2.f32 %v3269_v7  ;;  %v3044_v12 = vand.u32 2147483647, %v7502_v50  ;;  %v1462_v19 = vld [vmem:[#allocation11 + $0x570] sm:$0xff]  ;;  %v1336_v35 = vld [vmem:[#allocation11 + $0x180] sm:$0xff] }
 0x303   : > { %5520 = vmatpush3.msra.mxu0 %v1595_v31  ;;  %2512 = vmatmul.mubr.f32.gmra.mxu1 %v7169_v6  ;;  %v1859_v53 = vpop.f32.mrf.mxu1  ;;  %v1357_v31 = vld [vmem:[#allocation11 + $0x228] sm:$0xff]  ;;  %v10428_v6 = vld [vmem:[#allocation60_spill] sm:$0xff]  ;;  %vm3604_vm7 = vcmp.ge.f32.partialorder %v7502_v50, 0.0 }
 0x304   : > { %2673 = vmatmul.mubr.f32.gmra.mxu0 %v7172_v9  ;;  %5442 = vmatpush3.msra.mxu1 %v1364_v23  ;;  %v2020_v41 = vpop.f32.mrf.mxu0  ;;  %v3281_v30 = vmul.f32 1.442695, %v3155_v52  ;;  %v7510_v33 = vadd.f32 %v2018_v10, %v1858_v46  ;;  %v3156_v39 = vsub.f32 0.0, %v3044_v12  ;;  %v1860_v1 = vadd.f32 %v1859_v53, %v7460_v62  ;;  %v1693_v23 = vld [vmem:[#allocation11 + $0xca8] sm:$0xff] }
 0x305   : > { %2517 = vmatprep.mubr.f32.mxu1 %v7181_v16  ;;  %2678 = vmatprep.mubr.f32.mxu0 %v7186_v37  ;;  %v4149_v7 = vld [vmem:[%s6932_s13] sm:$0xff] }
 0x306   : > { %5521 = vmatprep.subr.mxu0 %v1700_v60  ;;  %5443 = vmatprep.subr.mxu1 %v1469_v48  ;;  %5726 = vpow2.f32 %v3281_v30  ;;  %v3050_v16 = vand.u32 2147483647, %v7510_v33  ;;  %v1581_v46 = vld [vmem:[#allocation11 + $0x928] sm:$0xff]  ;;  %v3283_v10 = vmul.f32 1.442695, %v3156_v39  ;;  %v7519_v60 = vadd.f32 %v2020_v41, %v1860_v1  ;;  %v1350_v48 = vld [vmem:[#allocation11 + $0x1f0] sm:$0xff] }
 0x307   : > { %5522 = vmatpush3.msra.mxu0 %v1588_v43  ;;  %2518 = vmatmul.mubr.f32.gmra.mxu1 %v7197_v59  ;;  %v1863_v9 = vpop.f32.mrf.mxu1  ;;  %v4373_v39 = vmul.f32 %v4149_v7, %v7467_v34  ;;  %vm3610_vm8 = vcmp.ge.f32.partialorder %v7510_v33, 0.0 }
 0x308   : > { %v7516_v37 = vpop.eup %5718  ;;  %2679 = vmatmul.mubr.f32.gmra.mxu0 %v7202_v8  ;;  %5444 = vmatpush3.msra.mxu1 %v1357_v31  ;;  %v2024_v53 = vpop.f32.mrf.mxu0  ;;  %v3162_v43 = vsub.f32 0.0, %v3050_v16  ;;  %v1864_v12 = vadd.f32 %v1863_v9, %v7456_v20  ;;  %v4261_v31 = vmax.f32 %v7467_v34, 0.0  ;;  %5728 = vpow2.f32 %v3283_v10  ;;  %v1686_v16 = vld [vmem:[#allocation11 + $0xc70] sm:$0xff] }
 0x309   : > { %2523 = vmatprep.mubr.f32.mxu1 %v7207_v32  ;;  %2684 = vmatprep.mubr.f32.mxu0 %v7212_v36  ;;  %v3477_v52 = vadd.f32 1.0, %v7516_v37  ;;  %v1865_v30 = vpop.f32.mrf.mxu1  ;;  %v3051_v41 = vand.u32 2147483647, %v7519_v60  ;;  %v1455_v36 = vld [vmem:[#allocation11 + $0x538] sm:$0xff]  ;;  %v4156_v32 = vld [vmem:[%s6932_s13 + $0x38] sm:$0xff]  ;;  %vm3611_vm9 = vcmp.ge.f32.partialorder %v7519_v60, 0.0 }
 0x30a   : > { %5523 = vmatprep.subr.mxu0 %v1693_v23  ;;  %5445 = vmatprep.subr.mxu1 %v1462_v19  ;;  %v7528_v1 = vpop.eup %5720  ;;  %v3295_v9 = vmul.f32 1.442695, %v3162_v43  ;;  %v2026_v23 = vpop.f32.mrf.mxu0  ;;  %v1574_v19 = vld [vmem:[#allocation11 + $0x8f0] sm:$0xff]  ;;  %v7537_v8 = vadd.f32 %v2024_v53, %v1864_v12  ;;  %v1866_v43 = vadd.f32 %v1865_v30, %v7460_v62  ;;  %v1448_v53 = vld [vmem:[#allocation11 + $0x500] sm:$0xff]  ;;  %v4262_v12 = vmax.f32 %v7474_v26, 0.0 }
 0x30b   : > { %5524 = vmatpush3.msra.mxu0 %v1581_v46  ;;  %2524 = vmatmul.mubr.f32.gmra.mxu1 %v7221_v54  ;;  %5730 = vrcp.f32 %v3477_v52  ;;  %v3478_v7 = vadd.f32 1.0, %v7528_v1  ;;  %v3163_v10 = vsub.f32 0.0, %v3051_v41  ;;  %v1343_v46 = vld [vmem:[#allocation11 + $0x1b8] sm:$0xff]  ;;  %v7542_v41 = vsub.f32 %v4261_v31, %v4373_v39 }
 0x30c   : > { %2685 = vmatmul.mubr.f32.gmra.mxu0 %v7224_v17  ;;  %5446 = vmatpush3.msra.mxu1 %v1350_v48  ;;  %5732 = vlog2.f32 %v3477_v52  ;;  %v4150_v54 = vld [vmem:[%s6932_s13 + $0x8] sm:$0xff]  ;;  %v3057_v31 = vand.u32 2147483647, %v7537_v8  ;;  %v10427_v17 = vld [vmem:[#allocation59_spill] sm:$0xff]  ;;  %vm3617_vm10 = vcmp.ge.f32.partialorder %v7537_v8, 0.0 }
 0x30d   : > { %2529 = vmatprep.mubr.f32.mxu1 %v7231_v14  ;;  %2690 = vmatprep.mubr.f32.mxu0 %v10408_v28  ;;  %5734 = vpow2.f32 %v3295_v9  ;;  %v1869_v59 = vpop.f32.mrf.mxu1  ;;  %v7540_v48 = vpop.eup %5722  ;;  %v1679_v52 = vld [vmem:[#allocation11 + $0xc38] sm:$0xff]  ;;  %v3297_v14 = vmul.f32 1.442695, %v3163_v10  ;;  %v4374_v9 = vmul.f32 %v4150_v54, %v7474_v26  ;;  %v4380_v10 = vmul.f32 %v4156_v32, %v7482_v56  ;;  %v1672_v54 = vld [vmem:[#allocation11 + $0xc00] sm:$0xff] }
 0x30e   : > { %5525 = vmatprep.subr.mxu0 %v1686_v16  ;;  %5447 = vmatprep.subr.mxu1 %v1455_v36  ;;  %5736 = vrcp.f32 %v3478_v7  ;;  %v1870_v28 = vadd.f32 %v1869_v59, %v7456_v20  ;;  %v3484_v30 = vadd.f32 1.0, %v7540_v48  ;;  %v4157_v36 = vld [vmem:[%s6932_s13 + $0x40] sm:$0xff]  ;;  %v2030_v39 = vpop.f32.mrf.mxu0  ;;  %v1567_v59 = vld [vmem:[#allocation11 + $0x8b8] sm:$0xff]  ;;  %v3169_v29 = vsub.f32 0.0, %v3057_v31 }
 0x30f   : > { %5526 = vmatpush3.msra.mxu0 %v1574_v19  ;;  %2530 = vmatmul.mubr.f32.gmra.mxu1 %v10409_v42  ;;  %5738 = vlog2.f32 %v3478_v7  ;;  %v7551_v16 = vpop.f32.mrf.mxu1  ;;  %v4268_v19 = vmax.f32 %v7482_v56, 0.0  ;;  %v4163_v42 = vld [vmem:[%s6932_s13 + $0x70] sm:$0xff]  ;;  %v7558_v7 = vpop.eup %5724  ;;  %v4381_v5 = vmul.f32 %v4157_v36, %v7488_v57  ;;  %v4275_v31 = vmax.f32 %v7495_v63, 0.0 }
 0x310   : > { %2691 = vmatmul.mubr.f32.gmra.mxu0 %v10410_v2  ;;  %5448 = vmatpush3.msra.mxu1 %v1343_v46  ;;  %5740 = vpow2.f32 %v3297_v14  ;;  %v7562_v2 = vadd.f32 %v2026_v23, %v1866_v43  ;;  %v7564_v46 = vadd.f32 %v2030_v39, %v1870_v28  ;;  %v3485_v32 = vadd.f32 1.0, %v7558_v7  ;;  %v10429_v39 = vld [vmem:[#allocation62_spill] sm:$0xff] }
 0x311   : > { %2535 = vmatprep.mubr.f32.mxu1 %v10427_v17  ;;  %2696 = vmatprep.mubr.f32.mxu0 %v10428_v6  ;;  %5742 = vrcp.f32 %v3484_v30  ;;  %v4269_v14 = vmax.f32 %v7488_v57, 0.0  ;;  %v1441_v6 = vld [vmem:[#allocation11 + $0x4c8] sm:$0xff]  ;;  %v4387_v23 = vmul.f32 %v4163_v42, %v7495_v63  ;;  %v3309_v28 = vmul.f32 1.442695, %v3169_v29  ;;  %v1560_v36 = vld [vmem:[#allocation11 + $0x880] sm:$0xff]  ;;  %v10431_v29 = vld [vmem:[#allocation64_spill] sm:$0xff] }
 0x312   : > { %5527 = vmatprep.subr.mxu0 %v1679_v52  ;;  %5449 = vmatprep.subr.mxu1 %v1448_v53  ;;  %5744 = vlog2.f32 %v3484_v30  ;;  %v3058_v43 = vand.u32 2147483647, %v7562_v2  ;;  %v2032_v52 = vpop.f32.mrf.mxu0  ;;  %v10430_v42 = vld [vmem:[#allocation63_spill] sm:$0xff]  ;;  %vm3618_vm11 = vcmp.ge.f32.partialorder %v7562_v2, 0.0  ;;  %vm3624_vm12 = vcmp.ge.f32.partialorder %v7564_v46, 0.0 }
 0x313   : > { %5528 = vmatpush3.msra.mxu0 %v1567_v59  ;;  %2536 = vmatmul.mubr.f32.gmra.mxu1 %v10413_v3  ;;  %v7573_v53 = vpop.f32.mrf.mxu1  ;;  %v7575_v30 = vpop.eup %5726  ;;  %v7579_v59 = vsub.f32 %v4262_v12, %v4374_v9  ;;  %5746 = vrcp.f32 %v3485_v32  ;;  %v3064_v3 = vand.u32 2147483647, %v7564_v46  ;;  %v1329_v17 = vld [vmem:[#allocation11 + $0x148] sm:$0xff]  ;;  %v7588_v12 = vsub.f32 %v4268_v19, %v4380_v10  ;;  %v10432_v10 = vld [vmem:[#allocation66_spill] sm:$0xff] }
 0x314   : > { %2697 = vmatmul.mubr.f32.gmra.mxu0 %v10429_v39  ;;  %5450 = vmatpush3.msra.mxu1 %v1336_v35  ;;  %5748 = vlog2.f32 %v3485_v32  ;;  %v3491_v61 = vadd.f32 1.0, %v7575_v30  ;;  %v3170_v35 = vsub.f32 0.0, %v3058_v43  ;;  %v7590_v9 = vsub.f32 %v4269_v14, %v4381_v5  ;;  %v1665_v32 = vld [vmem:[#allocation11 + $0xbc8] sm:$0xff]  ;;  %v7600_v19 = vpop.f32.mrf.mxu0 }
 0x315   : > { %2541 = vmatprep.mubr.f32.mxu1 %v10430_v42  ;;  %2702 = vmatprep.mubr.f32.mxu0 %v10431_v29  ;;  %v7586_v39 = vpop.f32.mrf.mxu1  ;;  %5750 = vpow2.f32 %v3309_v28  ;;  %v3176_v42 = vsub.f32 0.0, %v3064_v3  ;;  %v7592_v58 = vpop.eup %5728  ;;  %v1434_v29 = vld [vmem:[#allocation11 + $0x490] sm:$0xff]  ;;  %v7595_v47 = vsub.f32 %v4275_v31, %v4387_v23  ;;  %v4164_v43 = vld [vmem:[%s6932_s13 + $0x78] sm:$0xff] }
 0x316   : > { %5529 = vmatprep.subr.mxu0 %v1672_v54  ;;  %5451 = vmatprep.subr.mxu1 %v1441_v6  ;;  %5752 = vrcp.f32 %v3491_v61  ;;  %v3311_v25 = vmul.f32 1.442695, %v3170_v35  ;;  %v1872_v6 = vadd.f32 %v7551_v16, %v7460_v62  ;;  %v1553_v3 = vld [vmem:[#allocation11 + $0x848] sm:$0xff]  ;;  %v3701_v54 = vsel %vm3589_vm2, 1.0, %v7516_v37  ;;  %v10434_v16 = vld [vmem:[#allocation68_spill] sm:$0xff] }
 0x317   : > { %5530 = vmatpush3.msra.mxu0 %v1560_v36  ;;  %2542 = vmatmul.mubr.f32.gmra.mxu1 %v10416_v18  ;;  %5754 = vlog2.f32 %v3491_v61  ;;  %v3492_v14 = vadd.f32 1.0, %v7592_v58  ;;  %v3323_v31 = vmul.f32 1.442695, %v3176_v42  ;;  %v10433_v28 = vld [vmem:[#allocation67_spill] sm:$0xff]  ;;  %v1322_v36 = vld [vmem:[#allocation11 + $0x110] sm:$0xff]  ;;  %v3702_v42 = vsel %vm3590_vm3, 1.0, %v7528_v1 }
 0x318   : > { %v5731_v5 = vpop.eup %5730  ;;  %2703 = vmatmul.mubr.f32.gmra.mxu0 %v10432_v10  ;;  %5452 = vmatpush3.msra.mxu1 %v1329_v17  ;;  %5756 = vpow2.f32 %v3311_v25  ;;  %v7611_v10 = vadd.f32 %v2032_v52, %v1872_v6  ;;  %v1658_v25 = vld [vmem:[#allocation11 + $0xb90] sm:$0xff]  ;;  %v1427_v52 = vld [vmem:[#allocation11 + $0x458] sm:$0xff]  ;;  %v1413_v57 = vld [vmem:[#allocation11 + $0x3e8] sm:$0xff] }
 0x319   : > { %v5733_v23 = vpop.eup %5732  ;;  %2547 = vmatprep.mubr.f32.mxu1 %v10433_v28  ;;  %2708 = vmatprep.mubr.f32.mxu0 %v10434_v16  ;;  %v3814_v35 = vmul.f32 %v5731_v5, %v3701_v54  ;;  %v7613_v37 = vpop.f32.mrf.mxu1  ;;  %5758 = vrcp.f32 %v3492_v14  ;;  %v7621_v5 = vmul.f32 %v4164_v43, %v7502_v50  ;;  %v4170_v1 = vld [vmem:[%s6932_s13 + $0xa8] sm:$0xff] }
 0x31a   : > { %v7615_v34 = vpop.eup %5734  ;;  %5531 = vmatprep.subr.mxu0 %v1665_v32  ;;  %5453 = vmatprep.subr.mxu1 %v1434_v29  ;;  %v4598_v61 = vmul.f32 0.6931472, %v5733_v23  ;;  %5760 = vlog2.f32 %v3492_v14  ;;  %v3065_v29 = vand.u32 2147483647, %v7611_v10  ;;  %v1876_v32 = vadd.f32 %v7573_v53, %v7456_v20  ;;  %v2038_v43 = vpop.f32.mrf.mxu0  ;;  %v10436_v16 = vld [vmem:[#allocation72_spill] sm:$0xff]  ;;  %v1315_v53 = vld [vmem:[#allocation11 + $0xd8] sm:$0xff] }
 0x31b   : > { %v5737_v54 = vpop.eup %5736  ;;  %5532 = vmatpush3.msra.mxu0 %v1553_v3  ;;  %2548 = vmatmul.mubr.f32.gmra.mxu1 %v10419_v21  ;;  %4037 = vst [vmem:[%s7626_s18] sm:$0xff] %v3814_v35  ;;  %v3498_v26 = vadd.f32 1.0, %v7615_v34  ;;  %v1546_v3 = vld [vmem:[#allocation11 + $0x810] sm:$0xff]  ;;  %5762 = vpow2.f32 %v3323_v31  ;;  %v1878_v14 = vadd.f32 %v7586_v39, %v7460_v62  ;;  %v10435_v21 = vld [vmem:[#allocation71_spill] sm:$0xff]  ;;  %v7644_v18 = vpop.f32.mrf.mxu1  ;;  %v3708_v39 = vsel %vm3596_vm4, 1.0, %v7540_v48 }
 0x31c   : > { %v5739_v6 = vpop.eup %5738  ;;  %2709 = vmatmul.mubr.f32.gmra.mxu0 %v7312_v24  ;;  %5454 = vmatpush3.msra.mxu1 %v1322_v36  ;;  %v4821_v23 = vadd.f32 %v4598_v61, %v7542_v41  ;;  %v3816_v35 = vmul.f32 %v5737_v54, %v3702_v42  ;;  %v3177_v24 = vsub.f32 0.0, %v3065_v29  ;;  %v4394_v31 = vmul.f32 %v4170_v1, %v7510_v33  ;;  %v1651_v54 = vld [vmem:[#allocation11 + $0xb58] sm:$0xff]  ;;  %v1420_v29 = vld [vmem:[#allocation11 + $0x420] sm:$0xff] }
 0x31d   : > { %v7639_v17 = vpop.eup %5740  ;;  %2553 = vmatprep.mubr.f32.mxu1 %v10435_v21  ;;  %2714 = vmatprep.mubr.f32.mxu0 %v10436_v16  ;;  %v4600_v28 = vmul.f32 0.6931472, %v5739_v6  ;;  %5764 = vrcp.f32 %v3498_v26  ;;  %v4171_v6 = vld [vmem:[%s6932_s13 + $0xb0] sm:$0xff]  ;;  %v7657_v48 = vadd.f32 %v7600_v19, %v1876_v32  ;;  %v7663_v36 = vadd.f32 %v2038_v43, %v1878_v14 }
 0x31e   : > { %v5743_v41 = vpop.eup %5742  ;;  %5533 = vmatprep.subr.mxu0 %v1658_v25  ;;  %5455 = vmatprep.subr.mxu1 %v1427_v52  ;;  %4038 = vst [vmem:[%s7626_s18 + $0x8] sm:$0xff] %v3816_v35  ;;  %5766 = vlog2.f32 %v3498_v26  ;;  %v3499_v61 = vadd.f32 1.0, %v7639_v17  ;;  %v3325_v56 = vmul.f32 1.442695, %v3177_v24  ;;  %v7659_v35 = vpop.f32.mrf.mxu0  ;;  %v1539_v26 = vld [vmem:[#allocation11 + $0x7d8] sm:$0xff]  ;;  %v1308_v24 = vld [vmem:[#allocation11 + $0xa0] sm:$0xff] }
 0x31f   : > { %v5745_v42 = vpop.eup %5744  ;;  %5534 = vmatpush3.msra.mxu0 %v1546_v3  ;;  %2554 = vmatmul.mubr.f32.gmra.mxu1 %v10422_v13  ;;  %v4822_v25 = vadd.f32 %v4600_v28, %v7579_v59  ;;  %v3828_v52 = vmul.f32 %v5743_v41, %v3708_v39  ;;  %v4283_v3 = vmax.f32 %v7519_v60, 0.0  ;;  %v10437_v28 = vld [vmem:[#allocation74_spill] sm:$0xff]  ;;  %v10438_v41 = vld [vmem:[#allocation75_spill] sm:$0xff]  ;;  %v3709_v32 = vsel %vm3597_vm5, 1.0, %v7558_v7  ;;  %v7674_v39 = vpop.f32.mrf.mxu1 }
 0x320   : > { %2715 = vmatmul.mubr.f32.gmra.mxu0 %v7334_v45  ;;  %5456 = vmatpush3.msra.mxu1 %v1315_v53  ;;  %v4612_v1 = vmul.f32 0.6931472, %v5745_v42  ;;  %5768 = vrcp.f32 %v3499_v61  ;;  %v5747_v59 = vpop.eup %5746  ;;  %v3071_v53 = vand.u32 2147483647, %v7657_v48  ;;  %v1644_v14 = vld [vmem:[#allocation11 + $0xb20] sm:$0xff]  ;;  %vm3625_vm13 = vcmp.ge.f32.partialorder %v7611_v10, 0.0 }
 0x321   : > { %2559 = vmatprep.mubr.f32.mxu1 %v10437_v28  ;;  %2720 = vmatprep.mubr.f32.mxu0 %v10438_v41  ;;  %v7667_v19 = vadd.f32 %v4822_v25, %v4821_v23  ;;  %4044 = vst [vmem:[%s7626_s18 + $0x38] sm:$0xff] %v3828_v52  ;;  %5770 = vlog2.f32 %v3499_v61  ;;  %v5749_v43 = vpop.eup %5748  ;;  %v3830_v41 = vmul.f32 %v5747_v59, %v3709_v32  ;;  %v10440_v61 = vmax.f32 %v7502_v50, 0.0  ;;  %v7687_v52 = vpop.f32.mrf.mxu0  ;;  %v1294_v50 = vld [vmem:[#allocation11 + $0x30] sm:$0xff] }
 0x322   : > { %5535 = vmatprep.subr.mxu0 %v1651_v54  ;;  %5457 = vmatprep.subr.mxu1 %v1420_v29  ;;  %v4828_v42 = vadd.f32 %v4612_v1, %v7588_v12  ;;  %v4395_v23 = vmul.f32 %v4171_v6, %v7519_v60  ;;  %5772 = vpow2.f32 %v3325_v56  ;;  %v7678_v25 = vpop.eup %5750  ;;  %v4614_v7 = vmul.f32 0.6931472, %v5749_v43  ;;  %v1532_v6 = vld [vmem:[#allocation11 + $0x7a0] sm:$0xff] }
 0x323   : > { %10439 = vst [vmem:[#allocation73_spill] sm:$0xff] %v7667_v19  ;;  %5536 = vmatpush3.msra.mxu0 %v1539_v26  ;;  %2560 = vmatmul.mubr.f32.gmra.mxu1 %v10424_v27  ;;  %v7684_v54 = vsub.f32 %v10440_v61, %v7621_v5  ;;  %v3183_v29 = vsub.f32 0.0, %v3071_v53  ;;  %v3072_v12 = vand.u32 2147483647, %v7663_v36  ;;  %v5753_v1 = vpop.eup %5752  ;;  %4045 = vst [vmem:[%s7626_s18 + $0x40] sm:$0xff] %v3830_v41  ;;  %v3715_v56 = vsel %vm3603_vm6, 1.0, %v7575_v30  ;;  %v7704_v30 = vpop.f32.mrf.mxu1 }
 0x324   : > { %2721 = vmatmul.mubr.f32.gmra.mxu0 %v7352_v11  ;;  %5458 = vmatpush3.msra.mxu1 %v1308_v24  ;;  %v10441_v5 = vmax.f32 %v7510_v33, 0.0  ;;  %v3505_v59 = vadd.f32 1.0, %v7678_v25  ;;  %v5755_v32 = vpop.eup %5754  ;;  %v1301_v24 = vld [vmem:[#allocation11 + $0x68] sm:$0xff]  ;;  %v4829_v41 = vadd.f32 %v4614_v7, %v7590_v9  ;;  %v3842_v53 = vmul.f32 %v5753_v1, %v3715_v56  ;;  %v1406_v7 = vld [vmem:[#allocation11 + $0x3b0] sm:$0xff] }
 0x325   : > { %2565 = vmatprep.mubr.f32.mxu1 %v7357_v0  ;;  %2726 = vmatprep.mubr.f32.mxu0 %v7362_v49  ;;  %v3337_v63 = vmul.f32 1.442695, %v3183_v29  ;;  %v7706_v43 = vpop.eup %5756  ;;  %v7708_v61 = vsub.f32 %v4283_v3, %v4395_v23  ;;  %v1637_v9 = vld [vmem:[#allocation11 + $0xae8] sm:$0xff]  ;;  %v3716_v29 = vsel %vm3604_vm7, 1.0, %v7592_v58  ;;  %v10442_v58 = vld [vmem:[#allocation77_spill] sm:$0xff]  ;;  %vm3631_vm14 = vcmp.ge.f32.partialorder %v7657_v48, 0.0 }
 0x326   : > { %v7697_v26 = vsub.f32 %v10441_v5, %v4394_v31  ;;  %5537 = vmatprep.subr.mxu0 %v1644_v14  ;;  %5459 = vmatprep.subr.mxu1 %v1413_v57  ;;  %v4626_v31 = vmul.f32 0.6931472, %v5755_v32  ;;  %5774 = vrcp.f32 %v3505_v59  ;;  %v3184_v5 = vsub.f32 0.0, %v3072_v12  ;;  %v5759_v19 = vpop.eup %5758  ;;  %4051 = vst [vmem:[%s7626_s18 + $0x70] sm:$0xff] %v3842_v53  ;;  %v7718_v14 = vpop.f32.mrf.mxu0  ;;  %v1525_v57 = vld [vmem:[#allocation11 + $0x768] sm:$0xff]  ;;  %v1630_v53 = vld [vmem:[#allocation11 + $0xab0] sm:$0xff] }
 0x327   : > { %5538 = vmatpush3.msra.mxu0 %v1532_v6  ;;  %2566 = vmatmul.mubr.f32.gmra.mxu1 %v7367_v4  ;;  %v7711_v1 = vadd.f32 %v4829_v41, %v4828_v42  ;;  %5776 = vlog2.f32 %v3505_v59  ;;  %v3506_v3 = vadd.f32 1.0, %v7706_v43  ;;  %v5761_v23 = vpop.eup %5760  ;;  %v3844_v42 = vmul.f32 %v5759_v19, %v3716_v29  ;;  %v4177_v32 = vld [vmem:[%s6932_s13 + $0xe0] sm:$0xff] }
 0x328   : > { %2727 = vmatmul.mubr.f32.gmra.mxu0 %v7370_v51  ;;  %5460 = vmatpush3.msra.mxu1 %v1301_v24  ;;  %v4835_v12 = vadd.f32 %v4626_v31, %v7595_v47  ;;  %5778 = vpow2.f32 %v3337_v63  ;;  %v3339_v6 = vmul.f32 1.442695, %v3184_v5  ;;  %v7722_v56 = vpop.eup %5762  ;;  %v4628_v59 = vmul.f32 0.6931472, %v5761_v23  ;;  %v7730_v47 = vpop.f32.mrf.mxu1 }
 0x329   : > { %2571 = vmatprep.mubr.f32.mxu1 %v7374_v22  ;;  %2732 = vmatprep.mubr.f32.mxu0 %v10442_v58  ;;  %v4289_v41 = vmax.f32 %v7537_v8, 0.0  ;;  %5780 = vrcp.f32 %v3506_v3  ;;  %v1882_v24 = vadd.f32 %v7613_v37, %v7456_v20  ;;  %4052 = vst [vmem:[%s7626_s18 + $0x78] sm:$0xff] %v3844_v42  ;;  %v3722_v63 = vsel %vm3610_vm8, 1.0, %v7615_v34  ;;  %v1518_v37 = vld [vmem:[#allocation11 + $0x730] sm:$0xff]  ;;  %v7744_v33 = vpop.f32.mrf.mxu0 }
 0x32a   : > { %v5765_v19 = vpop.eup %5764  ;;  %5539 = vmatprep.subr.mxu0 %v1637_v9  ;;  %5461 = vmatprep.subr.mxu1 %v1406_v7  ;;  %5782 = vlog2.f32 %v3506_v3  ;;  %v3512_v31 = vadd.f32 1.0, %v7722_v56  ;;  %v1884_v5 = vadd.f32 %v7644_v18, %v7460_v62  ;;  %v4836_v9 = vadd.f32 %v4628_v59, %v7684_v54  ;;  %v10443_v59 = vld [vmem:[#allocation26_spill] sm:$0xff] }
 0x32b   : > { %v5767_v29 = vpop.eup %5766  ;;  %5540 = vmatpush3.msra.mxu0 %v1525_v57  ;;  %2572 = vmatmul.mubr.f32.gmra.mxu1 %v7381_v44  ;;  %v3856_v7 = vmul.f32 %v5765_v19, %v3722_v63  ;;  %5784 = vpow2.f32 %v3339_v6  ;;  %v7742_v23 = vadd.f32 %v7659_v35, %v1882_v24  ;;  %v4401_v18 = vmul.f32 %v4177_v32, %v7537_v8  ;;  %v7759_v6 = vpop.f32.mrf.mxu1  ;;  %v10444_v63 = vld [vmem:[#allocation27_spill] sm:$0xff] }
 0x32c   : > { %2733 = vmatmul.mubr.f32.gmra.mxu0 %v7384_v15  ;;  %5462 = vmatpush3.msra.mxu1 %v1294_v50  ;;  %v4640_v34 = vmul.f32 0.6931472, %v5767_v29  ;;  %5786 = vrcp.f32 %v3512_v31  ;;  %v7749_v3 = vadd.f32 %v7687_v52, %v1884_v5  ;;  %v7752_v54 = vadd.f32 %v4836_v9, %v4835_v12  ;;  %v4178_v12 = vld [vmem:[%s6932_s13 + $0xe8] sm:$0xff] }
 0x32d   : > { %v5769_v57 = vpop.eup %5768  ;;  %2803 = vmatprep.mubr.f32.mxu1 %v7071_v38  ;;  %5541 = vmatprep.subr.mxu0 %v1630_v53  ;;  %4058 = vst [vmem:[%s7626_s18 + $0xa8] sm:$0xff] %v3856_v7  ;;  %v3723_v35 = vsel %vm3611_vm9, 1.0, %v7639_v17  ;;  %5788 = vlog2.f32 %v3512_v31  ;;  %v3078_v42 = vand.u32 2147483647, %v7742_v23  ;;  %v1888_v32 = vadd.f32 %v7674_v39, %v7456_v20  ;;  %v2054_v53 = vpop.f32.mrf.mxu0  ;;  %v10445_v31 = vld [vmem:[#allocation28_spill] sm:$0xff] }
 0x32e   : > { %v5771_v50 = vpop.eup %5770  ;;  %2948 = vmatprep.mubr.f32.mxu0 %v10443_v59  ;;  %5542 = vmatpush3.msra.mxu0 %v1518_v37  ;;  %v4842_v38 = vadd.f32 %v4640_v34, %v7697_v26  ;;  %v3858_v52 = vmul.f32 %v5769_v57, %v3723_v35  ;;  %v3079_v19 = vand.u32 2147483647, %v7749_v3  ;;  %v4513_v26 = vsub.f32 %v4289_v41, %v4401_v18  ;;  %v7780_v7 = vpop.f32.mrf.mxu1  ;;  %v4184_v41 = vld [vmem:[%s6932_s13 + $0x118] sm:$0xff] }
 0x32f   : > { %v7766_v24 = vpop.eup %5772  ;;  %2804 = vmatmul.mubr.f32.vlgmr.msra.gmra.mxu1 %v7075_v40  ;;  %v4642_v60 = vmul.f32 0.6931472, %v5771_v50  ;;  %v3190_v17 = vsub.f32 0.0, %v3078_v42  ;;  %v4290_v39 = vmax.f32 %v7562_v2, 0.0  ;;  %v4402_v29 = vmul.f32 %v4178_v12, %v7562_v2  ;;  %v7796_v8 = vpop.f32.mrf.mxu0  ;;  %v10448_v59 = vld [vmem:[#allocation30_spill] sm:$0xff]  ;;  %v10450_v12 = vld [vmem:[#allocation32_spill] sm:$0xff] }
 0x330   : > { %2949 = vmatmul.mubr.f32.vlgmr.msra.gmra.mxu0 %v10444_v63  ;;  %2808 = vmatprep.mubr.f32.mxu1 %v7087_v55  ;;  %4059 = vst [vmem:[%s7626_s18 + $0xb0] sm:$0xff] %v3858_v52  ;;  %v3513_v40 = vadd.f32 1.0, %v7766_v24  ;;  %v3191_v9 = vsub.f32 0.0, %v3079_v19  ;;  %v3729_v55 = vsel %vm3617_vm10, 1.0, %v7678_v25  ;;  %v7787_v34 = vadd.f32 %v7718_v14, %v1888_v32  ;;  %v10449_v14 = vld [vmem:[#allocation31_spill] sm:$0xff] }
 0x331   : > { %2953 = vmatprep.mubr.f32.mxu0 %v10445_v31  ;;  %v4843_v5 = vadd.f32 %v4642_v60, %v7708_v61  ;;  %v3351_v37 = vmul.f32 1.442695, %v3190_v17  ;;  %v1890_v18 = vadd.f32 %v7704_v30, %v7460_v62  ;;  %v10446_v61 = vld [vmem:[#allocation29_spill] sm:$0xff]  ;;  %v1894_v50 = vadd.f32 %v7730_v47, %v7456_v20  ;;  %v7807_v17 = vpop.f32.mrf.mxu1 }
 0x332   : > { %5790 = vrcp.f32 %v3513_v40  ;;  %v3353_v42 = vmul.f32 1.442695, %v3191_v9  ;;  %v3085_v30 = vand.u32 2147483647, %v7787_v34  ;;  %v4296_v47 = vmax.f32 %v7564_v46, 0.0  ;;  %v10451_v9 = vld [vmem:[#allocation33_spill] sm:$0xff] }
 0x333   : > { %v5775_v57 = vpop.eup %5774  ;;  %2809 = vmatmul.mubr.f32.gmra.mxu1 %v10446_v61  ;;  %v7792_v35 = vadd.f32 %v4843_v5, %v4842_v38  ;;  %5792 = vlog2.f32 %v3513_v40  ;;  %v4408_v60 = vmul.f32 %v4184_v41, %v7564_v46  ;;  %v3730_v63 = vsel %vm3618_vm11, 1.0, %v7706_v43  ;;  %v4185_v61 = vld [vmem:[%s6932_s13 + $0x120] sm:$0xff]  ;;  %v10452_v43 = vld [vmem:[#allocation34_spill] sm:$0xff] }
 0x334   : > { %v5777_v25 = vpop.eup %5776  ;;  %2954 = vmatmul.mubr.f32.gmra.mxu0 %v10448_v59  ;;  %2813 = vmatprep.mubr.f32.mxu1 %v10449_v14  ;;  %v3870_v52 = vmul.f32 %v5775_v57, %v3729_v55  ;;  %5794 = vpow2.f32 %v3351_v37  ;;  %v3197_v31 = vsub.f32 0.0, %v3085_v30  ;;  %v7815_v5 = vadd.f32 %v7744_v33, %v1890_v18  ;;  %v10453_v59 = vld [vmem:[#allocation35_spill] sm:$0xff] }
 0x335   : > { %10447 = vst [vmem:[#allocation76_spill] sm:$0xff] %v7792_v35  ;;  %v7802_v38 = vpop.eup %5778  ;;  %2958 = vmatprep.mubr.f32.mxu0 %v10450_v12  ;;  %v4654_v32 = vmul.f32 0.6931472, %v5777_v25  ;;  %5796 = vpow2.f32 %v3353_v42  ;;  %v4514_v57 = vsub.f32 %v4290_v39, %v4402_v29  ;;  %v7819_v42 = vadd.f32 %v2054_v53, %v1894_v50  ;;  %v7821_v25 = vpop.f32.mrf.mxu0 }
 0x336   : > { %v5781_v19 = vpop.eup %5780  ;;  %4065 = vst [vmem:[%s7626_s18 + $0xe0] sm:$0xff] %v3870_v52  ;;  %v3519_v40 = vadd.f32 1.0, %v7802_v38  ;;  %v3365_v18 = vmul.f32 1.442695, %v3197_v31  ;;  %v3086_v14 = vand.u32 2147483647, %v7815_v5  ;;  %v4520_v39 = vsub.f32 %v4296_v47, %v4408_v60  ;;  %v7834_v50 = vpop.f32.mrf.mxu1 }
 0x337   : > { %v5783_v37 = vpop.eup %5782  ;;  %2814 = vmatmul.mubr.f32.gmra.mxu1 %v10451_v9  ;;  %v4849_v55 = vadd.f32 %v4654_v32, %v4513_v26  ;;  %v3872_v41 = vmul.f32 %v5781_v19, %v3730_v63  ;;  %v10454_v26 = vld [vmem:[#allocation36_spill] sm:$0xff]  ;;  %v3736_v53 = vsel %vm3624_vm12, 1.0, %v7722_v56  ;;  %v10455_v63 = vld [vmem:[#allocation37_spill] sm:$0xff]  ;;  %v4409_v46 = vmul.f32 %v4185_v61, %v7611_v10  ;;  %v7839_v56 = vpop.f32.mrf.mxu0  ;;  %v10456_v47 = vld [vmem:[#allocation38_spill] sm:$0xff] }
 0x338   : > { %v7823_v2 = vpop.eup %5784  ;;  %2959 = vmatmul.mubr.f32.gmra.mxu0 %v10452_v43  ;;  %2818 = vmatprep.mubr.f32.mxu1 %v10453_v59  ;;  %v4656_v33 = vmul.f32 0.6931472, %v5783_v37  ;;  %5798 = vrcp.f32 %v3519_v40  ;;  %v3198_v19 = vsub.f32 0.0, %v3086_v14  ;;  %v4297_v37 = vmax.f32 %v7611_v10, 0.0  ;;  %v10457_v60 = vld [vmem:[#allocation39_spill] sm:$0xff]  ;;  %v7848_v59 = vpop.f32.mrf.mxu1  ;;  %v6390_v61 = vld [vmem:[#allocation13] sm:$0xff] }
 0x339   : > { %v5787_v52 = vpop.eup %5786  ;;  %2963 = vmatprep.mubr.f32.mxu0 %v10454_v26  ;;  %4066 = vst [vmem:[%s7626_s18 + $0xe8] sm:$0xff] %v3872_v41  ;;  %5800 = vlog2.f32 %v3519_v40  ;;  %v3520_v29 = vadd.f32 1.0, %v7823_v2  ;;  %v3092_v41 = vand.u32 2147483647, %v7819_v42  ;;  %vm3632_vm15 = vcmp.ge.f32.partialorder %v7663_v36, 0.0 }
 0x33a   : > { %v5789_v30 = vpop.eup %5788  ;;  %v4850_v12 = vadd.f32 %v4656_v33, %v4514_v57  ;;  %v3884_v32 = vmul.f32 %v5787_v52, %v3736_v53  ;;  %5802 = vpow2.f32 %v3365_v18  ;;  %v3367_v9 = vmul.f32 1.442695, %v3198_v19  ;;  %v10459_v57 = vld [vmem:[#allocation40_spill] sm:$0xff]  ;;  %v10460_v33 = vld [vmem:[#allocation23_spill] sm:$0xff] }
 0x33b   : > { %2819 = vmatmul.mubr.f32.gmra.mxu1 %v10455_v63  ;;  %v4668_v31 = vmul.f32 0.6931472, %v5789_v30  ;;  %5804 = vrcp.f32 %v3520_v29  ;;  %v10461_v18 = vsub.s32 2, %v10460_v33  ;;  %v10462_v52 = vsub.s32 3, %v10460_v33  ;;  %v10463_v30 = vld [vmem:[#allocation41_spill] sm:$0xff]  ;;  %v2066_v63 = vpop.f32.mrf.mxu0  ;;  %v10473_v33 = vld [vmem:[#allocation50_spill] sm:$0xff] }
 0x33c   : > { %2964 = vmatmul.mubr.f32.gmra.mxu0 %v10456_v47  ;;  %2823 = vmatprep.mubr.f32.mxu1 %v10457_v60  ;;  %v7843_v40 = vadd.f32 %v4850_v12, %v4849_v55  ;;  %4072 = vst [vmem:[%s7626_s18 + $0x118] sm:$0xff] %v3884_v32  ;;  %5806 = vlog2.f32 %v3520_v29  ;;  %v4191_v55 = vld [vmem:[%s6932_s13 + $0x150] sm:$0xff]  ;;  %v3204_v53 = vsub.f32 0.0, %v3092_v41  ;;  %v3737_v12 = vsel %vm3625_vm13, 1.0, %v7766_v24  ;;  %v10465_v47 = vld [vmem:[#allocation43_spill] sm:$0xff] }
 0x33d   : > { %2968 = vmatprep.mubr.f32.mxu0 %v10459_v57  ;;  %v4856_v43 = vadd.f32 %v4668_v31, %v4520_v39  ;;  %v7852_v14 = vrot.slane %v6390_v61, %v10461_v18  ;;  %v7856_v26 = vrot.slane %v6390_v61, %v10462_v52  ;;  %5808 = vpow2.f32 %v3367_v9  ;;  %v10464_v31 = vld [vmem:[#allocation42_spill] sm:$0xff]  ;;  %v7883_v52 = vpop.f32.mrf.mxu1 }
 0x33e   : > { %10458 = vst [vmem:[#allocation24_spill] sm:$0xff] %v7843_v40  ;;  %v1896_v39 = vadd.f32 %v7759_v6, %v7460_v62  ;;  %v4521_v32 = vsub.f32 %v4297_v37, %v4409_v46  ;;  %v1900_v19 = vadd.f32 %v7780_v7, %v7456_v20  ;;  %v4303_v6 = vmax.f32 %v7657_v48, 0.0  ;;  %v4192_v9 = vld [vmem:[%s6932_s13 + $0x158] sm:$0xff]  ;;  %v10466_v46 = vld [vmem:[#allocation44_spill] sm:$0xff] }
 0x33f   : > { %v5791_v29 = vpop.eup %5790  ;;  %2824 = vmatmul.mubr.f32.gmra.mxu1 %v10463_v30  ;;  %v3379_v41 = vmul.f32 1.442695, %v3204_v53  ;;  %v4415_v57 = vmul.f32 %v4191_v55, %v7657_v48  ;;  %v1902_v18 = vadd.f32 %v7807_v17, %v7460_v62  ;;  %v4416_v30 = vmul.f32 %v4192_v9, %v7663_v36  ;;  %v7911_v48 = vpop.f32.mrf.mxu1 }
 0x340   : > { %v5793_v10 = vpop.eup %5792  ;;  %2969 = vmatmul.mubr.f32.gmra.mxu0 %v10464_v31  ;;  %2828 = vmatprep.mubr.f32.mxu1 %v10465_v47  ;;  %v3886_v60 = vmul.f32 %v5791_v29, %v3737_v12  ;;  %v7872_v24 = vadd.f32 %v7796_v8, %v1896_v39  ;;  %v7879_v61 = vadd.f32 %v7821_v25, %v1900_v19  ;;  %v10467_v39 = vld [vmem:[#allocation45_spill] sm:$0xff]  ;;  %v4304_v25 = vmax.f32 %v7663_v36, 0.0  ;;  %v7895_v12 = vpop.f32.mrf.mxu0  ;;  %v10468_v19 = vld [vmem:[#allocation46_spill] sm:$0xff] }
 0x341   : > { %v7874_v37 = vpop.eup %5794  ;;  %2973 = vmatprep.mubr.f32.mxu0 %v10466_v46  ;;  %v4670_v7 = vmul.f32 0.6931472, %v5793_v10  ;;  %5810 = vpow2.f32 %v3379_v41  ;;  %v10469_v10 = vld [vmem:[#allocation47_spill] sm:$0xff]  ;;  %v3743_v31 = vsel %vm3631_vm14, 1.0, %v7802_v38  ;;  %v10470_v41 = vld [vmem:[#allocation48_spill] sm:$0xff]  ;;  %vm3638_vm0 = vcmp.ge.f32.partialorder %v7742_v23, 0.0  ;;  %v7932_v36 = vpop.f32.mrf.mxu1 }
 0x342   : > { %v7885_v29 = vpop.eup %5796  ;;  %4073 = vst [vmem:[%s7626_s18 + $0x120] sm:$0xff] %v3886_v60  ;;  %v3526_v8 = vadd.f32 1.0, %v7874_v37  ;;  %v3093_v53 = vand.u32 2147483647, %v7872_v24  ;;  %v3099_v46 = vand.u32 2147483647, %v7879_v61 }
 0x343   : > { %2829 = vmatmul.mubr.f32.gmra.mxu1 %v10467_v39  ;;  %v4857_v55 = vadd.f32 %v4670_v7, %v4521_v32  ;;  %v3527_v17 = vadd.f32 1.0, %v7885_v29  ;;  %v1906_v32 = vadd.f32 %v7834_v50, %v7456_v20  ;;  %v7909_v7 = vadd.f32 %v7839_v56, %v1902_v18  ;;  %v7917_v56 = vpop.f32.mrf.mxu0 }
 0x344   : > { %2974 = vmatmul.mubr.f32.gmra.mxu0 %v10468_v19  ;;  %2833 = vmatprep.mubr.f32.mxu1 %v10469_v10  ;;  %5812 = vrcp.f32 %v3526_v8  ;;  %v3205_v47 = vsub.f32 0.0, %v3093_v53  ;;  %v4527_v39 = vsub.f32 %v4303_v6, %v4415_v57  ;;  %v3744_v6 = vsel %vm3632_vm15, 1.0, %v7823_v2 }
 0x345   : > { %v5799_v60 = vpop.eup %5798  ;;  %2978 = vmatprep.mubr.f32.mxu0 %v10470_v41  ;;  %v7905_v9 = vadd.f32 %v4857_v55, %v4856_v43  ;;  %5814 = vlog2.f32 %v3526_v8  ;;  %v10472_v41 = vld [vmem:[#allocation49_spill] sm:$0xff]  ;;  %v4528_v43 = vsub.f32 %v4304_v25, %v4416_v30  ;;  %v3211_v55 = vsub.f32 0.0, %v3099_v46 }
 0x346   : > { %v5801_v38 = vpop.eup %5800  ;;  %v3898_v53 = vmul.f32 %v5799_v60, %v3743_v31  ;;  %5816 = vrcp.f32 %v3527_v17  ;;  %v3381_v50 = vmul.f32 1.442695, %v3205_v47  ;;  %v4198_v8 = vld [vmem:[%s6932_s13 + $0x188] sm:$0xff]  ;;  %v10474_v31 = vld [vmem:[#allocation51_spill] sm:$0xff]  ;;  %v7927_v25 = vadd.f32 %v2066_v63, %v1906_v32  ;;  %v4199_v60 = vld [vmem:[%s6932_s13 + $0x190] sm:$0xff] }
 0x347   : > { %10471 = vst [vmem:[#allocation25_spill] sm:$0xff] %v7905_v9  ;;  %v7913_v19 = vpop.eup %5802  ;;  %v4682_v10 = vmul.f32 0.6931472, %v5801_v38  ;;  %2834 = vmatmul.mubr.f32.gmra.mxu1 %v10472_v41  ;;  %5818 = vlog2.f32 %v3527_v17  ;;  %v10475_v47 = vld [vmem:[#allocation52_spill] sm:$0xff]  ;;  %v3393_v46 = vmul.f32 1.442695, %v3211_v55  ;;  %v4422_v41 = vmul.f32 %v4198_v8, %v7742_v23  ;;  %v7954_v9 = vpop.f32.mrf.mxu1 }
 0x348   : > { %v5805_v18 = vpop.eup %5804  ;;  %4079 = vst [vmem:[%s7626_s18 + $0x150] sm:$0xff] %v3898_v53  ;;  %2979 = vmatmul.mubr.f32.gmra.mxu0 %v10473_v33  ;;  %2838 = vmatprep.mubr.f32.mxu1 %v10474_v31  ;;  %v3533_v57 = vadd.f32 1.0, %v7913_v19  ;;  %5820 = vpow2.f32 %v3381_v50  ;;  %v3100_v38 = vand.u32 2147483647, %v7909_v7  ;;  %v4310_v53 = vmax.f32 %v7742_v23, 0.0  ;;  %v4205_v50 = vld [vmem:[%s6932_s13 + $0x1c0] sm:$0xff] }
 0x349   : > { %v5807_v30 = vpop.eup %5806  ;;  %v4863_v17 = vadd.f32 %v4682_v10, %v4527_v39  ;;  %2983 = vmatprep.mubr.f32.mxu0 %v10475_v47  ;;  %v3900_v33 = vmul.f32 %v5805_v18, %v3744_v6  ;;  %v10476_v32 = vld [vmem:[#allocation53_spill] sm:$0xff]  ;;  %v4311_v39 = vmax.f32 %v7749_v3, 0.0  ;;  %v1908_v55 = vadd.f32 %v7848_v59, %v7460_v62  ;;  %v7944_v18 = vpop.f32.mrf.mxu0  ;;  %v10477_v6 = vld [vmem:[#allocation54_spill] sm:$0xff]  ;;  %v10478_v8 = vld [vmem:[#allocation55_spill] sm:$0xff] }
 0x34a   : > { %v4684_v2 = vmul.f32 0.6931472, %v5807_v30  ;;  %5822 = vrcp.f32 %v3533_v57  ;;  %v7937_v63 = vpop.eup %5808  ;;  %v3212_v10 = vsub.f32 0.0, %v3100_v38  ;;  %v4423_v30 = vmul.f32 %v4199_v60, %v7749_v3 }
 0x34b   : > { %4080 = vst [vmem:[%s7626_s18 + $0x158] sm:$0xff] %v3900_v33  ;;  %2839 = vmatmul.mubr.f32.gmra.mxu1 %v10476_v32  ;;  %5824 = vlog2.f32 %v3533_v57  ;;  %v3534_v47 = vadd.f32 1.0, %v7937_v63  ;;  %v10479_v33 = vld [vmem:[#allocation56_spill] sm:$0xff]  ;;  %v4317_v57 = vmax.f32 %v7787_v34, 0.0  ;;  %v4429_v38 = vmul.f32 %v4205_v50, %v7787_v34 }
 0x34c   : > { %v4864_v31 = vadd.f32 %v4684_v2, %v4528_v43  ;;  %2984 = vmatmul.mubr.f32.gmra.mxu0 %v10477_v6  ;;  %2843 = vmatprep.mubr.f32.mxu1 %v10478_v8  ;;  %5826 = vpow2.f32 %v3393_v46  ;;  %v3395_v32 = vmul.f32 1.442695, %v3212_v10  ;;  %v3106_v59 = vand.u32 2147483647, %v7927_v25  ;;  %v10481_v46 = vld [vmem:[#allocation57_spill] sm:$0xff]  ;;  %v7967_v10 = vpop.f32.mrf.mxu0 }
 0x34d   : > { %2988 = vmatprep.mubr.f32.mxu0 %v10479_v33  ;;  %v4534_v2 = vsub.f32 %v4310_v53, %v4422_v41  ;;  %vm3639_vm1 = vcmp.ge.f32.partialorder %v7749_v3, 0.0  ;;  %5828 = vrcp.f32 %v3534_v47  ;;  %v7963_v8 = vadd.f32 %v7895_v12, %v1908_v55  ;;  %v10482_v53 = vld [vmem:[#allocation58_spill] sm:$0xff]  ;;  %v10483_v41 = vld [vmem:[#allocation59_spill] sm:$0xff]  ;;  %v10484_v55 = vld [vmem:[#allocation60_spill] sm:$0xff]  ;;  %v7980_v33 = vpop.f32.mrf.mxu1 }
 0x34e   : > { %v7956_v43 = vadd.f32 %v4864_v31, %v4863_v17  ;;  %v7959_v60 = vpop.eup %5810  ;;  %5830 = vlog2.f32 %v3534_v47  ;;  %v3218_v6 = vsub.f32 0.0, %v3106_v59  ;;  %v1912_v50 = vadd.f32 %v7883_v52, %v7456_v20 }
 0x34f   : > { %2844 = vmatmul.mubr.f32.gmra.mxu1 %v10481_v46  ;;  %v4535_v17 = vsub.f32 %v4311_v39, %v4423_v30  ;;  %vm3645_vm2 = vcmp.ge.f32.partialorder %v7787_v34, 0.0  ;;  %v3540_v31 = vadd.f32 1.0, %v7959_v60  ;;  %5832 = vpow2.f32 %v3395_v32 }
 0x350   : > { %10480 = vst [vmem:[#allocation71_spill] sm:$0xff] %v7956_v43  ;;  %2989 = vmatmul.mubr.f32.gmra.mxu0 %v10482_v53  ;;  %2848 = vmatprep.mubr.f32.mxu1 %v10483_v41  ;;  %v3750_v12 = vsel %vm3638_vm0, 1.0, %v7874_v37  ;;  %v7976_v52 = vsub.f32 %v4317_v57, %v4429_v38  ;;  %v3407_v39 = vmul.f32 1.442695, %v3218_v6  ;;  %v3107_v30 = vand.u32 2147483647, %v7963_v8 }
 0x351   : > { %v5813_v47 = vpop.eup %5812  ;;  %2993 = vmatprep.mubr.f32.mxu0 %v10484_v55  ;;  %v3751_v32 = vsel %vm3639_vm1, 1.0, %v7885_v29  ;;  %v4206_v53 = vld [vmem:[%s6932_s13 + $0x1c8] sm:$0xff]  ;;  %5834 = vrcp.f32 %v3540_v31  ;;  %v7987_v23 = vadd.f32 %v7917_v56, %v1912_v50  ;;  %v4212_v38 = vld [vmem:[%s6932_s13 + $0x1f8] sm:$0xff]  ;;  %v1914_v55 = vadd.f32 %v7911_v48, %v7460_v62 }
 0x352   : > { %v5815_v59 = vpop.eup %5814  ;;  %v3912_v46 = vmul.f32 %v5813_v47, %v3750_v12  ;;  %5836 = vlog2.f32 %v3540_v31  ;;  %v10485_v6 = vld [vmem:[#allocation61_spill] sm:$0xff]  ;;  %v3219_v41 = vsub.f32 0.0, %v3107_v30  ;;  %v7993_v47 = vpop.f32.mrf.mxu0  ;;  %v4318_v12 = vmax.f32 %v7815_v5, 0.0  ;;  %v10486_v56 = vld [vmem:[#allocation62_spill] sm:$0xff]  ;;  %v10487_v50 = vld [vmem:[#allocation63_spill] sm:$0xff] }
 0x353   : > { %v5817_v37 = vpop.eup %5816  ;;  %v4696_v57 = vmul.f32 0.6931472, %v5815_v59  ;;  %2849 = vmatmul.mubr.f32.gmra.mxu1 %v10485_v6  ;;  %5838 = vpow2.f32 %v3407_v39  ;;  %v3113_v31 = vand.u32 2147483647, %v7987_v23  ;;  %v4430_v48 = vmul.f32 %v4206_v53, %v7815_v5  ;;  %v10488_v43 = vld [vmem:[#allocation64_spill] sm:$0xff]  ;;  %v10489_v53 = vld [vmem:[#allocation65_spill] sm:$0xff] }
 0x354   : > { %v5819_v3 = vpop.eup %5818  ;;  %4086 = vst [vmem:[%s7626_s18 + $0x188] sm:$0xff] %v3912_v46  ;;  %v3914_v29 = vmul.f32 %v5817_v37, %v3751_v32  ;;  %2994 = vmatmul.mubr.f32.gmra.mxu0 %v10486_v56  ;;  %2853 = vmatprep.mubr.f32.mxu1 %v10487_v50  ;;  %v3409_v40 = vmul.f32 1.442695, %v3219_v41  ;;  %v8004_v46 = vpop.f32.mrf.mxu1  ;;  %v4324_v32 = vmax.f32 %v7819_v42, 0.0  ;;  %v4436_v37 = vmul.f32 %v4212_v38, %v7819_v42 }
 0x355   : > { %v8000_v59 = vpop.eup %5820  ;;  %v4870_v30 = vadd.f32 %v4696_v57, %v4534_v2  ;;  %v4698_v6 = vmul.f32 0.6931472, %v5819_v3  ;;  %2998 = vmatprep.mubr.f32.mxu0 %v10488_v43  ;;  %v3225_v56 = vsub.f32 0.0, %v3113_v31  ;;  %v3757_v2 = vsel %vm3645_vm2, 1.0, %v7913_v19  ;;  %v8017_v57 = vpop.f32.mrf.mxu0  ;;  %v10490_v3 = vld [vmem:[#allocation66_spill] sm:$0xff] }
 0x356   : > { %4087 = vst [vmem:[%s7626_s18 + $0x190] sm:$0xff] %v3914_v29  ;;  %v3541_v39 = vadd.f32 1.0, %v8000_v59  ;;  %5840 = vpow2.f32 %v3409_v40  ;;  %v8015_v43 = vadd.f32 %v7944_v18, %v1914_v55  ;;  %v10491_v29 = vld [vmem:[#allocation67_spill] sm:$0xff]  ;;  %v1918_v34 = vadd.f32 %v7932_v36, %v7456_v20  ;;  %v10492_v55 = vld [vmem:[#allocation68_spill] sm:$0xff]  ;;  %v8029_v31 = vpop.f32.mrf.mxu1 }
 0x357   : > { %v5823_v50 = vpop.eup %5822  ;;  %v4871_v35 = vadd.f32 %v4698_v6, %v4535_v17  ;;  %2854 = vmatmul.mubr.f32.gmra.mxu1 %v10489_v53  ;;  %v3421_v17 = vmul.f32 1.442695, %v3225_v56  ;;  %vm3646_vm3 = vcmp.ge.f32.partialorder %v7815_v5, 0.0  ;;  %v4542_v6 = vsub.f32 %v4318_v12, %v4430_v48  ;;  %v8039_v53 = vpop.f32.mrf.mxu0 }
 0x358   : > { %v5825_v41 = vpop.eup %5824  ;;  %v3926_v38 = vmul.f32 %v5823_v50, %v3757_v2  ;;  %5842 = vrcp.f32 %v3541_v39  ;;  %2999 = vmatmul.mubr.f32.gmra.mxu0 %v10490_v3  ;;  %2858 = vmatprep.mubr.f32.mxu1 %v10491_v29  ;;  %v3114_v36 = vand.u32 2147483647, %v8015_v43  ;;  %vm3652_vm4 = vcmp.ge.f32.partialorder %v7819_v42, 0.0  ;;  %v10493_v2 = vld [vmem:[#allocation69_spill] sm:$0xff] }
 0x359   : > { %v8023_v19 = vpop.eup %5826  ;;  %v8025_v40 = vadd.f32 %v4871_v35, %v4870_v30  ;;  %v4710_v18 = vmul.f32 0.6931472, %v5825_v41  ;;  %5844 = vlog2.f32 %v3541_v39  ;;  %3003 = vmatprep.mubr.f32.mxu0 %v10492_v55  ;;  %v3758_v30 = vsel %vm3646_vm3, 1.0, %v7937_v63  ;;  %v4213_v39 = vld [vmem:[%s6932_s13 + $0x200] sm:$0xff]  ;;  %v4219_v41 = vld [vmem:[%s6932_s13 + $0x230] sm:$0xff] }
 0x35a   : > { %4093 = vst [vmem:[%s7626_s18 + $0x1c0] sm:$0xff] %v3926_v38  ;;  %v3547_v56 = vadd.f32 1.0, %v8023_v19  ;;  %5846 = vpow2.f32 %v3421_v17  ;;  %v5829_v50 = vpop.eup %5828  ;;  %v4548_v5 = vsub.f32 %v4324_v32, %v4436_v37  ;;  %vm3653_vm5 = vcmp.ge.f32.partialorder %v7872_v24, 0.0  ;;  %v10494_v38 = vld [vmem:[#allocation70_spill] sm:$0xff]  ;;  %v8054_v17 = vpop.f32.mrf.mxu1 }
 0x35b   : > { %v4877_v35 = vadd.f32 %v4710_v18, %v7976_v52  ;;  %2859 = vmatmul.mubr.f32.gmra.mxu1 %v10493_v2  ;;  %v5831_v12 = vpop.eup %5830  ;;  %v3928_v48 = vmul.f32 %v5829_v50, %v3758_v30  ;;  %v3226_v63 = vsub.f32 0.0, %v3114_v36  ;;  %v8046_v52 = vadd.f32 %v7967_v10, %v1918_v34  ;;  %v8066_v50 = vpop.f32.mrf.mxu0 }
 0x35c   : > { %5848 = vrcp.f32 %v3547_v56  ;;  %3004 = vmatmul.mubr.f32.gmra.mxu0 %v10494_v38  ;;  %2863 = vmatprep.mubr.f32.mxu1 %v10435_v21  ;;  %v8048_v32 = vpop.eup %5832  ;;  %v4712_v37 = vmul.f32 0.6931472, %v5831_v12  ;;  %v4325_v3 = vmax.f32 %v7872_v24, 0.0  ;;  %v1920_v29 = vadd.f32 %v7954_v9, %v7460_v62 }
 0x35d   : > { %5850 = vlog2.f32 %v3547_v56  ;;  %3008 = vmatprep.mubr.f32.mxu0 %v10436_v16  ;;  %4094 = vst [vmem:[%s7626_s18 + $0x1c8] sm:$0xff] %v3928_v48  ;;  %v4437_v21 = vmul.f32 %v4213_v39, %v7872_v24  ;;  %v3548_v18 = vadd.f32 1.0, %v8048_v32  ;;  %v3423_v10 = vmul.f32 1.442695, %v3226_v63  ;;  %v10495_v48 = vld [vmem:[#allocation75_spill] sm:$0xff] }
 0x35e   : > { %v3120_v34 = vand.u32 2147483647, %v8046_v52  ;;  %v5835_v55 = vpop.eup %5834  ;;  %v4878_v36 = vadd.f32 %v4712_v37, %v4542_v6  ;;  %v3764_v56 = vsel %vm3652_vm4, 1.0, %v7959_v60  ;;  %v4331_v16 = vmax.f32 %v7879_v61, 0.0 }
 0x35f   : > { %v4443_v9 = vmul.f32 %v4219_v41, %v7879_v61  ;;  %2864 = vmatmul.mubr.f32.gmra.mxu1 %v10422_v13  ;;  %v5837_v30 = vpop.eup %5836  ;;  %v3940_v39 = vmul.f32 %v5835_v55, %v3764_v56  ;;  %5852 = vrcp.f32 %v3548_v18  ;;  %v8071_v42 = vadd.f32 %v7993_v47, %v1920_v29  ;;  %v4220_v13 = vld [vmem:[%s6932_s13 + $0x238] sm:$0xff]  ;;  %v8080_v41 = vpop.f32.mrf.mxu1 }
 0x360   : > { %3009 = vmatmul.mubr.f32.gmra.mxu0 %v7334_v45  ;;  %2868 = vmatprep.mubr.f32.mxu1 %v10437_v28  ;;  %v3232_v6 = vsub.f32 0.0, %v3120_v34  ;;  %v8073_v60 = vpop.eup %5838  ;;  %v8075_v2 = vadd.f32 %v4878_v36, %v4877_v35  ;;  %v4724_v12 = vmul.f32 0.6931472, %v5837_v30  ;;  %vm3659_vm6 = vcmp.ge.f32.partialorder %v7879_v61, 0.0  ;;  %v8089_v29 = vpop.f32.mrf.mxu0 }
 0x361   : > { %5854 = vlog2.f32 %v3548_v18  ;;  %3013 = vmatprep.mubr.f32.mxu0 %v10495_v48  ;;  %4100 = vst [vmem:[%s7626_s18 + $0x1f8] sm:$0xff] %v3940_v39  ;;  %v4549_v45 = vsub.f32 %v4325_v3, %v4437_v21  ;;  %v3554_v28 = vadd.f32 1.0, %v8073_v60  ;;  %v8084_v63 = vsub.f32 %v4331_v16, %v4443_v9 }
 0x362   : > { %5856 = vpow2.f32 %v3423_v10  ;;  %v3435_v47 = vmul.f32 1.442695, %v3232_v6  ;;  %v4884_v38 = vadd.f32 %v4724_v12, %v4548_v5  ;;  %v4332_v35 = vmax.f32 %v7909_v7, 0.0  ;;  %v8118_v16 = vpop.f32.mrf.mxu0  ;;  %v4227_v12 = vld [vmem:[%s6932_s13 + $0x270] sm:$0xff] }
 0x363   : > { %2869 = vmatmul.mubr.f32.gmra.mxu1 %v10424_v27  ;;  %v3121_v37 = vand.u32 2147483647, %v8071_v42  ;;  %v8091_v18 = vpop.eup %5840  ;;  %v4444_v34 = vmul.f32 %v4220_v13, %v7909_v7  ;;  %5858 = vrcp.f32 %v3554_v28  ;;  %v1924_v5 = vadd.f32 %v7980_v33, %v7456_v20 }
 0x364   : > { %3014 = vmatmul.mubr.f32.gmra.mxu0 %v7352_v11  ;;  %2873 = vmatprep.mubr.f32.mxu1 %v7357_v0  ;;  %v1926_v27 = vadd.f32 %v8004_v46, %v7460_v62  ;;  %v3765_v21 = vsel %vm3653_vm5, 1.0, %v8000_v59  ;;  %5860 = vlog2.f32 %v3554_v28  ;;  %v3555_v10 = vadd.f32 1.0, %v8091_v18  ;;  %v8105_v0 = vpop.f32.mrf.mxu1  ;;  %v4226_v59 = vld [vmem:[%s6932_s13 + $0x268] sm:$0xff] }
 0x365   : > { %v5843_v3 = vpop.eup %5842  ;;  %3018 = vmatprep.mubr.f32.mxu0 %v7362_v49  ;;  %v3233_v11 = vsub.f32 0.0, %v3121_v37  ;;  %vm3660_vm7 = vcmp.ge.f32.partialorder %v7909_v7, 0.0  ;;  %5862 = vpow2.f32 %v3435_v47  ;;  %v8109_v46 = vadd.f32 %v8017_v57, %v1924_v5 }
 0x366   : > { %v5845_v55 = vpop.eup %5844  ;;  %v3942_v33 = vmul.f32 %v5843_v3, %v3765_v21  ;;  %5864 = vrcp.f32 %v3555_v10  ;;  %v8116_v49 = vadd.f32 %v8039_v53, %v1926_v27  ;;  %v4556_v9 = vsub.f32 %v4332_v35, %v4444_v34  ;;  %v8131_v13 = vpop.f32.mrf.mxu1 }
 0x367   : > { %v8111_v36 = vpop.eup %5846  ;;  %v4726_v24 = vmul.f32 0.6931472, %v5845_v55  ;;  %v3437_v56 = vmul.f32 1.442695, %v3233_v11  ;;  %2874 = vmatmul.mubr.f32.gmra.mxu1 %v7367_v4  ;;  %5866 = vlog2.f32 %v3555_v10  ;;  %v3127_v30 = vand.u32 2147483647, %v8109_v46 }
 0x368   : > { %4101 = vst [vmem:[%s7626_s18 + $0x200] sm:$0xff] %v3942_v33  ;;  %v3561_v57 = vadd.f32 1.0, %v8111_v36  ;;  %3019 = vmatmul.mubr.f32.gmra.mxu0 %v7370_v51  ;;  %2878 = vmatprep.mubr.f32.mxu1 %v7374_v22  ;;  %v3771_v4 = vsel %vm3659_vm6, 1.0, %v8023_v19  ;;  %v4338_v53 = vmax.f32 %v7927_v25, 0.0  ;;  %v4450_v51 = vmul.f32 %v4226_v59, %v7927_v25  ;;  %v8138_v19 = vpop.f32.mrf.mxu0  ;;  %v8151_v3 = vpop.f32.mrf.mxu1 }
 0x369   : > { %v5849_v39 = vpop.eup %5848  ;;  %v4885_v6 = vadd.f32 %v4726_v24, %v4549_v45  ;;  %5868 = vpow2.f32 %v3437_v56  ;;  %3023 = vmatprep.mubr.f32.mxu0 %v10442_v58  ;;  %v3239_v22 = vsub.f32 0.0, %v3127_v30  ;;  %v3128_v61 = vand.u32 2147483647, %v8116_v49  ;;  %v4233_v56 = vld [vmem:[%s6932_s13 + $0x2a0] sm:$0xff] }
 0x36a   : > { %v5851_v48 = vpop.eup %5850  ;;  %v3954_v28 = vmul.f32 %v5849_v39, %v3771_v4  ;;  %5870 = vrcp.f32 %v3561_v57  ;;  %vm3666_vm8 = vcmp.ge.f32.partialorder %v7927_v25, 0.0  ;;  %v4339_v58 = vmax.f32 %v7963_v8, 0.0  ;;  %v8175_v30 = vpop.f32.mrf.mxu1 }
 0x36b   : > { %v8134_v45 = vadd.f32 %v4885_v6, %v4884_v38  ;;  %v4738_v47 = vmul.f32 0.6931472, %v5851_v48  ;;  %5872 = vlog2.f32 %v3561_v57  ;;  %2879 = vmatmul.mubr.f32.gmra.mxu1 %v7381_v44  ;;  %v4451_v35 = vmul.f32 %v4227_v12, %v7963_v8 }
 0x36c   : > { %4107 = vst [vmem:[%s7626_s18 + $0x230] sm:$0xff] %v3954_v28  ;;  %v3449_v37 = vmul.f32 1.442695, %v3239_v22  ;;  %3024 = vmatmul.mubr.f32.gmra.mxu0 %v7384_v15  ;;  %v5853_v38 = vpop.eup %5852  ;;  %v3772_v44 = vsel %vm3660_vm7, 1.0, %v8048_v32  ;;  %v3240_v5 = vsub.f32 0.0, %v3128_v61  ;;  %v1930_v27 = vadd.f32 %v8029_v31, %v7456_v20  ;;  %v8161_v20 = vpop.f32.mrf.mxu0  ;;  %v4234_v28 = vld [vmem:[%s6932_s13 + $0x2a8] sm:$0xff] }
 0x36d   : > { %v4891_v34 = vadd.f32 %v4738_v47, %v8084_v63  ;;  %v3956_v10 = vmul.f32 %v5853_v38, %v3772_v44  ;;  %v4562_v11 = vsub.f32 %v4338_v53, %v4450_v51  ;;  %v1932_v15 = vadd.f32 %v8054_v17, %v7460_v62  ;;  %v8196_v38 = vpop.f32.mrf.mxu1 }
 0x36e   : > { %v5855_v21 = vpop.eup %5854  ;;  %5874 = vpow2.f32 %v3449_v37  ;;  %vm3667_vm9 = vcmp.ge.f32.partialorder %v7963_v8, 0.0  ;;  %v3451_v7 = vmul.f32 1.442695, %v3240_v5  ;;  %v8159_v32 = vadd.f32 %v8066_v50, %v1930_v27  ;;  %v8183_v53 = vpop.f32.mrf.mxu0 }
 0x36f   : > { %v8155_v63 = vpop.eup %5856  ;;  %v4740_v55 = vmul.f32 0.6931472, %v5855_v21  ;;  %4108 = vst [vmem:[%s7626_s18 + $0x238] sm:$0xff] %v3956_v10  ;;  %v3778_v31 = vsel %vm3666_vm8, 1.0, %v8073_v60  ;;  %v4563_v33 = vsub.f32 %v4339_v58, %v4451_v35  ;;  %v8169_v62 = vadd.f32 %v8089_v29, %v1932_v15 }
 0x370   : > { %v3562_v24 = vadd.f32 1.0, %v8155_v63  ;;  %v5859_v17 = vpop.eup %5858  ;;  %5876 = vpow2.f32 %v3451_v7  ;;  %v3134_v50 = vand.u32 2147483647, %v8159_v32  ;;  %v2162_v57 = vadd.f32 %v8080_v41, %v7852_v14  ;;  %v8207_v10 = vpop.f32.mrf.mxu0  ;;  %v4240_v7 = vld [vmem:[%s6932_s13 + $0x2d8] sm:$0xff] }
 0x371   : > { %v4892_v59 = vadd.f32 %v4740_v55, %v4556_v9  ;;  %v5861_v25 = vpop.eup %5860  ;;  %v3968_v60 = vmul.f32 %v5859_v17, %v3778_v31  ;;  %vm3673_vm10 = vcmp.ge.f32.partialorder %v7987_v23, 0.0  ;;  %v4345_v29 = vmax.f32 %v7987_v23, 0.0 }
 0x372   : > { %5878 = vrcp.f32 %v3562_v24  ;;  %v8179_v39 = vpop.eup %5862  ;;  %v4752_v6 = vmul.f32 0.6931472, %v5861_v25  ;;  %v3246_v4 = vsub.f32 0.0, %v3134_v50  ;;  %v3779_v12 = vsel %vm3667_vm9, 1.0, %v8091_v18  ;;  %v4241_v50 = vld [vmem:[%s6932_s13 + $0x2e0] sm:$0xff] }
 0x373   : > { %v8181_v9 = vadd.f32 %v4892_v59, %v4891_v34  ;;  %5880 = vlog2.f32 %v3562_v24  ;;  %v5865_v41 = vpop.eup %5864  ;;  %4114 = vst [vmem:[%s7626_s18 + $0x268] sm:$0xff] %v3968_v60  ;;  %v4457_v48 = vmul.f32 %v4233_v56, %v7987_v23  ;;  %v3568_v51 = vadd.f32 1.0, %v8179_v39 }
 0x374   : > { %v3135_v22 = vand.u32 2147483647, %v8169_v62  ;;  %v5867_v47 = vpop.eup %5866  ;;  %v4898_v61 = vadd.f32 %v4752_v6, %v4562_v11  ;;  %v3970_v58 = vmul.f32 %v5865_v41, %v3779_v12  ;;  %v3463_v35 = vmul.f32 1.442695, %v3246_v4 }
 0x375   : > { %v8194_v37 = vadd.f32 %v8118_v16, %v2162_v57  ;;  %v4754_v18 = vmul.f32 0.6931472, %v5867_v47  ;;  %v4346_v34 = vmax.f32 %v8015_v43, 0.0  ;;  %5882 = vrcp.f32 %v3568_v51 }
 0x376   : > { %v8198_v8 = vpop.eup %5868  ;;  %v3247_v44 = vsub.f32 0.0, %v3135_v22  ;;  %4115 = vst [vmem:[%s7626_s18 + $0x270] sm:$0xff] %v3970_v58  ;;  %v3785_v27 = vsel %vm3673_vm10, 1.0, %v8111_v36  ;;  %v4458_v21 = vmul.f32 %v4234_v28, %v8015_v43  ;;  %5884 = vlog2.f32 %v3568_v51  ;;  %v8211_v36 = vpop.f32.mrf.mxu1 }
 0x377   : > { %v5871_v5 = vpop.eup %5870  ;;  %v3569_v16 = vadd.f32 1.0, %v8198_v8  ;;  %v4899_v15 = vadd.f32 %v4754_v18, %v4563_v33  ;;  %5886 = vpow2.f32 %v3463_v35  ;;  %v4569_v24 = vsub.f32 %v4345_v29, %v4457_v48  ;;  %v8222_v29 = vpop.f32.mrf.mxu0 }
 0x378   : > { %v5873_v11 = vpop.eup %5872  ;;  %v3982_v55 = vmul.f32 %v5871_v5, %v3785_v27  ;;  %v3465_v31 = vmul.f32 1.442695, %v3247_v44  ;;  %v3031_v23 = vand.u32 2147483647, %v8194_v37  ;;  %vm3674_vm11 = vcmp.ge.f32.partialorder %v8015_v43, 0.0  ;;  %v8233_v47 = vpop.f32.mrf.mxu1  ;;  %v4247_v27 = vld [vmem:[%s6932_s13 + $0x310] sm:$0xff] }
 0x379   : > { %v4766_v17 = vmul.f32 0.6931472, %v5873_v11  ;;  %5888 = vrcp.f32 %v3569_v16  ;;  %v8213_v59 = vadd.f32 %v4899_v15, %v4898_v61  ;;  %v4352_v56 = vmax.f32 %v8046_v52, 0.0 }
 0x37a   : > { %4121 = vst [vmem:[%s7626_s18 + $0x2a0] sm:$0xff] %v3982_v55  ;;  %5890 = vlog2.f32 %v3569_v16  ;;  %v4464_v25 = vmul.f32 %v4240_v7, %v8046_v52  ;;  %v3143_v60 = vsub.f32 0.0, %v3031_v23  ;;  %v4570_v6 = vsub.f32 %v4346_v34, %v4458_v21  ;;  %v8248_v34 = vpop.f32.mrf.mxu0 }
 0x37b   : > { %v8219_v33 = vpop.eup %5874  ;;  %v4905_v57 = vadd.f32 %v4766_v17, %v4569_v24  ;;  %5892 = vpow2.f32 %v3465_v31  ;;  %v2164_v41 = vadd.f32 %v8105_v0, %v7856_v26  ;;  %v2168_v12 = vadd.f32 %v8131_v13, %v7852_v14 }
 0x37c   : > { %v3575_v4 = vadd.f32 1.0, %v8219_v33  ;;  %v4353_v48 = vmax.f32 %v8071_v42, 0.0  ;;  %v4465_v28 = vmul.f32 %v4241_v50, %v8071_v42  ;;  %v3257_v51 = vmul.f32 1.442695, %v3143_v60  ;;  %v8267_v17 = vpop.f32.mrf.mxu0  ;;  %v4248_v50 = vld [vmem:[%s6932_s13 + $0x318] sm:$0xff] }
 0x37d   : > { %v2170_v22 = vadd.f32 %v8151_v3, %v7856_v26  ;;  %v8235_v61 = vpop.eup %5876  ;;  %vm3680_vm12 = vcmp.ge.f32.partialorder %v8046_v52, 0.0  ;;  %v8239_v0 = vadd.f32 %v8138_v19, %v2164_v41  ;;  %v8242_v13 = vadd.f32 %v8161_v20, %v2168_v12 }
 0x37e   : > { %5894 = vrcp.f32 %v3575_v4  ;;  %v3786_v35 = vsel %vm3674_vm11, 1.0, %v8155_v63  ;;  %v4576_v3 = vsub.f32 %v4352_v56, %v4464_v25  ;;  %v3576_v18 = vadd.f32 1.0, %v8235_v61  ;;  %v8256_v63 = vpop.f32.mrf.mxu1 }
 0x37f   : > { %v5879_v58 = vpop.eup %5878  ;;  %5896 = vlog2.f32 %v3575_v4  ;;  %v3032_v19 = vand.u32 2147483647, %v8239_v0  ;;  %v8253_v20 = vadd.f32 %v8183_v53, %v2170_v22  ;;  %vm3681_vm13 = vcmp.ge.f32.partialorder %v8071_v42, 0.0 }
 0x380   : > { %v5881_v44 = vpop.eup %5880  ;;  %v3984_v5 = vmul.f32 %v5879_v58, %v3786_v35  ;;  %5898 = vpow2.f32 %v3257_v51  ;;  %v4577_v43 = vsub.f32 %v4353_v48, %v4465_v28  ;;  %v4359_v16 = vmax.f32 %v8109_v46, 0.0  ;;  %v8277_v12 = vpop.f32.mrf.mxu1 }
 0x381   : > { %v4768_v21 = vmul.f32 0.6931472, %v5881_v44  ;;  %5900 = vrcp.f32 %v3576_v18  ;;  %v3144_v11 = vsub.f32 0.0, %v3032_v19  ;;  %v3038_v15 = vand.u32 2147483647, %v8242_v13  ;;  %v8285_v44 = vpop.f32.mrf.mxu0 }
 0x382   : > { %4122 = vst [vmem:[%s7626_s18 + $0x2a8] sm:$0xff] %v3984_v5  ;;  %5902 = vlog2.f32 %v3576_v18  ;;  %v5883_v55 = vpop.eup %5882  ;;  %v3792_v53 = vsel %vm3680_vm12, 1.0, %v8179_v39  ;;  %v4471_v31 = vmul.f32 %v4247_v27, %v8109_v46  ;;  %v2174_v24 = vadd.f32 %v8175_v30, %v7852_v14 }
 0x383   : > { %v4906_v7 = vadd.f32 %v4768_v21, %v4570_v6  ;;  %v5885_v23 = vpop.eup %5884  ;;  %v3996_v56 = vmul.f32 %v5883_v55, %v3792_v53  ;;  %v3259_v25 = vmul.f32 1.442695, %v3144_v11  ;;  %v3150_v60 = vsub.f32 0.0, %v3038_v15  ;;  %v8296_v11 = vpop.f32.mrf.mxu1  ;;  %v4254_v55 = vld [vmem:[%s6932_s13 + $0x348] sm:$0xff] }
 0x384   : > { %v3039_v4 = vand.u32 2147483647, %v8253_v20  ;;  %v8271_v6 = vpop.eup %5886  ;;  %v4780_v52 = vmul.f32 0.6931472, %v5885_v23  ;;  %vm3687_vm14 = vcmp.ge.f32.partialorder %v8109_v46, 0.0  ;;  %v4360_v39 = vmax.f32 %v8116_v49, 0.0 }
 0x385   : > { %v8273_v41 = vadd.f32 %v4906_v7, %v4905_v57  ;;  %4128 = vst [vmem:[%s7626_s18 + $0x2d8] sm:$0xff] %v3996_v56  ;;  %v3793_v48 = vsel %vm3681_vm13, 1.0, %v8198_v8  ;;  %v3582_v28 = vadd.f32 1.0, %v8271_v6  ;;  %5904 = vpow2.f32 %v3259_v25 }
 0x386   : > { %v5889_v30 = vpop.eup %5888  ;;  %v3271_v51 = vmul.f32 1.442695, %v3150_v60  ;;  %v4912_v22 = vadd.f32 %v4780_v52, %v4576_v3  ;;  %v4472_v35 = vmul.f32 %v4248_v50, %v8116_v49  ;;  %v3151_v18 = vsub.f32 0.0, %v3039_v4  ;;  %v8317_v4 = vpop.f32.mrf.mxu1 }
 0x387   : > { %v5891_v57 = vpop.eup %5890  ;;  %v3998_v58 = vmul.f32 %v5889_v30, %v3793_v48  ;;  %v4583_v19 = vsub.f32 %v4359_v16, %v4471_v31  ;;  %5906 = vrcp.f32 %v3582_v28  ;;  %v8290_v42 = vadd.f32 %v8207_v10, %v2174_v24 }
 0x388   : > { %v8287_v5 = vpop.eup %5892  ;;  %v4782_v27 = vmul.f32 0.6931472, %v5891_v57  ;;  %5908 = vlog2.f32 %v3582_v28  ;;  %v3273_v3 = vmul.f32 1.442695, %v3151_v18  ;;  %v2176_v21 = vadd.f32 %v8196_v38, %v7856_v26  ;;  %v8305_v38 = vpop.f32.mrf.mxu0 }
 0x389   : > { %4129 = vst [vmem:[%s7626_s18 + $0x2e0] sm:$0xff] %v3998_v58  ;;  %v3583_v8 = vadd.f32 1.0, %v8287_v5  ;;  %vm3688_vm15 = vcmp.ge.f32.partialorder %v8116_v49, 0.0  ;;  %5910 = vpow2.f32 %v3271_v51  ;;  %v3045_v16 = vand.u32 2147483647, %v8290_v42  ;;  %v4151_v58 = vld [vmem:[%s6932_s13 + $0x10] sm:$0xff] }
 0x38a   : > { %v4913_v15 = vadd.f32 %v4782_v27, %v4577_v43  ;;  %v3799_v7 = vsel %vm3687_vm14, 1.0, %v8219_v33  ;;  %v4584_v53 = vsub.f32 %v4360_v39, %v4472_v35  ;;  %v4366_v31 = vmax.f32 %v8159_v32, 0.0  ;;  %v4255_v33 = vld [vmem:[%s6932_s13 + $0x350] sm:$0xff]  ;;  %v8329_v18 = vpop.f32.mrf.mxu0 }
 0x38b   : > { %v5895_v10 = vpop.eup %5894  ;;  %5912 = vrcp.f32 %v3583_v8  ;;  %vm3694_vm0 = vcmp.ge.f32.partialorder %v8159_v32, 0.0  ;;  %v3157_v56 = vsub.f32 0.0, %v3045_v16  ;;  %v4478_v46 = vmul.f32 %v4254_v55, %v8159_v32 }
 0x38c   : > { %v5897_v43 = vpop.eup %5896  ;;  %v8307_v24 = vadd.f32 %v4913_v15, %v4912_v22  ;;  %v4010_v23 = vmul.f32 %v5895_v10, %v3799_v7  ;;  %5914 = vlog2.f32 %v3583_v8  ;;  %v8315_v60 = vadd.f32 %v8222_v29, %v2176_v21 }
 0x38d   : > { %v8310_v50 = vpop.eup %5898  ;;  %v4794_v25 = vmul.f32 0.6931472, %v5897_v43  ;;  %5916 = vpow2.f32 %v3273_v3  ;;  %v3800_v39 = vsel %vm3688_vm15, 1.0, %v8235_v61  ;;  %v3285_v48 = vmul.f32 1.442695, %v3157_v56  ;;  %v8339_v3 = vpop.f32.mrf.mxu1 }
 0x38e   : > { %v5901_v52 = vpop.eup %5900  ;;  %4135 = vst [vmem:[%s7626_s18 + $0x310] sm:$0xff] %v4010_v23  ;;  %v3479_v30 = vadd.f32 1.0, %v8310_v50  ;;  %v2180_v28 = vadd.f32 %v8211_v36, %v7852_v14  ;;  %v4367_v29 = vmax.f32 %v8169_v62, 0.0  ;;  %v3046_v35 = vand.u32 2147483647, %v8315_v60  ;;  %v8348_v43 = vpop.f32.mrf.mxu0 }
 0x38f   : > { %v5903_v51 = vpop.eup %5902  ;;  %v4919_v57 = vadd.f32 %v4794_v25, %v4583_v19  ;;  %v4012_v22 = vmul.f32 %v5901_v52, %v3800_v39  ;;  %v4479_v49 = vmul.f32 %v4255_v33, %v8169_v62  ;;  %v4263_v61 = vmax.f32 %v8194_v37, 0.0 }
 0x390   : > { %v4796_v27 = vmul.f32 0.6931472, %v5903_v51  ;;  %5918 = vrcp.f32 %v3479_v30  ;;  %v3158_v8 = vsub.f32 0.0, %v3046_v35  ;;  %v8335_v36 = vadd.f32 %v8248_v34, %v2180_v28 }
 0x391   : > { %4136 = vst [vmem:[%s7626_s18 + $0x318] sm:$0xff] %v4012_v22  ;;  %5920 = vlog2.f32 %v3479_v30  ;;  %v2182_v19 = vadd.f32 %v8233_v47, %v7856_v26  ;;  %v4375_v15 = vmul.f32 %v4151_v58, %v8194_v37  ;;  %v2186_v55 = vadd.f32 %v8256_v63, %v7852_v14  ;;  %v4152_v30 = vld [vmem:[%s6932_s13 + $0x18] sm:$0xff] }
 0x392   : > { %v4920_v21 = vadd.f32 %v4796_v27, %v4584_v53  ;;  %5922 = vpow2.f32 %v3285_v48  ;;  %v8344_v16 = vpop.eup %5904  ;;  %v4590_v10 = vsub.f32 %v4366_v31, %v4478_v46  ;;  %vm3695_vm1 = vcmp.ge.f32.partialorder %v8169_v62, 0.0  ;;  %v8360_v46 = vpop.f32.mrf.mxu1 }
 0x393   : > { %v3287_v7 = vmul.f32 1.442695, %v3158_v8  ;;  %v3052_v34 = vand.u32 2147483647, %v8335_v36  ;;  %v4591_v53 = vsub.f32 %v4367_v29, %v4479_v49  ;;  %vm3591_vm2 = vcmp.ge.f32.partialorder %v8194_v37, 0.0 }
 0x394   : > { %v8350_v47 = vadd.f32 %v4920_v21, %v4919_v57  ;;  %v3480_v23 = vadd.f32 1.0, %v8344_v16  ;;  %v5907_v56 = vpop.eup %5906  ;;  %v3806_v63 = vsel %vm3694_vm0, 1.0, %v8271_v6  ;;  %v8358_v25 = vadd.f32 %v8267_v17, %v2182_v19  ;;  %v8369_v17 = vpop.f32.mrf.mxu0 }
 0x395   : > { %5924 = vpow2.f32 %v3287_v7  ;;  %v3164_v31 = vsub.f32 0.0, %v3052_v34  ;;  %v5909_v33 = vpop.eup %5908  ;;  %v4024_v52 = vmul.f32 %v5907_v56, %v3806_v63  ;;  %v4487_v39 = vsub.f32 %v4263_v61, %v4375_v15  ;;  %v4158_v61 = vld [vmem:[%s6932_s13 + $0x48] sm:$0xff]  ;;  %v8380_v19 = vpop.f32.mrf.mxu1  ;;  %v4159_v15 = vld [vmem:[%s6932_s13 + $0x50] sm:$0xff] }
 0x396   : > { %5926 = vrcp.f32 %v3480_v23  ;;  %v8364_v48 = vadd.f32 %v8285_v44, %v2186_v55  ;;  %v8366_v28 = vpop.eup %5910  ;;  %v4808_v32 = vmul.f32 0.6931472, %v5909_v33  ;;  %v3053_v51 = vand.u32 2147483647, %v8358_v25  ;;  %v8390_v34 = vpop.f32.mrf.mxu0 }
 0x397   : > { %5928 = vlog2.f32 %v3480_v23  ;;  %v3299_v6 = vmul.f32 1.442695, %v3164_v31  ;;  %4142 = vst [vmem:[%s7626_s18 + $0x348] sm:$0xff] %v4024_v52  ;;  %v3807_v22 = vsel %vm3695_vm1, 1.0, %v8287_v5  ;;  %v4264_v44 = vmax.f32 %v8239_v0, 0.0 }
 0x398   : > { %v5913_v57 = vpop.eup %5912  ;;  %v3486_v29 = vadd.f32 1.0, %v8366_v28  ;;  %v2188_v58 = vadd.f32 %v8277_v12, %v7856_v26  ;;  %v4926_v27 = vadd.f32 %v4808_v32, %v4590_v10  ;;  %v3165_v8 = vsub.f32 0.0, %v3053_v51 }
 0x399   : > { %v5915_v35 = vpop.eup %5914  ;;  %v4026_v49 = vmul.f32 %v5913_v57, %v3807_v22  ;;  %5930 = vpow2.f32 %v3299_v6  ;;  %v4376_v5 = vmul.f32 %v4152_v30, %v8239_v0  ;;  %v3059_v55 = vand.u32 2147483647, %v8364_v48  ;;  %v8401_v6 = vpop.f32.mrf.mxu1 }
 0x39a   : > { %v8382_v21 = vpop.eup %5916  ;;  %v4810_v62 = vmul.f32 0.6931472, %v5915_v35  ;;  %5932 = vrcp.f32 %v3486_v29  ;;  %v4270_v12 = vmax.f32 %v8242_v13, 0.0  ;;  %v3301_v7 = vmul.f32 1.442695, %v3165_v8 }
 0x39b   : > { %4143 = vst [vmem:[%s7626_s18 + $0x350] sm:$0xff] %v4026_v49  ;;  %5934 = vlog2.f32 %v3486_v29  ;;  %v3487_v10 = vadd.f32 1.0, %v8382_v21  ;;  %v4382_v56 = vmul.f32 %v4158_v61, %v8242_v13  ;;  %v4271_v63 = vmax.f32 %v8253_v20, 0.0  ;;  %v8415_v8 = vpop.f32.mrf.mxu1 }
 0x39c   : > { %v4927_v23 = vadd.f32 %v4810_v62, %v4591_v53  ;;  %v3171_v31 = vsub.f32 0.0, %v3059_v55  ;;  %v3703_v52 = vsel %vm3591_vm2, 1.0, %v8310_v50  ;;  %v4383_v30 = vmul.f32 %v4159_v15, %v8253_v20  ;;  %v8409_v50 = vpop.f32.mrf.mxu0 }
 0x39d   : > { %v5919_v33 = vpop.eup %5918  ;;  %5936 = vrcp.f32 %v3487_v10  ;;  %v8399_v32 = vadd.f32 %v8305_v38, %v2188_v58  ;;  %vm3592_vm3 = vcmp.ge.f32.partialorder %v8239_v0, 0.0  ;;  %v4488_v38 = vsub.f32 %v4264_v44, %v4376_v5 }
 0x39e   : > { %v5921_v53 = vpop.eup %5920  ;;  %v8403_v51 = vadd.f32 %v4927_v23, %v4926_v27  ;;  %v3818_v57 = vmul.f32 %v5919_v33, %v3703_v52  ;;  %5938 = vlog2.f32 %v3487_v10  ;;  %v3313_v22 = vmul.f32 1.442695, %v3171_v31  ;;  %v10496_v10 = vld [vmem:[#allocation73_spill] sm:$0xff] }
 0x39f   : > { %v8405_v29 = vpop.eup %5922  ;;  %v4602_v35 = vmul.f32 0.6931472, %v5921_v53  ;;  %5940 = vpow2.f32 %v3301_v7  ;;  %v3060_v37 = vand.u32 2147483647, %v8399_v32  ;;  %vm3598_vm4 = vcmp.ge.f32.partialorder %v8242_v13, 0.0  ;;  %v4165_v7 = vld [vmem:[%s6932_s13 + $0x80] sm:$0xff] }
 0x3a0   : > { %4039 = vst [vmem:[%s7626_s18 + $0x10] sm:$0xff] %v3818_v57  ;;  %v3493_v58 = vadd.f32 1.0, %v8405_v29  ;;  %5942 = vpow2.f32 %v3313_v22  ;;  %v4494_v49 = vsub.f32 %v4270_v12, %v4382_v56  ;;  %vm3599_vm5 = vcmp.ge.f32.partialorder %v8253_v20, 0.0  ;;  %v8431_v56 = vpop.f32.mrf.mxu0  ;;  %v4166_v57 = vld [vmem:[%s6932_s13 + $0x88] sm:$0xff] }
 0x3a1   : > { %v4823_v27 = vadd.f32 %v4602_v35, %v4487_v39  ;;  %v3172_v61 = vsub.f32 0.0, %v3060_v37  ;;  %v8419_v15 = vsub.f32 %v4271_v63, %v4383_v30  ;;  %v2192_v44 = vadd.f32 %v8296_v11, %v7852_v14  ;;  %v8442_v30 = vpop.f32.mrf.mxu1 }
 0x3a2   : > { %v8417_v62 = vpop.eup %5924  ;;  %5944 = vrcp.f32 %v3493_v58  ;;  %v2194_v5 = vadd.f32 %v8317_v4, %v7856_v26  ;;  %v3704_v12 = vsel %vm3592_vm3, 1.0, %v8344_v16  ;;  %v2198_v33 = vadd.f32 %v8339_v3, %v7852_v14 }
 0x3a3   : > { %v5927_v55 = vpop.eup %5926  ;;  %v5076_v39 = vadd.f32 %v10496_v10, %v4823_v27  ;;  %5946 = vlog2.f32 %v3493_v58  ;;  %v3494_v23 = vadd.f32 1.0, %v8417_v62  ;;  %v3315_v31 = vmul.f32 1.442695, %v3172_v61  ;;  %v8456_v27 = vpop.f32.mrf.mxu0 }
 0x3a4   : > { %v5929_v63 = vpop.eup %5928  ;;  %v3820_v11 = vmul.f32 %v5927_v55, %v3704_v12  ;;  %v8434_v4 = vadd.f32 %v8329_v18, %v2192_v44  ;;  %v4277_v0 = vmax.f32 %v8290_v42, 0.0  ;;  %v8440_v16 = vadd.f32 %v8348_v43, %v2194_v5  ;;  %v4172_v5 = vld [vmem:[%s6932_s13 + $0xb8] sm:$0xff] }
 0x3a5   : > { %v4604_v52 = vmul.f32 0.6931472, %v5929_v63  ;;  %5948 = vrcp.f32 %v3494_v23  ;;  %vm3605_vm6 = vcmp.ge.f32.partialorder %v8290_v42, 0.0  ;;  %v4389_v18 = vmul.f32 %v4165_v7, %v8290_v42 }
 0x3a6   : > { %v8444_v53 = vpop.eup %5930  ;;  %4040 = vst [vmem:[%s7626_s18 + $0x18] sm:$0xff] %v3820_v11  ;;  %v4278_v3 = vmax.f32 %v8315_v60, 0.0  ;;  %5950 = vlog2.f32 %v3494_v23  ;;  %v3066_v22 = vand.u32 2147483647, %v8434_v4  ;;  %v3710_v43 = vsel %vm3598_vm4, 1.0, %v8366_v28  ;;  %v8466_v28 = vpop.f32.mrf.mxu1 }
 0x3a7   : > { %v5933_v35 = vpop.eup %5932  ;;  %v4824_v37 = vadd.f32 %v4604_v52, %v4488_v38  ;;  %v3500_v58 = vadd.f32 1.0, %v8444_v53  ;;  %5952 = vpow2.f32 %v3315_v31  ;;  %v3067_v10 = vand.u32 2147483647, %v8440_v16 }
 0x3a8   : > { %v5935_v61 = vpop.eup %5934  ;;  %v3832_v44 = vmul.f32 %v5933_v35, %v3710_v43  ;;  %v3178_v55 = vsub.f32 0.0, %v3066_v22  ;;  %v8461_v12 = vadd.f32 %v8369_v17, %v2198_v33  ;;  %v4390_v13 = vmul.f32 %v4166_v57, %v8315_v60  ;;  %v8474_v22 = vpop.f32.mrf.mxu0 }
 0x3a9   : > { %v8463_v38 = vadd.f32 %v5076_v39, %v4824_v37  ;;  %v4616_v7 = vmul.f32 0.6931472, %v5935_v61  ;;  %5954 = vrcp.f32 %v3500_v58  ;;  %v3711_v63 = vsel %vm3599_vm5, 1.0, %v8382_v21 }
 0x3aa   : > { %v5937_v23 = vpop.eup %5936  ;;  %4046 = vst [vmem:[%s7626_s18 + $0x48] sm:$0xff] %v3832_v44  ;;  %5956 = vlog2.f32 %v3500_v58  ;;  %v3327_v11 = vmul.f32 1.442695, %v3178_v55  ;;  %v3179_v31 = vsub.f32 0.0, %v3067_v10  ;;  %v4284_v52 = vmax.f32 %v8335_v36, 0.0  ;;  %v8485_v44 = vpop.f32.mrf.mxu1 }
 0x3ab   : > { %v5939_v17 = vpop.eup %5938  ;;  %v4830_v33 = vadd.f32 %v4616_v7, %v4494_v49  ;;  %v3834_v39 = vmul.f32 %v5937_v23, %v3711_v63  ;;  %v4396_v57 = vmul.f32 %v4172_v5, %v8335_v36  ;;  %v3073_v20 = vand.u32 2147483647, %v8461_v12 }
 0x3ac   : > { %v8476_v35 = vpop.eup %5940  ;;  %v4618_v37 = vmul.f32 0.6931472, %v5939_v17  ;;  %5958 = vpow2.f32 %v3327_v11  ;;  %v3329_v43 = vmul.f32 1.442695, %v3179_v31  ;;  %v4501_v49 = vsub.f32 %v4277_v0, %v4389_v18  ;;  %v8493_v18 = vpop.f32.mrf.mxu0  ;;  %v4173_v11 = vld [vmem:[%s6932_s13 + $0xc0] sm:$0xff] }
 0x3ad   : > { %v8479_v21 = vpop.eup %5942  ;;  %v5077_v58 = vadd.f32 %v7711_v1, %v4830_v33  ;;  %4047 = vst [vmem:[%s7626_s18 + $0x50] sm:$0xff] %v3834_v39  ;;  %vm3606_vm7 = vcmp.ge.f32.partialorder %v8315_v60, 0.0  ;;  %v3501_v61 = vadd.f32 1.0, %v8476_v35  ;;  %v4502_v55 = vsub.f32 %v4278_v3, %v4390_v13 }
 0x3ae   : > { %v4831_v5 = vadd.f32 %v4618_v37, %v8419_v15  ;;  %v3507_v10 = vadd.f32 1.0, %v8479_v21  ;;  %5960 = vpow2.f32 %v3329_v43  ;;  %v3717_v1 = vsel %vm3605_vm6, 1.0, %v8405_v29  ;;  %v8500_v29 = vpop.f32.mrf.mxu1 }
 0x3af   : > { %v5945_v7 = vpop.eup %5944  ;;  %vm3612_vm8 = vcmp.ge.f32.partialorder %v8335_v36, 0.0  ;;  %5962 = vrcp.f32 %v3501_v61  ;;  %v3185_v0 = vsub.f32 0.0, %v3073_v20  ;;  %v4508_v3 = vsub.f32 %v4284_v52, %v4396_v57 }
 0x3b0   : > { %v5947_v23 = vpop.eup %5946  ;;  %v8495_v63 = vadd.f32 %v5077_v58, %v4831_v5  ;;  %v3846_v15 = vmul.f32 %v5945_v7, %v3717_v1  ;;  %5964 = vlog2.f32 %v3501_v61  ;;  %v2200_v42 = vadd.f32 %v8360_v46, %v7856_v26  ;;  %v4179_v46 = vld [vmem:[%s6932_s13 + $0xf0] sm:$0xff]  ;;  %v8514_v58 = vpop.f32.mrf.mxu0 }
 0x3b1   : > { %v4630_v13 = vmul.f32 0.6931472, %v5947_v23  ;;  %5966 = vrcp.f32 %v3507_v10  ;;  %v3341_v31 = vmul.f32 1.442695, %v3185_v0  ;;  %v3718_v33 = vsel %vm3606_vm7, 1.0, %v8417_v62  ;;  %v8528_v7 = vpop.f32.mrf.mxu1 }
 0x3b2   : > { %v5949_v17 = vpop.eup %5948  ;;  %4053 = vst [vmem:[%s7626_s18 + $0x80] sm:$0xff] %v3846_v15  ;;  %5968 = vlog2.f32 %v3507_v10  ;;  %v2204_v39 = vadd.f32 %v8380_v19, %v7852_v14  ;;  %v2206_v52 = vadd.f32 %v8401_v6, %v7856_v26  ;;  %v8512_v20 = vadd.f32 %v8390_v34, %v2200_v42  ;;  %v8538_v42 = vpop.f32.mrf.mxu0 }
 0x3b3   : > { %v5951_v57 = vpop.eup %5950  ;;  %v4837_v37 = vadd.f32 %v4630_v13, %v4501_v49  ;;  %v3848_v43 = vmul.f32 %v5949_v17, %v3718_v33  ;;  %5970 = vpow2.f32 %v3341_v31  ;;  %v4285_v61 = vmax.f32 %v8358_v25, 0.0 }
 0x3b4   : > { %v8516_v60 = vpop.eup %5952  ;;  %v4632_v62 = vmul.f32 0.6931472, %v5951_v57  ;;  %v4397_v19 = vmul.f32 %v4173_v11, %v8358_v25  ;;  %v8521_v5 = vadd.f32 %v8409_v50, %v2204_v39  ;;  %v4291_v49 = vmax.f32 %v8364_v48, 0.0  ;;  %v8547_v39 = vpop.f32.mrf.mxu1 }
 0x3b5   : > { %v5078_v6 = vadd.f32 %v7752_v54, %v4837_v37  ;;  %4054 = vst [vmem:[%s7626_s18 + $0x88] sm:$0xff] %v3848_v43  ;;  %v3508_v34 = vadd.f32 1.0, %v8516_v60  ;;  %v3074_v10 = vand.u32 2147483647, %v8512_v20  ;;  %v3724_v23 = vsel %vm3612_vm8, 1.0, %v8444_v53 }
 0x3b6   : > { %v5955_v1 = vpop.eup %5954  ;;  %v4838_v0 = vadd.f32 %v4632_v62, %v4502_v55  ;;  %v4403_v50 = vmul.f32 %v4179_v46, %v8364_v48  ;;  %v8535_v54 = vadd.f32 %v8431_v56, %v2206_v52  ;;  %v3080_v31 = vand.u32 2147483647, %v8521_v5  ;;  %v4180_v46 = vld [vmem:[%s6932_s13 + $0xf8] sm:$0xff] }
 0x3b7   : > { %v5957_v15 = vpop.eup %5956  ;;  %v3860_v13 = vmul.f32 %v5955_v1, %v3724_v23  ;;  %5972 = vrcp.f32 %v3508_v34  ;;  %v3186_v11 = vsub.f32 0.0, %v3074_v10  ;;  %vm3613_vm9 = vcmp.ge.f32.partialorder %v8358_v25, 0.0 }
 0x3b8   : > { %v8540_v17 = vadd.f32 %v5078_v6, %v4838_v0  ;;  %v4644_v55 = vmul.f32 0.6931472, %v5957_v15  ;;  %5974 = vlog2.f32 %v3508_v34  ;;  %v4509_v56 = vsub.f32 %v4285_v61, %v4397_v19  ;;  %v8558_v19 = vpop.f32.mrf.mxu0  ;;  %v10497_v6 = vld [vmem:[#allocation76_spill] sm:$0xff] }
 0x3b9   : > { %v8543_v36 = vpop.eup %5958  ;;  %4060 = vst [vmem:[%s7626_s18 + $0xb8] sm:$0xff] %v3860_v13  ;;  %vm3619_vm10 = vcmp.ge.f32.partialorder %v8364_v48, 0.0  ;;  %v3343_v53 = vmul.f32 1.442695, %v3186_v11  ;;  %v3192_v33 = vsub.f32 0.0, %v3080_v31  ;;  %v4515_v57 = vsub.f32 %v4291_v49, %v4403_v50  ;;  %v8563_v50 = vpop.f32.mrf.mxu1  ;;  %v4186_v31 = vld [vmem:[%s6932_s13 + $0x128] sm:$0xff] }
 0x3ba   : > { %v4844_v52 = vadd.f32 %v4644_v55, %v4508_v3  ;;  %vm3620_vm11 = vcmp.ge.f32.partialorder %v8399_v32, 0.0  ;;  %v3514_v37 = vadd.f32 1.0, %v8543_v36  ;;  %v3725_v25 = vsel %vm3613_vm9, 1.0, %v8476_v35 }
 0x3bb   : > { %v8551_v43 = vpop.eup %5960  ;;  %5976 = vpow2.f32 %v3343_v53  ;;  %v3081_v62 = vand.u32 2147483647, %v8535_v54  ;;  %v2210_v61 = vadd.f32 %v8415_v8, %v7852_v14  ;;  %v3355_v10 = vmul.f32 1.442695, %v3192_v33  ;;  %v4187_v33 = vld [vmem:[%s6932_s13 + $0x130] sm:$0xff] }
 0x3bc   : > { %v5963_v3 = vpop.eup %5962  ;;  %v5079_v49 = vadd.f32 %v10497_v6, %v4844_v52  ;;  %5978 = vrcp.f32 %v3514_v37  ;;  %v3515_v34 = vadd.f32 1.0, %v8551_v43  ;;  %v4292_v0 = vmax.f32 %v8399_v32, 0.0 }
 0x3bd   : > { %v5965_v35 = vpop.eup %5964  ;;  %v3862_v1 = vmul.f32 %v5963_v3, %v3725_v25  ;;  %5980 = vlog2.f32 %v3514_v37  ;;  %v3193_v23 = vsub.f32 0.0, %v3081_v62  ;;  %v3731_v13 = vsel %vm3619_vm10, 1.0, %v8479_v21  ;;  %v8575_v25 = vpop.f32.mrf.mxu0 }
 0x3be   : > { %v5967_v8 = vpop.eup %5966  ;;  %v4646_v15 = vmul.f32 0.6931472, %v5965_v35  ;;  %v4404_v11 = vmul.f32 %v4180_v46, %v8399_v32  ;;  %5982 = vrcp.f32 %v3515_v34  ;;  %v8573_v37 = vadd.f32 %v8456_v27, %v2210_v61  ;;  %v8584_v35 = vpop.f32.mrf.mxu1 }
 0x3bf   : > { %v5969_v55 = vpop.eup %5968  ;;  %4061 = vst [vmem:[%s7626_s18 + $0xc0] sm:$0xff] %v3862_v1  ;;  %v3874_v53 = vmul.f32 %v5967_v8, %v3731_v13  ;;  %5984 = vlog2.f32 %v3515_v34  ;;  %v3357_v52 = vmul.f32 1.442695, %v3193_v23  ;;  %v4298_v46 = vmax.f32 %v8434_v4, 0.0 }
 0x3c0   : > { %v8577_v62 = vpop.eup %5970  ;;  %v4845_v48 = vadd.f32 %v4646_v15, %v4509_v56  ;;  %v4658_v21 = vmul.f32 0.6931472, %v5969_v55  ;;  %5986 = vpow2.f32 %v3355_v10  ;;  %v4410_v3 = vmul.f32 %v4186_v31, %v8434_v4  ;;  %v8595_v15 = vpop.f32.mrf.mxu0 }
 0x3c1   : > { %4067 = vst [vmem:[%s7626_s18 + $0xf0] sm:$0xff] %v3874_v53  ;;  %v3521_v6 = vadd.f32 1.0, %v8577_v62  ;;  %5988 = vpow2.f32 %v3357_v52  ;;  %v3087_v34 = vand.u32 2147483647, %v8573_v37  ;;  %v4299_v1 = vmax.f32 %v8440_v16, 0.0 }
 0x3c2   : > { %v8586_v27 = vadd.f32 %v5079_v49, %v4845_v48  ;;  %v4851_v61 = vadd.f32 %v4658_v21, %v4515_v57  ;;  %v4411_v56 = vmul.f32 %v4187_v33, %v8440_v16  ;;  %v3732_v10 = vsel %vm3620_vm11, 1.0, %v8516_v60  ;;  %v10498_v49 = vld [vmem:[#allocation24_spill] sm:$0xff] }
 0x3c3   : > { %5990 = vrcp.f32 %v3521_v6  ;;  %v3199_v23 = vsub.f32 0.0, %v3087_v34  ;;  %v2212_v8 = vadd.f32 %v8442_v30, %v7856_v26  ;;  %v2216_v57 = vadd.f32 %v8466_v28, %v7852_v14  ;;  %v8605_v30 = vpop.f32.mrf.mxu1 }
 0x3c4   : > { %v5973_v13 = vpop.eup %5972  ;;  %v5080_v31 = vadd.f32 %v10498_v49, %v4851_v61  ;;  %5992 = vlog2.f32 %v3521_v6  ;;  %v2218_v55 = vadd.f32 %v8485_v44, %v7856_v26  ;;  %v4516_v52 = vsub.f32 %v4292_v0, %v4404_v11  ;;  %v8614_v6 = vpop.f32.mrf.mxu0 }
 0x3c5   : > { %v5975_v32 = vpop.eup %5974  ;;  %v3876_v60 = vmul.f32 %v5973_v13, %v3732_v10  ;;  %v3369_v53 = vmul.f32 1.442695, %v3199_v23  ;;  %v8603_v33 = vadd.f32 %v8474_v22, %v2212_v8  ;;  %vm3626_vm12 = vcmp.ge.f32.partialorder %v8434_v4, 0.0  ;;  %v8625_v10 = vpop.f32.mrf.mxu1 }
 0x3c6   : > { %v4660_v48 = vmul.f32 0.6931472, %v5975_v32  ;;  %v8609_v21 = vadd.f32 %v8493_v18, %v2216_v57  ;;  %v4522_v28 = vsub.f32 %v4298_v46, %v4410_v3  ;;  %vm3627_vm13 = vcmp.ge.f32.partialorder %v8440_v16, 0.0  ;;  %v8634_v32 = vpop.f32.mrf.mxu0  ;;  %v4194_v16 = vld [vmem:[%s6932_s13 + $0x168] sm:$0xff] }
 0x3c7   : > { %4068 = vst [vmem:[%s7626_s18 + $0xf8] sm:$0xff] %v3876_v60  ;;  %5994 = vpow2.f32 %v3369_v53  ;;  %v3088_v44 = vand.u32 2147483647, %v8603_v33  ;;  %v4523_v0 = vsub.f32 %v4299_v1, %v4411_v56  ;;  %v8620_v4 = vadd.f32 %v8514_v58, %v2218_v55  ;;  %v4193_v56 = vld [vmem:[%s6932_s13 + $0x160] sm:$0xff] }
 0x3c8   : > { %v8616_v22 = vpop.eup %5976  ;;  %v4852_v34 = vadd.f32 %v4660_v48, %v4516_v52  ;;  %v3094_v11 = vand.u32 2147483647, %v8609_v21  ;;  %v3738_v46 = vsel %vm3626_vm12, 1.0, %v8543_v36  ;;  %vm3633_vm14 = vcmp.ge.f32.partialorder %v8461_v12, 0.0 }
 0x3c9   : > { %v5979_v18 = vpop.eup %5978  ;;  %v3522_v3 = vadd.f32 1.0, %v8616_v22  ;;  %v3200_v61 = vsub.f32 0.0, %v3088_v44  ;;  %v4305_v13 = vmax.f32 %v8461_v12, 0.0  ;;  %v3739_v36 = vsel %vm3627_vm13, 1.0, %v8551_v43  ;;  %v8642_v43 = vpop.f32.mrf.mxu1 }
 0x3ca   : > { %v5981_v23 = vpop.eup %5980  ;;  %v8627_v8 = vadd.f32 %v5080_v31, %v4852_v34  ;;  %v3888_v1 = vmul.f32 %v5979_v18, %v3738_v46  ;;  %v3206_v58 = vsub.f32 0.0, %v3094_v11  ;;  %v3095_v52 = vand.u32 2147483647, %v8620_v4 }
 0x3cb   : > { %v5983_v49 = vpop.eup %5982  ;;  %v4672_v57 = vmul.f32 0.6931472, %v5981_v23  ;;  %5996 = vrcp.f32 %v3522_v3  ;;  %v3371_v55 = vmul.f32 1.442695, %v3200_v61  ;;  %v4417_v11 = vmul.f32 %v4193_v56, %v8461_v12  ;;  %v10500_v23 = vld [vmem:[#allocation25_spill] sm:$0xff] }
 0x3cc   : > { %10499 = vst [vmem:[#allocation72_spill] sm:$0xff] %v8627_v8  ;;  %v5985_v60 = vpop.eup %5984  ;;  %4074 = vst [vmem:[%s7626_s18 + $0x128] sm:$0xff] %v3888_v1  ;;  %v3890_v31 = vmul.f32 %v5983_v49, %v3739_v36  ;;  %5998 = vlog2.f32 %v3522_v3  ;;  %v3383_v53 = vmul.f32 1.442695, %v3206_v58  ;;  %v3207_v3 = vsub.f32 0.0, %v3095_v52  ;;  %v8653_v49 = vpop.f32.mrf.mxu0 }
 0x3cd   : > { %v8638_v48 = vpop.eup %5986  ;;  %v4858_v44 = vadd.f32 %v4672_v57, %v4522_v28  ;;  %v4674_v34 = vmul.f32 0.6931472, %v5985_v60  ;;  %6000 = vpow2.f32 %v3371_v55  ;;  %v2222_v61 = vadd.f32 %v8500_v29, %v7852_v14  ;;  %v8661_v52 = vpop.f32.mrf.mxu1 }
 0x3ce   : > { %v8644_v18 = vpop.eup %5988  ;;  %4075 = vst [vmem:[%s7626_s18 + $0x130] sm:$0xff] %v3890_v31  ;;  %v3528_v46 = vadd.f32 1.0, %v8638_v48  ;;  %6002 = vpow2.f32 %v3383_v53  ;;  %v4306_v56 = vmax.f32 %v8512_v20, 0.0  ;;  %v3745_v36 = vsel %vm3633_vm14, 1.0, %v8577_v62 }
 0x3cf   : > { %v5081_v1 = vadd.f32 %v10500_v23, %v4858_v44  ;;  %v4859_v28 = vadd.f32 %v4674_v34, %v4523_v0  ;;  %v3529_v58 = vadd.f32 1.0, %v8644_v18  ;;  %v4418_v55 = vmul.f32 %v4194_v16, %v8512_v20  ;;  %v4200_v34 = vld [vmem:[%s6932_s13 + $0x198] sm:$0xff]  ;;  %v4201_v23 = vld [vmem:[%s6932_s13 + $0x1a0] sm:$0xff] }
 0x3d0   : > { %v5991_v57 = vpop.eup %5990  ;;  %6004 = vrcp.f32 %v3528_v46  ;;  %v3385_v29 = vmul.f32 1.442695, %v3207_v3  ;;  %v4529_v53 = vsub.f32 %v4305_v13, %v4417_v11  ;;  %v8665_v12 = vadd.f32 %v8538_v42, %v2222_v61  ;;  %v8673_v11 = vpop.f32.mrf.mxu0 }
 0x3d1   : > { %v5993_v60 = vpop.eup %5992  ;;  %v8659_v31 = vadd.f32 %v5081_v1, %v4859_v28  ;;  %v3902_v0 = vmul.f32 %v5991_v57, %v3745_v36  ;;  %6006 = vlog2.f32 %v3528_v46  ;;  %v2224_v62 = vadd.f32 %v8528_v7, %v7856_v26 }
 0x3d2   : > { %v4686_v44 = vmul.f32 0.6931472, %v5993_v60  ;;  %6008 = vrcp.f32 %v3529_v58  ;;  %vm3634_vm15 = vcmp.ge.f32.partialorder %v8512_v20, 0.0  ;;  %v2228_v13 = vadd.f32 %v8547_v39, %v7852_v14  ;;  %v8684_v39 = vpop.f32.mrf.mxu1 }
 0x3d3   : > { %10501 = vst [vmem:[#allocation74_spill] sm:$0xff] %v8659_v31  ;;  %4081 = vst [vmem:[%s7626_s18 + $0x160] sm:$0xff] %v3902_v0  ;;  %6010 = vlog2.f32 %v3529_v58  ;;  %v4530_v3 = vsub.f32 %v4306_v56, %v4418_v55  ;;  %v3101_v42 = vand.u32 2147483647, %v8665_v12  ;;  %v4312_v61 = vmax.f32 %v8521_v5, 0.0  ;;  %v10502_v58 = vld [vmem:[#allocation71_spill] sm:$0xff] }
 0x3d4   : > { %v8675_v16 = vpop.eup %5994  ;;  %v4865_v46 = vadd.f32 %v4686_v44, %v4529_v53  ;;  %6012 = vpow2.f32 %v3385_v29  ;;  %v4424_v7 = vmul.f32 %v4200_v34, %v8521_v5  ;;  %v2230_v28 = vadd.f32 %v8563_v50, %v7856_v26  ;;  %v8696_v50 = vpop.f32.mrf.mxu0 }
 0x3d5   : > { %v3535_v1 = vadd.f32 1.0, %v8675_v16  ;;  %v3213_v36 = vsub.f32 0.0, %v3101_v42  ;;  %v8688_v56 = vadd.f32 %v8558_v19, %v2224_v62  ;;  %v8691_v55 = vadd.f32 %v8575_v25, %v2228_v13  ;;  %v4207_v13 = vld [vmem:[%s6932_s13 + $0x1d0] sm:$0xff] }
 0x3d6   : > { %v5082_v57 = vadd.f32 %v10502_v58, %v4865_v46  ;;  %vm3640_vm0 = vcmp.ge.f32.partialorder %v8521_v5, 0.0  ;;  %v4313_v29 = vmax.f32 %v8535_v54, 0.0  ;;  %v4425_v60 = vmul.f32 %v4201_v23, %v8535_v54  ;;  %v8705_v23 = vpop.f32.mrf.mxu1 }
 0x3d7   : > { %6014 = vrcp.f32 %v3535_v1  ;;  %v3746_v53 = vsel %vm3634_vm15, 1.0, %v8616_v22  ;;  %v3397_v19 = vmul.f32 1.442695, %v3213_v36  ;;  %v3102_v25 = vand.u32 2147483647, %v8688_v56 }
 0x3d8   : > { %v5997_v0 = vpop.eup %5996  ;;  %6016 = vlog2.f32 %v3535_v1  ;;  %v4536_v62 = vsub.f32 %v4312_v61, %v4424_v7  ;;  %vm3641_vm1 = vcmp.ge.f32.partialorder %v8535_v54, 0.0  ;;  %v3108_v46 = vand.u32 2147483647, %v8691_v55 }
 0x3d9   : > { %v5999_v44 = vpop.eup %5998  ;;  %v3904_v34 = vmul.f32 %v5997_v0, %v3746_v53  ;;  %6018 = vpow2.f32 %v3397_v19  ;;  %v3214_v20 = vsub.f32 0.0, %v3102_v25  ;;  %v8710_v22 = vadd.f32 %v8595_v15, %v2230_v28  ;;  %v8717_v0 = vpop.f32.mrf.mxu0 }
 0x3da   : > { %v8707_v42 = vpop.eup %6000  ;;  %v4688_v58 = vmul.f32 0.6931472, %v5999_v44  ;;  %v4537_v36 = vsub.f32 %v4313_v29, %v4425_v60  ;;  %vm3647_vm2 = vcmp.ge.f32.partialorder %v8573_v37, 0.0  ;;  %v3220_v7 = vsub.f32 0.0, %v3108_v46  ;;  %v8725_v44 = vpop.f32.mrf.mxu1 }
 0x3db   : > { %v8712_v1 = vpop.eup %6002  ;;  %4082 = vst [vmem:[%s7626_s18 + $0x168] sm:$0xff] %v3904_v34  ;;  %v3536_v61 = vadd.f32 1.0, %v8707_v42  ;;  %v4319_v31 = vmax.f32 %v8573_v37, 0.0  ;;  %v4431_v19 = vmul.f32 %v4207_v13, %v8573_v37  ;;  %v3752_v28 = vsel %vm3640_vm0, 1.0, %v8638_v48 }
 0x3dc   : > { %v4866_v53 = vadd.f32 %v4688_v58, %v4530_v3  ;;  %v3542_v25 = vadd.f32 1.0, %v8712_v1  ;;  %v3399_v29 = vmul.f32 1.442695, %v3214_v20  ;;  %v3411_v60 = vmul.f32 1.442695, %v3220_v7  ;;  %v8735_v20 = vpop.f32.mrf.mxu0  ;;  %v8742_v54 = vpop.f32.mrf.mxu1 }
 0x3dd   : > { %v6005_v15 = vpop.eup %6004  ;;  %6020 = vrcp.f32 %v3536_v61  ;;  %v3109_v13 = vand.u32 2147483647, %v8710_v22  ;;  %v3753_v5 = vsel %vm3641_vm1, 1.0, %v8644_v18  ;;  %v2234_v48 = vadd.f32 %v8584_v35, %v7852_v14 }
 0x3de   : > { %v6007_v34 = vpop.eup %6006  ;;  %v8727_v3 = vadd.f32 %v5082_v57, %v4866_v53  ;;  %v3916_v46 = vmul.f32 %v6005_v15, %v3752_v28  ;;  %6022 = vlog2.f32 %v3536_v61  ;;  %v4543_v53 = vsub.f32 %v4319_v31, %v4431_v19  ;;  %v4208_v61 = vld [vmem:[%s6932_s13 + $0x1d8] sm:$0xff] }
 0x3df   : > { %v6009_v58 = vpop.eup %6008  ;;  %v4700_v8 = vmul.f32 0.6931472, %v6007_v34  ;;  %6024 = vrcp.f32 %v3542_v25  ;;  %v3221_v15 = vsub.f32 0.0, %v3109_v13  ;;  %vm3648_vm3 = vcmp.ge.f32.partialorder %v8603_v33, 0.0 }
 0x3e0   : > { %10503 = vst [vmem:[#allocation77_spill] sm:$0xff] %v8727_v3  ;;  %v6011_v7 = vpop.eup %6010  ;;  %4088 = vst [vmem:[%s7626_s18 + $0x198] sm:$0xff] %v3916_v46  ;;  %v3918_v57 = vmul.f32 %v6009_v58, %v3753_v5  ;;  %6026 = vlog2.f32 %v3542_v25  ;;  %v4320_v35 = vmax.f32 %v8603_v33, 0.0  ;;  %v4432_v46 = vmul.f32 %v4208_v61, %v8603_v33  ;;  %v4214_v58 = vld [vmem:[%s6932_s13 + $0x208] sm:$0xff] }
 0x3e1   : > { %v8739_v28 = vpop.eup %6012  ;;  %v4872_v34 = vadd.f32 %v4700_v8, %v4536_v62  ;;  %v4702_v3 = vmul.f32 0.6931472, %v6011_v7  ;;  %6028 = vpow2.f32 %v3399_v29  ;;  %v3413_v31 = vmul.f32 1.442695, %v3221_v15  ;;  %v8752_v62 = vpop.f32.mrf.mxu0 }
 0x3e2   : > { %4089 = vst [vmem:[%s7626_s18 + $0x1a0] sm:$0xff] %v3918_v57  ;;  %v3543_v18 = vadd.f32 1.0, %v8739_v28  ;;  %6030 = vpow2.f32 %v3411_v60  ;;  %v8750_v8 = vadd.f32 %v8614_v6, %v2234_v48  ;;  %v3759_v13 = vsel %vm3647_vm2, 1.0, %v8675_v16  ;;  %v8765_v48 = vpop.f32.mrf.mxu1  ;;  %v4215_v16 = vld [vmem:[%s6932_s13 + $0x210] sm:$0xff] }
 0x3e3   : > { %v5083_v19 = vadd.f32 %v8025_v40, %v4872_v34  ;;  %v4873_v25 = vadd.f32 %v4702_v3, %v4537_v36  ;;  %v2236_v60 = vadd.f32 %v8605_v30, %v7856_v26  ;;  %v2240_v40 = vadd.f32 %v8625_v10, %v7852_v14  ;;  %v8781_v34 = vpop.f32.mrf.mxu0 }
 0x3e4   : > { %v6015_v29 = vpop.eup %6014  ;;  %6032 = vrcp.f32 %v3543_v18  ;;  %v3115_v5 = vand.u32 2147483647, %v8750_v8  ;;  %vm3654_vm4 = vcmp.ge.f32.partialorder %v8609_v21, 0.0  ;;  %v2242_v30 = vadd.f32 %v8642_v43, %v7856_v26 }
 0x3e5   : > { %v6017_v36 = vpop.eup %6016  ;;  %v8761_v3 = vadd.f32 %v5083_v19, %v4873_v25  ;;  %v3930_v6 = vmul.f32 %v6015_v29, %v3759_v13  ;;  %6034 = vlog2.f32 %v3543_v18  ;;  %v4326_v10 = vmax.f32 %v8609_v21, 0.0 }
 0x3e6   : > { %v4714_v37 = vmul.f32 0.6931472, %v6017_v36  ;;  %6036 = vpow2.f32 %v3413_v31  ;;  %v8771_v7 = vpop.eup %6018  ;;  %v3227_v57 = vsub.f32 0.0, %v3115_v5  ;;  %v8776_v61 = vadd.f32 %v8634_v32, %v2236_v60  ;;  %v8788_v32 = vpop.f32.mrf.mxu1 }
 0x3e7   : > { %10504 = vst [vmem:[#allocation26_spill] sm:$0xff] %v8761_v3  ;;  %4095 = vst [vmem:[%s7626_s18 + $0x1d0] sm:$0xff] %v3930_v6  ;;  %v8779_v15 = vadd.f32 %v8653_v49, %v2240_v40  ;;  %v4544_v19 = vsub.f32 %v4320_v35, %v4432_v46  ;;  %v4438_v31 = vmul.f32 %v4214_v58, %v8609_v21  ;;  %v3549_v43 = vadd.f32 1.0, %v8771_v7  ;;  %v8798_v5 = vpop.f32.mrf.mxu0 }
 0x3e8   : > { %v4879_v18 = vadd.f32 %v4714_v37, %v4543_v53  ;;  %v4327_v25 = vmax.f32 %v8620_v4, 0.0  ;;  %v4439_v29 = vmul.f32 %v4215_v16, %v8620_v4  ;;  %v3425_v13 = vmul.f32 1.442695, %v3227_v57 }
 0x3e9   : > { %v3116_v36 = vand.u32 2147483647, %v8776_v61  ;;  %v3760_v53 = vsel %vm3648_vm3, 1.0, %v8707_v42  ;;  %6038 = vrcp.f32 %v3549_v43  ;;  %v8795_v35 = vadd.f32 %v8673_v11, %v2242_v30  ;;  %v4221_v30 = vld [vmem:[%s6932_s13 + $0x240] sm:$0xff] }
 0x3ea   : > { %v6021_v60 = vpop.eup %6020  ;;  %v5084_v49 = vadd.f32 %v8075_v2, %v4879_v18  ;;  %6040 = vlog2.f32 %v3549_v43  ;;  %v3122_v58 = vand.u32 2147483647, %v8779_v15  ;;  %v3766_v33 = vsel %vm3654_vm4, 1.0, %v8712_v1  ;;  %v8806_v43 = vpop.f32.mrf.mxu1 }
 0x3eb   : > { %v6023_v46 = vpop.eup %6022  ;;  %v3932_v40 = vmul.f32 %v6021_v60, %v3760_v53  ;;  %v3228_v6 = vsub.f32 0.0, %v3116_v36  ;;  %v4550_v42 = vsub.f32 %v4326_v10, %v4438_v31  ;;  %6042 = vpow2.f32 %v3425_v13 }
 0x3ec   : > { %v6025_v37 = vpop.eup %6024  ;;  %v4716_v2 = vmul.f32 0.6931472, %v6023_v46  ;;  %vm3655_vm5 = vcmp.ge.f32.partialorder %v8620_v4, 0.0  ;;  %v3234_v18 = vsub.f32 0.0, %v3122_v58  ;;  %v4551_v21 = vsub.f32 %v4327_v25, %v4439_v29  ;;  %v8817_v46 = vpop.f32.mrf.mxu0  ;;  %v4222_v29 = vld [vmem:[%s6932_s13 + $0x248] sm:$0xff] }
 0x3ed   : > { %v6027_v11 = vpop.eup %6026  ;;  %4096 = vst [vmem:[%s7626_s18 + $0x1d8] sm:$0xff] %v3932_v40  ;;  %v3944_v16 = vmul.f32 %v6025_v37, %v3766_v33  ;;  %v3427_v57 = vmul.f32 1.442695, %v3228_v6  ;;  %v3123_v1 = vand.u32 2147483647, %v8795_v35  ;;  %vm3661_vm6 = vcmp.ge.f32.partialorder %v8665_v12, 0.0 }
 0x3ee   : > { %v8808_v36 = vpop.eup %6028  ;;  %v4880_v60 = vadd.f32 %v4716_v2, %v4544_v19  ;;  %v4728_v53 = vmul.f32 0.6931472, %v6027_v11  ;;  %v4333_v31 = vmax.f32 %v8665_v12, 0.0  ;;  %v4445_v25 = vmul.f32 %v4221_v30, %v8665_v12  ;;  %v8827_v11 = vpop.f32.mrf.mxu1 }
 0x3ef   : > { %v8811_v10 = vpop.eup %6030  ;;  %4102 = vst [vmem:[%s7626_s18 + $0x208] sm:$0xff] %v3944_v16  ;;  %v3550_v13 = vadd.f32 1.0, %v8808_v36  ;;  %6044 = vpow2.f32 %v3427_v57  ;;  %v3767_v37 = vsel %vm3655_vm5, 1.0, %v8739_v28  ;;  %v3439_v2 = vmul.f32 1.442695, %v3234_v18  ;;  %v4228_v57 = vld [vmem:[%s6932_s13 + $0x278] sm:$0xff] }
 0x3f0   : > { %v8819_v40 = vadd.f32 %v5084_v49, %v4880_v60  ;;  %v4886_v19 = vadd.f32 %v4728_v53, %v4550_v42  ;;  %v3556_v6 = vadd.f32 1.0, %v8811_v10  ;;  %v3235_v33 = vsub.f32 0.0, %v3123_v1  ;;  %v4229_v18 = vld [vmem:[%s6932_s13 + $0x280] sm:$0xff]  ;;  %v8837_v1 = vpop.f32.mrf.mxu0 }
 0x3f1   : > { %v6033_v58 = vpop.eup %6032  ;;  %6046 = vrcp.f32 %v3550_v13  ;;  %v4334_v30 = vmax.f32 %v8688_v56, 0.0  ;;  %v4446_v4 = vmul.f32 %v4222_v29, %v8688_v56  ;;  %v4340_v28 = vmax.f32 %v8691_v55, 0.0 }
 0x3f2   : > { %10505 = vst [vmem:[#allocation27_spill] sm:$0xff] %v8819_v40  ;;  %v6035_v49 = vpop.eup %6034  ;;  %v5085_v42 = vadd.f32 %v8134_v45, %v4886_v19  ;;  %v3946_v16 = vmul.f32 %v6033_v58, %v3767_v37  ;;  %6048 = vlog2.f32 %v3550_v13  ;;  %v3441_v19 = vmul.f32 1.442695, %v3235_v33 }
 0x3f3   : > { %v8832_v60 = vpop.eup %6036  ;;  %v4730_v53 = vmul.f32 0.6931472, %v6035_v49  ;;  %6050 = vrcp.f32 %v3556_v6  ;;  %v2246_v13 = vadd.f32 %v8661_v52, %v7852_v14  ;;  %v4452_v37 = vmul.f32 %v4228_v57, %v8691_v55  ;;  %v8846_v49 = vpop.f32.mrf.mxu1 }
 0x3f4   : > { %4103 = vst [vmem:[%s7626_s18 + $0x210] sm:$0xff] %v3946_v16  ;;  %6052 = vlog2.f32 %v3556_v6  ;;  %v3557_v45 = vadd.f32 1.0, %v8832_v60  ;;  %v2248_v29 = vadd.f32 %v8684_v39, %v7856_v26  ;;  %v4341_v40 = vmax.f32 %v8710_v22, 0.0 }
 0x3f5   : > { %v4887_v58 = vadd.f32 %v4730_v53, %v4551_v21  ;;  %6054 = vpow2.f32 %v3439_v2  ;;  %v4453_v6 = vmul.f32 %v4229_v18, %v8710_v22  ;;  %v8851_v16 = vadd.f32 %v8696_v50, %v2246_v13  ;;  %v8861_v21 = vpop.f32.mrf.mxu0 }
 0x3f6   : > { %6056 = vrcp.f32 %v3557_v45  ;;  %v6039_v33 = vpop.eup %6038  ;;  %v3773_v52 = vsel %vm3661_vm6, 1.0, %v8771_v7  ;;  %v8859_v39 = vadd.f32 %v8717_v0, %v2248_v29  ;;  %v4557_v18 = vsub.f32 %v4333_v31, %v4445_v25  ;;  %v8870_v0 = vpop.f32.mrf.mxu1 }
 0x3f7   : > { %v8853_v3 = vadd.f32 %v5085_v42, %v4887_v58  ;;  %6058 = vlog2.f32 %v3557_v45  ;;  %v6041_v2 = vpop.eup %6040  ;;  %v3958_v57 = vmul.f32 %v6039_v33, %v3773_v52  ;;  %v3129_v50 = vand.u32 2147483647, %v8851_v16 }
 0x3f8   : > { %6060 = vpow2.f32 %v3441_v19  ;;  %v2252_v42 = vadd.f32 %v8705_v23, %v7852_v14  ;;  %v8866_v53 = vpop.eup %6042  ;;  %v4742_v12 = vmul.f32 0.6931472, %v6041_v2  ;;  %vm3662_vm7 = vcmp.ge.f32.partialorder %v8688_v56, 0.0  ;;  %v8876_v23 = vpop.f32.mrf.mxu0 }
 0x3f9   : > { %v3130_v7 = vand.u32 2147483647, %v8859_v39  ;;  %4109 = vst [vmem:[%s7626_s18 + $0x240] sm:$0xff] %v3958_v57  ;;  %v4558_v45 = vsub.f32 %v4334_v30, %v4446_v4  ;;  %vm3668_vm8 = vcmp.ge.f32.partialorder %v8691_v55, 0.0  ;;  %v3563_v19 = vadd.f32 1.0, %v8866_v53  ;;  %v8889_v52 = vpop.f32.mrf.mxu1 }
 0x3fa   : > { %v3241_v13 = vsub.f32 0.0, %v3129_v50  ;;  %v4893_v58 = vadd.f32 %v4742_v12, %v4557_v18  ;;  %v4564_v29 = vsub.f32 %v4340_v28, %v4452_v37  ;;  %vm3669_vm9 = vcmp.ge.f32.partialorder %v8710_v22, 0.0  ;;  %v10506_v18 = vld [vmem:[#allocation23_spill] sm:$0xff] }
 0x3fb   : > { %v3242_v14 = vsub.f32 0.0, %v3130_v7  ;;  %v8880_v25 = vsub.f32 %v4341_v40, %v4453_v6  ;;  %6062 = vrcp.f32 %v3563_v19  ;;  %v8883_v30 = vadd.f32 %v8735_v20, %v2252_v42  ;;  %v4235_v6 = vld [vmem:[%s6932_s13 + $0x2b0] sm:$0xff] }
 0x3fc   : > { %v8878_v31 = vpop.eup %6044  ;;  %v3453_v33 = vmul.f32 1.442695, %v3241_v13  ;;  %v5086_v4 = vadd.f32 %v8181_v9, %v4893_v58  ;;  %6064 = vlog2.f32 %v3563_v19  ;;  %v2254_v37 = vadd.f32 %v8725_v44, %v7856_v26  ;;  %v8898_v44 = vpop.f32.mrf.mxu0 }
 0x3fd   : > { %v3564_v28 = vadd.f32 1.0, %v8878_v31  ;;  %v3774_v40 = vsel %vm3662_vm7, 1.0, %v8808_v36  ;;  %v3455_v20 = vmul.f32 1.442695, %v3242_v14  ;;  %v3136_v57 = vand.u32 2147483647, %v8883_v30 }
 0x3fe   : > { %v6047_v2 = vpop.eup %6046  ;;  %6066 = vpow2.f32 %v3453_v33  ;;  %v4347_v42 = vmax.f32 %v8750_v8, 0.0  ;;  %v1756_v26 = vsub.s32 4, %v10506_v18  ;;  %v3780_v56 = vsel %vm3668_vm8, 1.0, %v8811_v10  ;;  %v8908_v33 = vpop.f32.mrf.mxu1 }
 0x3ff   : > { %v6049_v9 = vpop.eup %6048  ;;  %v3960_v50 = vmul.f32 %v6047_v2, %v3774_v40  ;;  %6068 = vrcp.f32 %v3564_v28  ;;  %v3248_v36 = vsub.f32 0.0, %v3136_v57  ;;  %v4459_v58 = vmul.f32 %v4235_v6, %v8750_v8 }
 0x400   : > { %v6051_v12 = vpop.eup %6050  ;;  %v4744_v7 = vmul.f32 0.6931472, %v6049_v9  ;;  %6070 = vlog2.f32 %v3564_v28  ;;  %v8906_v14 = vadd.f32 %v8752_v62, %v2254_v37  ;;  %vm3675_vm10 = vcmp.ge.f32.partialorder %v8750_v8, 0.0  ;;  %v6391_v37 = vld [vmem:[#allocation13] sm:$0xff] }
 0x401   : > { %v6053_v19 = vpop.eup %6052  ;;  %4110 = vst [vmem:[%s7626_s18 + $0x248] sm:$0xff] %v3960_v50  ;;  %v3972_v13 = vmul.f32 %v6051_v12, %v3780_v56  ;;  %6072 = vpow2.f32 %v3455_v20  ;;  %v3467_v55 = vmul.f32 1.442695, %v3248_v36  ;;  %v3781_v28 = vsel %vm3669_vm9, 1.0, %v8832_v60  ;;  %v4236_v36 = vld [vmem:[%s6932_s13 + $0x2b8] sm:$0xff] }
 0x402   : > { %v8910_v2 = vpop.eup %6054  ;;  %v4894_v40 = vadd.f32 %v4744_v7, %v4558_v45  ;;  %v4756_v9 = vmul.f32 0.6931472, %v6053_v19  ;;  %v3137_v62 = vand.u32 2147483647, %v8906_v14  ;;  %v8919_v20 = vrot.slane %v6391_v37, %v1756_v26  ;;  %v8921_v45 = vpop.f32.mrf.mxu0 }
 0x403   : > { %v6057_v10 = vpop.eup %6056  ;;  %4116 = vst [vmem:[%s7626_s18 + $0x278] sm:$0xff] %v3972_v13  ;;  %v3570_v6 = vadd.f32 1.0, %v8910_v2  ;;  %6074 = vpow2.f32 %v3467_v55  ;;  %v4571_v60 = vsub.f32 %v4347_v42, %v4459_v58  ;;  %v8928_v13 = vpop.f32.mrf.mxu1  ;;  %vm3676_vm11 = vcmp.ge.f32.partialorder %v8776_v61, 0.0 }
 0x404   : > { %v6059_v57 = vpop.eup %6058  ;;  %v8923_v50 = vadd.f32 %v5086_v4, %v4894_v40  ;;  %v4900_v12 = vadd.f32 %v4756_v9, %v4564_v29  ;;  %v3974_v7 = vmul.f32 %v6057_v10, %v3781_v28  ;;  %v3249_v19 = vsub.f32 0.0, %v3137_v62  ;;  %v8938_v58 = vpop.f32.mrf.mxu0  ;;  %v4242_v10 = vld [vmem:[%s6932_s13 + $0x2e8] sm:$0xff] }
 0x405   : > { %v8925_v56 = vpop.eup %6060  ;;  %v4758_v22 = vmul.f32 0.6931472, %v6059_v57  ;;  %6076 = vrcp.f32 %v3570_v6  ;;  %v4348_v40 = vmax.f32 %v8776_v61, 0.0  ;;  %v2484_v42 = vadd.f32 %v8742_v54, %v8919_v20  ;;  %v8953_v57 = vpop.f32.mrf.mxu1 }
 0x406   : > { %v5087_v26 = vadd.f32 %v8213_v59, %v4900_v12  ;;  %4117 = vst [vmem:[%s7626_s18 + $0x280] sm:$0xff] %v3974_v7  ;;  %6078 = vlog2.f32 %v3570_v6  ;;  %v3571_v29 = vadd.f32 1.0, %v8925_v56  ;;  %v3469_v9 = vmul.f32 1.442695, %v3249_v19 }
 0x407   : > { %v4901_v4 = vadd.f32 %v4758_v22, %v8880_v25  ;;  %v4460_v55 = vmul.f32 %v4236_v36, %v8776_v61  ;;  %v1760_v59 = vsub.s32 5, %v10506_v18  ;;  %v2490_v28 = vadd.f32 %v8788_v32, %v8919_v20  ;;  %v4243_v61 = vld [vmem:[%s6932_s13 + $0x2f0] sm:$0xff] }
 0x408   : > { %6080 = vrcp.f32 %v3571_v29  ;;  %v6063_v6 = vpop.eup %6062  ;;  %v3787_v25 = vsel %vm3675_vm10, 1.0, %v8866_v53  ;;  %v8951_v54 = vadd.f32 %v8781_v34, %v2484_v42  ;;  %v4354_v8 = vmax.f32 %v8779_v15, 0.0 }
 0x409   : > { %v8945_v62 = vadd.f32 %v5087_v26, %v4901_v4  ;;  %6082 = vlog2.f32 %v3571_v29  ;;  %v6065_v12 = vpop.eup %6064  ;;  %v3986_v7 = vmul.f32 %v6063_v6, %v3787_v25  ;;  %v8955_v22 = vrot.slane %v6391_v37, %v1760_v59  ;;  %v8965_v26 = vpop.f32.mrf.mxu0 }
 0x40a   : > { %6084 = vpow2.f32 %v3469_v9  ;;  %v8958_v32 = vadd.f32 %v8817_v46, %v2490_v28  ;;  %v4770_v19 = vmul.f32 0.6931472, %v6065_v12  ;;  %v4466_v53 = vmul.f32 %v4242_v10, %v8779_v15  ;;  %v8975_v25 = vpop.f32.mrf.mxu1 }
 0x40b   : > { %10507 = vst [vmem:[#allocation28_spill] sm:$0xff] %v8945_v62  ;;  %v8960_v36 = vpop.eup %6066  ;;  %v3033_v34 = vand.u32 2147483647, %v8951_v54  ;;  %4123 = vst [vmem:[%s7626_s18 + $0x2b0] sm:$0xff] %v3986_v7  ;;  %v3788_v37 = vsel %vm3676_vm11, 1.0, %v8878_v31  ;;  %v4572_v46 = vsub.f32 %v4348_v40, %v4460_v55  ;;  %v2486_v9 = vadd.f32 %v8765_v48, %v8955_v22  ;;  %v8987_v55 = vpop.f32.mrf.mxu0 }
 0x40c   : > { %v6069_v29 = vpop.eup %6068  ;;  %v3577_v4 = vadd.f32 1.0, %v8960_v36  ;;  %v4907_v10 = vadd.f32 %v4770_v19, %v4571_v60  ;;  %v3040_v6 = vand.u32 2147483647, %v8958_v32  ;;  %vm3682_vm12 = vcmp.ge.f32.partialorder %v8779_v15, 0.0 }
 0x40d   : > { %v6071_v42 = vpop.eup %6070  ;;  %v3988_v59 = vmul.f32 %v6069_v29, %v3788_v37  ;;  %v3145_v28 = vsub.f32 0.0, %v3033_v34  ;;  %v8982_v31 = vadd.f32 %v8798_v5, %v2486_v9  ;;  %v4578_v60 = vsub.f32 %v4354_v8, %v4466_v53  ;;  %v8995_v53 = vpop.f32.mrf.mxu1 }
 0x40e   : > { %v8977_v12 = vpop.eup %6072  ;;  %v4772_v7 = vmul.f32 0.6931472, %v6071_v42  ;;  %6086 = vrcp.f32 %v3577_v4  ;;  %v5088_v48 = vadd.f32 %v8273_v41, %v4907_v10  ;;  %vm3683_vm13 = vcmp.ge.f32.partialorder %v8795_v35, 0.0  ;;  %v4249_v42 = vld [vmem:[%s6932_s13 + $0x320] sm:$0xff] }
 0x40f   : > { %4124 = vst [vmem:[%s7626_s18 + $0x2b8] sm:$0xff] %v3988_v59  ;;  %6088 = vlog2.f32 %v3577_v4  ;;  %v3578_v40 = vadd.f32 1.0, %v8977_v12  ;;  %v3261_v34 = vmul.f32 1.442695, %v3145_v28  ;;  %v3034_v29 = vand.u32 2147483647, %v8982_v31 }
 0x410   : > { %v4908_v19 = vadd.f32 %v4772_v7, %v4572_v46  ;;  %v8991_v37 = vpop.eup %6074  ;;  %v4355_v5 = vmax.f32 %v8795_v35, 0.0  ;;  %v4467_v41 = vmul.f32 %v4243_v61, %v8795_v35  ;;  %v3152_v8 = vsub.f32 0.0, %v3040_v6  ;;  %v9006_v61 = vpop.f32.mrf.mxu0  ;;  %v4250_v35 = vld [vmem:[%s6932_s13 + $0x328] sm:$0xff] }
 0x411   : > { %6090 = vrcp.f32 %v3578_v40  ;;  %v3794_v46 = vsel %vm3682_vm12, 1.0, %v8910_v2  ;;  %v3584_v10 = vadd.f32 1.0, %v8991_v37  ;;  %v3146_v7 = vsub.f32 0.0, %v3034_v29 }
 0x412   : > { %v6077_v4 = vpop.eup %6076  ;;  %v8997_v9 = vadd.f32 %v5088_v48, %v4908_v19  ;;  %6092 = vlog2.f32 %v3578_v40  ;;  %v2496_v6 = vadd.f32 %v8827_v11, %v8919_v20  ;;  %v4361_v19 = vmax.f32 %v8851_v16, 0.0  ;;  %v9014_v11 = vpop.f32.mrf.mxu1 }
 0x413   : > { %v6079_v59 = vpop.eup %6078  ;;  %v4000_v28 = vmul.f32 %v6077_v4, %v3794_v46  ;;  %6094 = vpow2.f32 %v3261_v34  ;;  %v3275_v15 = vmul.f32 1.442695, %v3152_v8  ;;  %v3795_v40 = vsel %vm3683_vm13, 1.0, %v8925_v56 }
 0x414   : > { %10508 = vst [vmem:[#allocation29_spill] sm:$0xff] %v8997_v9  ;;  %v4784_v48 = vmul.f32 0.6931472, %v6079_v59  ;;  %6096 = vrcp.f32 %v3584_v10  ;;  %v4473_v34 = vmul.f32 %v4249_v42, %v8851_v16  ;;  %v3263_v29 = vmul.f32 1.442695, %v3146_v7  ;;  %v9024_v42 = vpop.f32.mrf.mxu0 }
 0x415   : > { %v6081_v2 = vpop.eup %6080  ;;  %4130 = vst [vmem:[%s7626_s18 + $0x2e8] sm:$0xff] %v4000_v28  ;;  %6098 = vlog2.f32 %v3584_v10  ;;  %v2492_v8 = vadd.f32 %v8806_v43, %v8955_v22  ;;  %v4579_v28 = vsub.f32 %v4355_v5, %v4467_v41  ;;  %v9022_v56 = vadd.f32 %v8861_v21, %v2496_v6  ;;  %v9035_v21 = vpop.f32.mrf.mxu1 }
 0x416   : > { %v6083_v4 = vpop.eup %6082  ;;  %v4914_v46 = vadd.f32 %v4784_v48, %v4578_v60  ;;  %v4002_v59 = vmul.f32 %v6081_v2, %v3795_v40  ;;  %6100 = vpow2.f32 %v3275_v15  ;;  %vm3689_vm14 = vcmp.ge.f32.partialorder %v8851_v16, 0.0  ;;  %v4256_v48 = vld [vmem:[%s6932_s13 + $0x358] sm:$0xff] }
 0x417   : > { %v9018_v9 = vpop.eup %6084  ;;  %v4786_v62 = vmul.f32 0.6931472, %v6083_v4  ;;  %6102 = vpow2.f32 %v3263_v29  ;;  %v9031_v43 = vadd.f32 %v8837_v1, %v2492_v8  ;;  %v4585_v41 = vsub.f32 %v4361_v19, %v4473_v34  ;;  %v9044_v19 = vpop.f32.mrf.mxu0 }
 0x418   : > { %v5089_v10 = vadd.f32 %v8307_v24, %v4914_v46  ;;  %4131 = vst [vmem:[%s7626_s18 + $0x2f0] sm:$0xff] %v4002_v59  ;;  %v3585_v60 = vadd.f32 1.0, %v9018_v9  ;;  %vm3690_vm15 = vcmp.ge.f32.partialorder %v8859_v39, 0.0  ;;  %v3047_v7 = vand.u32 2147483647, %v9022_v56 }
 0x419   : > { %v4915_v5 = vadd.f32 %v4786_v62, %v4579_v28  ;;  %v4362_v6 = vmax.f32 %v8859_v39, 0.0  ;;  %v4474_v24 = vmul.f32 %v4250_v35, %v8859_v39  ;;  %v3041_v16 = vand.u32 2147483647, %v9031_v43 }
 0x41a   : > { %6104 = vrcp.f32 %v3585_v60  ;;  %v3801_v1 = vsel %vm3689_vm14, 1.0, %v8960_v36  ;;  %v3159_v62 = vsub.f32 0.0, %v3047_v7  ;;  %v4368_v29 = vmax.f32 %v8883_v30, 0.0  ;;  %v9052_v36 = vpop.f32.mrf.mxu1 }
 0x41b   : > { %v6087_v15 = vpop.eup %6086  ;;  %v9041_v2 = vadd.f32 %v5089_v10, %v4915_v5  ;;  %6106 = vlog2.f32 %v3585_v60  ;;  %v3153_v4 = vsub.f32 0.0, %v3041_v16  ;;  %v2498_v46 = vadd.f32 %v8846_v49, %v8955_v22 }
 0x41c   : > { %v6089_v40 = vpop.eup %6088  ;;  %v4014_v34 = vmul.f32 %v6087_v15, %v3801_v1  ;;  %v4480_v8 = vmul.f32 %v4256_v48, %v8883_v30  ;;  %v3289_v28 = vmul.f32 1.442695, %v3159_v62  ;;  %v2502_v35 = vadd.f32 %v8870_v0, %v8919_v20  ;;  %v9064_v1 = vpop.f32.mrf.mxu0 }
 0x41d   : > { %v4798_v59 = vmul.f32 0.6931472, %v6089_v40  ;;  %v3802_v60 = vsel %vm3690_vm15, 1.0, %v8977_v12  ;;  %v4586_v5 = vsub.f32 %v4362_v6, %v4474_v24  ;;  %v3277_v7 = vmul.f32 1.442695, %v3153_v4  ;;  %v9074_v40 = vpop.f32.mrf.mxu1 }
 0x41e   : > { %v6091_v10 = vpop.eup %6090  ;;  %4137 = vst [vmem:[%s7626_s18 + $0x320] sm:$0xff] %v4014_v34  ;;  %v9059_v49 = vadd.f32 %v8876_v23, %v2498_v46  ;;  %6108 = vpow2.f32 %v3289_v28  ;;  %v9062_v0 = vadd.f32 %v8898_v44, %v2502_v35  ;;  %vm3696_vm0 = vcmp.ge.f32.partialorder %v8883_v30, 0.0  ;;  %v4257_v30 = vld [vmem:[%s6932_s13 + $0x360] sm:$0xff] }
 0x41f   : > { %v6093_v16 = vpop.eup %6092  ;;  %v4921_v48 = vadd.f32 %v4798_v59, %v4585_v41  ;;  %v4016_v15 = vmul.f32 %v6091_v10, %v3802_v60  ;;  %6110 = vpow2.f32 %v3277_v7  ;;  %v3808_v6 = vsel %vm3696_vm0, 1.0, %v8991_v37 }
 0x420   : > { %v9066_v62 = vpop.eup %6094  ;;  %v4800_v39 = vmul.f32 0.6931472, %v6093_v16  ;;  %v3048_v12 = vand.u32 2147483647, %v9059_v49  ;;  %v4592_v44 = vsub.f32 %v4368_v29, %v4480_v8  ;;  %vm3697_vm1 = vcmp.ge.f32.partialorder %v8906_v14, 0.0  ;;  %v9084_v8 = vpop.f32.mrf.mxu0 }
 0x421   : > { %v6097_v23 = vpop.eup %6096  ;;  %v5090_v41 = vadd.f32 %v8350_v47, %v4921_v48  ;;  %4138 = vst [vmem:[%s7626_s18 + $0x328] sm:$0xff] %v4016_v15  ;;  %v3481_v24 = vadd.f32 1.0, %v9066_v62  ;;  %v4153_v47 = vld [vmem:[%s6932_s13 + $0x20] sm:$0xff]  ;;  %v3054_v37 = vand.u32 2147483647, %v9062_v0  ;;  %v2504_v29 = vadd.f32 %v8889_v52, %v8955_v22  ;;  %v9096_v52 = vpop.f32.mrf.mxu1 }
 0x422   : > { %v6099_v34 = vpop.eup %6098  ;;  %v4922_v4 = vadd.f32 %v4800_v39, %v4586_v5  ;;  %v4028_v46 = vmul.f32 %v6097_v23, %v3808_v6  ;;  %v3160_v59 = vsub.f32 0.0, %v3048_v12  ;;  %v4369_v5 = vmax.f32 %v8906_v14, 0.0 }
 0x423   : > { %v9078_v28 = vpop.eup %6100  ;;  %v4812_v35 = vmul.f32 0.6931472, %v6099_v34  ;;  %6112 = vrcp.f32 %v3481_v24  ;;  %v4481_v48 = vmul.f32 %v4257_v30, %v8906_v14  ;;  %v4265_v15 = vmax.f32 %v8951_v54, 0.0 }
 0x424   : > { %v9086_v10 = vpop.eup %6102  ;;  %v9088_v60 = vadd.f32 %v5090_v41, %v4922_v4  ;;  %4144 = vst [vmem:[%s7626_s18 + $0x358] sm:$0xff] %v4028_v46  ;;  %6114 = vlog2.f32 %v3481_v24  ;;  %v3488_v7 = vadd.f32 1.0, %v9078_v28  ;;  %v4377_v12 = vmul.f32 %v4153_v47, %v8951_v54  ;;  %v9106_v4 = vpop.f32.mrf.mxu0 }
 0x425   : > { %v4928_v16 = vadd.f32 %v4812_v35, %v4592_v44  ;;  %v3482_v39 = vadd.f32 1.0, %v9086_v10  ;;  %v3291_v23 = vmul.f32 1.442695, %v3160_v59  ;;  %v3166_v41 = vsub.f32 0.0, %v3054_v37 }
 0x426   : > { %10509 = vst [vmem:[#allocation30_spill] sm:$0xff] %v9088_v60  ;;  %6116 = vrcp.f32 %v3488_v7  ;;  %v3809_v44 = vsel %vm3697_vm1, 1.0, %v9018_v9  ;;  %v9104_v34 = vadd.f32 %v8921_v45, %v2504_v29  ;;  %v2508_v35 = vadd.f32 %v8908_v33, %v8919_v20  ;;  %v9111_v9 = vpop.f32.mrf.mxu1  ;;  %v4154_v45 = vld [vmem:[%s6932_s13 + $0x28] sm:$0xff]  ;;  %v9119_v33 = vpop.f32.mrf.mxu0 }
 0x427   : > { %v6105_v6 = vpop.eup %6104  ;;  %v5091_v24 = vadd.f32 %v8403_v51, %v4928_v16  ;;  %6118 = vrcp.f32 %v3482_v39  ;;  %v3303_v59 = vmul.f32 1.442695, %v3166_v41  ;;  %v4593_v47 = vsub.f32 %v4369_v5, %v4481_v48 }
 0x428   : > { %v6107_v46 = vpop.eup %6106  ;;  %v4030_v30 = vmul.f32 %v6105_v6, %v3809_v44  ;;  %6120 = vlog2.f32 %v3482_v39  ;;  %v3055_v14 = vand.u32 2147483647, %v9104_v34  ;;  %vm3593_vm2 = vcmp.ge.f32.partialorder %v8951_v54, 0.0 }
 0x429   : > { %v4814_v51 = vmul.f32 0.6931472, %v6107_v46  ;;  %6122 = vlog2.f32 %v3488_v7  ;;  %v9117_v16 = vadd.f32 %v8938_v58, %v2508_v35  ;;  %v4489_v7 = vsub.f32 %v4265_v15, %v4377_v12  ;;  %v9135_v46 = vpop.f32.mrf.mxu1  ;;  %v4160_v15 = vld [vmem:[%s6932_s13 + $0x58] sm:$0xff]  ;;  %v9147_v35 = vpop.f32.mrf.mxu0 }
 0x42a   : > { %4145 = vst [vmem:[%s7626_s18 + $0x360] sm:$0xff] %v4030_v30  ;;  %6124 = vpow2.f32 %v3291_v23  ;;  %v3167_v29 = vsub.f32 0.0, %v3055_v14  ;;  %vm3594_vm3 = vcmp.ge.f32.partialorder %v8982_v31, 0.0  ;;  %v2510_v48 = vadd.f32 %v8928_v13, %v8955_v22 }
 0x42b   : > { %v4929_v37 = vadd.f32 %v4814_v51, %v4593_v47  ;;  %6126 = vpow2.f32 %v3303_v59  ;;  %v9121_v5 = vpop.eup %6108  ;;  %v2514_v39 = vadd.f32 %v8953_v57, %v8919_v20  ;;  %v4266_v58 = vmax.f32 %v8982_v31, 0.0 }
 0x42c   : > { %v9128_v23 = vpop.eup %6110  ;;  %v4378_v6 = vmul.f32 %v4154_v45, %v8982_v31  ;;  %v3495_v44 = vadd.f32 1.0, %v9121_v5  ;;  %vm3600_vm4 = vcmp.ge.f32.partialorder %v8958_v32, 0.0  ;;  %v4272_v13 = vmax.f32 %v8958_v32, 0.0 }
 0x42d   : > { %v9130_v41 = vadd.f32 %v5091_v24, %v4929_v37  ;;  %v3489_v12 = vadd.f32 1.0, %v9128_v23  ;;  %v3061_v57 = vand.u32 2147483647, %v9117_v16  ;;  %v3305_v24 = vmul.f32 1.442695, %v3167_v29 }
 0x42e   : > { %6128 = vrcp.f32 %v3495_v44  ;;  %v9143_v30 = vadd.f32 %v8965_v26, %v2510_v48  ;;  %v2516_v59 = vadd.f32 %v8975_v25, %v8955_v22  ;;  %v3705_v51 = vsel %vm3593_vm2, 1.0, %v9066_v62  ;;  %v9157_v48 = vpop.f32.mrf.mxu1 }
 0x42f   : > { %10510 = vst [vmem:[#allocation31_spill] sm:$0xff] %v9130_v41  ;;  %6130 = vrcp.f32 %v3489_v12  ;;  %v3173_v14 = vsub.f32 0.0, %v3061_v57  ;;  %v9153_v45 = vadd.f32 %v8987_v55, %v2514_v39  ;;  %v4384_v26 = vmul.f32 %v4160_v15, %v8958_v32 }
 0x430   : > { %v6113_v47 = vpop.eup %6112  ;;  %6132 = vlog2.f32 %v3489_v12  ;;  %v3062_v25 = vand.u32 2147483647, %v9143_v30  ;;  %v3712_v54 = vsel %vm3600_vm4, 1.0, %v9078_v28  ;;  %v3706_v55 = vsel %vm3594_vm3, 1.0, %v9086_v10  ;;  %v9169_v12 = vpop.f32.mrf.mxu0  ;;  %v4161_v28 = vld [vmem:[%s6932_s13 + $0x60] sm:$0xff] }
 0x431   : > { %v6115_v37 = vpop.eup %6114  ;;  %v3822_v29 = vmul.f32 %v6113_v47, %v3705_v51  ;;  %6134 = vlog2.f32 %v3495_v44  ;;  %v3317_v62 = vmul.f32 1.442695, %v3173_v14  ;;  %v9167_v15 = vadd.f32 %v9006_v61, %v2516_v59 }
 0x432   : > { %v4606_v41 = vmul.f32 0.6931472, %v6115_v37  ;;  %6136 = vpow2.f32 %v3305_v24  ;;  %v3174_v39 = vsub.f32 0.0, %v3062_v25  ;;  %v3068_v44 = vand.u32 2147483647, %v9153_v45 }
 0x433   : > { %v6117_v57 = vpop.eup %6116  ;;  %4041 = vst [vmem:[%s7626_s18 + $0x20] sm:$0xff] %v3822_v29  ;;  %6138 = vpow2.f32 %v3317_v62  ;;  %v4490_v10 = vsub.f32 %v4266_v58, %v4378_v6  ;;  %v4496_v24 = vsub.f32 %v4272_v13, %v4384_v26  ;;  %v9173_v29 = vpop.f32.mrf.mxu1  ;;  %v3069_v58 = vand.u32 2147483647, %v9167_v15 }
 0x434   : > { %v6119_v47 = vpop.eup %6118  ;;  %v4825_v51 = vadd.f32 %v4606_v41, %v4489_v7  ;;  %v3836_v32 = vmul.f32 %v6117_v57, %v3712_v54  ;;  %v3319_v37 = vmul.f32 1.442695, %v3174_v39  ;;  %v4273_v7 = vmax.f32 %v9031_v43, 0.0  ;;  %v4167_v41 = vld [vmem:[%s6932_s13 + $0x90] sm:$0xff]  ;;  %v9184_v6 = vpop.f32.mrf.mxu0 }
 0x435   : > { %v6121_v14 = vpop.eup %6120  ;;  %v3824_v31 = vmul.f32 %v6119_v47, %v3706_v55  ;;  %v3180_v54 = vsub.f32 0.0, %v3068_v44  ;;  %v4385_v55 = vmul.f32 %v4161_v28, %v9031_v43  ;;  %vm3607_vm5 = vcmp.ge.f32.partialorder %v9022_v56, 0.0  ;;  %v9194_v28 = vpop.f32.mrf.mxu1 }
 0x436   : > { %v6123_v61 = vpop.eup %6122  ;;  %v5108_v59 = vadd.f32 %v8463_v38, %v4825_v51  ;;  %v4608_v25 = vmul.f32 0.6931472, %v6121_v14  ;;  %4048 = vst [vmem:[%s7626_s18 + $0x58] sm:$0xff] %v3836_v32  ;;  %6140 = vpow2.f32 %v3319_v37  ;;  %v4279_v26 = vmax.f32 %v9022_v56, 0.0 }
 0x437   : > { %v9179_v62 = vpop.eup %6124  ;;  %4042 = vst [vmem:[%s7626_s18 + $0x28] sm:$0xff] %v3824_v31  ;;  %v4620_v57 = vmul.f32 0.6931472, %v6123_v61  ;;  %vm3601_vm6 = vcmp.ge.f32.partialorder %v9031_v43, 0.0  ;;  %v4391_v51 = vmul.f32 %v4167_v41, %v9022_v56  ;;  %v3331_v14 = vmul.f32 1.442695, %v3180_v54 }
 0x438   : > { %v9186_v13 = vpop.eup %6126  ;;  %v4826_v38 = vadd.f32 %v4608_v25, %v4490_v10  ;;  %v3496_v39 = vadd.f32 1.0, %v9179_v62  ;;  %v3181_v31 = vsub.f32 0.0, %v3069_v58  ;;  %v4497_v37 = vsub.f32 %v4273_v7, %v4385_v55  ;;  %v9210_v55 = vpop.f32.mrf.mxu1 }
 0x439   : > { %v4832_v47 = vadd.f32 %v4620_v57, %v4496_v24  ;;  %v3502_v32 = vadd.f32 1.0, %v9186_v13  ;;  %v3719_v61 = vsel %vm3607_vm5, 1.0, %v9121_v5  ;;  %v9200_v24 = vpop.f32.mrf.mxu0  ;;  %v2522_v41 = vadd.f32 %v9014_v11, %v8955_v22  ;;  %v4168_v57 = vld [vmem:[%s6932_s13 + $0x98] sm:$0xff] }
 0x43a   : > { %v9196_v44 = vadd.f32 %v5108_v59, %v4826_v38  ;;  %6142 = vrcp.f32 %v3496_v39  ;;  %v3333_v25 = vmul.f32 1.442695, %v3181_v31  ;;  %v2520_v59 = vadd.f32 %v8995_v53, %v8919_v20  ;;  %v4174_v53 = vld [vmem:[%s6932_s13 + $0xc8] sm:$0xff] }
 0x43b   : > { %v5109_v10 = vadd.f32 %v8495_v63, %v4832_v47  ;;  %6144 = vlog2.f32 %v3496_v39  ;;  %v6129_v56 = vpop.eup %6128  ;;  %v3713_v63 = vsel %vm3601_vm6, 1.0, %v9128_v23  ;;  %v4503_v7 = vsub.f32 %v4279_v26, %v4391_v51  ;;  %v9224_v51 = vpop.f32.mrf.mxu0 }
 0x43c   : > { %10511 = vst [vmem:[#allocation32_spill] sm:$0xff] %v9196_v44  ;;  %6146 = vrcp.f32 %v3502_v32  ;;  %v6131_v54 = vpop.eup %6130  ;;  %v3850_v5 = vmul.f32 %v6129_v56, %v3719_v61  ;;  %vm3608_vm7 = vcmp.ge.f32.partialorder %v9059_v49, 0.0  ;;  %v9215_v11 = vadd.f32 %v9024_v42, %v2520_v59 }
 0x43d   : > { %6148 = vlog2.f32 %v3502_v32  ;;  %v6133_v58 = vpop.eup %6132  ;;  %v3838_v38 = vmul.f32 %v6131_v54, %v3713_v63  ;;  %v2526_v43 = vadd.f32 %v9035_v21, %v8919_v20  ;;  %v4280_v39 = vmax.f32 %v9059_v49, 0.0  ;;  %v4175_v21 = vld [vmem:[%s6932_s13 + $0xd0] sm:$0xff]  ;;  %v9238_v54 = vpop.f32.mrf.mxu1 }
 0x43e   : > { %6150 = vpow2.f32 %v3331_v14  ;;  %v6135_v23 = vpop.eup %6134  ;;  %v4622_v26 = vmul.f32 0.6931472, %v6133_v58  ;;  %4055 = vst [vmem:[%s7626_s18 + $0x90] sm:$0xff] %v3850_v5  ;;  %v9222_v47 = vadd.f32 %v9044_v19, %v2522_v41  ;;  %v4392_v42 = vmul.f32 %v4168_v57, %v9059_v49 }
 0x43f   : > { %6152 = vpow2.f32 %v3333_v25  ;;  %v9226_v32 = vpop.eup %6136  ;;  %4049 = vst [vmem:[%s7626_s18 + $0x60] sm:$0xff] %v3838_v38  ;;  %v4634_v14 = vmul.f32 0.6931472, %v6135_v23  ;;  %v4286_v31 = vmax.f32 %v9062_v0, 0.0  ;;  %v3075_v61 = vand.u32 2147483647, %v9215_v11  ;;  %v9248_v23 = vpop.f32.mrf.mxu0 }
 0x440   : > { %v9233_v56 = vpop.eup %6138  ;;  %v4833_v59 = vadd.f32 %v4622_v26, %v4497_v37  ;;  %v4398_v25 = vmul.f32 %v4174_v53, %v9062_v0  ;;  %v3503_v19 = vadd.f32 1.0, %v9226_v32  ;;  %v4287_v41 = vmax.f32 %v9104_v34, 0.0 }
 0x441   : > { %v4839_v63 = vadd.f32 %v4634_v14, %v4503_v7  ;;  %v3509_v5 = vadd.f32 1.0, %v9233_v56  ;;  %v3187_v57 = vsub.f32 0.0, %v3075_v61  ;;  %v9242_v58 = vadd.f32 %v9064_v1, %v2526_v43  ;;  %v9257_v14 = vpop.f32.mrf.mxu1 }
 0x442   : > { %v9244_v38 = vadd.f32 %v5109_v10, %v4833_v59  ;;  %6154 = vrcp.f32 %v3503_v19  ;;  %v4399_v37 = vmul.f32 %v4175_v21, %v9104_v34  ;;  %v3076_v53 = vand.u32 2147483647, %v9222_v47 }
 0x443   : > { %v9250_v26 = vpop.eup %6140  ;;  %v5110_v44 = vadd.f32 %v8540_v17, %v4839_v63  ;;  %vm3614_vm8 = vcmp.ge.f32.partialorder %v9062_v0, 0.0  ;;  %6156 = vlog2.f32 %v3503_v19  ;;  %v2528_v1 = vadd.f32 %v9052_v36, %v8955_v22  ;;  %v4181_v63 = vld [vmem:[%s6932_s13 + $0x100] sm:$0xff] }
 0x444   : > { %10512 = vst [vmem:[#allocation33_spill] sm:$0xff] %v9244_v38  ;;  %6158 = vrcp.f32 %v3509_v5  ;;  %v3510_v10 = vadd.f32 1.0, %v9250_v26  ;;  %v3345_v7 = vmul.f32 1.442695, %v3187_v57  ;;  %v3188_v43 = vsub.f32 0.0, %v3076_v53  ;;  %v9267_v53 = vpop.f32.mrf.mxu0 }
 0x445   : > { %v4504_v21 = vsub.f32 %v4280_v39, %v4392_v42  ;;  %v4510_v61 = vsub.f32 %v4286_v31, %v4398_v25  ;;  %6160 = vlog2.f32 %v3509_v5  ;;  %v3082_v59 = vand.u32 2147483647, %v9242_v58 }
 0x446   : > { %v3720_v19 = vsel %vm3608_vm7, 1.0, %v9179_v62  ;;  %vm3615_vm9 = vcmp.ge.f32.partialorder %v9104_v34, 0.0  ;;  %v9264_v36 = vsub.f32 %v4287_v41, %v4399_v37  ;;  %6162 = vrcp.f32 %v3510_v10  ;;  %v4182_v41 = vld [vmem:[%s6932_s13 + $0x108] sm:$0xff] }
 0x447   : > { %v6143_v17 = vpop.eup %6142  ;;  %v3347_v57 = vmul.f32 1.442695, %v3188_v43  ;;  %v4293_v31 = vmax.f32 %v9117_v16, 0.0  ;;  %6164 = vlog2.f32 %v3510_v10  ;;  %v3194_v25 = vsub.f32 0.0, %v3082_v59  ;;  %v9277_v43 = vpop.f32.mrf.mxu1 }
 0x448   : > { %v6145_v39 = vpop.eup %6144  ;;  %v3852_v42 = vmul.f32 %v6143_v17, %v3720_v19  ;;  %v3726_v62 = vsel %vm3614_vm8, 1.0, %v9186_v13  ;;  %6166 = vpow2.f32 %v3345_v7  ;;  %v9275_v37 = vadd.f32 %v9084_v8, %v2528_v1  ;;  %v9286_v8 = vpop.f32.mrf.mxu0 }
 0x449   : > { %v6147_v5 = vpop.eup %6146  ;;  %v4636_v49 = vmul.f32 0.6931472, %v6145_v39  ;;  %v4405_v10 = vmul.f32 %v4181_v63, %v9117_v16  ;;  %6168 = vpow2.f32 %v3347_v57  ;;  %v3359_v59 = vmul.f32 1.442695, %v3194_v25 }
 0x44a   : > { %v6149_v38 = vpop.eup %6148  ;;  %4056 = vst [vmem:[%s7626_s18 + $0x98] sm:$0xff] %v3852_v42  ;;  %v3864_v17 = vmul.f32 %v6147_v5, %v3726_v62  ;;  %v3083_v13 = vand.u32 2147483647, %v9275_v37  ;;  %v2532_v7 = vadd.f32 %v9074_v40, %v8919_v20  ;;  %v4294_v42 = vmax.f32 %v9143_v30, 0.0 }
 0x44b   : > { %v9281_v19 = vpop.eup %6150  ;;  %v4840_v39 = vadd.f32 %v4636_v49, %v4504_v21  ;;  %v4648_v0 = vmul.f32 0.6931472, %v6149_v38  ;;  %v4406_v63 = vmul.f32 %v4182_v41, %v9143_v30  ;;  %6170 = vpow2.f32 %v3359_v59  ;;  %v9298_v21 = vpop.f32.mrf.mxu1  ;;  %v4188_v59 = vld [vmem:[%s6932_s13 + $0x138] sm:$0xff] }
 0x44c   : > { %v9288_v1 = vpop.eup %6152  ;;  %4062 = vst [vmem:[%s7626_s18 + $0xc8] sm:$0xff] %v3864_v17  ;;  %v3516_v57 = vadd.f32 1.0, %v9281_v19  ;;  %vm3621_vm10 = vcmp.ge.f32.partialorder %v9117_v16, 0.0  ;;  %v4517_v5 = vsub.f32 %v4293_v31, %v4405_v10  ;;  %vm3622_vm11 = vcmp.ge.f32.partialorder %v9143_v30, 0.0 }
 0x44d   : > { %v9294_v25 = vadd.f32 %v5110_v44, %v4840_v39  ;;  %v4846_v38 = vadd.f32 %v4648_v0, %v4510_v61  ;;  %v3517_v40 = vadd.f32 1.0, %v9288_v1  ;;  %v3195_v49 = vsub.f32 0.0, %v3083_v13  ;;  %v9307_v61 = vpop.f32.mrf.mxu0  ;;  %v9316_v13 = vpop.f32.mrf.mxu1 }
 0x44e   : > { %6172 = vrcp.f32 %v3516_v57  ;;  %v9303_v41 = vadd.f32 %v9106_v4, %v2532_v7  ;;  %v2534_v44 = vadd.f32 %v9096_v52, %v8955_v22  ;;  %v3727_v31 = vsel %vm3615_vm9, 1.0, %v9226_v32 }
 0x44f   : > { %10513 = vst [vmem:[#allocation34_spill] sm:$0xff] %v9294_v25  ;;  %v5111_v62 = vadd.f32 %v8586_v27, %v4846_v38  ;;  %6174 = vlog2.f32 %v3516_v57  ;;  %v6155_v17 = vpop.eup %6154  ;;  %v4518_v10 = vsub.f32 %v4294_v42, %v4406_v63  ;;  %v3361_v39 = vmul.f32 1.442695, %v3195_v49 }
 0x450   : > { %6176 = vrcp.f32 %v3517_v40  ;;  %v6157_v27 = vpop.eup %6156  ;;  %v3866_v0 = vmul.f32 %v6155_v17, %v3727_v31  ;;  %v3089_v4 = vand.u32 2147483647, %v9303_v41  ;;  %v2538_v52 = vadd.f32 %v9111_v9, %v8919_v20  ;;  %v9328_v17 = vpop.f32.mrf.mxu0 }
 0x451   : > { %6178 = vlog2.f32 %v3517_v40  ;;  %v6159_v7 = vpop.eup %6158  ;;  %v4650_v57 = vmul.f32 0.6931472, %v6157_v27  ;;  %v3733_v34 = vsel %vm3621_vm10, 1.0, %v9233_v56  ;;  %v4300_v32 = vmax.f32 %v9153_v45, 0.0  ;;  %v4189_v40 = vld [vmem:[%s6932_s13 + $0x140] sm:$0xff] }
 0x452   : > { %6180 = vpow2.f32 %v3361_v39  ;;  %v6161_v42 = vpop.eup %6160  ;;  %4063 = vst [vmem:[%s7626_s18 + $0xd0] sm:$0xff] %v3866_v0  ;;  %v3878_v63 = vmul.f32 %v6159_v7, %v3733_v34  ;;  %v4412_v38 = vmul.f32 %v4188_v59, %v9153_v45  ;;  %v3201_v49 = vsub.f32 0.0, %v3089_v4  ;;  %v9340_v7 = vpop.f32.mrf.mxu1 }
 0x453   : > { %v9326_v9 = vadd.f32 %v9119_v33, %v2534_v44  ;;  %v6163_v31 = vpop.eup %6162  ;;  %v4847_v16 = vadd.f32 %v4650_v57, %v9264_v36  ;;  %v4662_v56 = vmul.f32 0.6931472, %v6161_v42  ;;  %v3734_v39 = vsel %vm3622_vm11, 1.0, %v9250_v26 }
 0x454   : > { %v4301_v27 = vmax.f32 %v9167_v15, 0.0  ;;  %v6165_v0 = vpop.eup %6164  ;;  %4069 = vst [vmem:[%s7626_s18 + $0x100] sm:$0xff] %v3878_v63  ;;  %v3880_v59 = vmul.f32 %v6163_v31, %v3734_v39  ;;  %v3373_v4 = vmul.f32 1.442695, %v3201_v49  ;;  %v9338_v44 = vadd.f32 %v9147_v35, %v2538_v52  ;;  %v9352_v52 = vpop.f32.mrf.mxu0  ;;  %v10515_v49 = vld [vmem:[#allocation72_spill] sm:$0xff] }
 0x455   : > { %v3090_v33 = vand.u32 2147483647, %v9326_v9  ;;  %v9342_v36 = vpop.eup %6166  ;;  %v9344_v57 = vadd.f32 %v5111_v62, %v4847_v16  ;;  %v4853_v30 = vadd.f32 %v4662_v56, %v4517_v5  ;;  %v4664_v34 = vmul.f32 0.6931472, %v6165_v0  ;;  %v9362_v0 = vpop.f32.mrf.mxu1 }
 0x456   : > { %v4413_v26 = vmul.f32 %v4189_v40, %v9167_v15  ;;  %v9347_v42 = vpop.eup %6168  ;;  %4070 = vst [vmem:[%s7626_s18 + $0x108] sm:$0xff] %v3880_v59  ;;  %vm3628_vm12 = vcmp.ge.f32.partialorder %v9153_v45, 0.0  ;;  %v3523_v63 = vadd.f32 1.0, %v9342_v36  ;;  %6182 = vpow2.f32 %v3373_v4 }
 0x457   : > { %10514 = vst [vmem:[#allocation35_spill] sm:$0xff] %v9344_v57  ;;  %v3202_v35 = vsub.f32 0.0, %v3090_v33  ;;  %v5112_v31 = vadd.f32 %v10515_v49, %v4853_v30  ;;  %v4854_v62 = vadd.f32 %v4664_v34, %v4518_v10  ;;  %v4524_v16 = vsub.f32 %v4300_v32, %v4412_v38  ;;  %v4195_v33 = vld [vmem:[%s6932_s13 + $0x170] sm:$0xff] }
 0x458   : > { %v3524_v5 = vadd.f32 1.0, %v9347_v42  ;;  %v9356_v56 = vpop.eup %6170  ;;  %vm3629_vm13 = vcmp.ge.f32.partialorder %v9167_v15, 0.0  ;;  %6184 = vrcp.f32 %v3523_v63  ;;  %v3096_v40 = vand.u32 2147483647, %v9338_v44 }
 0x459   : > { %v2540_v39 = vadd.f32 %v9135_v46, %v8955_v22  ;;  %v9364_v59 = vadd.f32 %v5112_v31, %v4854_v62  ;;  %v4525_v4 = vsub.f32 %v4301_v27, %v4413_v26  ;;  %6186 = vlog2.f32 %v3523_v63  ;;  %v9371_v46 = vpop.f32.mrf.mxu0 }
 0x45a   : > { %v3530_v10 = vadd.f32 1.0, %v9356_v56  ;;  %v3740_v38 = vsel %vm3628_vm12, 1.0, %v9281_v19  ;;  %6188 = vrcp.f32 %v3524_v5  ;;  %v3375_v30 = vmul.f32 1.442695, %v3202_v35  ;;  %v4196_v19 = vld [vmem:[%s6932_s13 + $0x178] sm:$0xff] }
 0x45b   : > { %10516 = vst [vmem:[#allocation36_spill] sm:$0xff] %v9364_v59  ;;  %v6173_v32 = vpop.eup %6172  ;;  %v3208_v34 = vsub.f32 0.0, %v3096_v40  ;;  %v3741_v27 = vsel %vm3629_vm13, 1.0, %v9288_v1  ;;  %v4307_v26 = vmax.f32 %v9215_v11, 0.0  ;;  %6190 = vlog2.f32 %v3524_v5  ;;  %v9381_v40 = vpop.f32.mrf.mxu1 }
 0x45c   : > { %v6175_v49 = vpop.eup %6174  ;;  %v3892_v31 = vmul.f32 %v6173_v32, %v3740_v38  ;;  %6192 = vrcp.f32 %v3530_v10  ;;  %v9379_v35 = vadd.f32 %v9169_v12, %v2540_v39  ;;  %v4419_v15 = vmul.f32 %v4195_v33, %v9215_v11  ;;  %v9391_v39 = vpop.f32.mrf.mxu0  ;;  %v10517_v33 = vld [vmem:[#allocation74_spill] sm:$0xff] }
 0x45d   : > { %v6177_v63 = vpop.eup %6176  ;;  %v4676_v45 = vmul.f32 0.6931472, %v6175_v49  ;;  %v3387_v62 = vmul.f32 1.442695, %v3208_v34  ;;  %6194 = vlog2.f32 %v3530_v10  ;;  %v2544_v1 = vadd.f32 %v9157_v48, %v8919_v20  ;;  %v4202_v34 = vld [vmem:[%s6932_s13 + $0x1a8] sm:$0xff] }
 0x45e   : > { %v6179_v32 = vpop.eup %6178  ;;  %4076 = vst [vmem:[%s7626_s18 + $0x138] sm:$0xff] %v3892_v31  ;;  %v3894_v38 = vmul.f32 %v6177_v63, %v3741_v27  ;;  %6196 = vpow2.f32 %v3375_v30  ;;  %v3097_v12 = vand.u32 2147483647, %v9379_v35  ;;  %v4308_v31 = vmax.f32 %v9222_v47, 0.0 }
 0x45f   : > { %v9387_v5 = vpop.eup %6180  ;;  %v4860_v49 = vadd.f32 %v4676_v45, %v4524_v16  ;;  %v4678_v59 = vmul.f32 0.6931472, %v6179_v32  ;;  %v4420_v27 = vmul.f32 %v4196_v19, %v9222_v47  ;;  %6198 = vpow2.f32 %v3387_v62  ;;  %v9399_v32 = vpop.f32.mrf.mxu1 }
 0x460   : > { %4077 = vst [vmem:[%s7626_s18 + $0x140] sm:$0xff] %v3894_v38  ;;  %v3531_v10 = vadd.f32 1.0, %v9387_v5  ;;  %v4314_v16 = vmax.f32 %v9242_v58, 0.0  ;;  %v3209_v45 = vsub.f32 0.0, %v3097_v12  ;;  %v4426_v30 = vmul.f32 %v4202_v34, %v9242_v58 }
 0x461   : > { %v5113_v48 = vadd.f32 %v10517_v33, %v4860_v49  ;;  %v4861_v63 = vadd.f32 %v4678_v59, %v4525_v4  ;;  %v9403_v38 = vadd.f32 %v9184_v6, %v2544_v1  ;;  %v2546_v19 = vadd.f32 %v9173_v29, %v8955_v22  ;;  %v9411_v4 = vpop.f32.mrf.mxu0  ;;  %v9420_v12 = vpop.f32.mrf.mxu1 }
 0x462   : > { %6200 = vrcp.f32 %v3531_v10  ;;  %v3389_v62 = vmul.f32 1.442695, %v3209_v45  ;;  %v2550_v59 = vadd.f32 %v9194_v28, %v8919_v20  ;;  %vm3635_vm14 = vcmp.ge.f32.partialorder %v9215_v11, 0.0 }
 0x463   : > { %v9407_v57 = vadd.f32 %v5113_v48, %v4861_v63  ;;  %6202 = vlog2.f32 %v3531_v10  ;;  %v9413_v49 = vpop.eup %6182  ;;  %v4531_v34 = vsub.f32 %v4307_v26, %v4419_v15  ;;  %vm3636_vm15 = vcmp.ge.f32.partialorder %v9222_v47, 0.0  ;;  %v4203_v48 = vld [vmem:[%s6932_s13 + $0x1b0] sm:$0xff]  ;;  %v9431_v63 = vpop.f32.mrf.mxu0 }
 0x464   : > { %v3103_v6 = vand.u32 2147483647, %v9403_v38  ;;  %v4532_v29 = vsub.f32 %v4308_v31, %v4420_v27  ;;  %vm3642_vm0 = vcmp.ge.f32.partialorder %v9242_v58, 0.0  ;;  %v3537_v1 = vadd.f32 1.0, %v9413_v49 }
 0x465   : > { %10518 = vst [vmem:[#allocation37_spill] sm:$0xff] %v9407_v57  ;;  %6204 = vpow2.f32 %v3389_v62  ;;  %v6185_v28 = vpop.eup %6184  ;;  %v3747_v10 = vsel %vm3635_vm14, 1.0, %v9342_v36  ;;  %v4538_v33 = vsub.f32 %v4314_v16, %v4426_v30  ;;  %v9425_v26 = vadd.f32 %v9200_v24, %v2546_v19  ;;  %v9438_v62 = vpop.f32.mrf.mxu1 }
 0x466   : > { %v3215_v11 = vsub.f32 0.0, %v3103_v6  ;;  %v6187_v47 = vpop.eup %6186  ;;  %v3906_v15 = vmul.f32 %v6185_v28, %v3747_v10  ;;  %v3748_v31 = vsel %vm3636_vm15, 1.0, %v9347_v42  ;;  %6206 = vrcp.f32 %v3537_v1  ;;  %v4209_v10 = vld [vmem:[%s6932_s13 + $0x1e0] sm:$0xff] }
 0x467   : > { %v9429_v27 = vadd.f32 %v9224_v51, %v2550_v59  ;;  %v6189_v45 = vpop.eup %6188  ;;  %v4690_v36 = vmul.f32 0.6931472, %v6187_v47  ;;  %6208 = vlog2.f32 %v3537_v1  ;;  %v3104_v30 = vand.u32 2147483647, %v9425_v26 }
 0x468   : > { %v3401_v16 = vmul.f32 1.442695, %v3215_v11  ;;  %v6191_v24 = vpop.eup %6190  ;;  %4083 = vst [vmem:[%s7626_s18 + $0x170] sm:$0xff] %v3906_v15  ;;  %v3908_v19 = vmul.f32 %v6189_v45, %v3748_v31  ;;  %vm3643_vm1 = vcmp.ge.f32.partialorder %v9275_v37, 0.0  ;;  %v4315_v42 = vmax.f32 %v9275_v37, 0.0  ;;  %v9448_v45 = vpop.f32.mrf.mxu0 }
 0x469   : > { %v4427_v51 = vmul.f32 %v4203_v48, %v9275_v37  ;;  %v6193_v59 = vpop.eup %6192  ;;  %v4867_v6 = vadd.f32 %v4690_v36, %v4531_v34  ;;  %v4692_v28 = vmul.f32 0.6931472, %v6191_v24  ;;  %v3754_v1 = vsel %vm3642_vm0, 1.0, %v9356_v56  ;;  %v10519_v36 = vld [vmem:[#allocation77_spill] sm:$0xff] }
 0x46a   : > { %6210 = vpow2.f32 %v3401_v16  ;;  %v6195_v11 = vpop.eup %6194  ;;  %4084 = vst [vmem:[%s7626_s18 + $0x178] sm:$0xff] %v3908_v19  ;;  %v3920_v47 = vmul.f32 %v6193_v59, %v3754_v1  ;;  %v3216_v15 = vsub.f32 0.0, %v3104_v30  ;;  %v3110_v31 = vand.u32 2147483647, %v9429_v27  ;;  %v9461_v1 = vpop.f32.mrf.mxu1 }
 0x46b   : > { %v2552_v48 = vadd.f32 %v9210_v55, %v8955_v22  ;;  %v9450_v34 = vpop.eup %6196  ;;  %v5114_v24 = vadd.f32 %v10519_v36, %v4867_v6  ;;  %v4868_v58 = vadd.f32 %v4692_v28, %v4532_v29  ;;  %v4704_v56 = vmul.f32 0.6931472, %v6195_v11 }
 0x46c   : > { %v2556_v16 = vadd.f32 %v9238_v54, %v8919_v20  ;;  %v9455_v57 = vpop.eup %6198  ;;  %4090 = vst [vmem:[%s7626_s18 + $0x1a8] sm:$0xff] %v3920_v47  ;;  %v4321_v30 = vmax.f32 %v9303_v41, 0.0  ;;  %v4433_v19 = vmul.f32 %v4209_v10, %v9303_v41  ;;  %v3538_v55 = vadd.f32 1.0, %v9450_v34 }
 0x46d   : > { %v3222_v59 = vsub.f32 0.0, %v3110_v31  ;;  %v9463_v25 = vadd.f32 %v5114_v24, %v4868_v58  ;;  %v4874_v6 = vadd.f32 %v4704_v56, %v4538_v33  ;;  %v3755_v29 = vsel %vm3643_vm1, 1.0, %v9387_v5  ;;  %v9472_v31 = vpop.f32.mrf.mxu0  ;;  %v10521_v24 = vld [vmem:[#allocation26_spill] sm:$0xff] }
 0x46e   : > { %v3544_v54 = vadd.f32 1.0, %v9455_v57  ;;  %6212 = vrcp.f32 %v3538_v55  ;;  %v3403_v11 = vmul.f32 1.442695, %v3216_v15  ;;  %v9470_v10 = vadd.f32 %v9248_v23, %v2552_v48 }
 0x46f   : > { %10520 = vst [vmem:[#allocation38_spill] sm:$0xff] %v9463_v25  ;;  %v6201_v28 = vpop.eup %6200  ;;  %v3415_v47 = vmul.f32 1.442695, %v3222_v59  ;;  %v5115_v58 = vadd.f32 %v10521_v24, %v4874_v6  ;;  %6214 = vlog2.f32 %v3538_v55  ;;  %v9476_v37 = vadd.f32 %v9267_v53, %v2556_v16  ;;  %v9479_v59 = vpop.f32.mrf.mxu1  ;;  %v4210_v6 = vld [vmem:[%s6932_s13 + $0x1e8] sm:$0xff] }
 0x470   : > { %v6203_v36 = vpop.eup %6202  ;;  %v3922_v33 = vmul.f32 %v6201_v28, %v3755_v29  ;;  %v4539_v5 = vsub.f32 %v4315_v42, %v4427_v51  ;;  %6216 = vrcp.f32 %v3544_v54  ;;  %v3111_v15 = vand.u32 2147483647, %v9470_v10  ;;  %v9487_v42 = vpop.f32.mrf.mxu0 }
 0x471   : > { %v4706_v56 = vmul.f32 0.6931472, %v6203_v36  ;;  %vm3649_vm2 = vcmp.ge.f32.partialorder %v9303_v41, 0.0  ;;  %v4545_v48 = vsub.f32 %v4321_v30, %v4433_v19  ;;  %6218 = vlog2.f32 %v3544_v54  ;;  %v4216_v36 = vld [vmem:[%s6932_s13 + $0x218] sm:$0xff] }
 0x472   : > { %v9481_v23 = vpop.eup %6204  ;;  %4091 = vst [vmem:[%s7626_s18 + $0x1b0] sm:$0xff] %v3922_v33  ;;  %vm3650_vm3 = vcmp.ge.f32.partialorder %v9326_v9, 0.0  ;;  %6220 = vpow2.f32 %v3403_v11  ;;  %v3761_v16 = vsel %vm3649_vm2, 1.0, %v9413_v49  ;;  %v3223_v29 = vsub.f32 0.0, %v3111_v15  ;;  %v9496_v11 = vpop.f32.mrf.mxu1 }
 0x473   : > { %v4875_v55 = vadd.f32 %v4706_v56, %v4539_v5  ;;  %v3545_v53 = vadd.f32 1.0, %v9481_v23  ;;  %v6207_v51 = vpop.eup %6206  ;;  %6222 = vpow2.f32 %v3415_v47  ;;  %v3117_v41 = vand.u32 2147483647, %v9476_v37 }
 0x474   : > { %v6209_v30 = vpop.eup %6208  ;;  %v3934_v54 = vmul.f32 %v6207_v51, %v3761_v16  ;;  %v4322_v28 = vmax.f32 %v9326_v9, 0.0  ;;  %v3417_v49 = vmul.f32 1.442695, %v3223_v29  ;;  %v4434_v47 = vmul.f32 %v4210_v6, %v9326_v9  ;;  %v9508_v51 = vpop.f32.mrf.mxu0 }
 0x475   : > { %v9492_v19 = vadd.f32 %v5115_v58, %v4875_v55  ;;  %6224 = vrcp.f32 %v3545_v53  ;;  %v4718_v24 = vmul.f32 0.6931472, %v6209_v30  ;;  %v3229_v33 = vsub.f32 0.0, %v3117_v41  ;;  %v4217_v58 = vld [vmem:[%s6932_s13 + $0x220] sm:$0xff] }
 0x476   : > { %6226 = vlog2.f32 %v3545_v53  ;;  %4097 = vst [vmem:[%s7626_s18 + $0x1e0] sm:$0xff] %v3934_v54  ;;  %v4328_v56 = vmax.f32 %v9338_v44, 0.0  ;;  %v2558_v15 = vadd.f32 %v9257_v14, %v8955_v22  ;;  %v2562_v55 = vadd.f32 %v9277_v43, %v8919_v20  ;;  %v9519_v14 = vpop.f32.mrf.mxu1  ;;  %v10523_v43 = vld [vmem:[#allocation27_spill] sm:$0xff] }
 0x477   : > { %10522 = vst [vmem:[#allocation39_spill] sm:$0xff] %v9492_v19  ;;  %v9498_v5 = vpop.eup %6210  ;;  %v4881_v16 = vadd.f32 %v4718_v24, %v4545_v48  ;;  %v4440_v53 = vmul.f32 %v4216_v36, %v9338_v44  ;;  %6228 = vpow2.f32 %v3417_v49  ;;  %v4329_v41 = vmax.f32 %v9379_v35, 0.0  ;;  %v9527_v49 = vpop.f32.mrf.mxu0 }
 0x478   : > { %v3551_v29 = vadd.f32 1.0, %v9498_v5  ;;  %v3429_v6 = vmul.f32 1.442695, %v3229_v33  ;;  %v9514_v30 = vadd.f32 %v9286_v8, %v2558_v15  ;;  %v9517_v54 = vadd.f32 %v9307_v61, %v2562_v55 }
 0x479   : > { %v5116_v19 = vadd.f32 %v10523_v43, %v4881_v16  ;;  %v4441_v48 = vmul.f32 %v4217_v58, %v9379_v35  ;;  %v2564_v36 = vadd.f32 %v9298_v21, %v8955_v22  ;;  %v4546_v24 = vsub.f32 %v4322_v28, %v4434_v47  ;;  %v4223_v28 = vld [vmem:[%s6932_s13 + $0x250] sm:$0xff] }
 0x47a   : > { %6230 = vrcp.f32 %v3551_v29  ;;  %vm3656_vm4 = vcmp.ge.f32.partialorder %v9338_v44, 0.0  ;;  %v3118_v8 = vand.u32 2147483647, %v9514_v30  ;;  %v3762_v33 = vsel %vm3650_vm3, 1.0, %v9450_v34 }
 0x47b   : > { %6232 = vlog2.f32 %v3551_v29  ;;  %v6213_v61 = vpop.eup %6212  ;;  %v4552_v15 = vsub.f32 %v4328_v56, %v4440_v53  ;;  %v3124_v58 = vand.u32 2147483647, %v9517_v54  ;;  %vm3657_vm5 = vcmp.ge.f32.partialorder %v9379_v35, 0.0  ;;  %v9537_v29 = vpop.f32.mrf.mxu1 }
 0x47c   : > { %6234 = vpow2.f32 %v3429_v6  ;;  %v6215_v55 = vpop.eup %6214  ;;  %v3936_v21 = vmul.f32 %v6213_v61, %v3762_v33  ;;  %v3230_v47 = vsub.f32 0.0, %v3118_v8  ;;  %v2568_v16 = vadd.f32 %v9316_v13, %v8919_v20  ;;  %v9547_v33 = vpop.f32.mrf.mxu0 }
 0x47d   : > { %v6217_v43 = vpop.eup %6216  ;;  %v4720_v25 = vmul.f32 0.6931472, %v6215_v55  ;;  %v3768_v9 = vsel %vm3656_vm4, 1.0, %v9455_v57  ;;  %v4553_v34 = vsub.f32 %v4329_v41, %v4441_v48  ;;  %v9543_v56 = vadd.f32 %v9328_v17, %v2564_v36 }
 0x47e   : > { %v6219_v53 = vpop.eup %6218  ;;  %4098 = vst [vmem:[%s7626_s18 + $0x1e8] sm:$0xff] %v3936_v21  ;;  %v3948_v6 = vmul.f32 %v6217_v43, %v3768_v9  ;;  %v4335_v8 = vmax.f32 %v9403_v38, 0.0  ;;  %v3431_v61 = vmul.f32 1.442695, %v3230_v47  ;;  %v3236_v13 = vsub.f32 0.0, %v3124_v58  ;;  %v9561_v58 = vpop.f32.mrf.mxu1  ;;  %v4224_v47 = vld [vmem:[%s6932_s13 + $0x258] sm:$0xff] }
 0x47f   : > { %v9549_v60 = vpop.eup %6220  ;;  %v4882_v55 = vadd.f32 %v4720_v25, %v4546_v24  ;;  %v4732_v44 = vmul.f32 0.6931472, %v6219_v53  ;;  %v4447_v57 = vmul.f32 %v4223_v28, %v9403_v38  ;;  %v3125_v41 = vand.u32 2147483647, %v9543_v56 }
 0x480   : > { %v9553_v17 = vpop.eup %6222  ;;  %4104 = vst [vmem:[%s7626_s18 + $0x218] sm:$0xff] %v3948_v6  ;;  %vm3663_vm6 = vcmp.ge.f32.partialorder %v9403_v38, 0.0  ;;  %v3552_v48 = vadd.f32 1.0, %v9549_v60  ;;  %6236 = vpow2.f32 %v3431_v61  ;;  %v9559_v36 = vadd.f32 %v9352_v52, %v2568_v16  ;;  %v9570_v6 = vpop.f32.mrf.mxu0 }
 0x481   : > { %v9563_v25 = vadd.f32 %v5116_v19, %v4882_v55  ;;  %v4888_v24 = vadd.f32 %v4732_v44, %v4552_v15  ;;  %v3769_v28 = vsel %vm3657_vm5, 1.0, %v9481_v23  ;;  %v3558_v43 = vadd.f32 1.0, %v9553_v17  ;;  %v4230_v44 = vld [vmem:[%s6932_s13 + $0x288] sm:$0xff] }
 0x482   : > { %v6225_v21 = vpop.eup %6224  ;;  %6238 = vrcp.f32 %v3552_v48  ;;  %v3443_v52 = vmul.f32 1.442695, %v3236_v13  ;;  %v3237_v16 = vsub.f32 0.0, %v3125_v41  ;;  %v4559_v55 = vsub.f32 %v4335_v8, %v4447_v57  ;;  %v9580_v41 = vpop.f32.mrf.mxu1 }
 0x483   : > { %10524 = vst [vmem:[#allocation40_spill] sm:$0xff] %v9563_v25  ;;  %v6227_v9 = vpop.eup %6226  ;;  %v3950_v53 = vmul.f32 %v6225_v21, %v3769_v28  ;;  %v5117_v19 = vadd.f32 %v8853_v3, %v4888_v24  ;;  %6240 = vlog2.f32 %v3552_v48  ;;  %v4336_v35 = vmax.f32 %v9425_v26, 0.0  ;;  %10525 = vst [vmem:[#allocation41_spill] sm:$0xff] %v9580_v41  ;;  %v4231_v28 = vld [vmem:[%s6932_s13 + $0x290] sm:$0xff] }
 0x484   : > { %v4734_v61 = vmul.f32 0.6931472, %v6227_v9  ;;  %v9573_v15 = vpop.eup %6228  ;;  %v4448_v23 = vmul.f32 %v4224_v47, %v9425_v26  ;;  %6242 = vrcp.f32 %v3558_v43  ;;  %v3131_v13 = vand.u32 2147483647, %v9559_v36  ;;  %v9589_v9 = vpop.f32.mrf.mxu0 }
 0x485   : > { %4105 = vst [vmem:[%s7626_s18 + $0x220] sm:$0xff] %v3950_v53  ;;  %6244 = vlog2.f32 %v3558_v43  ;;  %v3559_v3 = vadd.f32 1.0, %v9573_v15  ;;  %v3445_v8 = vmul.f32 1.442695, %v3237_v16  ;;  %v3775_v48 = vsel %vm3663_vm6, 1.0, %v9498_v5 }
 0x486   : > { %v4889_v21 = vadd.f32 %v4734_v61, %v4553_v34  ;;  %vm3664_vm7 = vcmp.ge.f32.partialorder %v9425_v26, 0.0  ;;  %v4342_v24 = vmax.f32 %v9429_v27, 0.0  ;;  %6246 = vpow2.f32 %v3443_v52  ;;  %v4237_v61 = vld [vmem:[%s6932_s13 + $0x2c0] sm:$0xff]  ;;  %v9599_v52 = vpop.f32.mrf.mxu1 }
 0x487   : > { %v6231_v57 = vpop.eup %6230  ;;  %v3243_v47 = vsub.f32 0.0, %v3131_v13  ;;  %v4454_v16 = vmul.f32 %v4230_v44, %v9429_v27  ;;  %6248 = vrcp.f32 %v3559_v3  ;;  %v2570_v41 = vadd.f32 %v9340_v7, %v8955_v22 }
 0x488   : > { %v6233_v34 = vpop.eup %6232  ;;  %v9591_v43 = vadd.f32 %v5117_v19, %v4889_v21  ;;  %v3962_v53 = vmul.f32 %v6231_v57, %v3775_v48  ;;  %6250 = vlog2.f32 %v3559_v3  ;;  %v4343_v13 = vmax.f32 %v9470_v10, 0.0  ;;  %v9610_v48 = vpop.f32.mrf.mxu0 }
 0x489   : > { %v9594_v38 = vpop.eup %6234  ;;  %v4746_v5 = vmul.f32 0.6931472, %v6233_v34  ;;  %v3457_v25 = vmul.f32 1.442695, %v3243_v47  ;;  %v4455_v19 = vmul.f32 %v4231_v28, %v9470_v10  ;;  %6252 = vpow2.f32 %v3445_v8 }
 0x48a   : > { %4111 = vst [vmem:[%s7626_s18 + $0x250] sm:$0xff] %v3962_v53  ;;  %v3565_v21 = vadd.f32 1.0, %v9594_v38  ;;  %v9606_v57 = vadd.f32 %v9371_v46, %v2570_v41  ;;  %v2574_v3 = vadd.f32 %v9362_v0, %v8919_v20  ;;  %v4349_v7 = vmax.f32 %v9476_v37, 0.0 }
 0x48b   : > { %v4895_v44 = vadd.f32 %v4746_v5, %v4559_v55  ;;  %6254 = vpow2.f32 %v3457_v25  ;;  %v4461_v47 = vmul.f32 %v4237_v61, %v9476_v37  ;;  %v2576_v28 = vadd.f32 %v9381_v40, %v8955_v22  ;;  %v9618_v25 = vpop.f32.mrf.mxu1 }
 0x48c   : > { %6256 = vrcp.f32 %v3565_v21  ;;  %v4560_v55 = vsub.f32 %v4336_v35, %v4448_v23  ;;  %v3132_v46 = vand.u32 2147483647, %v9606_v57  ;;  %vm3670_vm8 = vcmp.ge.f32.partialorder %v9429_v27, 0.0  ;;  %v9631_v35 = vpop.f32.mrf.mxu0 }
 0x48d   : > { %v5118_v8 = vadd.f32 %v8923_v50, %v4895_v44  ;;  %6258 = vlog2.f32 %v3565_v21  ;;  %v9620_v20 = vpop.eup %6236  ;;  %v4566_v0 = vsub.f32 %v4342_v24, %v4454_v16  ;;  %v9624_v41 = vadd.f32 %v9391_v39, %v2574_v3 }
 0x48e   : > { %v9627_v34 = vadd.f32 %v9411_v4, %v2576_v28  ;;  %vm3671_vm9 = vcmp.ge.f32.partialorder %v9470_v10, 0.0  ;;  %v4567_v50 = vsub.f32 %v4343_v13, %v4455_v19  ;;  %v3566_v22 = vadd.f32 1.0, %v9620_v20  ;;  %v4238_v4 = vld [vmem:[%s6932_s13 + $0x2c8] sm:$0xff]  ;;  %v9643_v19 = vpop.f32.mrf.mxu1  ;;  %v9649_v28 = vpop.f32.mrf.mxu0 }
 0x48f   : > { %v3244_v40 = vsub.f32 0.0, %v3132_v46  ;;  %v6239_v23 = vpop.eup %6238  ;;  %v3776_v27 = vsel %vm3664_vm7, 1.0, %v9549_v60  ;;  %v3782_v24 = vsel %vm3670_vm8, 1.0, %v9553_v17  ;;  %vm3677_vm10 = vcmp.ge.f32.partialorder %v9476_v37, 0.0 }
 0x490   : > { %v9638_v39 = vsub.f32 %v4349_v7, %v4461_v47  ;;  %v3138_v53 = vand.u32 2147483647, %v9624_v41  ;;  %v6241_v16 = vpop.eup %6240  ;;  %v3964_v5 = vmul.f32 %v6239_v23, %v3776_v27  ;;  %6260 = vrcp.f32 %v3566_v22 }
 0x491   : > { %v3459_v61 = vmul.f32 1.442695, %v3244_v40  ;;  %v1764_v13 = vsub.s32 6, %v10506_v18  ;;  %v6243_v26 = vpop.eup %6242  ;;  %v4748_v60 = vmul.f32 0.6931472, %v6241_v16  ;;  %6262 = vlog2.f32 %v3566_v22  ;;  %v6392_v16 = vld [vmem:[#allocation13] sm:$0xff] }
 0x492   : > { %v3250_v17 = vsub.f32 0.0, %v3138_v53  ;;  %v3139_v21 = vand.u32 2147483647, %v9627_v34  ;;  %v6245_v44 = vpop.eup %6244  ;;  %4112 = vst [vmem:[%s7626_s18 + $0x258] sm:$0xff] %v3964_v5  ;;  %v3976_v3 = vmul.f32 %v6243_v26, %v3782_v24  ;;  %v4350_v7 = vmax.f32 %v9514_v30, 0.0 }
 0x493   : > { %v4462_v47 = vmul.f32 %v4238_v4, %v9514_v30  ;;  %6264 = vpow2.f32 %v3459_v61  ;;  %v9651_v18 = vpop.eup %6246  ;;  %v4896_v46 = vadd.f32 %v4748_v60, %v4560_v55  ;;  %v4760_v40 = vmul.f32 0.6931472, %v6245_v44  ;;  %v4244_v4 = vld [vmem:[%s6932_s13 + $0x2f8] sm:$0xff]  ;;  %v9664_v61 = vpop.f32.mrf.mxu1 }
 0x494   : > { %v3471_v22 = vmul.f32 1.442695, %v3250_v17  ;;  %v3251_v23 = vsub.f32 0.0, %v3139_v21  ;;  %v6249_v27 = vpop.eup %6248  ;;  %4118 = vst [vmem:[%s7626_s18 + $0x288] sm:$0xff] %v3976_v3  ;;  %v3783_v53 = vsel %vm3671_vm9, 1.0, %v9573_v15  ;;  %vm3678_vm11 = vcmp.ge.f32.partialorder %v9514_v30, 0.0  ;;  %v9671_v3 = vpop.f32.mrf.mxu0 }
 0x495   : > { %v3572_v24 = vadd.f32 1.0, %v9651_v18  ;;  %v9660_v5 = vrot.slane %v6392_v16, %v1764_v13  ;;  %v5465_v55 = vadd.f32 %v9420_v12, %v9399_v32  ;;  %v6251_v26 = vpop.eup %6250  ;;  %v9666_v60 = vadd.f32 %v5118_v8, %v4896_v46  ;;  %v10526_v32 = vld [vmem:[#allocation28_spill] sm:$0xff] }
 0x496   : > { %v4902_v17 = vadd.f32 %v4760_v40, %v4566_v0  ;;  %v3978_v10 = vmul.f32 %v6249_v27, %v3783_v53  ;;  %6266 = vpow2.f32 %v3471_v22  ;;  %v9668_v15 = vpop.eup %6252  ;;  %v4762_v21 = vmul.f32 0.6931472, %v6251_v26  ;;  %v9683_v27 = vpop.f32.mrf.mxu1 }
 0x497   : > { %6268 = vrcp.f32 %v3572_v24  ;;  %v4356_v44 = vmax.f32 %v9517_v54, 0.0  ;;  %v3473_v13 = vmul.f32 1.442695, %v3251_v23  ;;  %v4468_v8 = vmul.f32 %v4244_v4, %v9517_v54 }
 0x498   : > { %v9673_v16 = vpop.eup %6254  ;;  %v5119_v12 = vadd.f32 %v10526_v32, %v4902_v17  ;;  %4119 = vst [vmem:[%s7626_s18 + $0x290] sm:$0xff] %v3978_v10  ;;  %6270 = vlog2.f32 %v3572_v24  ;;  %v3573_v0 = vadd.f32 1.0, %v9668_v15  ;;  %v4903_v40 = vadd.f32 %v4762_v21, %v4567_v50  ;;  %v4245_v24 = vld [vmem:[%s6932_s13 + $0x300] sm:$0xff]  ;;  %v4251_v10 = vld [vmem:[%s6932_s13 + $0x330] sm:$0xff]  ;;  %v9693_v21 = vpop.f32.mrf.mxu0 }
 0x499   : > { %v6257_v46 = vpop.eup %6256  ;;  %v3789_v22 = vsel %vm3677_vm10, 1.0, %v9594_v38  ;;  %v3579_v23 = vadd.f32 1.0, %v9673_v16  ;;  %6272 = vpow2.f32 %v3473_v13  ;;  %vm3684_vm12 = vcmp.ge.f32.partialorder %v9517_v54, 0.0 }
 0x49a   : > { %v6259_v53 = vpop.eup %6258  ;;  %v3990_v26 = vmul.f32 %v6257_v46, %v3789_v22  ;;  %6274 = vrcp.f32 %v3573_v0  ;;  %v2806_v4 = vadd.f32 %v5465_v55, %v9660_v5  ;;  %v5545_v50 = vadd.f32 %v9448_v45, %v9431_v63 }
 0x49b   : > { %v9690_v37 = vadd.f32 %v5119_v12, %v4903_v40  ;;  %v4774_v38 = vmul.f32 0.6931472, %v6259_v53  ;;  %v4574_v17 = vsub.f32 %v4350_v7, %v4462_v47  ;;  %6276 = vlog2.f32 %v3573_v0  ;;  %v9704_v7 = vpop.f32.mrf.mxu1 }
 0x49c   : > { %4125 = vst [vmem:[%s7626_s18 + $0x2c0] sm:$0xff] %v3990_v26  ;;  %v4357_v13 = vmax.f32 %v9543_v56, 0.0  ;;  %6278 = vrcp.f32 %v3579_v23  ;;  %v9697_v32 = vadd.f32 %v5545_v50, %v2806_v4  ;;  %v5468_v55 = vadd.f32 %v9461_v1, %v9438_v62 }
 0x49d   : > { %v4909_v46 = vadd.f32 %v4774_v38, %v9638_v39  ;;  %v4469_v63 = vmul.f32 %v4245_v24, %v9543_v56  ;;  %v4363_v45 = vmax.f32 %v9559_v36, 0.0  ;;  %6280 = vlog2.f32 %v3579_v23  ;;  %v6261_v47 = vpop.eup %6260  ;;  %v10527_v39 = vld [vmem:[#allocation29_spill] sm:$0xff]  ;;  %v9717_v24 = vpop.f32.mrf.mxu0 }
 0x49e   : > { %v3790_v12 = vsel %vm3678_vm11, 1.0, %v9620_v20  ;;  %v4475_v0 = vmul.f32 %v4251_v10, %v9559_v36  ;;  %v3035_v40 = vand.u32 2147483647, %v9697_v32  ;;  %v5471_v62 = vadd.f32 %v9496_v11, %v9479_v59  ;;  %v6263_v1 = vpop.eup %6262  ;;  %v9727_v10 = vpop.f32.mrf.mxu1 }
 0x49f   : > { %v5120_v22 = vadd.f32 %v10527_v39, %v4909_v46  ;;  %v3992_v53 = vmul.f32 %v6261_v47, %v3790_v12  ;;  %v2811_v23 = vadd.f32 %v5468_v55, %v9660_v5  ;;  %v5548_v26 = vadd.f32 %v9487_v42, %v9472_v31  ;;  %v9739_v12 = vpop.f32.mrf.mxu0 }
 0x4a0   : > { %v9719_v30 = vpop.eup %6264  ;;  %v4776_v20 = vmul.f32 0.6931472, %v6263_v1  ;;  %v4580_v4 = vsub.f32 %v4356_v44, %v4468_v8  ;;  %vm3685_vm13 = vcmp.ge.f32.partialorder %v9543_v56, 0.0  ;;  %v3147_v50 = vsub.f32 0.0, %v3035_v40  ;;  %v9747_v39 = vpop.f32.mrf.mxu1 }
 0x4a1   : > { %4126 = vst [vmem:[%s7626_s18 + $0x2c8] sm:$0xff] %v3992_v53  ;;  %v4581_v59 = vsub.f32 %v4357_v13, %v4469_v63  ;;  %vm3691_vm14 = vcmp.ge.f32.partialorder %v9559_v36, 0.0  ;;  %v3580_v11 = vadd.f32 1.0, %v9719_v30  ;;  %v9725_v38 = vadd.f32 %v5548_v26, %v2811_v23  ;;  %v4252_v13 = vld [vmem:[%s6932_s13 + $0x338] sm:$0xff] }
 0x4a2   : > { %v4910_v31 = vadd.f32 %v4776_v20, %v4574_v17  ;;  %v4587_v42 = vsub.f32 %v4363_v45, %v4475_v0  ;;  %v3265_v55 = vmul.f32 1.442695, %v3147_v50  ;;  %v2816_v46 = vadd.f32 %v5471_v62, %v9660_v5  ;;  %v9759_v20 = vpop.f32.mrf.mxu0 }
 0x4a3   : > { %v9730_v44 = vpop.eup %6266  ;;  %v3796_v8 = vsel %vm3684_vm12, 1.0, %v9651_v18  ;;  %6282 = vrcp.f32 %v3580_v11  ;;  %v3042_v63 = vand.u32 2147483647, %v9725_v38  ;;  %v5551_v47 = vadd.f32 %v9527_v49, %v9508_v51 }
 0x4a4   : > { %v6269_v17 = vpop.eup %6268  ;;  %v9741_v45 = vadd.f32 %v5120_v22, %v4910_v31  ;;  %6284 = vlog2.f32 %v3580_v11  ;;  %v3586_v0 = vadd.f32 1.0, %v9730_v44  ;;  %v5474_v54 = vadd.f32 %v9537_v29, %v9519_v14 }
 0x4a5   : > { %v6271_v18 = vpop.eup %6270  ;;  %v4004_v40 = vmul.f32 %v6269_v17, %v3796_v8  ;;  %v4364_v62 = vmax.f32 %v9606_v57, 0.0  ;;  %6286 = vpow2.f32 %v3265_v55  ;;  %v3154_v1 = vsub.f32 0.0, %v3042_v63 }
 0x4a6   : > { %v9749_v51 = vpop.eup %6272  ;;  %v4788_v49 = vmul.f32 0.6931472, %v6271_v18  ;;  %v4476_v22 = vmul.f32 %v4252_v13, %v9606_v57  ;;  %6288 = vrcp.f32 %v3586_v0  ;;  %v9752_v53 = vadd.f32 %v5551_v47, %v2816_v46  ;;  %v9769_v47 = vpop.f32.mrf.mxu1 }
 0x4a7   : > { %v6275_v23 = vpop.eup %6274  ;;  %4132 = vst [vmem:[%s7626_s18 + $0x2f8] sm:$0xff] %v4004_v40  ;;  %v3797_v14 = vsel %vm3685_vm13, 1.0, %v9668_v15  ;;  %6290 = vlog2.f32 %v3586_v0  ;;  %v3587_v29 = vadd.f32 1.0, %v9749_v51  ;;  %v3279_v26 = vmul.f32 1.442695, %v3154_v1  ;;  %v4258_v15 = vld [vmem:[%s6932_s13 + $0x368] sm:$0xff] }
 0x4a8   : > { %v6277_v50 = vpop.eup %6276  ;;  %v4916_v11 = vadd.f32 %v4788_v49, %v4580_v4  ;;  %v4006_v31 = vmul.f32 %v6275_v23, %v3797_v14  ;;  %v3049_v55 = vand.u32 2147483647, %v9752_v53  ;;  %v2821_v46 = vadd.f32 %v5474_v54, %v9660_v5  ;;  %v10528_v49 = vld [vmem:[#allocation41_spill] sm:$0xff] }
 0x4a9   : > { %v6279_v8 = vpop.eup %6278  ;;  %v4790_v13 = vmul.f32 0.6931472, %v6277_v50  ;;  %v3803_v56 = vsel %vm3691_vm14, 1.0, %v9673_v16  ;;  %6292 = vrcp.f32 %v3587_v29  ;;  %v5554_v63 = vadd.f32 %v9570_v6, %v9547_v33  ;;  %v9774_v16 = vpop.f32.mrf.mxu0 }
 0x4aa   : > { %v6281_v4 = vpop.eup %6280  ;;  %v5121_v17 = vadd.f32 %v9041_v2, %v4916_v11  ;;  %4133 = vst [vmem:[%s7626_s18 + $0x300] sm:$0xff] %v4006_v31  ;;  %v4018_v0 = vmul.f32 %v6279_v8, %v3803_v56  ;;  %6294 = vlog2.f32 %v3587_v29  ;;  %v3161_v54 = vsub.f32 0.0, %v3049_v55  ;;  %v9787_v29 = vpop.f32.mrf.mxu1  ;;  %v10529_v11 = vld [vmem:[#allocation30_spill] sm:$0xff] }
 0x4ab   : > { %v4917_v18 = vadd.f32 %v4790_v13, %v4581_v59  ;;  %v4802_v40 = vmul.f32 0.6931472, %v6281_v4  ;;  %v4370_v36 = vmax.f32 %v9624_v41, 0.0  ;;  %6296 = vpow2.f32 %v3279_v26  ;;  %v9796_v55 = vpop.f32.mrf.mxu0 }
 0x4ac   : > { %4139 = vst [vmem:[%s7626_s18 + $0x330] sm:$0xff] %v4018_v0  ;;  %v4482_v1 = vmul.f32 %v4258_v15, %v9624_v41  ;;  %v3293_v33 = vmul.f32 1.442695, %v3161_v54  ;;  %v9778_v6 = vadd.f32 %v5554_v63, %v2821_v46  ;;  %v5477_v2 = vadd.f32 %v10528_v49, %v9561_v58  ;;  %v9806_v15 = vpop.f32.mrf.mxu1 }
 0x4ad   : > { %v9782_v23 = vadd.f32 %v5121_v17, %v4917_v18  ;;  %v4923_v14 = vadd.f32 %v4802_v40, %v4587_v42  ;;  %vm3692_vm15 = vcmp.ge.f32.partialorder %v9606_v57, 0.0  ;;  %v5480_v59 = vadd.f32 %v9618_v25, %v9599_v52 }
 0x4ae   : > { %v4588_v26 = vsub.f32 %v4364_v62, %v4476_v22  ;;  %vm3698_vm0 = vcmp.ge.f32.partialorder %v9624_v41, 0.0  ;;  %6298 = vpow2.f32 %v3293_v33  ;;  %v3056_v50 = vand.u32 2147483647, %v9778_v6  ;;  %v4259_v22 = vld [vmem:[%s6932_s13 + $0x370] sm:$0xff] }
 0x4af   : > { %v5122_v31 = vadd.f32 %v10529_v11, %v4923_v14  ;;  %v2826_v58 = vadd.f32 %v5477_v2, %v9660_v5  ;;  %v5557_v42 = vadd.f32 %v9610_v48, %v9589_v9  ;;  %v2831_v57 = vadd.f32 %v5480_v59, %v9660_v5  ;;  %v9827_v14 = vpop.f32.mrf.mxu1 }
 0x4b0   : > { %v6283_v52 = vpop.eup %6282  ;;  %v3804_v25 = vsel %vm3692_vm15, 1.0, %v9719_v30  ;;  %v4594_v62 = vsub.f32 %v4370_v36, %v4482_v1  ;;  %v3168_v46 = vsub.f32 0.0, %v3056_v50  ;;  %v5560_v8 = vadd.f32 %v9649_v28, %v9631_v35  ;;  %v9821_v36 = vpop.f32.mrf.mxu0 }
 0x4b1   : > { %v6285_v13 = vpop.eup %6284  ;;  %v4020_v56 = vmul.f32 %v6283_v52, %v3804_v25  ;;  %vm3699_vm1 = vcmp.ge.f32.partialorder %v9627_v34, 0.0  ;;  %v4371_v9 = vmax.f32 %v9627_v34, 0.0  ;;  %v9804_v48 = vadd.f32 %v5557_v42, %v2826_v58 }
 0x4b2   : > { %v9808_v63 = vpop.eup %6286  ;;  %v4804_v30 = vmul.f32 0.6931472, %v6285_v13  ;;  %v3307_v4 = vmul.f32 1.442695, %v3168_v46  ;;  %v9810_v17 = vadd.f32 %v5560_v8, %v2831_v57  ;;  %v5483_v0 = vadd.f32 %v9664_v61, %v9643_v19  ;;  %v9836_v52 = vpop.f32.mrf.mxu0  ;;  %v4155_v46 = vld [vmem:[%s6932_s13 + $0x30] sm:$0xff] }
 0x4b3   : > { %v6289_v35 = vpop.eup %6288  ;;  %4140 = vst [vmem:[%s7626_s18 + $0x338] sm:$0xff] %v4020_v56  ;;  %v3810_v28 = vsel %vm3698_vm0, 1.0, %v9730_v44  ;;  %v4483_v54 = vmul.f32 %v4259_v22, %v9627_v34  ;;  %v3483_v18 = vadd.f32 1.0, %v9808_v63  ;;  %v3063_v40 = vand.u32 2147483647, %v9804_v48  ;;  %v10531_v56 = vld [vmem:[#allocation31_spill] sm:$0xff] }
 0x4b4   : > { %v6291_v1 = vpop.eup %6290  ;;  %v4924_v33 = vadd.f32 %v4804_v30, %v4588_v26  ;;  %v4032_v49 = vmul.f32 %v6289_v35, %v3810_v28  ;;  %v10530_v2 = vlaneseq  ;;  %6300 = vpow2.f32 %v3307_v4 }
 0x4b5   : > { %v4816_v61 = vmul.f32 0.6931472, %v6291_v1  ;;  %v3811_v41 = vsel %vm3699_vm1, 1.0, %v9749_v51  ;;  %6302 = vrcp.f32 %v3483_v18  ;;  %v3175_v44 = vsub.f32 0.0, %v3063_v40 }
 0x4b6   : > { %v4934_v19 = vand.u32 127, %v10530_v2  ;;  %v6293_v59 = vpop.eup %6292  ;;  %v9829_v50 = vadd.f32 %v5122_v31, %v4924_v33  ;;  %4146 = vst [vmem:[%s7626_s18 + $0x368] sm:$0xff] %v4032_v49  ;;  %6304 = vlog2.f32 %v3483_v18  ;;  %v3070_v26 = vand.u32 2147483647, %v9810_v17  ;;  %v9859_v18 = vpop.f32.mrf.mxu0 }
 0x4b7   : > { %v2836_v11 = vadd.f32 %v5483_v0, %v9660_v5  ;;  %v6295_v58 = vpop.eup %6294  ;;  %v4930_v42 = vadd.f32 %v4816_v61, %v4594_v62  ;;  %v4034_v57 = vmul.f32 %v6293_v59, %v3811_v41  ;;  %v3321_v34 = vmul.f32 1.442695, %v3175_v44 }
 0x4b8   : > { %v5486_v51 = vadd.f32 %v9704_v7, %v9683_v27  ;;  %v9838_v25 = vpop.eup %6296  ;;  %v4595_v31 = vsub.f32 %v4371_v9, %v4483_v54  ;;  %v4818_v22 = vmul.f32 0.6931472, %v6295_v58  ;;  %v3182_v8 = vsub.f32 0.0, %v3070_v26  ;;  %v9848_v27 = vpop.f32.mrf.mxu1  ;;  %v4169_v26 = vld [vmem:[%s6932_s13 + $0xa0] sm:$0xff] }
 0x4b9   : > { %v5563_v13 = vadd.f32 %v9693_v21, %v9671_v3  ;;  %v5123_v30 = vadd.f32 %v10531_v56, %v4930_v42  ;;  %4147 = vst [vmem:[%s7626_s18 + $0x370] sm:$0xff] %v4034_v57  ;;  %v9845_v62 = vadd.s32 768, %v4934_v19  ;;  %v3490_v4 = vadd.f32 1.0, %v9838_v25  ;;  %v9879_v41 = vpop.f32.mrf.mxu0 }
 0x4ba   : > { %6306 = vpow2.f32 %v3321_v34  ;;  %v4931_v7 = vadd.f32 %v4818_v22, %v4595_v31  ;;  %v4267_v0 = vmax.f32 %v9697_v32, 0.0  ;;  %v3335_v9 = vmul.f32 1.442695, %v3182_v8  ;;  %v9868_v2 = vpop.f32.mrf.mxu1 }
 0x4bb   : > { %v9851_v35 = vadd.f32 %v5563_v13, %v2836_v11  ;;  %v9853_v28 = vpop.eup %6298  ;;  %v4379_v3 = vmul.f32 %v4155_v46, %v9697_v32  ;;  %6308 = vrcp.f32 %v3490_v4  ;;  %v2841_v21 = vadd.f32 %v5486_v51, %v9660_v5 }
 0x4bc   : > { %v5489_v54 = vadd.f32 %v9747_v39, %v9727_v10  ;;  %v9861_v40 = vadd.f32 %v5123_v30, %v4931_v7  ;;  %6310 = vlog2.f32 %v3490_v4  ;;  %v3497_v1 = vadd.f32 1.0, %v9853_v28  ;;  %v4162_v10 = vld [vmem:[%s6932_s13 + $0x68] sm:$0xff]  ;;  %v9900_v30 = vpop.f32.mrf.mxu0 }
 0x4bd   : > { %v5566_v33 = vadd.f32 %v9739_v12, %v9717_v24  ;;  %vm3595_vm2 = vcmp.ge.f32.partialorder %v9697_v32, 0.0  ;;  %6312 = vpow2.f32 %v3335_v9  ;;  %v3077_v49 = vand.u32 2147483647, %v9851_v35  ;;  %v4176_v32 = vld [vmem:[%s6932_s13 + $0xd8] sm:$0xff] }
 0x4be   : > { %vm4947_vm3 = vcmp.lt.s32.totalorder %v9845_v62, 784  ;;  %6314 = vrcp.f32 %v3497_v1  ;;  %v2846_v19 = vadd.f32 %v5489_v54, %v9660_v5  ;;  %v5569_v24 = vadd.f32 %v9774_v16, %v9759_v20 }
 0x4bf   : > { %v9872_v39 = vadd.f32 %v5566_v33, %v2841_v21  ;;  %6316 = vlog2.f32 %v3497_v1  ;;  %v3189_v61 = vsub.f32 0.0, %v3077_v49  ;;  %v5492_v12 = vadd.f32 %v9787_v29, %v9769_v47  ;;  %v9891_v47 = vpop.f32.mrf.mxu1 }
 0x4c0   : > { %v4491_v44 = vsub.f32 %v4267_v0, %v4379_v3  ;;  %vm3602_vm4 = vcmp.ge.f32.partialorder %v9725_v38, 0.0  ;;  %v4274_v59 = vmax.f32 %v9725_v38, 0.0  ;;  %v4386_v42 = vmul.f32 %v4162_v10, %v9725_v38 }
 0x4c1   : > { %v3084_v11 = vand.u32 2147483647, %v9872_v39  ;;  %v9885_v58 = vpop.eup %6300  ;;  %v4281_v57 = vmax.f32 %v9752_v53, 0.0  ;;  %v3349_v20 = vmul.f32 1.442695, %v3189_v61  ;;  %v9889_v16 = vadd.f32 %v5569_v24, %v2846_v19  ;;  %v9908_v3 = vpop.f32.mrf.mxu1 }
 0x4c2   : > { %v6303_v29 = vpop.eup %6302  ;;  %v3707_v34 = vsel %vm3595_vm2, 1.0, %v9808_v63  ;;  %v3504_v51 = vadd.f32 1.0, %v9885_v58  ;;  %v2851_v22 = vadd.f32 %v5492_v12, %v9660_v5  ;;  %v4393_v13 = vmul.f32 %v4169_v26, %v9752_v53  ;;  %v9919_v19 = vpop.f32.mrf.mxu0 }
 0x4c3   : > { %v3196_v31 = vsub.f32 0.0, %v3084_v11  ;;  %v6305_v46 = vpop.eup %6304  ;;  %v3826_v8 = vmul.f32 %v6303_v29, %v3707_v34  ;;  %6318 = vpow2.f32 %v3349_v20  ;;  %v3091_v56 = vand.u32 2147483647, %v9889_v16 }
 0x4c4   : > { %v4610_v4 = vmul.f32 0.6931472, %v6305_v46  ;;  %6320 = vrcp.f32 %v3504_v51  ;;  %v5572_v63 = vadd.f32 %v9821_v36, %v9796_v55  ;;  %v4498_v0 = vsub.f32 %v4274_v59, %v4386_v42  ;;  %v10532_v59 = vld [vmem:[#allocation32_spill] sm:$0xff]  ;;  %v9929_v42 = vpop.f32.mrf.mxu1 }
 0x4c5   : > { %v3363_v7 = vmul.f32 1.442695, %v3196_v31  ;;  %4043 = vst [vmem:[%s7626_s18 + $0x30] sm:$0xff] %v3826_v8  ;;  %vm3609_vm5 = vcmp.ge.f32.partialorder %v9752_v53, 0.0  ;;  %6322 = vlog2.f32 %v3504_v51  ;;  %v3203_v9 = vsub.f32 0.0, %v3091_v56  ;;  %v4183_v53 = vld [vmem:[%s6932_s13 + $0x110] sm:$0xff] }
 0x4c6   : > { %v4827_v54 = vadd.f32 %v4610_v4, %v4491_v44  ;;  %v9912_v1 = vadd.f32 %v5572_v63, %v2851_v22  ;;  %v5495_v33 = vadd.f32 %v9827_v14, %v9806_v15  ;;  %v4288_v55 = vmax.f32 %v9778_v6, 0.0  ;;  %v9944_v22 = vpop.f32.mrf.mxu0 }
 0x4c7   : > { %v9910_v21 = vpop.eup %6306  ;;  %6324 = vpow2.f32 %v3363_v7  ;;  %v4400_v36 = vmul.f32 %v4176_v32, %v9778_v6  ;;  %v3377_v10 = vmul.f32 1.442695, %v3203_v9  ;;  %v3714_v12 = vsel %vm3602_vm4, 1.0, %v9838_v25  ;;  %v4190_v7 = vld [vmem:[%s6932_s13 + $0x148] sm:$0xff]  ;;  %v5503_v9 = vpop.f32.mrf.mxu1 }
 0x4c8   : > { %v3511_v49 = vadd.f32 1.0, %v9910_v21  ;;  %v6309_v61 = vpop.eup %6308  ;;  %v4954_v24 = vsel %vm4947_vm3, %v4827_v54, 0.0  ;;  %v4505_v44 = vsub.f32 %v4281_v57, %v4393_v13  ;;  %v3098_v15 = vand.u32 2147483647, %v9912_v1 }
 0x4c9   : > { %v6311_v14 = vpop.eup %6310  ;;  %v5140_v26 = vadd.f32 %v10532_v59, %v4954_v24  ;;  %v3840_v11 = vmul.f32 %v6309_v61, %v3714_v12  ;;  %vm3616_vm6 = vcmp.ge.f32.partialorder %v9778_v6, 0.0  ;;  %v2856_v25 = vadd.f32 %v5495_v33, %v9660_v5 }
 0x4ca   : > { %6326 = vrcp.f32 %v3511_v49  ;;  %v9931_v20 = vpop.eup %6312  ;;  %v4624_v29 = vmul.f32 0.6931472, %v6311_v14  ;;  %v3210_v38 = vsub.f32 0.0, %v3098_v15  ;;  %v3721_v34 = vsel %vm3609_vm5, 1.0, %v9853_v28  ;;  %v5505_v14 = vpop.f32.mrf.mxu1 }
 0x4cb   : > { %6328 = vlog2.f32 %v3511_v49  ;;  %v6315_v57 = vpop.eup %6314  ;;  %5156 = vst [vmem:[%s9936_s14] sm:$0xff] %v5140_v26  ;;  %4050 = vst [vmem:[%s7626_s18 + $0x68] sm:$0xff] %v3840_v11  ;;  %v4512_v51 = vsub.f32 %v4288_v55, %v4400_v36  ;;  %v3518_v31 = vadd.f32 1.0, %v9931_v20  ;;  %vm3623_vm7 = vcmp.ge.f32.partialorder %v9804_v48, 0.0  ;;  %v9963_v49 = vpop.f32.mrf.mxu0  ;;  %v10534_v26 = vld [vmem:[#allocation34_spill] sm:$0xff] }
 0x4cc   : > { %6330 = vpow2.f32 %v3377_v10  ;;  %v6317_v46 = vpop.eup %6316  ;;  %v4834_v8 = vadd.f32 %v4624_v29, %v4498_v0  ;;  %v3854_v13 = vmul.f32 %v6315_v57, %v3721_v34  ;;  %v3391_v56 = vmul.f32 1.442695, %v3210_v38 }
 0x4cd   : > { %v5575_v4 = vadd.f32 %v9859_v18, %v9836_v52  ;;  %v4638_v32 = vmul.f32 0.6931472, %v6317_v46  ;;  %v4295_v28 = vmax.f32 %v9804_v48, 0.0  ;;  %6332 = vrcp.f32 %v3518_v31  ;;  %v10533_v18 = vld [vmem:[#allocation33_spill] sm:$0xff] }
 0x4ce   : > { %v5498_v63 = vadd.f32 %v9868_v2, %v9848_v27  ;;  %v4961_v0 = vsel %vm4947_vm3, %v4834_v8, 0.0  ;;  %4057 = vst [vmem:[%s7626_s18 + $0xa0] sm:$0xff] %v3854_v13  ;;  %6334 = vlog2.f32 %v3518_v31  ;;  %v5578_v52 = vadd.f32 %v9900_v30, %v9879_v41 }
 0x4cf   : > { %v9957_v54 = vadd.f32 %v5575_v4, %v2856_v25  ;;  %v5141_v33 = vadd.f32 %v10533_v18, %v4961_v0  ;;  %v4841_v55 = vadd.f32 %v4638_v32, %v4505_v44  ;;  %6336 = vpow2.f32 %v3391_v56  ;;  %v5506_v4 = vpop.f32.mrf.mxu1 }
 0x4d0   : > { %v2861_v36 = vadd.f32 %v5498_v63, %v9660_v5  ;;  %v9965_v27 = vpop.eup %6318  ;;  %v4407_v2 = vmul.f32 %v4183_v53, %v9804_v48  ;;  %v4302_v10 = vmax.f32 %v9810_v17, 0.0  ;;  %v4414_v61 = vmul.f32 %v4190_v7, %v9810_v17  ;;  %v4197_v53 = vld [vmem:[%s6932_s13 + $0x180] sm:$0xff] }
 0x4d1   : > { %v3105_v24 = vand.u32 2147483647, %v9957_v54  ;;  %v6321_v12 = vpop.eup %6320  ;;  %5157 = vst [vmem:[%s9936_s14 + $0x8] sm:$0xff] %v5141_v33  ;;  %v4968_v41 = vsel %vm4947_vm3, %v4841_v55, 0.0  ;;  %v3728_v30 = vsel %vm3616_vm6, 1.0, %v9885_v58  ;;  %v3525_v44 = vadd.f32 1.0, %v9965_v27  ;;  %v5583_v58 = vpop.f32.mrf.mxu0 }
 0x4d2   : > { %v9978_v15 = vadd.f32 %v5578_v52, %v2861_v36  ;;  %v6323_v59 = vpop.eup %6322  ;;  %v5142_v11 = vadd.f32 %v10534_v26, %v4968_v41  ;;  %v3868_v29 = vmul.f32 %v6321_v12, %v3728_v30  ;;  %v5501_v25 = vadd.f32 %v9908_v3, %v9891_v47  ;;  %v10535_v33 = vld [vmem:[#allocation35_spill] sm:$0xff]  ;;  %v4211_v26 = vld [vmem:[%s6932_s13 + $0x1f0] sm:$0xff] }
 0x4d3   : > { %v3217_v38 = vsub.f32 0.0, %v3105_v24  ;;  %v4652_v34 = vmul.f32 0.6931472, %v6323_v59  ;;  %vm3630_vm8 = vcmp.ge.f32.partialorder %v9810_v17, 0.0  ;;  %6338 = vrcp.f32 %v3525_v44  ;;  %v5585_v52 = vpop.f32.mrf.mxu0  ;;  %v4204_v12 = vld [vmem:[%s6932_s13 + $0x1b8] sm:$0xff] }
 0x4d4   : > { %v9983_v57 = vpop.eup %6324  ;;  %v3112_v6 = vand.u32 2147483647, %v9978_v15  ;;  %5158 = vst [vmem:[%s9936_s14 + $0x10] sm:$0xff] %v5142_v11  ;;  %4064 = vst [vmem:[%s7626_s18 + $0xd8] sm:$0xff] %v3868_v29  ;;  %v4519_v31 = vsub.f32 %v4295_v28, %v4407_v2  ;;  %6340 = vlog2.f32 %v3525_v44  ;;  %v3735_v47 = vsel %vm3623_vm7, 1.0, %v9910_v21 }
 0x4d5   : > { %v3532_v46 = vadd.f32 1.0, %v9983_v57  ;;  %v3405_v8 = vmul.f32 1.442695, %v3217_v38  ;;  %v4848_v13 = vadd.f32 %v4652_v34, %v4512_v51  ;;  %v4526_v3 = vsub.f32 %v4302_v10, %v4414_v61  ;;  %v5586_v38 = vpop.f32.mrf.mxu0 }
 0x4d6   : > { %v3224_v56 = vsub.f32 0.0, %v3112_v6  ;;  %vm3637_vm9 = vcmp.ge.f32.partialorder %v9851_v35, 0.0  ;;  %v2866_v28 = vadd.f32 %v5501_v25, %v9660_v5  ;;  %v5581_v7 = vadd.f32 %v9944_v22, %v9919_v19  ;;  %v10536_v6 = vld [vmem:[#allocation36_spill] sm:$0xff] }
 0x4d7   : > { %v6327_v32 = vpop.eup %6326  ;;  %6342 = vrcp.f32 %v3532_v46  ;;  %v5504_v51 = vadd.f32 %v5503_v9, %v9929_v42  ;;  %v4975_v48 = vsel %vm4947_vm3, %v4848_v13, 0.0  ;;  %v4309_v2 = vmax.f32 %v9851_v35, 0.0  ;;  %v5508_v9 = vpop.f32.mrf.mxu1 }
 0x4d8   : > { %v6329_v63 = vpop.eup %6328  ;;  %v3882_v21 = vmul.f32 %v6327_v32, %v3735_v47  ;;  %6344 = vlog2.f32 %v3532_v46  ;;  %v3419_v0 = vmul.f32 1.442695, %v3224_v56  ;;  %v5143_v55 = vadd.f32 %v10535_v33, %v4975_v48 }
 0x4d9   : > { %v10001_v18 = vpop.eup %6330  ;;  %v4666_v36 = vmul.f32 0.6931472, %v6329_v63  ;;  %6346 = vpow2.f32 %v3405_v8  ;;  %v4421_v19 = vmul.f32 %v4197_v53, %v9851_v35  ;;  %v10008_v22 = vadd.f32 %v5581_v7, %v2866_v28  ;;  %v5588_v28 = vpop.f32.mrf.mxu0 }
 0x4da   : > { %4071 = vst [vmem:[%s7626_s18 + $0x110] sm:$0xff] %v3882_v21  ;;  %v3539_v42 = vadd.f32 1.0, %v10001_v18  ;;  %6348 = vpow2.f32 %v3419_v0  ;;  %v6333_v10 = vpop.eup %6332  ;;  %5159 = vst [vmem:[%s9936_s14 + $0x18] sm:$0xff] %v5143_v55  ;;  %v3742_v24 = vsel %vm3630_vm8, 1.0, %v9931_v20  ;;  %v4316_v41 = vmax.f32 %v9872_v39, 0.0  ;;  %v10537_v21 = vld [vmem:[#allocation37_spill] sm:$0xff] }
 0x4db   : > { %v4855_v61 = vadd.f32 %v4666_v36, %v4519_v31  ;;  %v2871_v30 = vadd.f32 %v5504_v51, %v9660_v5  ;;  %v6335_v44 = vpop.eup %6334  ;;  %v3896_v59 = vmul.f32 %v6333_v10, %v3742_v24  ;;  %v3119_v11 = vand.u32 2147483647, %v10008_v22  ;;  %v5589_v24 = vpop.f32.mrf.mxu0 }
 0x4dc   : > { %6350 = vrcp.f32 %v3539_v42  ;;  %v5507_v29 = vadd.f32 %v5506_v4, %v5505_v14  ;;  %v10019_v25 = vpop.eup %6336  ;;  %v4680_v20 = vmul.f32 0.6931472, %v6335_v44  ;;  %v5584_v34 = vadd.f32 %v5583_v58, %v9963_v49  ;;  %v5509_v14 = vpop.f32.mrf.mxu1 }
 0x4dd   : > { %v4982_v17 = vsel %vm4947_vm3, %v4855_v61, 0.0  ;;  %6352 = vlog2.f32 %v3539_v42  ;;  %4078 = vst [vmem:[%s7626_s18 + $0x148] sm:$0xff] %v3896_v59  ;;  %v4428_v46 = vmul.f32 %v4204_v12, %v9872_v39  ;;  %v3546_v8 = vadd.f32 1.0, %v10019_v25 }
 0x4de   : > { %v5144_v31 = vadd.f32 %v10536_v6, %v4982_v17  ;;  %v3231_v13 = vsub.f32 0.0, %v3119_v11  ;;  %v4862_v47 = vadd.f32 %v4680_v20, %v4526_v3  ;;  %v4323_v56 = vmax.f32 %v9889_v16, 0.0  ;;  %v4218_v11 = vld [vmem:[%s6932_s13 + $0x228] sm:$0xff] }
 0x4df   : > { %v4435_v4 = vmul.f32 %v4211_v26, %v9889_v16  ;;  %v10030_v32 = vadd.f32 %v5584_v34, %v2871_v30  ;;  %v3749_v49 = vsel %vm3637_vm9, 1.0, %v9965_v27  ;;  %6354 = vrcp.f32 %v3546_v8 }
 0x4e0   : > { %5160 = vst [vmem:[%s9936_s14 + $0x20] sm:$0xff] %v5144_v31  ;;  %v3433_v58 = vmul.f32 1.442695, %v3231_v13  ;;  %v2876_v53 = vadd.f32 %v5507_v29, %v9660_v5  ;;  %v6339_v7 = vpop.eup %6338  ;;  %v4989_v3 = vsel %vm4947_vm3, %v4862_v47, 0.0  ;;  %6356 = vlog2.f32 %v3546_v8 }
 0x4e1   : > { %v3126_v51 = vand.u32 2147483647, %v10030_v32  ;;  %v5510_v63 = vadd.f32 %v5509_v14, %v5508_v9  ;;  %v6341_v48 = vpop.eup %6340  ;;  %v5145_v0 = vadd.f32 %v10537_v21, %v4989_v3  ;;  %v3910_v35 = vmul.f32 %v6339_v7, %v3749_v49 }
 0x4e2   : > { %6358 = vpow2.f32 %v3433_v58  ;;  %v5587_v27 = vadd.f32 %v5586_v38, %v5585_v52  ;;  %v4533_v33 = vsub.f32 %v4309_v2, %v4421_v19  ;;  %v4694_v55 = vmul.f32 0.6931472, %v6341_v48  ;;  %v10538_v38 = vld [vmem:[#allocation38_spill] sm:$0xff] }
 0x4e3   : > { %vm3644_vm10 = vcmp.ge.f32.partialorder %v9872_v39, 0.0  ;;  %v3238_v36 = vsub.f32 0.0, %v3126_v51  ;;  %5161 = vst [vmem:[%s9936_s14 + $0x28] sm:$0xff] %v5145_v0  ;;  %4085 = vst [vmem:[%s7626_s18 + $0x180] sm:$0xff] %v3910_v35  ;;  %v4540_v61 = vsub.f32 %v4316_v41, %v4428_v46  ;;  %v2881_v2 = vadd.f32 %v5510_v63, %v9660_v5 }
 0x4e4   : > { %v6343_v42 = vpop.eup %6342  ;;  %v3756_v10 = vsel %vm3644_vm10, 1.0, %v9983_v57  ;;  %v10045_v9 = vadd.f32 %v5587_v27, %v2876_v53  ;;  %v4869_v30 = vadd.f32 %v4694_v55, %v4533_v33  ;;  %vm3651_vm11 = vcmp.ge.f32.partialorder %v9889_v16, 0.0  ;;  %v10540_v27 = vld [vmem:[#allocation40_spill] sm:$0xff] }
 0x4e5   : > { %v6345_v12 = vpop.eup %6344  ;;  %v3924_v44 = vmul.f32 %v6343_v42, %v3756_v10  ;;  %v3447_v52 = vmul.f32 1.442695, %v3238_v36  ;;  %v4547_v59 = vsub.f32 %v4323_v56, %v4435_v4  ;;  %v5590_v5 = vadd.f32 %v5589_v24, %v5588_v28  ;;  %v10539_v4 = vld [vmem:[#allocation39_spill] sm:$0xff] }
 0x4e6   : > { %v10048_v19 = vpop.eup %6346  ;;  %v4708_v39 = vmul.f32 0.6931472, %v6345_v12  ;;  %v3133_v57 = vand.u32 2147483647, %v10045_v9  ;;  %v4996_v41 = vsel %vm4947_vm3, %v4869_v30, 0.0  ;;  %v4330_v16 = vmax.f32 %v9912_v1, 0.0 }
 0x4e7   : > { %v10052_v26 = vpop.eup %6348  ;;  %4092 = vst [vmem:[%s7626_s18 + $0x1b8] sm:$0xff] %v3924_v44  ;;  %v3553_v29 = vadd.f32 1.0, %v10048_v19  ;;  %6360 = vpow2.f32 %v3447_v52  ;;  %v5146_v17 = vadd.f32 %v10538_v38, %v4996_v41  ;;  %v3763_v31 = vsel %vm3651_vm11, 1.0, %v10001_v18  ;;  %v4225_v10 = vld [vmem:[%s6932_s13 + $0x260] sm:$0xff] }
 0x4e8   : > { %v4876_v20 = vadd.f32 %v4708_v39, %v4540_v61  ;;  %v3560_v34 = vadd.f32 1.0, %v10052_v26  ;;  %v3245_v46 = vsub.f32 0.0, %v3133_v57  ;;  %v10063_v8 = vadd.f32 %v5590_v5, %v2881_v2  ;;  %v4232_v61 = vld [vmem:[%s6932_s13 + $0x298] sm:$0xff] }
 0x4e9   : > { %v6351_v6 = vpop.eup %6350  ;;  %6362 = vrcp.f32 %v3553_v29  ;;  %5162 = vst [vmem:[%s9936_s14 + $0x30] sm:$0xff] %v5146_v17  ;;  %v4442_v56 = vmul.f32 %v4218_v11, %v9912_v1  ;;  %vm3658_vm12 = vcmp.ge.f32.partialorder %v9912_v1, 0.0  ;;  %v4337_v30 = vmax.f32 %v9957_v54, 0.0 }
 0x4ea   : > { %v6353_v13 = vpop.eup %6352  ;;  %v5003_v14 = vsel %vm4947_vm3, %v4876_v20, 0.0  ;;  %v3938_v47 = vmul.f32 %v6351_v6, %v3763_v31  ;;  %6364 = vlog2.f32 %v3553_v29  ;;  %v3461_v53 = vmul.f32 1.442695, %v3245_v46  ;;  %v4239_v6 = vld [vmem:[%s6932_s13 + $0x2d0] sm:$0xff] }
 0x4eb   : > { %v5147_v49 = vadd.f32 %v10539_v4, %v5003_v14  ;;  %v4722_v58 = vmul.f32 0.6931472, %v6353_v13  ;;  %6366 = vrcp.f32 %v3560_v34  ;;  %v3140_v18 = vand.u32 2147483647, %v10063_v8 }
 0x4ec   : > { %4099 = vst [vmem:[%s7626_s18 + $0x1f0] sm:$0xff] %v3938_v47  ;;  %6368 = vlog2.f32 %v3560_v34  ;;  %v6355_v28 = vpop.eup %6354  ;;  %v3770_v3 = vsel %vm3658_vm12, 1.0, %v10019_v25  ;;  %v4554_v0 = vsub.f32 %v4330_v16, %v4442_v56  ;;  %v4449_v44 = vmul.f32 %v4225_v10, %v9957_v54 }
 0x4ed   : > { %5163 = vst [vmem:[%s9936_s14 + $0x38] sm:$0xff] %v5147_v49  ;;  %v4883_v7 = vadd.f32 %v4722_v58, %v4547_v59  ;;  %6370 = vpow2.f32 %v3461_v53  ;;  %v6357_v51 = vpop.eup %6356  ;;  %v3952_v63 = vmul.f32 %v6355_v28, %v3770_v3  ;;  %v3252_v48 = vsub.f32 0.0, %v3140_v18  ;;  %v4246_v58 = vld [vmem:[%s6932_s13 + $0x308] sm:$0xff] }
 0x4ee   : > { %v4736_v35 = vmul.f32 0.6931472, %v6357_v51  ;;  %vm3665_vm13 = vcmp.ge.f32.partialorder %v9957_v54, 0.0  ;;  %v4344_v59 = vmax.f32 %v9978_v15, 0.0  ;;  %v4456_v57 = vmul.f32 %v4232_v61, %v9978_v15 }
 0x4ef   : > { %v6359_v21 = vpop.eup %6358  ;;  %v5010_v1 = vsel %vm4947_vm3, %v4883_v7, 0.0  ;;  %4106 = vst [vmem:[%s7626_s18 + $0x228] sm:$0xff] %v3952_v63  ;;  %v3475_v36 = vmul.f32 1.442695, %v3252_v48  ;;  %v3777_v39 = vsel %vm3665_vm13, 1.0, %v10048_v19  ;;  %vm3672_vm14 = vcmp.ge.f32.partialorder %v9978_v15, 0.0 }
 0x4f0   : > { %v5148_v33 = vadd.f32 %v10540_v27, %v5010_v1  ;;  %v3567_v55 = vadd.f32 1.0, %v6359_v21  ;;  %v4890_v42 = vadd.f32 %v4736_v35, %v4554_v0  ;;  %v4561_v29 = vsub.f32 %v4337_v30, %v4449_v44  ;;  %v4253_v35 = vld [vmem:[%s6932_s13 + $0x340] sm:$0xff] }
 0x4f1   : > { %v3784_v5 = vsel %vm3672_vm14, 1.0, %v10052_v26  ;;  %v4568_v16 = vsub.f32 %v4344_v59, %v4456_v57  ;;  %v4351_v13 = vmax.f32 %v10008_v22, 0.0  ;;  %v4463_v14 = vmul.f32 %v4239_v6, %v10008_v22 }
 0x4f2   : > { %5164 = vst [vmem:[%s9936_s14 + $0x40] sm:$0xff] %v5148_v33  ;;  %6372 = vrcp.f32 %v3567_v55  ;;  %v5017_v25 = vsel %vm4947_vm3, %v4890_v42, 0.0  ;;  %vm3679_vm15 = vcmp.ge.f32.partialorder %v10008_v22, 0.0  ;;  %v4358_v3 = vmax.f32 %v10030_v32, 0.0 }
 0x4f3   : > { %6374 = vlog2.f32 %v3567_v55  ;;  %v5149_v12 = vadd.f32 %v9591_v43, %v5017_v25  ;;  %v3791_v49 = vsel %vm3679_vm15, 1.0, %v6359_v21  ;;  %v4575_v28 = vsub.f32 %v4351_v13, %v4463_v14 }
 0x4f4   : > { %v6361_v24 = vpop.eup %6360  ;;  %6376 = vpow2.f32 %v3475_v36  ;;  %v4470_v22 = vmul.f32 %v4246_v58, %v10030_v32  ;;  %vm3686_vm0 = vcmp.ge.f32.partialorder %v10030_v32, 0.0  ;;  %v4365_v36 = vmax.f32 %v10045_v9, 0.0 }
 0x4f5   : > { %v3574_v52 = vadd.f32 1.0, %v6361_v24  ;;  %5165 = vst [vmem:[%s9936_s14 + $0x48] sm:$0xff] %v5149_v12  ;;  %v3798_v48 = vsel %vm3686_vm0, 1.0, %v6361_v24  ;;  %v4477_v42 = vmul.f32 %v4253_v35, %v10045_v9  ;;  %vm3693_vm1 = vcmp.ge.f32.partialorder %v10045_v9, 0.0 }
 0x4f6   : > { %v6363_v2 = vpop.eup %6362  ;;  %v4582_v33 = vsub.f32 %v4358_v3, %v4470_v22  ;;  %v4372_v9 = vmax.f32 %v10063_v8, 0.0  ;;  %vm3700_vm2 = vcmp.ge.f32.partialorder %v10063_v8, 0.0 }
 0x4f7   : > { %v6365_v41 = vpop.eup %6364  ;;  %v3966_v43 = vmul.f32 %v6363_v2, %v3777_v39  ;;  %6378 = vrcp.f32 %v3574_v52  ;;  %v4589_v30 = vsub.f32 %v4365_v36, %v4477_v42 }
 0x4f8   : > { %v6367_v11 = vpop.eup %6366  ;;  %v4750_v54 = vmul.f32 0.6931472, %v6365_v41  ;;  %6380 = vlog2.f32 %v3574_v52  ;;  %v4260_v52 = vld [vmem:[%s6932_s13 + $0x378] sm:$0xff]  ;;  %s5430_s13 = sshll.u32 %s6776_s15, 11 }
 0x4f9   : > { %v6369_v38 = vpop.eup %6368  ;;  %4113 = vst [vmem:[%s7626_s18 + $0x260] sm:$0xff] %v3966_v43  ;;  %v3980_v19 = vmul.f32 %v6367_v11, %v3784_v5  ;;  %v4484_v39 = vmul.f32 %v4260_v52, %v10063_v8 }
 0x4fa   : > { %v6371_v17 = vpop.eup %6370  ;;  %v4897_v20 = vadd.f32 %v4750_v54, %v4561_v29  ;;  %v4764_v34 = vmul.f32 0.6931472, %v6369_v38 }
 0x4fb   : > { %4120 = vst [vmem:[%s7626_s18 + $0x298] sm:$0xff] %v3980_v19  ;;  %v3581_v31 = vadd.f32 1.0, %v6371_v17  ;;  %v3805_v25 = vsel %vm3693_vm1, 1.0, %v6371_v17  ;;  %v4596_v29 = vsub.f32 %v4372_v9, %v4484_v39 }
 0x4fc   : > { %v5024_v15 = vsel %vm4947_vm3, %v4897_v20, 0.0  ;;  %v4904_v46 = vadd.f32 %v4764_v34, %v4568_v16 }
 0x4fd   : > { %v5150_v26 = vadd.f32 %v9666_v60, %v5024_v15  ;;  %6382 = vrcp.f32 %v3581_v31 }
 0x4fe   : > { %v5031_v47 = vsel %vm4947_vm3, %v4904_v46, 0.0  ;;  %6384 = vlog2.f32 %v3581_v31 }
 0x4ff   : > { %v6373_v56 = vpop.eup %6372  ;;  %5166 = vst [vmem:[%s9936_s14 + $0x50] sm:$0xff] %v5150_v26  ;;  %v5151_v4 = vadd.f32 %v9690_v37, %v5031_v47 }
 0x500   : > { %v6375_v53 = vpop.eup %6374  ;;  %v3994_v60 = vmul.f32 %v6373_v56, %v3791_v49 }
 0x501   : > { %v6377_v18 = vpop.eup %6376  ;;  %5167 = vst [vmem:[%s9936_s14 + $0x58] sm:$0xff] %v5151_v4  ;;  %v4778_v7 = vmul.f32 0.6931472, %v6375_v53 }
 0x502   : > { %4127 = vst [vmem:[%s7626_s18 + $0x2d0] sm:$0xff] %v3994_v60  ;;  %v3588_v51 = vadd.f32 1.0, %v6377_v18  ;;  %v3812_v41 = vsel %vm3700_vm2, 1.0, %v6377_v18 }
 0x503   : > { %v4911_v63 = vadd.f32 %v4778_v7, %v4575_v28 }
 0x504   : > { %v6379_v37 = vpop.eup %6378  ;;  %6386 = vrcp.f32 %v3588_v51 }
 0x505   : > { %v6381_v21 = vpop.eup %6380  ;;  %v5038_v1 = vsel %vm4947_vm3, %v4911_v63, 0.0  ;;  %v4008_v0 = vmul.f32 %v6379_v37, %v3798_v48  ;;  %6388 = vlog2.f32 %v3588_v51 }
 0x506   : > { %v5152_v27 = vadd.f32 %v9741_v45, %v5038_v1  ;;  %v4792_v55 = vmul.f32 0.6931472, %v6381_v21 }
 0x507   : > { %4134 = vst [vmem:[%s7626_s18 + $0x308] sm:$0xff] %v4008_v0 }
 0x508   : > { %5168 = vst [vmem:[%s9936_s14 + $0x60] sm:$0xff] %v5152_v27  ;;  %v4918_v32 = vadd.f32 %v4792_v55, %v4582_v33 }
 0x50a   : > { %v6383_v10 = vpop.eup %6382  ;;  %v5045_v45 = vsel %vm4947_vm3, %v4918_v32, 0.0 }
 0x50b   : > { %v6385_v61 = vpop.eup %6384  ;;  %v5153_v24 = vadd.f32 %v9782_v23, %v5045_v45  ;;  %v4022_v12 = vmul.f32 %v6383_v10, %v3805_v25 }
 0x50c   : > { %v4806_v44 = vmul.f32 0.6931472, %v6385_v61 }
 0x50d   : > { %5169 = vst [vmem:[%s9936_s14 + $0x68] sm:$0xff] %v5153_v24  ;;  %4141 = vst [vmem:[%s7626_s18 + $0x340] sm:$0xff] %v4022_v12 }
 0x50e   : > { %v4925_v2 = vadd.f32 %v4806_v44, %v4589_v30 }
 0x510   : > { %v5052_v23 = vsel %vm4947_vm3, %v4925_v2, 0.0 }
 0x511   : > { %v6387_v59 = vpop.eup %6386  ;;  %v5154_v57 = vadd.f32 %v9829_v50, %v5052_v23 }
 0x512   : > { %v6389_v43 = vpop.eup %6388  ;;  %v4036_v11 = vmul.f32 %v6387_v59, %v3812_v41 }
 0x513   : > { %5170 = vst [vmem:[%s9936_s14 + $0x70] sm:$0xff] %v5154_v57  ;;  %v4820_v8 = vmul.f32 0.6931472, %v6389_v43 }
 0x514   : > { %4148 = vst [vmem:[%s7626_s18 + $0x378] sm:$0xff] %v4036_v11 }
 0x515   : > { %v4932_v50 = vadd.f32 %v4820_v8, %v4596_v29 }
 0x516   : > { %6590 = shalt.err (!%p6587_p5)
}
 0x517   : > { %s6591_s18 = scalar_lea.hbm %s10139_s29, 14336  ;;  %s6595_s28 = scalar_lea.hbm %s10234_s8, 28672 }
 0x518   : > { %p6592_p8 = scmp.ne.s32.totalorder %s10139_s29, %s6591_s18  ;;  %p6596_p10 = scmp.lt.s32.totalorder %s10139_s29, %s10234_s8 }
 0x519   : > { %p6597_p11 = scmp.lt.s32.totalorder %s6595_s28, %s6591_s18 }
 0x51a   : > { %p6593_p1 = pnand %p6592_p8, %p10541_p0 }
 0x51b   : > { %p6598_p12 = por %p6597_p11, %p6596_p10 }
 0x51c   : > { %p6594_p9 = pneg %p6593_p1 }
 0x51e   : > { %p6599_p6 = pnand %p6598_p12, %p6594_p9 }
 0x520   : > { %6602 = shalt.err (!%p6599_p6)
}
 0x521   : > { %s6700_s24 = smov 896   ;;  %s6701_s22 = smov 56   ;;  %v5059_v54 = vsel %vm4947_vm3, %v4932_v50, 0.0 }
 0x522   : > { %5621 = dma.vmem_to_hbm [thread:$0]  (%p10541_p0), %s10141_s2, 14336, %s10139_s29, %s5173_s23, %s6700_s24, %s6700_s24, %s6701_s22   ;;  %v5155_v5 = vadd.f32 %v9861_v40, %v5059_v54 }
 0x523   : > { %s10177_s18 = scalar_lea.hbm %s10235_s9, %s5430_s13  ;;  %s10542_s3 = sshll.u32 %s9936_s14, 4  ;;  %s10181_s3 = int_to_ptr.vmem [resolvable:$true] %s10542_s3 }
 0x524   : > { %5171 = vst [vmem:[%s9936_s14 + $0x78] sm:$0xff] %v5155_v5  ;;  %s5178_s4 = scalar_lea.sflag [#allocation16], %s6926_s17  ;;  %s6603_s2 = scalar_lea.vmem %s10181_s3, 2048 }
 0x525   : > { %p6604_p2 = scmp.ne.s32.totalorder %s10181_s3, %s6603_s2  ;;  %s6702_s15 = smov [#allocation15]  }
 0x526   : > { %s6607_s29 = sshll.u32 %s6702_s15, 4  ;;  %s6608_s29 = int_to_ptr.vmem [resolvable:$false] %s6607_s29 }
 0x527   : > { %p6605_p3 = pnand %p6604_p2, %p10541_p0  ;;  %s6609_s13 = scalar_lea.vmem %s6608_s29, 4096 }
 0x528   : > { %p6610_p4 = scmp.lt.s32.totalorder %s10181_s3, %s6608_s29  ;;  %p6611_p13 = scmp.lt.s32.totalorder %s6609_s13, %s6603_s2 }
 0x529   : > { %p6606_p7 = pneg %p6605_p3 }
 0x52a   : > { %p6612_p5 = por %p6611_p13, %p6610_p4 }
 0x52c   : > { %p6613_p8 = pnand %p6612_p5, %p6606_p7 }
 0x52e   : > { %6616 = shalt.err (!%p6613_p8)
}
 0x52f   : > { %s6617_s14 = scalar_lea.hbm %s10177_s18, 2048  ;;  %s6621_s20 = scalar_lea.hbm %s10235_s9, 4096 }
 0x530   : > { %p6618_p1 = scmp.ne.s32.totalorder %s10177_s18, %s6617_s14  ;;  %p6622_p11 = scmp.lt.s32.totalorder %s10177_s18, %s10235_s9 }
 0x531   : > { %p6623_p12 = scmp.lt.s32.totalorder %s6621_s20, %s6617_s14 }
 0x532   : > { %p6619_p9 = pnand %p6618_p1, %p10541_p0 }
 0x533   : > { %p6624_p6 = por %p6623_p12, %p6622_p11 }
 0x534   : > { %p6620_p10 = pneg %p6619_p9 }
 0x536   : > { %p6625_p2 = pnand %p6624_p6, %p6620_p10 }
 0x538   : > { %6628 = shalt.err (!%p6625_p2)
}
 0x539   : > { %s6703_s16 = smov 128   ;;  %s6704_s27 = smov 8  }
 0x53a   : > { %5622 = dma.vmem_to_hbm [thread:$0]  (%p10541_p0), %s10181_s3, 2048, %s10177_s18, %s5178_s4, %s6703_s16, %s6703_s16, %s6704_s27  }
 0x53b PF: > { %s5223_s2 = sand.u32 1, %s6671_s30   ;;  %p10543_p3 = scmp.ne.s32.totalorder %s10341_s26, 0 }
 0x53c   : > { %p10544_p7 = scmp.ge.s32.totalorder %s6683_s12, 2  ;;  %s5224_s15 = scalar_lea.sflag [#allocation4], %s5223_s2 }
 0x53e   : > { %p5649_p4 = pnand %p10544_p7, %p10543_p3 }
 0x540   : > { %p5650_p13 = pneg %p5649_p4 }
 0x542   : > { %6662 = dma.done.wait (%p5650_p13), %s5224_s15, 14336  }
 0x543   : > { %6664 = vsyncadd (%p5650_p13), %s5224_s15, 4294952960  ;;  %s5233_s29 = scalar_lea.sflag [#allocation16], %s5223_s2 }
 0x544   : > { %6666 = dma.done.wait (%p5650_p13), %s5233_s29, 2048  }
 0x545   : > { %6668 = vsyncadd (%p5650_p13), %s5233_s29, 4294965248  ;;  %p29_p0 = scmp.ge.s32.totalorder %s6857_s19, 4   ;;  %s10545_s30 = smov %s6675_s10 }
 0x546   : > { %s10546_s10 = smov %s6679_s11  ;;  %s10547_s11 = smov %s6868_s21 }
 0x547   : > { %s10548_s12 = smov %s6857_s19  ;;  %31 = sbr.rel (!%p29_p0) target bundleno = 14 (0xe), region = 141 }
 0x54c   :  { %5238 = vsyncpa [#allocation3], 1 }
 0x54d   :  { %5240 = vsyncpa [#allocation3 + $0x1], 1 }
 0x54e   :  { %5241 = vsyncpa [#allocation6], 1 }
 0x54f   :  { %5242 = vsyncpa [#allocation9], 1 }
 0x550   :  { %5243 = vsyncpa [#allocation12], 1 }
 0x551   :  { %5244 = vsyncpa [#allocation4], 1 }
 0x552   :  { %5246 = vsyncpa [#allocation4 + $0x1], 1 }
 0x553   :  { %5247 = vsyncpa [#allocation16], 1 }
 0x554   :  { %5249 = vsyncpa [#allocation16 + $0x1], 1 }

</bundles_post_ra>
